<compile_context>
chip_gen: v6e
topology: v6e:2x2x1
jax: 0.10.0
libtpu: 0.0.40
codegen_flags: <defaults>
</compile_context>

<pallas_src>
import functools

import jax
import jax.numpy as jnp
from jax.experimental import pallas as pl
from jax.experimental.pallas import tpu as pltpu


IMG_CHANNELS = 3
LATENT_DIM = 128
VMEM_LIMIT = 32 << 20          # safe on v7x (64 MiB/TC) as well as v5e/v6e


# ----------------------------------------------------------------------------
# Pallas kernels
# ----------------------------------------------------------------------------
def _conv_matmul_kernel(a_ref, w_ref, b_ref, o_ref, *, act):
    """Single-K-block fused matmul + bias + activation (weight VMEM-resident)."""
    out = jnp.dot(a_ref[...], w_ref[...],
                  preferred_element_type=jnp.float32) + b_ref[...]
    if act == "relu":
        out = jnp.maximum(out, 0.0)
    elif act == "tanh":
        out = jnp.tanh(out)
    o_ref[...] = out.astype(o_ref.dtype)


def _latent_decin_kernel(a_ref, wfc_ref, bfc_ref, eps_ref, wd_ref, bd_ref,
                         mu_ref, lv_ref, z_ref, d_ref, acc_ref):
    """Fused fc_mu+fc_logvar (concat along N, K-tiled) -> reparameterize ->
    decoder_input matmul, all in one pallas_call."""
    k = pl.program_id(0)

    @pl.when(k == 0)
    def _():
        acc_ref[...] = jnp.zeros_like(acc_ref)

    acc_ref[...] += jnp.dot(a_ref[...], wfc_ref[...],
                            preferred_element_type=jnp.float32)

    @pl.when(k == pl.num_programs(0) - 1)
    def _():
        latent = mu_ref.shape[-1]
        acc = acc_ref[...] + bfc_ref[...]
        mu = acc[:, :latent]
        lv = acc[:, latent:]
        z = mu + eps_ref[...] * jnp.exp(0.5 * lv)
        mu_ref[...] = mu.astype(mu_ref.dtype)
        lv_ref[...] = lv.astype(lv_ref.dtype)
        z_ref[...] = z.astype(z_ref.dtype)
        d = jnp.dot(z.astype(jnp.bfloat16), wd_ref[...],
                    preferred_element_type=jnp.float32) + bd_ref[...]
        d_ref[...] = d.astype(d_ref.dtype)


# ----------------------------------------------------------------------------
# Pallas wrappers
# ----------------------------------------------------------------------------
def _pick_bm(m):
    # prefer >=2 blocks (both v7x TensorCores busy); blocks stay 8-aligned
    for c in (512, 256, 128, 64, 32, 16, 8):
        if m % c == 0 and m // c >= 2:
            return c
    return m


def conv_matmul(a, w, b, act, out_dtype):
    """out = act(a @ w + b). a:(M,K) bf16, w:(K,N) bf16, b:(1,N) f32.
    K is NOT tiled (weights are small and stay VMEM-resident)."""
    M, K = a.shape
    K2, N = w.shape
    assert K == K2, (K, K2)
    a = a.astype(jnp.bfloat16)

    Mp = M
    if M % 8:
        Mp = ((M + 7) // 8) * 8
        a = jnp.pad(a, ((0, Mp - M), (0, 0)))
    bm = _pick_bm(Mp)

    out = pl.pallas_call(
        functools.partial(_conv_matmul_kernel, act=act),
        out_shape=jax.ShapeDtypeStruct((Mp, N), out_dtype),
        grid=(Mp // bm,),
        in_specs=[
            pl.BlockSpec((bm, K), lambda i: (i, 0)),
            pl.BlockSpec((K, N), lambda i: (0, 0)),
            pl.BlockSpec((1, N), lambda i: (0, 0)),
        ],
        out_specs=pl.BlockSpec((bm, N), lambda i: (i, 0)),
        compiler_params=pltpu.CompilerParams(
            dimension_semantics=("parallel",),
            vmem_limit_bytes=VMEM_LIMIT,
        ),
    )(a, w, b)
    return out[:M] if Mp != M else out


def latent_decoder_head(flat, w_fc, b_fc, eps, w_dec, b_dec):
    """mu, logvar, z, d = fused(fc_mu|fc_logvar, reparam, decoder_input)."""
    B, K = flat.shape
    N = w_fc.shape[1]
    latent = N // 2
    D = w_dec.shape[1]

    bk = min(K, 2048)
    while K % bk:
        bk //= 2
    grid = (K // bk,)

    out_shape = (
        jax.ShapeDtypeStruct((B, latent), jnp.float32),   # mu
        jax.ShapeDtypeStruct((B, latent), jnp.float32),   # logvar
        jax.ShapeDtypeStruct((B, latent), jnp.float32),   # z
        jax.ShapeDtypeStruct((B, D), jnp.bfloat16),       # decoder_input out
    )
    out_specs = (
        pl.BlockSpec((B, latent), lambda k: (0, 0)),
        pl.BlockSpec((B, latent), lambda k: (0, 0)),
        pl.BlockSpec((B, latent), lambda k: (0, 0)),
        pl.BlockSpec((B, D), lambda k: (0, 0)),
    )
    mu, logvar, z, d = pl.pallas_call(
        _latent_decin_kernel,
        out_shape=out_shape,
        grid=grid,
        in_specs=[
            pl.BlockSpec((B, bk), lambda k: (0, k)),          # flat
            pl.BlockSpec((bk, N), lambda k: (k, 0)),          # fc weight (streamed)
            pl.BlockSpec((1, N), lambda k: (0, 0)),           # fc bias
            pl.BlockSpec((B, latent), lambda k: (0, 0)),      # eps
            pl.BlockSpec((latent, D), lambda k: (0, 0)),      # dec_in weight (resident)
            pl.BlockSpec((1, D), lambda k: (0, 0)),           # dec_in bias
        ],
        out_specs=out_specs,
        scratch_shapes=[pltpu.VMEM((B, N), jnp.float32)],
        compiler_params=pltpu.CompilerParams(
            dimension_semantics=("arbitrary",),
            vmem_limit_bytes=VMEM_LIMIT,
        ),
    )(flat.astype(jnp.bfloat16), w_fc, b_fc, eps.astype(jnp.float32),
      w_dec, b_dec)
    return mu, logvar, z, d


# ----------------------------------------------------------------------------
# NHWC im2col + conv / conv-transpose glue (single fused XLA gather per layer)
# ----------------------------------------------------------------------------
def _im2col_nhwc(x, kh, kw, stride, pad):
    """x: (B,H,W,C) NHWC -> (B*OH*OW, kh*kw*C), tap-major column order."""
    B, H, W, C = x.shape
    xp = jnp.pad(x, ((0, 0), (pad, pad), (pad, pad), (0, 0)))
    OH = (H + 2 * pad - kh) // stride + 1
    OW = (W + 2 * pad - kw) // stride + 1
    taps = []
    for i in range(kh):
        for j in range(kw):
            taps.append(xp[:, i:i + stride * OH:stride,
                           j:j + stride * OW:stride, :])
    cols = jnp.stack(taps, axis=3)                  # (B, OH, OW, kh*kw, C)
    return cols.reshape(B * OH * OW, kh * kw * C), OH, OW


def conv2d_nhwc(x, wm, b, stride, pad, kh, kw, act, out_dtype):
    """x NHWC; wm (kh*kw*Cin, Cout_padded) tap-major; b (1, Cout_padded)."""
    B = x.shape[0]
    N = wm.shape[1]
    cols, OH, OW = _im2col_nhwc(x, kh, kw, stride, pad)
    out = conv_matmul(cols, wm, b, act, out_dtype)
    return out.reshape(B, OH, OW, N)


def conv_transpose2d_nhwc(x, wm_phase, b4, act, out_dtype):
    """ConvTranspose2d(k=4, s=2, p=1) via 4-phase (sub-pixel) decomposition.
    x NHWC; wm_phase: (9*Cin, 4*Coutp); b4: (1, 4*Coutp)."""
    B, H, W, _ = x.shape
    coutp = wm_phase.shape[1] // 4
    cols, _, _ = _im2col_nhwc(x, 3, 3, stride=1, pad=1)     # (B*H*W, 9*Cin)
    out = conv_matmul(cols, wm_phase, b4, act, out_dtype)
    out = out.reshape(B, H, W, 2, 2, coutp)                 # (b,h,w,r,c,co)
    out = out.transpose(0, 1, 3, 2, 4, 5)                   # (b,h,r,w,c,co)
    return out.reshape(B, 2 * H, 2 * W, coutp)


# ----------------------------------------------------------------------------
# Parameters
# ----------------------------------------------------------------------------
def init_params(key):
    ks = jax.random.split(key, 9)
    s = 0.05

    def n(k, shape):
        return s * jax.random.normal(k, shape, dtype=jnp.float32)

    p = {}
    p["enc1_w"] = n(ks[0], (32, IMG_CHANNELS, 4, 4)); p["enc1_b"] = jnp.zeros((32,), jnp.float32)
    p["enc2_w"] = n(ks[1], (64, 32, 4, 4));           p["enc2_b"] = jnp.zeros((64,), jnp.float32)
    p["enc3_w"] = n(ks[2], (128, 64, 4, 4));          p["enc3_b"] = jnp.zeros((128,), jnp.float32)
    p["fc_mu_w"] = n(ks[3], (128 * 8 * 8, LATENT_DIM));  p["fc_mu_b"] = jnp.zeros((LATENT_DIM,), jnp.float32)
    p["fc_lv_w"] = n(ks[4], (128 * 8 * 8, LATENT_DIM));  p["fc_lv_b"] = jnp.zeros((LATENT_DIM,), jnp.float32)
    p["dec_in_w"] = n(ks[5], (LATENT_DIM, 128 * 8 * 8)); p["dec_in_b"] = jnp.zeros((128 * 8 * 8,), jnp.float32)
    p["dt1_w"] = n(ks[6], (128, 64, 4, 4));           p["dt1_b"] = jnp.zeros((64,), jnp.float32)
    p["dt2_w"] = n(ks[7], (64, 32, 4, 4));            p["dt2_b"] = jnp.zeros((32,), jnp.float32)
    p["dt3_w"] = n(ks[8], (32, IMG_CHANNELS, 4, 4));  p["dt3_b"] = jnp.zeros((IMG_CHANNELS,), jnp.float32)
    return p


def _conv_weight(w, n_pad):
    """PyTorch Conv2d weight (Cout,Cin,kh,kw) -> (kh*kw*Cin, n_pad) tap-major,
    zero-padded output columns for 128-lane-dense stores."""
    Cout, Cin, kh, kw = w.shape
    wm = w.transpose(2, 3, 1, 0).reshape(kh * kw * Cin, Cout)
    if n_pad > Cout:
        wm = jnp.pad(wm, ((0, 0), (0, n_pad - Cout)))
    return wm.astype(jnp.bfloat16)


def _deconv_phase_weight(w, b, cout_pad):
    """PyTorch ConvTranspose2d weight (Cin,Cout,4,4) [stride=2, pad=1] ->
    (9*Cin, 4*cout_pad) matrix for a 3x3/stride-1/pad-1 tap-major im2col.
    Phase p = 2*r + c (sub-pixel position):
      y[2u+r, 2v+c] = sum_{tr,tc in {0,1}} x[u-1+r+tr, v-1+c+tc]
                                           * w[3-r-2*tr, 3-c-2*tc]."""
    Cin, Cout, kh, kw = w.shape
    assert kh == 4 and kw == 4
    wm = jnp.zeros((3, 3, Cin, 4, cout_pad), dtype=w.dtype)
    for r in range(2):
        for c in range(2):
            ph = 2 * r + c
            for tr in range(2):
                for tc in range(2):
                    ti, tj = r + tr, c + tc
                    wm = wm.at[ti, tj, :, ph, :Cout].set(
                        w[:, :, 3 - r - 2 * tr, 3 - c - 2 * tc])
    wm = wm.reshape(9 * Cin, 4 * cout_pad).astype(jnp.bfloat16)
    bm = jnp.zeros((4, cout_pad), jnp.float32).at[:, :Cout].set(b)
    return wm, bm.reshape(1, 4 * cout_pad)


def prepare_params(p):
    """One-time conversion (outside jit) of PyTorch-layout f32 params into
    matmul-ready bf16 matrices: tap-major conv weights with lane-dense (>=128)
    output columns, pre-permuted FC weights (no runtime flatten transposes)."""
    q = {}
    q["enc1_w"] = _conv_weight(p["enc1_w"], 128)
    q["enc1_b"] = jnp.pad(p["enc1_b"], (0, 128 - 32)).reshape(1, 128)
    q["enc2_w"] = _conv_weight(p["enc2_w"], 128)
    q["enc2_b"] = jnp.pad(p["enc2_b"], (0, 128 - 64)).reshape(1, 128)
    q["enc3_w"] = _conv_weight(p["enc3_w"], 128)
    q["enc3_b"] = p["enc3_b"].reshape(1, 128)

    # fused fc_mu|fc_logvar, rows permuted from NCHW- to NHWC-flatten order
    fc_w = jnp.concatenate([p["fc_mu_w"], p["fc_lv_w"]], axis=1)   # (8192, 256)
    fc_w = fc_w.reshape(128, 8, 8, 2 * LATENT_DIM).transpose(1, 2, 0, 3)
    q["fc_w"] = fc_w.reshape(8192, 2 * LATENT_DIM).astype(jnp.bfloat16)
    q["fc_b"] = jnp.concatenate([p["fc_mu_b"], p["fc_lv_b"]]).reshape(1, -1)

    # decoder_input, columns permuted (c,h,w) -> (h,w,c) so output is NHWC
    dw = p["dec_in_w"].reshape(LATENT_DIM, 128, 8, 8).transpose(0, 2, 3, 1)
    q["dec_in_w"] = dw.reshape(LATENT_DIM, 8192).astype(jnp.bfloat16)
    q["dec_in_b"] = (p["dec_in_b"].reshape(128, 8, 8).transpose(1, 2, 0)
                     .reshape(1, 8192))

    q["dt1_w"], q["dt1_b"] = _deconv_phase_weight(p["dt1_w"], p["dt1_b"], 64)
    q["dt2_w"], q["dt2_b"] = _deconv_phase_weight(p["dt2_w"], p["dt2_b"], 32)
    q["dt3_w"], q["dt3_b"] = _deconv_phase_weight(p["dt3_w"], p["dt3_b"], 32)
    return q


# ----------------------------------------------------------------------------
# VAE forward
# ----------------------------------------------------------------------------
def vae_forward(x_nchw, q, eps):
    B = x_nchw.shape[0]
    x = jnp.transpose(x_nchw, (0, 2, 3, 1)).astype(jnp.bfloat16)   # NHWC once
    # encoder (NHWC / bf16); outputs are 128-channel padded (lane-dense stores),
    # real channels are the leading 32 / 64 / 128
    h = conv2d_nhwc(x, q["enc1_w"], q["enc1_b"], 2, 1, 4, 4, "relu", jnp.bfloat16)
    h = conv2d_nhwc(h[..., :32], q["enc2_w"], q["enc2_b"], 2, 1, 4, 4, "relu", jnp.bfloat16)
    h = conv2d_nhwc(h[..., :64], q["enc3_w"], q["enc3_b"], 2, 1, 4, 4, "relu", jnp.bfloat16)
    # NHWC flatten is free; fc weights were row-permuted in prepare_params
    flat = h.reshape(B, 8 * 8 * 128)
    # fused fc_mu + fc_logvar + reparameterize + decoder_input (one pallas_call)
    mu, logvar, _, d = latent_decoder_head(flat, q["fc_w"], q["fc_b"], eps,
                                           q["dec_in_w"], q["dec_in_b"])
    d = d.reshape(B, 8, 8, 128)                                    # NHWC directly
    # decoder: 4-phase transposed convs, NHWC
    d = conv_transpose2d_nhwc(d, q["dt1_w"], q["dt1_b"], "relu", jnp.bfloat16)
    d = conv_transpose2d_nhwc(d, q["dt2_w"], q["dt2_b"], "relu", jnp.bfloat16)
    d = conv_transpose2d_nhwc(d, q["dt3_w"], q["dt3_b"], "tanh", jnp.float32)
    # drop the phase-padding channels, back to the NCHW API shape
    decoded = jnp.transpose(d[..., :IMG_CHANNELS], (0, 3, 1, 2))
    return decoded, mu, logvar


if __name__ == "__main__":
    # batch=2; spatial must be 64 so the flattened encoder output is 128*8*8,
    # as required by fc_mu / fc_logvar in the reference module.
    key = jax.random.PRNGKey(0)
    kx, keps, kp = jax.random.split(key, 3)
    x = jax.random.normal(kx, (2, IMG_CHANNELS, 64, 64), dtype=jnp.float32)
    # eps supplied explicitly (reference uses torch.randn_like) -> deterministic
    eps = jax.random.normal(keps, (2, LATENT_DIM), dtype=jnp.float32)
    params = init_params(kp)
    mm_params = prepare_params(params)          # one-time, outside jit

    fwd = jax.jit(vae_forward)
    decoded, mu, logvar = fwd(x, mm_params, eps)
    jax.block_until_ready((decoded, mu, logvar))

    assert decoded.shape == (2, IMG_CHANNELS, 64, 64)
    assert mu.shape == (2, LATENT_DIM) and logvar.shape == (2, LATENT_DIM)
    assert bool(jnp.isfinite(decoded).all()) and bool(jnp.isfinite(mu).all())
    assert float(jnp.abs(decoded).max()) <= 1.0 + 1e-6      # tanh range
    print("KERNEL_OK")
</pallas_src>

<mosaic_0001>
module attributes {stable_mosaic.version = 11 : i64} {
  func.func @_conv_matmul_kernel(%arg0: i32, %arg1: memref<512x48xbf16, #tpu.memory_space<vmem>>, %arg2: memref<48x128xbf16, #tpu.memory_space<vmem>>, %arg3: memref<1x128xf32, #tpu.memory_space<vmem>>, %arg4: memref<512x128xbf16, #tpu.memory_space<vmem>>) attributes {dimension_semantics = [#tpu.dimension_semantics<parallel>], iteration_bounds = array<i64: 4>, scalar_prefetch = 0 : i64, scratch_operands = 0 : i64, tpu.core_type = #tpu.core_type<tc>, window_params = [{transform_indices = @transform_0, window_bounds = array<i64: 512, 48>}, {pipeline_mode = #tpu.pipeline_mode<synchronous>, transform_indices = @transform_1, window_bounds = array<i64: 48, 128>}, {pipeline_mode = #tpu.pipeline_mode<synchronous>, transform_indices = @transform_2, window_bounds = array<i64: 1, 128>}, {transform_indices = @transform_3, window_bounds = array<i64: 512, 128>}]} {
    %c0 = arith.constant 0 : index
    %c0_0 = arith.constant 0 : index
    %0 = vector.load %arg1[%c0, %c0_0] : memref<512x48xbf16, #tpu.memory_space<vmem>>, vector<512x48xbf16>
    %c0_1 = arith.constant 0 : index
    %c0_2 = arith.constant 0 : index
    %1 = vector.load %arg2[%c0_1, %c0_2] : memref<48x128xbf16, #tpu.memory_space<vmem>>, vector<48x128xbf16>
    %cst = arith.constant dense<0.000000e+00> : vector<512x128xf32>
    %2 = tpu.matmul %0, %1, %cst {dimension_numbers = #tpu.dot_dimension_numbers<[1], [0], [0], [1], [0, 0, 1, 1], [], []>} : vector<512x48xbf16>, vector<48x128xbf16>, vector<512x128xf32> -> vector<512x128xf32>
    %c0_3 = arith.constant 0 : index
    %c0_4 = arith.constant 0 : index
    %3 = vector.load %arg3[%c0_3, %c0_4] : memref<1x128xf32, #tpu.memory_space<vmem>>, vector<1x128xf32>
    %4 = vector.broadcast %3 : vector<1x128xf32> to vector<512x128xf32>
    %5 = arith.addf %2, %4 : vector<512x128xf32>
    %cst_5 = arith.constant 0.000000e+00 : f32
    %6 = vector.broadcast %cst_5 : f32 to vector<512x128xf32>
    %7 = arith.maximumf %5, %6 : vector<512x128xf32>
    %8 = arith.truncf %7 : vector<512x128xf32> to vector<512x128xbf16>
    %c0_6 = arith.constant 0 : index
    %c0_7 = arith.constant 0 : index
    %9 = vector.load %arg4[%c0_6, %c0_7] : memref<512x128xbf16, #tpu.memory_space<vmem>>, vector<512x128xbf16>
    tpu.vector_store %arg4[%c0_6, %c0_7], %8 {strides = array<i32>} : memref<512x128xbf16, #tpu.memory_space<vmem>>, vector<512x128xbf16>,
    return
  }
  func.func @transform_0(%arg0: i32) -> (i32, i32) {
    %c0_i32 = arith.constant 0 : i32
    %c0_i32_0 = arith.constant 0 : i32
    return %arg0, %c0_i32 : i32, i32
  }
  func.func @transform_1(%arg0: i32) -> (i32, i32) {
    %c0_i32 = arith.constant 0 : i32
    %c0_i32_0 = arith.constant 0 : i32
    %c0_i32_1 = arith.constant 0 : i32
    return %c0_i32, %c0_i32_0 : i32, i32
  }
  func.func @transform_2(%arg0: i32) -> (i32, i32) {
    %c0_i32 = arith.constant 0 : i32
    %c0_i32_0 = arith.constant 0 : i32
    %c0_i32_1 = arith.constant 0 : i32
    return %c0_i32, %c0_i32_0 : i32, i32
  }
  func.func @transform_3(%arg0: i32) -> (i32, i32) {
    %c0_i32 = arith.constant 0 : i32
    %c0_i32_0 = arith.constant 0 : i32
    return %arg0, %c0_i32 : i32, i32
  }
}

module attributes {stable_mosaic.version = 11 : i64} {
  func.func @_conv_matmul_kernel(%arg0: i32, %arg1: memref<256x512xbf16, #tpu.memory_space<vmem>>, %arg2: memref<512x128xbf16, #tpu.memory_space<vmem>>, %arg3: memref<1x128xf32, #tpu.memory_space<vmem>>, %arg4: memref<256x128xbf16, #tpu.memory_space<vmem>>) attributes {dimension_semantics = [#tpu.dimension_semantics<parallel>], iteration_bounds = array<i64: 2>, scalar_prefetch = 0 : i64, scratch_operands = 0 : i64, tpu.core_type = #tpu.core_type<tc>, window_params = [{transform_indices = @transform_0, window_bounds = array<i64: 256, 512>}, {pipeline_mode = #tpu.pipeline_mode<synchronous>, transform_indices = @transform_1, window_bounds = array<i64: 512, 128>}, {pipeline_mode = #tpu.pipeline_mode<synchronous>, transform_indices = @transform_2, window_bounds = array<i64: 1, 128>}, {transform_indices = @transform_3, window_bounds = array<i64: 256, 128>}]} {
    %c0 = arith.constant 0 : index
    %c0_0 = arith.constant 0 : index
    %0 = vector.load %arg1[%c0, %c0_0] : memref<256x512xbf16, #tpu.memory_space<vmem>>, vector<256x512xbf16>
    %c0_1 = arith.constant 0 : index
    %c0_2 = arith.constant 0 : index
    %1 = vector.load %arg2[%c0_1, %c0_2] : memref<512x128xbf16, #tpu.memory_space<vmem>>, vector<512x128xbf16>
    %cst = arith.constant dense<0.000000e+00> : vector<256x128xf32>
    %2 = tpu.matmul %0, %1, %cst {dimension_numbers = #tpu.dot_dimension_numbers<[1], [0], [0], [1], [0, 0, 1, 1], [], []>} : vector<256x512xbf16>, vector<512x128xbf16>, vector<256x128xf32> -> vector<256x128xf32>
    %c0_3 = arith.constant 0 : index
    %c0_4 = arith.constant 0 : index
    %3 = vector.load %arg3[%c0_3, %c0_4] : memref<1x128xf32, #tpu.memory_space<vmem>>, vector<1x128xf32>
    %4 = vector.broadcast %3 : vector<1x128xf32> to vector<256x128xf32>
    %5 = arith.addf %2, %4 : vector<256x128xf32>
    %cst_5 = arith.constant 0.000000e+00 : f32
    %6 = vector.broadcast %cst_5 : f32 to vector<256x128xf32>
    %7 = arith.maximumf %5, %6 : vector<256x128xf32>
    %8 = arith.truncf %7 : vector<256x128xf32> to vector<256x128xbf16>
    %c0_6 = arith.constant 0 : index
    %c0_7 = arith.constant 0 : index
    %9 = vector.load %arg4[%c0_6, %c0_7] : memref<256x128xbf16, #tpu.memory_space<vmem>>, vector<256x128xbf16>
    tpu.vector_store %arg4[%c0_6, %c0_7], %8 {strides = array<i32>} : memref<256x128xbf16, #tpu.memory_space<vmem>>, vector<256x128xbf16>,
    return
  }
  func.func @transform_0(%arg0: i32) -> (i32, i32) {
    %c0_i32 = arith.constant 0 : i32
    %c0_i32_0 = arith.constant 0 : i32
    return %arg0, %c0_i32 : i32, i32
  }
  func.func @transform_1(%arg0: i32) -> (i32, i32) {
    %c0_i32 = arith.constant 0 : i32
    %c0_i32_0 = arith.constant 0 : i32
    %c0_i32_1 = arith.constant 0 : i32
    return %c0_i32, %c0_i32_0 : i32, i32
  }
  func.func @transform_2(%arg0: i32) -> (i32, i32) {
    %c0_i32 = arith.constant 0 : i32
    %c0_i32_0 = arith.constant 0 : i32
    %c0_i32_1 = arith.constant 0 : i32
    return %c0_i32, %c0_i32_0 : i32, i32
  }
  func.func @transform_3(%arg0: i32) -> (i32, i32) {
    %c0_i32 = arith.constant 0 : i32
    %c0_i32_0 = arith.constant 0 : i32
    return %arg0, %c0_i32 : i32, i32
  }
}

module attributes {stable_mosaic.version = 11 : i64} {
  func.func @_conv_matmul_kernel(%arg0: i32, %arg1: memref<64x1024xbf16, #tpu.memory_space<vmem>>, %arg2: memref<1024x128xbf16, #tpu.memory_space<vmem>>, %arg3: memref<1x128xf32, #tpu.memory_space<vmem>>, %arg4: memref<64x128xbf16, #tpu.memory_space<vmem>>) attributes {dimension_semantics = [#tpu.dimension_semantics<parallel>], iteration_bounds = array<i64: 2>, scalar_prefetch = 0 : i64, scratch_operands = 0 : i64, tpu.core_type = #tpu.core_type<tc>, window_params = [{transform_indices = @transform_0, window_bounds = array<i64: 64, 1024>}, {pipeline_mode = #tpu.pipeline_mode<synchronous>, transform_indices = @transform_1, window_bounds = array<i64: 1024, 128>}, {pipeline_mode = #tpu.pipeline_mode<synchronous>, transform_indices = @transform_2, window_bounds = array<i64: 1, 128>}, {transform_indices = @transform_3, window_bounds = array<i64: 64, 128>}]} {
    %c0 = arith.constant 0 : index
    %c0_0 = arith.constant 0 : index
    %0 = vector.load %arg1[%c0, %c0_0] : memref<64x1024xbf16, #tpu.memory_space<vmem>>, vector<64x1024xbf16>
    %c0_1 = arith.constant 0 : index
    %c0_2 = arith.constant 0 : index
    %1 = vector.load %arg2[%c0_1, %c0_2] : memref<1024x128xbf16, #tpu.memory_space<vmem>>, vector<1024x128xbf16>
    %cst = arith.constant dense<0.000000e+00> : vector<64x128xf32>
    %2 = tpu.matmul %0, %1, %cst {dimension_numbers = #tpu.dot_dimension_numbers<[1], [0], [0], [1], [0, 0, 1, 1], [], []>} : vector<64x1024xbf16>, vector<1024x128xbf16>, vector<64x128xf32> -> vector<64x128xf32>
    %c0_3 = arith.constant 0 : index
    %c0_4 = arith.constant 0 : index
    %3 = vector.load %arg3[%c0_3, %c0_4] : memref<1x128xf32, #tpu.memory_space<vmem>>, vector<1x128xf32>
    %4 = vector.broadcast %3 : vector<1x128xf32> to vector<64x128xf32>
    %5 = arith.addf %2, %4 : vector<64x128xf32>
    %cst_5 = arith.constant 0.000000e+00 : f32
    %6 = vector.broadcast %cst_5 : f32 to vector<64x128xf32>
    %7 = arith.maximumf %5, %6 : vector<64x128xf32>
    %8 = arith.truncf %7 : vector<64x128xf32> to vector<64x128xbf16>
    %c0_6 = arith.constant 0 : index
    %c0_7 = arith.constant 0 : index
    %9 = vector.load %arg4[%c0_6, %c0_7] : memref<64x128xbf16, #tpu.memory_space<vmem>>, vector<64x128xbf16>
    tpu.vector_store %arg4[%c0_6, %c0_7], %8 {strides = array<i32>} : memref<64x128xbf16, #tpu.memory_space<vmem>>, vector<64x128xbf16>,
    return
  }
  func.func @transform_0(%arg0: i32) -> (i32, i32) {
    %c0_i32 = arith.constant 0 : i32
    %c0_i32_0 = arith.constant 0 : i32
    return %arg0, %c0_i32 : i32, i32
  }
  func.func @transform_1(%arg0: i32) -> (i32, i32) {
    %c0_i32 = arith.constant 0 : i32
    %c0_i32_0 = arith.constant 0 : i32
    %c0_i32_1 = arith.constant 0 : i32
    return %c0_i32, %c0_i32_0 : i32, i32
  }
  func.func @transform_2(%arg0: i32) -> (i32, i32) {
    %c0_i32 = arith.constant 0 : i32
    %c0_i32_0 = arith.constant 0 : i32
    %c0_i32_1 = arith.constant 0 : i32
    return %c0_i32, %c0_i32_0 : i32, i32
  }
  func.func @transform_3(%arg0: i32) -> (i32, i32) {
    %c0_i32 = arith.constant 0 : i32
    %c0_i32_0 = arith.constant 0 : i32
    return %arg0, %c0_i32 : i32, i32
  }
}

module attributes {stable_mosaic.version = 11 : i64} {
  func.func @_latent_decin_kernel(%arg0: i32, %arg1: memref<2x2048xbf16, #tpu.memory_space<vmem>>, %arg2: memref<2048x256xbf16, #tpu.memory_space<vmem>>, %arg3: memref<1x256xf32, #tpu.memory_space<vmem>>, %arg4: memref<2x128xf32, #tpu.memory_space<vmem>>, %arg5: memref<128x8192xbf16, #tpu.memory_space<vmem>>, %arg6: memref<1x8192xf32, #tpu.memory_space<vmem>>, %arg7: memref<2x128xf32, #tpu.memory_space<vmem>>, %arg8: memref<2x128xf32, #tpu.memory_space<vmem>>, %arg9: memref<2x128xf32, #tpu.memory_space<vmem>>, %arg10: memref<2x8192xbf16, #tpu.memory_space<vmem>>, %arg11: memref<2x256xf32, #tpu.memory_space<vmem>>) attributes {dimension_semantics = [#tpu.dimension_semantics<arbitrary>], iteration_bounds = array<i64: 4>, scalar_prefetch = 0 : i64, scratch_operands = 1 : i64, tpu.core_type = #tpu.core_type<tc>, window_params = [{transform_indices = @transform_0, window_bounds = array<i64: 2, 2048>}, {transform_indices = @transform_1, window_bounds = array<i64: 2048, 256>}, {pipeline_mode = #tpu.pipeline_mode<synchronous>, transform_indices = @transform_2, window_bounds = array<i64: 1, 256>}, {pipeline_mode = #tpu.pipeline_mode<synchronous>, transform_indices = @transform_3, window_bounds = array<i64: 2, 128>}, {pipeline_mode = #tpu.pipeline_mode<synchronous>, transform_indices = @transform_4, window_bounds = array<i64: 128, 8192>}, {pipeline_mode = #tpu.pipeline_mode<synchronous>, transform_indices = @transform_5, window_bounds = array<i64: 1, 8192>}, {pipeline_mode = #tpu.pipeline_mode<synchronous>, transform_indices = @transform_6, window_bounds = array<i64: 2, 128>}, {pipeline_mode = #tpu.pipeline_mode<synchronous>, transform_indices = @transform_7, window_bounds = array<i64: 2, 128>}, {pipeline_mode = #tpu.pipeline_mode<synchronous>, transform_indices = @transform_8, window_bounds = array<i64: 2, 128>}, {pipeline_mode = #tpu.pipeline_mode<synchronous>, transform_indices = @transform_9, window_bounds = array<i64: 2, 8192>}]} {
    %c0_i32 = arith.constant 0 : i32
    %0 = arith.cmpi eq, %arg0, %c0_i32 : i32
    %1 = arith.extui %0 : i1 to i32
    %c0_i32_0 = arith.constant 0 : i32
    %2 = arith.cmpi ne, %1, %c0_i32_0 : i32
    scf.if %2 {
      %cst_9 = arith.constant 0.000000e+00 : f32
      %12 = vector.broadcast %cst_9 : f32 to vector<2x256xf32>
      %c0_10 = arith.constant 0 : index
      %c0_11 = arith.constant 0 : index
      %13 = vector.load %arg11[%c0_10, %c0_11] : memref<2x256xf32, #tpu.memory_space<vmem>>, vector<2x256xf32>
      tpu.vector_store %arg11[%c0_10, %c0_11], %12 {strides = array<i32>} : memref<2x256xf32, #tpu.memory_space<vmem>>, vector<2x256xf32>,
    } else {
    }
    %c0 = arith.constant 0 : index
    %c0_1 = arith.constant 0 : index
    %3 = vector.load %arg11[%c0, %c0_1] : memref<2x256xf32, #tpu.memory_space<vmem>>, vector<2x256xf32>
    %c0_2 = arith.constant 0 : index
    %c0_3 = arith.constant 0 : index
    %4 = vector.load %arg1[%c0_2, %c0_3] : memref<2x2048xbf16, #tpu.memory_space<vmem>>, vector<2x2048xbf16>
    %c0_4 = arith.constant 0 : index
    %c0_5 = arith.constant 0 : index
    %5 = vector.load %arg2[%c0_4, %c0_5] : memref<2048x256xbf16, #tpu.memory_space<vmem>>, vector<2048x256xbf16>
    %cst = arith.constant dense<0.000000e+00> : vector<2x256xf32>
    %6 = tpu.matmul %4, %5, %cst {dimension_numbers = #tpu.dot_dimension_numbers<[1], [0], [0], [1], [0, 0, 1, 1], [], []>} : vector<2x2048xbf16>, vector<2048x256xbf16>, vector<2x256xf32> -> vector<2x256xf32>
    %7 = arith.addf %3, %6 : vector<2x256xf32>
    %c0_6 = arith.constant 0 : index
    %c0_7 = arith.constant 0 : index
    %8 = vector.load %arg11[%c0_6, %c0_7] : memref<2x256xf32, #tpu.memory_space<vmem>>, vector<2x256xf32>
    tpu.vector_store %arg11[%c0_6, %c0_7], %7 {strides = array<i32>} : memref<2x256xf32, #tpu.memory_space<vmem>>, vector<2x256xf32>,
    %c3_i32 = arith.constant 3 : i32
    %9 = arith.cmpi eq, %arg0, %c3_i32 : i32
    %10 = arith.extui %9 : i1 to i32
    %c0_i32_8 = arith.constant 0 : i32
    %11 = arith.cmpi ne, %10, %c0_i32_8 : i32
    scf.if %11 {
      %c0_9 = arith.constant 0 : index
      %c0_10 = arith.constant 0 : index
      %12 = vector.load %arg11[%c0_9, %c0_10] : memref<2x256xf32, #tpu.memory_space<vmem>>, vector<2x256xf32>
      %c0_11 = arith.constant 0 : index
      %c0_12 = arith.constant 0 : index
      %13 = vector.load %arg3[%c0_11, %c0_12] : memref<1x256xf32, #tpu.memory_space<vmem>>, vector<1x256xf32>
      %14 = vector.broadcast %13 : vector<1x256xf32> to vector<2x256xf32>
      %15 = arith.addf %12, %14 : vector<2x256xf32>
      %16 = vector.extract_strided_slice %15 {offsets = [0, 0], sizes = [2, 128], strides = [1, 1]} : vector<2x256xf32> to vector<2x128xf32>
      %17 = vector.extract_strided_slice %15 {offsets = [0, 128], sizes = [2, 128], strides = [1, 1]} : vector<2x256xf32> to vector<2x128xf32>
      %c0_13 = arith.constant 0 : index
      %c0_14 = arith.constant 0 : index
      %18 = vector.load %arg4[%c0_13, %c0_14] : memref<2x128xf32, #tpu.memory_space<vmem>>, vector<2x128xf32>
      %cst_15 = arith.constant 5.000000e-01 : f32
      %19 = vector.broadcast %cst_15 : f32 to vector<2x128xf32>
      %20 = arith.mulf %19, %17 : vector<2x128xf32>
      %21 = math.exp %20 : vector<2x128xf32>
      %22 = arith.mulf %18, %21 : vector<2x128xf32>
      %23 = arith.addf %16, %22 : vector<2x128xf32>
      %c0_16 = arith.constant 0 : index
      %c0_17 = arith.constant 0 : index
      %24 = vector.load %arg7[%c0_16, %c0_17] : memref<2x128xf32, #tpu.memory_space<vmem>>, vector<2x128xf32>
      tpu.vector_store %arg7[%c0_16, %c0_17], %16 {strides = array<i32>} : memref<2x128xf32, #tpu.memory_space<vmem>>, vector<2x128xf32>,
      %c0_18 = arith.constant 0 : index
      %c0_19 = arith.constant 0 : index
      %25 = vector.load %arg8[%c0_18, %c0_19] : memref<2x128xf32, #tpu.memory_space<vmem>>, vector<2x128xf32>
      tpu.vector_store %arg8[%c0_18, %c0_19], %17 {strides = array<i32>} : memref<2x128xf32, #tpu.memory_space<vmem>>, vector<2x128xf32>,
      %c0_20 = arith.constant 0 : index
      %c0_21 = arith.constant 0 : index
      %26 = vector.load %arg9[%c0_20, %c0_21] : memref<2x128xf32, #tpu.memory_space<vmem>>, vector<2x128xf32>
      tpu.vector_store %arg9[%c0_20, %c0_21], %23 {strides = array<i32>} : memref<2x128xf32, #tpu.memory_space<vmem>>, vector<2x128xf32>,
      %27 = arith.truncf %23 : vector<2x128xf32> to vector<2x128xbf16>
      %c0_22 = arith.constant 0 : index
      %c0_23 = arith.constant 0 : index
      %28 = vector.load %arg5[%c0_22, %c0_23] : memref<128x8192xbf16, #tpu.memory_space<vmem>>, vector<128x8192xbf16>
      %cst_24 = arith.constant dense<0.000000e+00> : vector<2x8192xf32>
      %29 = tpu.matmul %27, %28, %cst_24 {dimension_numbers = #tpu.dot_dimension_numbers<[1], [0], [0], [1], [0, 0, 1, 1], [], []>} : vector<2x128xbf16>, vector<128x8192xbf16>, vector<2x8192xf32> -> vector<2x8192xf32>
      %c0_25 = arith.constant 0 : index
      %c0_26 = arith.constant 0 : index
      %30 = vector.load %arg6[%c0_25, %c0_26] : memref<1x8192xf32, #tpu.memory_space<vmem>>, vector<1x8192xf32>
      %31 = vector.broadcast %30 : vector<1x8192xf32> to vector<2x8192xf32>
      %32 = arith.addf %29, %31 : vector<2x8192xf32>
      %33 = arith.truncf %32 : vector<2x8192xf32> to vector<2x8192xbf16>
      %c0_27 = arith.constant 0 : index
      %c0_28 = arith.constant 0 : index
      %34 = vector.load %arg10[%c0_27, %c0_28] : memref<2x8192xbf16, #tpu.memory_space<vmem>>, vector<2x8192xbf16>
      tpu.vector_store %arg10[%c0_27, %c0_28], %33 {strides = array<i32>} : memref<2x8192xbf16, #tpu.memory_space<vmem>>, vector<2x8192xbf16>,
    } else {
    }
    return
  }
  func.func @transform_0(%arg0: i32) -> (i32, i32) {
    %c0_i32 = arith.constant 0 : i32
    %c0_i32_0 = arith.constant 0 : i32
    return %c0_i32, %arg0 : i32, i32
  }
  func.func @transform_1(%arg0: i32) -> (i32, i32) {
    %c0_i32 = arith.constant 0 : i32
    %c0_i32_0 = arith.constant 0 : i32
    return %arg0, %c0_i32 : i32, i32
  }
  func.func @transform_2(%arg0: i32) -> (i32, i32) {
    %c0_i32 = arith.constant 0 : i32
    %c0_i32_0 = arith.constant 0 : i32
    %c0_i32_1 = arith.constant 0 : i32
    return %c0_i32, %c0_i32_0 : i32, i32
  }
  func.func @transform_3(%arg0: i32) -> (i32, i32) {
    %c0_i32 = arith.constant 0 : i32
    %c0_i32_0 = arith.constant 0 : i32
    %c0_i32_1 = arith.constant 0 : i32
    return %c0_i32, %c0_i32_0 : i32, i32
  }
  func.func @transform_4(%arg0: i32) -> (i32, i32) {
    %c0_i32 = arith.constant 0 : i32
    %c0_i32_0 = arith.constant 0 : i32
    %c0_i32_1 = arith.constant 0 : i32
    return %c0_i32, %c0_i32_0 : i32, i32
  }
  func.func @transform_5(%arg0: i32) -> (i32, i32) {
    %c0_i32 = arith.constant 0 : i32
    %c0_i32_0 = arith.constant 0 : i32
    %c0_i32_1 = arith.constant 0 : i32
    return %c0_i32, %c0_i32_0 : i32, i32
  }
  func.func @transform_6(%arg0: i32) -> (i32, i32) {
    %c0_i32 = arith.constant 0 : i32
    %c0_i32_0 = arith.constant 0 : i32
    %c0_i32_1 = arith.constant 0 : i32
    return %c0_i32, %c0_i32_0 : i32, i32
  }
  func.func @transform_7(%arg0: i32) -> (i32, i32) {
    %c0_i32 = arith.constant 0 : i32
    %c0_i32_0 = arith.constant 0 : i32
    %c0_i32_1 = arith.constant 0 : i32
    return %c0_i32, %c0_i32_0 : i32, i32
  }
  func.func @transform_8(%arg0: i32) -> (i32, i32) {
    %c0_i32 = arith.constant 0 : i32
    %c0_i32_0 = arith.constant 0 : i32
    %c0_i32_1 = arith.constant 0 : i32
    return %c0_i32, %c0_i32_0 : i32, i32
  }
  func.func @transform_9(%arg0: i32) -> (i32, i32) {
    %c0_i32 = arith.constant 0 : i32
    %c0_i32_0 = arith.constant 0 : i32
    %c0_i32_1 = arith.constant 0 : i32
    return %c0_i32, %c0_i32_0 : i32, i32
  }
}

module attributes {stable_mosaic.version = 11 : i64} {
  func.func @_conv_matmul_kernel(%arg0: i32, %arg1: memref<64x1152xbf16, #tpu.memory_space<vmem>>, %arg2: memref<1152x256xbf16, #tpu.memory_space<vmem>>, %arg3: memref<1x256xf32, #tpu.memory_space<vmem>>, %arg4: memref<64x256xbf16, #tpu.memory_space<vmem>>) attributes {dimension_semantics = [#tpu.dimension_semantics<parallel>], iteration_bounds = array<i64: 2>, scalar_prefetch = 0 : i64, scratch_operands = 0 : i64, tpu.core_type = #tpu.core_type<tc>, window_params = [{transform_indices = @transform_0, window_bounds = array<i64: 64, 1152>}, {pipeline_mode = #tpu.pipeline_mode<synchronous>, transform_indices = @transform_1, window_bounds = array<i64: 1152, 256>}, {pipeline_mode = #tpu.pipeline_mode<synchronous>, transform_indices = @transform_2, window_bounds = array<i64: 1, 256>}, {transform_indices = @transform_3, window_bounds = array<i64: 64, 256>}]} {
    %c0 = arith.constant 0 : index
    %c0_0 = arith.constant 0 : index
    %0 = vector.load %arg1[%c0, %c0_0] : memref<64x1152xbf16, #tpu.memory_space<vmem>>, vector<64x1152xbf16>
    %c0_1 = arith.constant 0 : index
    %c0_2 = arith.constant 0 : index
    %1 = vector.load %arg2[%c0_1, %c0_2] : memref<1152x256xbf16, #tpu.memory_space<vmem>>, vector<1152x256xbf16>
    %cst = arith.constant dense<0.000000e+00> : vector<64x256xf32>
    %2 = tpu.matmul %0, %1, %cst {dimension_numbers = #tpu.dot_dimension_numbers<[1], [0], [0], [1], [0, 0, 1, 1], [], []>} : vector<64x1152xbf16>, vector<1152x256xbf16>, vector<64x256xf32> -> vector<64x256xf32>
    %c0_3 = arith.constant 0 : index
    %c0_4 = arith.constant 0 : index
    %3 = vector.load %arg3[%c0_3, %c0_4] : memref<1x256xf32, #tpu.memory_space<vmem>>, vector<1x256xf32>
    %4 = vector.broadcast %3 : vector<1x256xf32> to vector<64x256xf32>
    %5 = arith.addf %2, %4 : vector<64x256xf32>
    %cst_5 = arith.constant 0.000000e+00 : f32
    %6 = vector.broadcast %cst_5 : f32 to vector<64x256xf32>
    %7 = arith.maximumf %5, %6 : vector<64x256xf32>
    %8 = arith.truncf %7 : vector<64x256xf32> to vector<64x256xbf16>
    %c0_6 = arith.constant 0 : index
    %c0_7 = arith.constant 0 : index
    %9 = vector.load %arg4[%c0_6, %c0_7] : memref<64x256xbf16, #tpu.memory_space<vmem>>, vector<64x256xbf16>
    tpu.vector_store %arg4[%c0_6, %c0_7], %8 {strides = array<i32>} : memref<64x256xbf16, #tpu.memory_space<vmem>>, vector<64x256xbf16>,
    return
  }
  func.func @transform_0(%arg0: i32) -> (i32, i32) {
    %c0_i32 = arith.constant 0 : i32
    %c0_i32_0 = arith.constant 0 : i32
    return %arg0, %c0_i32 : i32, i32
  }
  func.func @transform_1(%arg0: i32) -> (i32, i32) {
    %c0_i32 = arith.constant 0 : i32
    %c0_i32_0 = arith.constant 0 : i32
    %c0_i32_1 = arith.constant 0 : i32
    return %c0_i32, %c0_i32_0 : i32, i32
  }
  func.func @transform_2(%arg0: i32) -> (i32, i32) {
    %c0_i32 = arith.constant 0 : i32
    %c0_i32_0 = arith.constant 0 : i32
    %c0_i32_1 = arith.constant 0 : i32
    return %c0_i32, %c0_i32_0 : i32, i32
  }
  func.func @transform_3(%arg0: i32) -> (i32, i32) {
    %c0_i32 = arith.constant 0 : i32
    %c0_i32_0 = arith.constant 0 : i32
    return %arg0, %c0_i32 : i32, i32
  }
}

module attributes {stable_mosaic.version = 11 : i64} {
  func.func @_conv_matmul_kernel(%arg0: i32, %arg1: memref<256x576xbf16, #tpu.memory_space<vmem>>, %arg2: memref<576x128xbf16, #tpu.memory_space<vmem>>, %arg3: memref<1x128xf32, #tpu.memory_space<vmem>>, %arg4: memref<256x128xbf16, #tpu.memory_space<vmem>>) attributes {dimension_semantics = [#tpu.dimension_semantics<parallel>], iteration_bounds = array<i64: 2>, scalar_prefetch = 0 : i64, scratch_operands = 0 : i64, tpu.core_type = #tpu.core_type<tc>, window_params = [{transform_indices = @transform_0, window_bounds = array<i64: 256, 576>}, {pipeline_mode = #tpu.pipeline_mode<synchronous>, transform_indices = @transform_1, window_bounds = array<i64: 576, 128>}, {pipeline_mode = #tpu.pipeline_mode<synchronous>, transform_indices = @transform_2, window_bounds = array<i64: 1, 128>}, {transform_indices = @transform_3, window_bounds = array<i64: 256, 128>}]} {
    %c0 = arith.constant 0 : index
    %c0_0 = arith.constant 0 : index
    %0 = vector.load %arg1[%c0, %c0_0] : memref<256x576xbf16, #tpu.memory_space<vmem>>, vector<256x576xbf16>
    %c0_1 = arith.constant 0 : index
    %c0_2 = arith.constant 0 : index
    %1 = vector.load %arg2[%c0_1, %c0_2] : memref<576x128xbf16, #tpu.memory_space<vmem>>, vector<576x128xbf16>
    %cst = arith.constant dense<0.000000e+00> : vector<256x128xf32>
    %2 = tpu.matmul %0, %1, %cst {dimension_numbers = #tpu.dot_dimension_numbers<[1], [0], [0], [1], [0, 0, 1, 1], [], []>} : vector<256x576xbf16>, vector<576x128xbf16>, vector<256x128xf32> -> vector<256x128xf32>
    %c0_3 = arith.constant 0 : index
    %c0_4 = arith.constant 0 : index
    %3 = vector.load %arg3[%c0_3, %c0_4] : memref<1x128xf32, #tpu.memory_space<vmem>>, vector<1x128xf32>
    %4 = vector.broadcast %3 : vector<1x128xf32> to vector<256x128xf32>
    %5 = arith.addf %2, %4 : vector<256x128xf32>
    %cst_5 = arith.constant 0.000000e+00 : f32
    %6 = vector.broadcast %cst_5 : f32 to vector<256x128xf32>
    %7 = arith.maximumf %5, %6 : vector<256x128xf32>
    %8 = arith.truncf %7 : vector<256x128xf32> to vector<256x128xbf16>
    %c0_6 = arith.constant 0 : index
    %c0_7 = arith.constant 0 : index
    %9 = vector.load %arg4[%c0_6, %c0_7] : memref<256x128xbf16, #tpu.memory_space<vmem>>, vector<256x128xbf16>
    tpu.vector_store %arg4[%c0_6, %c0_7], %8 {strides = array<i32>} : memref<256x128xbf16, #tpu.memory_space<vmem>>, vector<256x128xbf16>,
    return
  }
  func.func @transform_0(%arg0: i32) -> (i32, i32) {
    %c0_i32 = arith.constant 0 : i32
    %c0_i32_0 = arith.constant 0 : i32
    return %arg0, %c0_i32 : i32, i32
  }
  func.func @transform_1(%arg0: i32) -> (i32, i32) {
    %c0_i32 = arith.constant 0 : i32
    %c0_i32_0 = arith.constant 0 : i32
    %c0_i32_1 = arith.constant 0 : i32
    return %c0_i32, %c0_i32_0 : i32, i32
  }
  func.func @transform_2(%arg0: i32) -> (i32, i32) {
    %c0_i32 = arith.constant 0 : i32
    %c0_i32_0 = arith.constant 0 : i32
    %c0_i32_1 = arith.constant 0 : i32
    return %c0_i32, %c0_i32_0 : i32, i32
  }
  func.func @transform_3(%arg0: i32) -> (i32, i32) {
    %c0_i32 = arith.constant 0 : i32
    %c0_i32_0 = arith.constant 0 : i32
    return %arg0, %c0_i32 : i32, i32
  }
}

module attributes {stable_mosaic.version = 11 : i64} {
  func.func @_conv_matmul_kernel(%arg0: i32, %arg1: memref<512x288xbf16, #tpu.memory_space<vmem>>, %arg2: memref<288x128xbf16, #tpu.memory_space<vmem>>, %arg3: memref<1x128xf32, #tpu.memory_space<vmem>>, %arg4: memref<512x128xf32, #tpu.memory_space<vmem>>) attributes {dimension_semantics = [#tpu.dimension_semantics<parallel>], iteration_bounds = array<i64: 4>, scalar_prefetch = 0 : i64, scratch_operands = 0 : i64, tpu.core_type = #tpu.core_type<tc>, window_params = [{transform_indices = @transform_0, window_bounds = array<i64: 512, 288>}, {pipeline_mode = #tpu.pipeline_mode<synchronous>, transform_indices = @transform_1, window_bounds = array<i64: 288, 128>}, {pipeline_mode = #tpu.pipeline_mode<synchronous>, transform_indices = @transform_2, window_bounds = array<i64: 1, 128>}, {transform_indices = @transform_3, window_bounds = array<i64: 512, 128>}]} {
    %c0 = arith.constant 0 : index
    %c0_0 = arith.constant 0 : index
    %0 = vector.load %arg1[%c0, %c0_0] : memref<512x288xbf16, #tpu.memory_space<vmem>>, vector<512x288xbf16>
    %c0_1 = arith.constant 0 : index
    %c0_2 = arith.constant 0 : index
    %1 = vector.load %arg2[%c0_1, %c0_2] : memref<288x128xbf16, #tpu.memory_space<vmem>>, vector<288x128xbf16>
    %cst = arith.constant dense<0.000000e+00> : vector<512x128xf32>
    %2 = tpu.matmul %0, %1, %cst {dimension_numbers = #tpu.dot_dimension_numbers<[1], [0], [0], [1], [0, 0, 1, 1], [], []>} : vector<512x288xbf16>, vector<288x128xbf16>, vector<512x128xf32> -> vector<512x128xf32>
    %c0_3 = arith.constant 0 : index
    %c0_4 = arith.constant 0 : index
    %3 = vector.load %arg3[%c0_3, %c0_4] : memref<1x128xf32, #tpu.memory_space<vmem>>, vector<1x128xf32>
    %4 = vector.broadcast %3 : vector<1x128xf32> to vector<512x128xf32>
    %5 = arith.addf %2, %4 : vector<512x128xf32>
    %6 = math.tanh %5 : vector<512x128xf32>
    %c0_5 = arith.constant 0 : index
    %c0_6 = arith.constant 0 : index
    %7 = vector.load %arg4[%c0_5, %c0_6] : memref<512x128xf32, #tpu.memory_space<vmem>>, vector<512x128xf32>
    tpu.vector_store %arg4[%c0_5, %c0_6], %6 {strides = array<i32>} : memref<512x128xf32, #tpu.memory_space<vmem>>, vector<512x128xf32>,
    return
  }
  func.func @transform_0(%arg0: i32) -> (i32, i32) {
    %c0_i32 = arith.constant 0 : i32
    %c0_i32_0 = arith.constant 0 : i32
    return %arg0, %c0_i32 : i32, i32
  }
  func.func @transform_1(%arg0: i32) -> (i32, i32) {
    %c0_i32 = arith.constant 0 : i32
    %c0_i32_0 = arith.constant 0 : i32
    %c0_i32_1 = arith.constant 0 : i32
    return %c0_i32, %c0_i32_0 : i32, i32
  }
  func.func @transform_2(%arg0: i32) -> (i32, i32) {
    %c0_i32 = arith.constant 0 : i32
    %c0_i32_0 = arith.constant 0 : i32
    %c0_i32_1 = arith.constant 0 : i32
    return %c0_i32, %c0_i32_0 : i32, i32
  }
  func.func @transform_3(%arg0: i32) -> (i32, i32) {
    %c0_i32 = arith.constant 0 : i32
    %c0_i32_0 = arith.constant 0 : i32
    return %arg0, %c0_i32 : i32, i32
  }
}

</mosaic_0001>

<bundles_post_ra>
// kernel: vae_forward.7
= control target key start
LH: loop header
LB: loop body
LE: loop exit
PB: predicated region body
PF: predicated region fallthrough
CT: control target
= control target key end

     0   :  { %s1836_s12 = smov 0   ;;  %s2038_s0 = inlined_call_operand.vmem [shape: bf16[2048,48], index: 0, kind: input, shape index: {}]   ;;  %s2039_s1 = inlined_call_operand.vmem [shape: bf16[48,128], index: 1, kind: input, shape index: {}]   ;;  %s2040_s2 = inlined_call_operand.vmem [shape: f32[1,128], index: 2, kind: input, shape index: {}]   ;;  %s2041_s3 = inlined_call_operand.vmem [shape: bf16[2048,128], index: 3, kind: output, shape index: {}]  }
   0x1 LB: > { %s1256_s13 = sadd.s32 4294967295, %s1814_s12   ;;  %p1260_p0 = scmp.ge.s32.totalorder %s1814_s12, 1  ;;  %s1814_s12 = sphi %s1836_s12, %s13_s12  }
   0x2   : > { %p138_p1 = scmp.lt.s32.totalorder %s1814_s12, 5 }
   0x4   : > { %p139_p2 = pnand %p1260_p0, %p138_p1 }
   0x5   : > { %s1261_s16 = sshll.u32 (!%p139_p2), %s1256_s13, 6 }
   0x6   : > { %142 = sbr.rel (%p139_p2) target bundleno = 286 (0x11e), region = 32  ;;  %p163_p3 = scmp.lt.s32.totalorder (!%p139_p2), %s1261_s16, 255 }
   0xb   : > { %v1773_v0 = vld [vmem:[%s2039_s1 + $0x10] sm:$0xff]   ;;  %v1774_v1 = vld [vmem:[%s2039_s1 + $0x8] sm:$0xff]   ;;  %s2043_s16 = smov (!%p163_p3, %s1261_s16), 255  ;;  %v1775_v2 = vld [vmem:[%s2039_s1] sm:$0xff]   ;;  %vm430_vm0 = vcmask 392192  }
   0xc   : > { %1689 = vmatprep.subr.bf16.mxu0 %v1773_v0  ;;  %1759 = vmatprep.subr.bf16.mxu1 %v1773_v0  ;;  %s1262_s21 = sshll.u32 %s2043_s16, 2  ;;  %v1930_v35 = vld [vmem:[%s2040_s2] ss:$0 sm:$0xff] }
   0xd   : > { %1690 = vmatpush3.bf16.msra.mxu0 %v1773_v0  ;;  %1762 = vmatpush3.bf16.msra.mxu1 %v1773_v0  ;;  %s1861_s24 = scalar_lea.vmem %s2038_s0, %s1262_s21  ;;  %s1945_s29 = scalar_lea.vmem %s2041_s3, %s1262_s21 }
   0xe   : > { %1691 = vmatprep.subr.bf16.mxu0 %v1774_v1  ;;  %1760 = vmatprep.subr.bf16.mxu1 %v1774_v1  ;;  %v1776_v3 = vld [vmem:[%s1861_s24] sm:$0xff]   ;;  %v1778_v5 = vld [vmem:[%s1861_s24 + $0x8] sm:$0xff]   ;;  %v1780_v7 = vld [vmem:[%s1861_s24 + $0x10] sm:$0xff]  }
   0xf   : > { %v1777_v4 = vld [vmem:[%s1861_s24 + $0x80] sm:$0xff]   ;;  %1695 = vmatprep.mubr.msk.bf16.mxu0 %vm430_vm0, %v1776_v3  ;;  %v1779_v6 = vld [vmem:[%s1861_s24 + $0x88] sm:$0xff]   ;;  %v1781_v8 = vld [vmem:[%s1861_s24 + $0x90] sm:$0xff]  }
  0x10   : > { %1727 = vmatprep.mubr.msk.bf16.mxu1 %vm430_vm0, %v1777_v4  ;;  %v1782_v9 = vld [vmem:[%s1861_s24 + $0x18] sm:$0xff]   ;;  %v1784_v11 = vld [vmem:[%s1861_s24 + $0x20] sm:$0xff]   ;;  %v1786_v13 = vld [vmem:[%s1861_s24 + $0x28] sm:$0xff]  }
  0x11   : > { %1692 = vmatpush3.bf16.msra.mxu0 %v1774_v1  ;;  %1763 = vmatpush3.bf16.msra.mxu1 %v1774_v1  ;;  %v1783_v10 = vld [vmem:[%s1861_s24 + $0x98] sm:$0xff]   ;;  %v1785_v12 = vld [vmem:[%s1861_s24 + $0xa0] sm:$0xff]   ;;  %v1787_v14 = vld [vmem:[%s1861_s24 + $0xa8] sm:$0xff]  }
  0x12   : > { %1693 = vmatprep.subr.bf16.mxu0 %v1775_v2  ;;  %1761 = vmatprep.subr.bf16.mxu1 %v1775_v2  ;;  %v1788_v15 = vld [vmem:[%s1861_s24 + $0x30] sm:$0xff]   ;;  %v1790_v17 = vld [vmem:[%s1861_s24 + $0x38] sm:$0xff]   ;;  %v1792_v19 = vld [vmem:[%s1861_s24 + $0x40] sm:$0xff]  }
  0x13   : > { %v1789_v16 = vld [vmem:[%s1861_s24 + $0xb0] sm:$0xff]   ;;  %v1791_v18 = vld [vmem:[%s1861_s24 + $0xb8] sm:$0xff]   ;;  %v1793_v20 = vld [vmem:[%s1861_s24 + $0xc0] sm:$0xff]  }
  0x14   : > { %v1794_v21 = vld [vmem:[%s1861_s24 + $0x48] sm:$0xff]   ;;  %v1796_v23 = vld [vmem:[%s1861_s24 + $0x50] sm:$0xff]   ;;  %v1798_v25 = vld [vmem:[%s1861_s24 + $0x58] sm:$0xff]  }
  0x15   : > { %1694 = vmatpush3.bf16.msra.mxu0 %v1775_v2  ;;  %1764 = vmatpush3.bf16.msra.mxu1 %v1775_v2  ;;  %v1795_v22 = vld [vmem:[%s1861_s24 + $0xc8] sm:$0xff]   ;;  %v1797_v24 = vld [vmem:[%s1861_s24 + $0xd0] sm:$0xff]   ;;  %v1799_v26 = vld [vmem:[%s1861_s24 + $0xd8] sm:$0xff]  }
  0x16   : > { %v1800_v27 = vld [vmem:[%s1861_s24 + $0x60] sm:$0xff]   ;;  %v1802_v29 = vld [vmem:[%s1861_s24 + $0x68] sm:$0xff]   ;;  %v1804_v31 = vld [vmem:[%s1861_s24 + $0x70] sm:$0xff]  }
  0x17   : > { %v1801_v28 = vld [vmem:[%s1861_s24 + $0xe0] sm:$0xff]   ;;  %v1803_v30 = vld [vmem:[%s1861_s24 + $0xe8] sm:$0xff]   ;;  %v1805_v32 = vld [vmem:[%s1861_s24 + $0xf0] sm:$0xff]  }
  0x18   : > { %1696 = vmatmul.mubr.msk.bf16.vlgmr.msra.gmra.mxu0 %vm430_vm0, %v1778_v5  ;;  %1728 = vmatmul.mubr.msk.bf16.vlgmr.msra.gmra.mxu1 %vm430_vm0, %v1779_v6  ;;  %v1806_v33 = vld [vmem:[%s1861_s24 + $0x78] sm:$0xff]  }
  0x19   : > { %1699 = vmatprep.mubr.msk.bf16.mxu0 %vm430_vm0, %v1780_v7  ;;  %1731 = vmatprep.mubr.msk.bf16.mxu1 %vm430_vm0, %v1781_v8  ;;  %v1807_v34 = vld [vmem:[%s1861_s24 + $0xf8] sm:$0xff]  }
  0x20   : > { %1700 = vmatmul.mubr.msk.bf16.gmra.mxu0 %vm430_vm0, %v1782_v9  ;;  %1732 = vmatmul.mubr.msk.bf16.gmra.mxu1 %vm430_vm0, %v1783_v10 }
  0x21   : > { %1703 = vmatprep.mubr.msk.bf16.mxu0 %vm430_vm0, %v1784_v11  ;;  %1735 = vmatprep.mubr.msk.bf16.mxu1 %vm430_vm0, %v1785_v12 }
  0x28   : > { %1704 = vmatmul.mubr.msk.bf16.gmra.mxu0 %vm430_vm0, %v1786_v13  ;;  %1736 = vmatmul.mubr.msk.bf16.gmra.mxu1 %vm430_vm0, %v1787_v14 }
  0x29   : > { %1707 = vmatprep.mubr.msk.bf16.mxu0 %vm430_vm0, %v1788_v15  ;;  %1739 = vmatprep.mubr.msk.bf16.mxu1 %vm430_vm0, %v1789_v16 }
  0x30   : > { %1708 = vmatmul.mubr.msk.bf16.gmra.mxu0 %vm430_vm0, %v1790_v17  ;;  %1740 = vmatmul.mubr.msk.bf16.gmra.mxu1 %vm430_vm0, %v1791_v18 }
  0x31   : > { %1711 = vmatprep.mubr.msk.bf16.mxu0 %vm430_vm0, %v1792_v19  ;;  %1743 = vmatprep.mubr.msk.bf16.mxu1 %vm430_vm0, %v1793_v20 }
  0x38   : > { %1712 = vmatmul.mubr.msk.bf16.gmra.mxu0 %vm430_vm0, %v1794_v21  ;;  %1744 = vmatmul.mubr.msk.bf16.gmra.mxu1 %vm430_vm0, %v1795_v22 }
  0x39   : > { %1715 = vmatprep.mubr.msk.bf16.mxu0 %vm430_vm0, %v1796_v23  ;;  %1747 = vmatprep.mubr.msk.bf16.mxu1 %vm430_vm0, %v1797_v24 }
  0x40   : > { %1716 = vmatmul.mubr.msk.bf16.gmra.mxu0 %vm430_vm0, %v1798_v25  ;;  %1748 = vmatmul.mubr.msk.bf16.gmra.mxu1 %vm430_vm0, %v1799_v26 }
  0x41   : > { %1719 = vmatprep.mubr.msk.bf16.mxu0 %vm430_vm0, %v1800_v27  ;;  %1751 = vmatprep.mubr.msk.bf16.mxu1 %vm430_vm0, %v1801_v28 }
  0x48   : > { %1720 = vmatmul.mubr.msk.bf16.gmra.mxu0 %vm430_vm0, %v1802_v29  ;;  %1752 = vmatmul.mubr.msk.bf16.gmra.mxu1 %vm430_vm0, %v1803_v30 }
  0x49   : > { %1723 = vmatprep.mubr.msk.bf16.mxu0 %vm430_vm0, %v1804_v31  ;;  %1755 = vmatprep.mubr.msk.bf16.mxu1 %vm430_vm0, %v1805_v32 }
  0x50   : > { %1724 = vmatmul.mubr.msk.bf16.gmra.mxu0 %vm430_vm0, %v1806_v33  ;;  %1756 = vmatmul.mubr.msk.bf16.gmra.mxu1 %vm430_vm0, %v1807_v34 }
  0xd8   : > { %v1697_v36 = vpop.f32.mrf.mxu0  ;;  %v1729_v37 = vpop.f32.mrf.mxu1 }
  0xd9   : > { %v570_v38 = vadd.f32 %v1697_v36, %v1930_v35  ;;  %v698_v39 = vadd.f32 %v1729_v37, %v1930_v35 }
  0xda   : > { %v561_v40 = vpop.f32.mrf.mxu0  ;;  %v689_v41 = vpop.f32.mrf.mxu1 }
  0xdb   : > { %v562_v42 = vadd.f32 %v1930_v35, %v561_v40  ;;  %v690_v43 = vadd.f32 %v1930_v35, %v689_v41  ;;  %v818_v48 = vmax.f32 %v570_v38, 0.0  ;;  %v850_v49 = vmax.f32 %v698_v39, 0.0 }
  0xdc   : > { %v1698_v44 = vpop.f32.mrf.mxu0  ;;  %v1730_v45 = vpop.f32.mrf.mxu1 }
  0xdd   : > { %v573_v46 = vadd.f32 %v1698_v44, %v1930_v35  ;;  %v701_v47 = vadd.f32 %v1730_v45, %v1930_v35  ;;  %v816_v56 = vmax.f32 %v562_v42, 0.0  ;;  %v848_v57 = vmax.f32 %v690_v43, 0.0 }
  0xde   : > { %v564_v50 = vpop.f32.mrf.mxu0  ;;  %v692_v51 = vpop.f32.mrf.mxu1 }
  0xdf   : > { %v819_v52 = vmax.f32 %v573_v46, 0.0  ;;  %v851_v53 = vmax.f32 %v701_v47, 0.0  ;;  %v565_v54 = vadd.f32 %v1930_v35, %v564_v50  ;;  %v693_v55 = vadd.f32 %v1930_v35, %v692_v51 }
  0xe0   : > { %v1701_v58 = vpop.f32.mrf.mxu0  ;;  %v1733_v59 = vpop.f32.mrf.mxu1 }
  0xe1   : > { %v1471_v60 = vpack.c.bf16 %v819_v52, %v818_v48  ;;  %v1551_v61 = vpack.c.bf16 %v851_v53, %v850_v49  ;;  %v817_v62 = vmax.f32 %v565_v54, 0.0  ;;  %v849_v63 = vmax.f32 %v693_v55, 0.0 }
  0xe2   : > { %v586_v0 = vadd.f32 %v1701_v58, %v1930_v35  ;;  %v714_v1 = vadd.f32 %v1733_v59, %v1930_v35  ;;  %v577_v2 = vpop.f32.mrf.mxu0  ;;  %v705_v3 = vpop.f32.mrf.mxu1 }
  0xe3   : > { %1623 = vst [vmem:[%s1945_s29 + $0x8] sm:$0xff] %v1471_v60   ;;  %1639 = vst [vmem:[%s1945_s29 + $0x88] sm:$0xff] %v1551_v61   ;;  %v1466_v4 = vpack.c.bf16 %v817_v62, %v816_v56  ;;  %v1546_v5 = vpack.c.bf16 %v849_v63, %v848_v57  ;;  %v578_v6 = vadd.f32 %v1930_v35, %v577_v2 }
  0xe4   : > { %v706_v7 = vadd.f32 %v1930_v35, %v705_v3  ;;  %v1702_v8 = vpop.f32.mrf.mxu0  ;;  %v1734_v9 = vpop.f32.mrf.mxu1  ;;  %v822_v12 = vmax.f32 %v586_v0, 0.0  ;;  %v854_v13 = vmax.f32 %v714_v1, 0.0 }
  0xe5   : > { %1467 = vst [vmem:[%s1945_s29] sm:$0xff] %v1466_v4   ;;  %1638 = vst [vmem:[%s1945_s29 + $0x80] sm:$0xff] %v1546_v5   ;;  %v589_v10 = vadd.f32 %v1702_v8, %v1930_v35  ;;  %v717_v11 = vadd.f32 %v1734_v9, %v1930_v35  ;;  %v820_v20 = vmax.f32 %v578_v6, 0.0 }
  0xe6   : > { %v580_v14 = vpop.f32.mrf.mxu0  ;;  %v708_v15 = vpop.f32.mrf.mxu1  ;;  %v852_v21 = vmax.f32 %v706_v7, 0.0 }
  0xe7   : > { %v823_v16 = vmax.f32 %v589_v10, 0.0  ;;  %v855_v17 = vmax.f32 %v717_v11, 0.0  ;;  %v581_v18 = vadd.f32 %v1930_v35, %v580_v14  ;;  %v709_v19 = vadd.f32 %v1930_v35, %v708_v15 }
  0xe8   : > { %v1705_v22 = vpop.f32.mrf.mxu0  ;;  %v1737_v23 = vpop.f32.mrf.mxu1 }
  0xe9   : > { %v1481_v24 = vpack.c.bf16 %v823_v16, %v822_v12  ;;  %v1561_v25 = vpack.c.bf16 %v855_v17, %v854_v13  ;;  %v821_v26 = vmax.f32 %v581_v18, 0.0  ;;  %v853_v27 = vmax.f32 %v709_v19, 0.0 }
  0xea   : > { %v602_v28 = vadd.f32 %v1705_v22, %v1930_v35  ;;  %v730_v29 = vadd.f32 %v1737_v23, %v1930_v35  ;;  %v593_v30 = vpop.f32.mrf.mxu0  ;;  %v721_v31 = vpop.f32.mrf.mxu1 }
  0xeb   : > { %1625 = vst [vmem:[%s1945_s29 + $0x18] sm:$0xff] %v1481_v24   ;;  %1641 = vst [vmem:[%s1945_s29 + $0x98] sm:$0xff] %v1561_v25   ;;  %v1476_v32 = vpack.c.bf16 %v821_v26, %v820_v20  ;;  %v1556_v33 = vpack.c.bf16 %v853_v27, %v852_v21  ;;  %v594_v34 = vadd.f32 %v1930_v35, %v593_v30 }
  0xec   : > { %v722_v36 = vadd.f32 %v1930_v35, %v721_v31  ;;  %v1706_v37 = vpop.f32.mrf.mxu0  ;;  %v1738_v38 = vpop.f32.mrf.mxu1  ;;  %v826_v41 = vmax.f32 %v602_v28, 0.0  ;;  %v858_v42 = vmax.f32 %v730_v29, 0.0 }
  0xed   : > { %1624 = vst [vmem:[%s1945_s29 + $0x10] sm:$0xff] %v1476_v32   ;;  %1640 = vst [vmem:[%s1945_s29 + $0x90] sm:$0xff] %v1556_v33   ;;  %v605_v39 = vadd.f32 %v1706_v37, %v1930_v35  ;;  %v733_v40 = vadd.f32 %v1738_v38, %v1930_v35  ;;  %v824_v49 = vmax.f32 %v594_v34, 0.0 }
  0xee   : > { %v596_v43 = vpop.f32.mrf.mxu0  ;;  %v724_v44 = vpop.f32.mrf.mxu1  ;;  %v856_v50 = vmax.f32 %v722_v36, 0.0 }
  0xef   : > { %v827_v45 = vmax.f32 %v605_v39, 0.0  ;;  %v859_v46 = vmax.f32 %v733_v40, 0.0  ;;  %v597_v47 = vadd.f32 %v1930_v35, %v596_v43  ;;  %v725_v48 = vadd.f32 %v1930_v35, %v724_v44 }
  0xf0   : > { %v1709_v51 = vpop.f32.mrf.mxu0  ;;  %v1741_v52 = vpop.f32.mrf.mxu1 }
  0xf1   : > { %v1491_v53 = vpack.c.bf16 %v827_v45, %v826_v41  ;;  %v1571_v54 = vpack.c.bf16 %v859_v46, %v858_v42  ;;  %v825_v55 = vmax.f32 %v597_v47, 0.0  ;;  %v857_v56 = vmax.f32 %v725_v48, 0.0 }
  0xf2   : > { %v618_v57 = vadd.f32 %v1709_v51, %v1930_v35  ;;  %v746_v58 = vadd.f32 %v1741_v52, %v1930_v35  ;;  %v609_v59 = vpop.f32.mrf.mxu0  ;;  %v737_v60 = vpop.f32.mrf.mxu1 }
  0xf3   : > { %1627 = vst [vmem:[%s1945_s29 + $0x28] sm:$0xff] %v1491_v53   ;;  %1643 = vst [vmem:[%s1945_s29 + $0xa8] sm:$0xff] %v1571_v54   ;;  %v1486_v61 = vpack.c.bf16 %v825_v55, %v824_v49  ;;  %v1566_v62 = vpack.c.bf16 %v857_v56, %v856_v50  ;;  %v610_v63 = vadd.f32 %v1930_v35, %v609_v59 }
  0xf4   : > { %v738_v0 = vadd.f32 %v1930_v35, %v737_v60  ;;  %v1710_v1 = vpop.f32.mrf.mxu0  ;;  %v1742_v2 = vpop.f32.mrf.mxu1  ;;  %v830_v5 = vmax.f32 %v618_v57, 0.0  ;;  %v862_v6 = vmax.f32 %v746_v58, 0.0 }
  0xf5   : > { %1626 = vst [vmem:[%s1945_s29 + $0x20] sm:$0xff] %v1486_v61   ;;  %1642 = vst [vmem:[%s1945_s29 + $0xa0] sm:$0xff] %v1566_v62   ;;  %v621_v3 = vadd.f32 %v1710_v1, %v1930_v35  ;;  %v749_v4 = vadd.f32 %v1742_v2, %v1930_v35  ;;  %v828_v13 = vmax.f32 %v610_v63, 0.0 }
  0xf6   : > { %v612_v7 = vpop.f32.mrf.mxu0  ;;  %v740_v8 = vpop.f32.mrf.mxu1  ;;  %v860_v14 = vmax.f32 %v738_v0, 0.0 }
  0xf7   : > { %v831_v9 = vmax.f32 %v621_v3, 0.0  ;;  %v863_v10 = vmax.f32 %v749_v4, 0.0  ;;  %v613_v11 = vadd.f32 %v1930_v35, %v612_v7  ;;  %v741_v12 = vadd.f32 %v1930_v35, %v740_v8 }
  0xf8   : > { %v1713_v15 = vpop.f32.mrf.mxu0  ;;  %v1745_v16 = vpop.f32.mrf.mxu1 }
  0xf9   : > { %v1501_v17 = vpack.c.bf16 %v831_v9, %v830_v5  ;;  %v1581_v18 = vpack.c.bf16 %v863_v10, %v862_v6  ;;  %v829_v19 = vmax.f32 %v613_v11, 0.0  ;;  %v861_v20 = vmax.f32 %v741_v12, 0.0 }
  0xfa   : > { %v634_v21 = vadd.f32 %v1713_v15, %v1930_v35  ;;  %v762_v22 = vadd.f32 %v1745_v16, %v1930_v35  ;;  %v625_v23 = vpop.f32.mrf.mxu0  ;;  %v753_v24 = vpop.f32.mrf.mxu1 }
  0xfb   : > { %1629 = vst [vmem:[%s1945_s29 + $0x38] sm:$0xff] %v1501_v17   ;;  %1645 = vst [vmem:[%s1945_s29 + $0xb8] sm:$0xff] %v1581_v18   ;;  %v1496_v25 = vpack.c.bf16 %v829_v19, %v828_v13  ;;  %v1576_v26 = vpack.c.bf16 %v861_v20, %v860_v14  ;;  %v626_v27 = vadd.f32 %v1930_v35, %v625_v23 }
  0xfc   : > { %v754_v28 = vadd.f32 %v1930_v35, %v753_v24  ;;  %v1714_v29 = vpop.f32.mrf.mxu0  ;;  %v1746_v30 = vpop.f32.mrf.mxu1  ;;  %v834_v33 = vmax.f32 %v634_v21, 0.0  ;;  %v866_v34 = vmax.f32 %v762_v22, 0.0 }
  0xfd   : > { %1628 = vst [vmem:[%s1945_s29 + $0x30] sm:$0xff] %v1496_v25   ;;  %1644 = vst [vmem:[%s1945_s29 + $0xb0] sm:$0xff] %v1576_v26   ;;  %v637_v31 = vadd.f32 %v1714_v29, %v1930_v35  ;;  %v765_v32 = vadd.f32 %v1746_v30, %v1930_v35  ;;  %v832_v42 = vmax.f32 %v626_v27, 0.0 }
  0xfe   : > { %v628_v36 = vpop.f32.mrf.mxu0  ;;  %v756_v37 = vpop.f32.mrf.mxu1  ;;  %v864_v43 = vmax.f32 %v754_v28, 0.0 }
  0xff   : > { %v835_v38 = vmax.f32 %v637_v31, 0.0  ;;  %v867_v39 = vmax.f32 %v765_v32, 0.0  ;;  %v629_v40 = vadd.f32 %v1930_v35, %v628_v36  ;;  %v757_v41 = vadd.f32 %v1930_v35, %v756_v37 }
 0x100   : > { %v1717_v44 = vpop.f32.mrf.mxu0  ;;  %v1749_v45 = vpop.f32.mrf.mxu1 }
 0x101   : > { %v1511_v46 = vpack.c.bf16 %v835_v38, %v834_v33  ;;  %v1591_v47 = vpack.c.bf16 %v867_v39, %v866_v34  ;;  %v833_v48 = vmax.f32 %v629_v40, 0.0  ;;  %v865_v49 = vmax.f32 %v757_v41, 0.0 }
 0x102   : > { %v650_v50 = vadd.f32 %v1717_v44, %v1930_v35  ;;  %v778_v51 = vadd.f32 %v1749_v45, %v1930_v35  ;;  %v641_v52 = vpop.f32.mrf.mxu0  ;;  %v769_v53 = vpop.f32.mrf.mxu1 }
 0x103   : > { %1631 = vst [vmem:[%s1945_s29 + $0x48] sm:$0xff] %v1511_v46   ;;  %1647 = vst [vmem:[%s1945_s29 + $0xc8] sm:$0xff] %v1591_v47   ;;  %v1506_v54 = vpack.c.bf16 %v833_v48, %v832_v42  ;;  %v1586_v55 = vpack.c.bf16 %v865_v49, %v864_v43  ;;  %v642_v56 = vadd.f32 %v1930_v35, %v641_v52 }
 0x104   : > { %v770_v57 = vadd.f32 %v1930_v35, %v769_v53  ;;  %v1718_v58 = vpop.f32.mrf.mxu0  ;;  %v1750_v59 = vpop.f32.mrf.mxu1  ;;  %v838_v62 = vmax.f32 %v650_v50, 0.0  ;;  %v870_v63 = vmax.f32 %v778_v51, 0.0 }
 0x105   : > { %1630 = vst [vmem:[%s1945_s29 + $0x40] sm:$0xff] %v1506_v54   ;;  %1646 = vst [vmem:[%s1945_s29 + $0xc0] sm:$0xff] %v1586_v55   ;;  %v653_v60 = vadd.f32 %v1718_v58, %v1930_v35  ;;  %v781_v61 = vadd.f32 %v1750_v59, %v1930_v35  ;;  %v836_v6 = vmax.f32 %v642_v56, 0.0 }
 0x106   : > { %v644_v0 = vpop.f32.mrf.mxu0  ;;  %v772_v1 = vpop.f32.mrf.mxu1  ;;  %v868_v7 = vmax.f32 %v770_v57, 0.0 }
 0x107   : > { %v839_v2 = vmax.f32 %v653_v60, 0.0  ;;  %v871_v3 = vmax.f32 %v781_v61, 0.0  ;;  %v645_v4 = vadd.f32 %v1930_v35, %v644_v0  ;;  %v773_v5 = vadd.f32 %v1930_v35, %v772_v1 }
 0x108   : > { %v1721_v8 = vpop.f32.mrf.mxu0  ;;  %v1753_v9 = vpop.f32.mrf.mxu1 }
 0x109   : > { %v1521_v10 = vpack.c.bf16 %v839_v2, %v838_v62  ;;  %v1601_v11 = vpack.c.bf16 %v871_v3, %v870_v63  ;;  %v837_v12 = vmax.f32 %v645_v4, 0.0  ;;  %v869_v13 = vmax.f32 %v773_v5, 0.0 }
 0x10a   : > { %v666_v14 = vadd.f32 %v1721_v8, %v1930_v35  ;;  %v794_v15 = vadd.f32 %v1753_v9, %v1930_v35  ;;  %v657_v16 = vpop.f32.mrf.mxu0  ;;  %v785_v17 = vpop.f32.mrf.mxu1 }
 0x10b   : > { %1633 = vst [vmem:[%s1945_s29 + $0x58] sm:$0xff] %v1521_v10   ;;  %1649 = vst [vmem:[%s1945_s29 + $0xd8] sm:$0xff] %v1601_v11   ;;  %v1516_v18 = vpack.c.bf16 %v837_v12, %v836_v6  ;;  %v1596_v19 = vpack.c.bf16 %v869_v13, %v868_v7  ;;  %v658_v20 = vadd.f32 %v1930_v35, %v657_v16 }
 0x10c   : > { %v786_v21 = vadd.f32 %v1930_v35, %v785_v17  ;;  %v1722_v22 = vpop.f32.mrf.mxu0  ;;  %v1754_v23 = vpop.f32.mrf.mxu1  ;;  %v842_v26 = vmax.f32 %v666_v14, 0.0  ;;  %v874_v27 = vmax.f32 %v794_v15, 0.0 }
 0x10d   : > { %1632 = vst [vmem:[%s1945_s29 + $0x50] sm:$0xff] %v1516_v18   ;;  %1648 = vst [vmem:[%s1945_s29 + $0xd0] sm:$0xff] %v1596_v19   ;;  %v669_v24 = vadd.f32 %v1722_v22, %v1930_v35  ;;  %v797_v25 = vadd.f32 %v1754_v23, %v1930_v35  ;;  %v840_v34 = vmax.f32 %v658_v20, 0.0 }
 0x10e   : > { %v660_v28 = vpop.f32.mrf.mxu0  ;;  %v788_v29 = vpop.f32.mrf.mxu1  ;;  %v872_v36 = vmax.f32 %v786_v21, 0.0 }
 0x10f   : > { %v843_v30 = vmax.f32 %v669_v24, 0.0  ;;  %v875_v31 = vmax.f32 %v797_v25, 0.0  ;;  %v661_v32 = vadd.f32 %v1930_v35, %v660_v28  ;;  %v789_v33 = vadd.f32 %v1930_v35, %v788_v29 }
 0x110   : > { %v1725_v37 = vpop.f32.mrf.mxu0  ;;  %v1757_v38 = vpop.f32.mrf.mxu1 }
 0x111   : > { %v1531_v39 = vpack.c.bf16 %v843_v30, %v842_v26  ;;  %v1611_v40 = vpack.c.bf16 %v875_v31, %v874_v27  ;;  %v841_v41 = vmax.f32 %v661_v32, 0.0  ;;  %v873_v42 = vmax.f32 %v789_v33, 0.0 }
 0x112   : > { %v682_v43 = vadd.f32 %v1725_v37, %v1930_v35  ;;  %v810_v44 = vadd.f32 %v1757_v38, %v1930_v35  ;;  %v673_v45 = vpop.f32.mrf.mxu0  ;;  %v801_v46 = vpop.f32.mrf.mxu1 }
 0x113   : > { %1635 = vst [vmem:[%s1945_s29 + $0x68] sm:$0xff] %v1531_v39   ;;  %1651 = vst [vmem:[%s1945_s29 + $0xe8] sm:$0xff] %v1611_v40   ;;  %v1526_v47 = vpack.c.bf16 %v841_v41, %v840_v34  ;;  %v1606_v48 = vpack.c.bf16 %v873_v42, %v872_v36  ;;  %v674_v49 = vadd.f32 %v1930_v35, %v673_v45 }
 0x114   : > { %v802_v50 = vadd.f32 %v1930_v35, %v801_v46  ;;  %v1726_v51 = vpop.f32.mrf.mxu0  ;;  %v1758_v52 = vpop.f32.mrf.mxu1  ;;  %v846_v55 = vmax.f32 %v682_v43, 0.0  ;;  %v878_v56 = vmax.f32 %v810_v44, 0.0 }
 0x115   : > { %1634 = vst [vmem:[%s1945_s29 + $0x60] sm:$0xff] %v1526_v47   ;;  %1650 = vst [vmem:[%s1945_s29 + $0xe0] sm:$0xff] %v1606_v48   ;;  %v685_v53 = vadd.f32 %v1726_v51, %v1930_v35  ;;  %v813_v54 = vadd.f32 %v1758_v52, %v1930_v35  ;;  %v844_v63 = vmax.f32 %v674_v49, 0.0 }
 0x116   : > { %v676_v57 = vpop.f32.mrf.mxu0  ;;  %v804_v58 = vpop.f32.mrf.mxu1  ;;  %v876_v0 = vmax.f32 %v802_v50, 0.0 }
 0x117   : > { %v847_v59 = vmax.f32 %v685_v53, 0.0  ;;  %v879_v60 = vmax.f32 %v813_v54, 0.0  ;;  %v677_v61 = vadd.f32 %v1930_v35, %v676_v57  ;;  %v805_v62 = vadd.f32 %v1930_v35, %v804_v58 }
 0x119   : > { %v1541_v1 = vpack.c.bf16 %v847_v59, %v846_v55  ;;  %v1621_v2 = vpack.c.bf16 %v879_v60, %v878_v56  ;;  %v845_v3 = vmax.f32 %v677_v61, 0.0  ;;  %v877_v4 = vmax.f32 %v805_v62, 0.0 }
 0x11b   : > { %1637 = vst [vmem:[%s1945_s29 + $0x78] sm:$0xff] %v1541_v1   ;;  %1653 = vst [vmem:[%s1945_s29 + $0xf8] sm:$0xff] %v1621_v2   ;;  %v1536_v5 = vpack.c.bf16 %v845_v3, %v844_v63  ;;  %v1616_v6 = vpack.c.bf16 %v877_v4, %v876_v0 }
 0x11d   : > { %1636 = vst [vmem:[%s1945_s29 + $0x70] sm:$0xff] %v1536_v5   ;;  %1652 = vst [vmem:[%s1945_s29 + $0xf0] sm:$0xff] %v1616_v6  }
 0x11e PF: > { %s13_s12 = sadd.s32 1, %s1814_s12  }
 0x11f   : > { %p10_p4 = scmp.ge.s32.totalorder %s13_s12, 6  }
 0x121   :  { %12 = sbr.rel (!%p10_p4) target bundleno = 1 (0x1), region = 62 }

// kernel: vae_forward.8
= control target key start
LH: loop header
LB: loop body
LE: loop exit
PB: predicated region body
PF: predicated region fallthrough
CT: control target
= control target key end

     0   :  { %s2052_s12 = smov 0   ;;  %s2292_s0 = inlined_call_operand.vmem [shape: bf16[512,512], index: 0, kind: input, shape index: {}]   ;;  %s2293_s1 = inlined_call_operand.vmem [shape: bf16[512,128], index: 1, kind: input, shape index: {}]   ;;  %s2294_s2 = inlined_call_operand.vmem [shape: f32[1,128], index: 2, kind: input, shape index: {}]   ;;  %s2295_s3 = inlined_call_operand.vmem [shape: bf16[512,128], index: 3, kind: output, shape index: {}]  }
   0x1 LB: > { %s1395_s13 = sadd.s32 4294967295, %s2030_s12   ;;  %p1399_p0 = scmp.ge.s32.totalorder %s2030_s12, 1  ;;  %s2030_s12 = sphi %s2052_s12, %s13_s12  }
   0x2   : > { %p139_p1 = scmp.lt.s32.totalorder %s2030_s12, 3 }
   0x4   : > { %p140_p2 = pnand %p1399_p0, %p139_p1 }
   0x5   : > { %s1400_s21 = sshll.u32 (!%p140_p2), %s1395_s13, 5 }
   0x6   : > { %143 = sbr.rel (%p140_p2) target bundleno = 375 (0x177), region = 32  ;;  %p165_p3 = scmp.lt.s32.totalorder (!%p140_p2), %s1400_s21, 63 }
   0xb   : > { %v1896_v0 = vld [vmem:[%s2293_s1 + $0x78] sm:$0xff]   ;;  %v1900_v4 = vld [vmem:[%s2293_s1 + $0x70] sm:$0xff]   ;;  %v1904_v8 = vld [vmem:[%s2293_s1 + $0x68] sm:$0xff]   ;;  %s2297_s21 = smov (!%p165_p3, %s1400_s21), 63 }
   0xc   : > { %v1897_v1 = vld [vmem:[%s2293_s1 + $0xf8] sm:$0xff]   ;;  %1664 = vmatprep.subr.bf16.mxu0 %v1896_v0  ;;  %v1901_v5 = vld [vmem:[%s2293_s1 + $0xf0] sm:$0xff]   ;;  %v1905_v9 = vld [vmem:[%s2293_s1 + $0xe8] sm:$0xff]   ;;  %s1536_s18 = sshll.u32 %s2297_s21, 4  ;;  %s1404_s7 = sshll.u32 %s2297_s21, 2 }
   0xd   : > { %v1898_v2 = vld [vmem:[%s2293_s1 + $0x38] sm:$0xff]   ;;  %1776 = vmatprep.subr.bf16.mxu1 %v1897_v1  ;;  %v1902_v6 = vld [vmem:[%s2293_s1 + $0x30] sm:$0xff]   ;;  %v1906_v10 = vld [vmem:[%s2293_s1 + $0x28] sm:$0xff]   ;;  %s2158_s28 = scalar_lea.vmem %s2292_s0, %s1536_s18  ;;  %s2242_s10 = scalar_lea.vmem %s2295_s3, %s1404_s7 }
   0xe   : > { %v1899_v3 = vld [vmem:[%s2293_s1 + $0xb8] sm:$0xff]   ;;  %1665 = vmatpush3.bf16.msra.mxu0 %v1898_v2  ;;  %v1903_v7 = vld [vmem:[%s2293_s1 + $0xb0] sm:$0xff]   ;;  %v1907_v11 = vld [vmem:[%s2293_s1 + $0xa8] sm:$0xff]  }
   0xf   : > { %1777 = vmatpush3.bf16.msra.mxu1 %v1899_v3  ;;  %1666 = vmatprep.subr.bf16.mxu0 %v1900_v4  ;;  %v1908_v12 = vld [vmem:[%s2293_s1 + $0x60] sm:$0xff]   ;;  %v1912_v16 = vld [vmem:[%s2293_s1 + $0x58] sm:$0xff]   ;;  %v1916_v20 = vld [vmem:[%s2293_s1 + $0x50] sm:$0xff]  }
  0x10   : > { %1778 = vmatprep.subr.bf16.mxu1 %v1901_v5  ;;  %v1909_v13 = vld [vmem:[%s2293_s1 + $0xe0] sm:$0xff]   ;;  %v1913_v17 = vld [vmem:[%s2293_s1 + $0xd8] sm:$0xff]   ;;  %v1917_v21 = vld [vmem:[%s2293_s1 + $0xd0] sm:$0xff]  }
  0x11   : > { %v1910_v14 = vld [vmem:[%s2293_s1 + $0x20] sm:$0xff]   ;;  %v1914_v18 = vld [vmem:[%s2293_s1 + $0x18] sm:$0xff]   ;;  %v1918_v22 = vld [vmem:[%s2293_s1 + $0x10] sm:$0xff]  }
  0x12   : > { %1667 = vmatpush3.bf16.msra.mxu0 %v1902_v6  ;;  %v1911_v15 = vld [vmem:[%s2293_s1 + $0xa0] sm:$0xff]   ;;  %v1915_v19 = vld [vmem:[%s2293_s1 + $0x98] sm:$0xff]   ;;  %v1919_v23 = vld [vmem:[%s2293_s1 + $0x90] sm:$0xff]  }
  0x13   : > { %1779 = vmatpush3.bf16.msra.mxu1 %v1903_v7  ;;  %1668 = vmatprep.subr.bf16.mxu0 %v1904_v8  ;;  %v1920_v24 = vld [vmem:[%s2293_s1 + $0x48] sm:$0xff]   ;;  %v1924_v28 = vld [vmem:[%s2293_s1 + $0x40] sm:$0xff]  }
  0x14   : > { %1780 = vmatprep.subr.bf16.mxu1 %v1905_v9  ;;  %v1921_v25 = vld [vmem:[%s2293_s1 + $0xc8] sm:$0xff]   ;;  %v1925_v29 = vld [vmem:[%s2293_s1 + $0xc0] sm:$0xff]  }
  0x15   : > { %v1922_v26 = vld [vmem:[%s2293_s1 + $0x8] sm:$0xff]   ;;  %v1926_v30 = vld [vmem:[%s2293_s1] sm:$0xff]  }
  0x16   : > { %1669 = vmatpush3.bf16.msra.mxu0 %v1906_v10  ;;  %v1923_v27 = vld [vmem:[%s2293_s1 + $0x88] sm:$0xff]   ;;  %v1927_v31 = vld [vmem:[%s2293_s1 + $0x80] sm:$0xff]  }
  0x17   : > { %1781 = vmatpush3.bf16.msra.mxu1 %v1907_v11  ;;  %1670 = vmatprep.subr.bf16.mxu0 %v1908_v12  ;;  %v1928_v32 = vld [vmem:[%s2158_s28] ss:$16 sps:$4 sm:$0xff]   ;;  %v1930_v33 = vld [vmem:[%s2158_s28 + $0x4] ss:$16 sps:$4 sm:$0xff]   ;;  %v1931_v34 = vld [vmem:[%s2158_s28 + $0x8] ss:$16 sps:$4 sm:$0xff]  }
  0x18   : > { %1782 = vmatprep.subr.bf16.mxu1 %v1909_v13  ;;  %v1933_v35 = vld [vmem:[%s2158_s28 + $0xc] ss:$16 sps:$4 sm:$0xff]   ;;  %857 = vmatprep.mubr.bf16.mxu0 %v1930_v33  ;;  %v1934_v36 = vld [vmem:[%s2158_s28 + $0x24] ss:$16 sps:$4 sm:$0xff]   ;;  %v1938_v38 = vld [vmem:[%s2158_s28 + $0x20] ss:$16 sps:$4 sm:$0xff]  }
  0x19   : > { %1018 = vmatprep.mubr.bf16.mxu1 %v1933_v35  ;;  %v1936_v37 = vld [vmem:[%s2158_s28 + $0x2c] ss:$16 sps:$4 sm:$0xff]   ;;  %v1939_v39 = vld [vmem:[%s2158_s28 + $0x28] ss:$16 sps:$4 sm:$0xff]   ;;  %v1940_v40 = vld [vmem:[%s2158_s28 + $0x44] ss:$16 sps:$4 sm:$0xff]  }
  0x1a   : > { %1671 = vmatpush3.bf16.msra.mxu0 %v1910_v14  ;;  %v1942_v41 = vld [vmem:[%s2158_s28 + $0x4c] ss:$16 sps:$4 sm:$0xff]   ;;  %v1944_v42 = vld [vmem:[%s2158_s28 + $0x40] ss:$16 sps:$4 sm:$0xff]   ;;  %v1945_v43 = vld [vmem:[%s2158_s28 + $0x48] ss:$16 sps:$4 sm:$0xff]  }
  0x1b   : > { %1783 = vmatpush3.bf16.msra.mxu1 %v1911_v15  ;;  %1672 = vmatprep.subr.bf16.mxu0 %v1912_v16  ;;  %v1946_v44 = vld [vmem:[%s2158_s28 + $0x64] ss:$16 sps:$4 sm:$0xff]   ;;  %v1948_v45 = vld [vmem:[%s2158_s28 + $0x6c] ss:$16 sps:$4 sm:$0xff]   ;;  %v1950_v46 = vld [vmem:[%s2158_s28 + $0x60] ss:$16 sps:$4 sm:$0xff]  }
  0x1c   : > { %1784 = vmatprep.subr.bf16.mxu1 %v1913_v17  ;;  %v1951_v47 = vld [vmem:[%s2158_s28 + $0x68] ss:$16 sps:$4 sm:$0xff]   ;;  %v1952_v48 = vld [vmem:[%s2158_s28 + $0x84] ss:$16 sps:$4 sm:$0xff]   ;;  %v1954_v49 = vld [vmem:[%s2158_s28 + $0x8c] ss:$16 sps:$4 sm:$0xff]  }
  0x1d   : > { %v1956_v50 = vld [vmem:[%s2158_s28 + $0x80] ss:$16 sps:$4 sm:$0xff]   ;;  %v1957_v51 = vld [vmem:[%s2158_s28 + $0x88] ss:$16 sps:$4 sm:$0xff]   ;;  %v1958_v52 = vld [vmem:[%s2158_s28 + $0xa4] ss:$16 sps:$4 sm:$0xff]  }
  0x1e   : > { %1673 = vmatpush3.bf16.msra.mxu0 %v1914_v18  ;;  %v1960_v53 = vld [vmem:[%s2158_s28 + $0xac] ss:$16 sps:$4 sm:$0xff]   ;;  %v1962_v54 = vld [vmem:[%s2158_s28 + $0xa0] ss:$16 sps:$4 sm:$0xff]   ;;  %v1963_v55 = vld [vmem:[%s2158_s28 + $0xa8] ss:$16 sps:$4 sm:$0xff]  }
  0x1f   : > { %1785 = vmatpush3.bf16.msra.mxu1 %v1915_v19  ;;  %1674 = vmatprep.subr.bf16.mxu0 %v1916_v20  ;;  %v1964_v56 = vld [vmem:[%s2158_s28 + $0xc4] ss:$16 sps:$4 sm:$0xff]   ;;  %v1966_v57 = vld [vmem:[%s2158_s28 + $0xcc] ss:$16 sps:$4 sm:$0xff]   ;;  %v1968_v58 = vld [vmem:[%s2158_s28 + $0xc0] ss:$16 sps:$4 sm:$0xff]  }
  0x20   : > { %1786 = vmatprep.subr.bf16.mxu1 %v1917_v21  ;;  %v1969_v59 = vld [vmem:[%s2158_s28 + $0xc8] ss:$16 sps:$4 sm:$0xff]   ;;  %v1970_v60 = vld [vmem:[%s2158_s28 + $0xe4] ss:$16 sps:$4 sm:$0xff]   ;;  %v1972_v61 = vld [vmem:[%s2158_s28 + $0xec] ss:$16 sps:$4 sm:$0xff]  }
  0x21   : > { %v1974_v62 = vld [vmem:[%s2158_s28 + $0xe0] ss:$16 sps:$4 sm:$0xff]   ;;  %v1975_v63 = vld [vmem:[%s2158_s28 + $0xe8] ss:$16 sps:$4 sm:$0xff]   ;;  %v1976_v0 = vld [vmem:[%s2158_s28 + $0x104] ss:$16 sps:$4 sm:$0xff]  }
  0x22   : > { %1675 = vmatpush3.bf16.msra.mxu0 %v1918_v22  ;;  %v1978_v1 = vld [vmem:[%s2158_s28 + $0x10c] ss:$16 sps:$4 sm:$0xff]   ;;  %v1980_v2 = vld [vmem:[%s2158_s28 + $0x100] ss:$16 sps:$4 sm:$0xff]   ;;  %v1981_v3 = vld [vmem:[%s2158_s28 + $0x108] ss:$16 sps:$4 sm:$0xff]  }
  0x23   : > { %1787 = vmatpush3.bf16.msra.mxu1 %v1919_v23  ;;  %1676 = vmatprep.subr.bf16.mxu0 %v1920_v24  ;;  %v1982_v4 = vld [vmem:[%s2158_s28 + $0x124] ss:$16 sps:$4 sm:$0xff]   ;;  %v1984_v5 = vld [vmem:[%s2158_s28 + $0x12c] ss:$16 sps:$4 sm:$0xff]   ;;  %v1986_v6 = vld [vmem:[%s2158_s28 + $0x120] ss:$16 sps:$4 sm:$0xff]  }
  0x24   : > { %1788 = vmatprep.subr.bf16.mxu1 %v1921_v25  ;;  %v1987_v7 = vld [vmem:[%s2158_s28 + $0x128] ss:$16 sps:$4 sm:$0xff]   ;;  %v1988_v8 = vld [vmem:[%s2158_s28 + $0x144] ss:$16 sps:$4 sm:$0xff]   ;;  %v1990_v9 = vld [vmem:[%s2158_s28 + $0x14c] ss:$16 sps:$4 sm:$0xff]  }
  0x25   : > { %v1992_v10 = vld [vmem:[%s2158_s28 + $0x140] ss:$16 sps:$4 sm:$0xff]   ;;  %v1993_v11 = vld [vmem:[%s2158_s28 + $0x148] ss:$16 sps:$4 sm:$0xff]   ;;  %v1994_v12 = vld [vmem:[%s2158_s28 + $0x164] ss:$16 sps:$4 sm:$0xff]  }
  0x26   : > { %1677 = vmatpush3.bf16.msra.mxu0 %v1922_v26  ;;  %v1996_v13 = vld [vmem:[%s2158_s28 + $0x16c] ss:$16 sps:$4 sm:$0xff]   ;;  %v1998_v14 = vld [vmem:[%s2158_s28 + $0x160] ss:$16 sps:$4 sm:$0xff]   ;;  %v1999_v15 = vld [vmem:[%s2158_s28 + $0x168] ss:$16 sps:$4 sm:$0xff]  }
  0x27   : > { %1789 = vmatpush3.bf16.msra.mxu1 %v1923_v27  ;;  %1678 = vmatprep.subr.bf16.mxu0 %v1924_v28  ;;  %v2000_v16 = vld [vmem:[%s2158_s28 + $0x184] ss:$16 sps:$4 sm:$0xff]   ;;  %v2002_v17 = vld [vmem:[%s2158_s28 + $0x18c] ss:$16 sps:$4 sm:$0xff]   ;;  %v2004_v18 = vld [vmem:[%s2158_s28 + $0x180] ss:$16 sps:$4 sm:$0xff]  }
  0x28   : > { %1790 = vmatprep.subr.bf16.mxu1 %v1925_v29  ;;  %v2005_v19 = vld [vmem:[%s2158_s28 + $0x188] ss:$16 sps:$4 sm:$0xff]   ;;  %v2006_v20 = vld [vmem:[%s2158_s28 + $0x1a4] ss:$16 sps:$4 sm:$0xff]   ;;  %v2008_v21 = vld [vmem:[%s2158_s28 + $0x1ac] ss:$16 sps:$4 sm:$0xff]  }
  0x29   : > { %v2010_v22 = vld [vmem:[%s2158_s28 + $0x1a0] ss:$16 sps:$4 sm:$0xff]   ;;  %v2011_v23 = vld [vmem:[%s2158_s28 + $0x1a8] ss:$16 sps:$4 sm:$0xff]   ;;  %v2012_v24 = vld [vmem:[%s2158_s28 + $0x1c4] ss:$16 sps:$4 sm:$0xff]  }
  0x2a   : > { %1679 = vmatpush3.bf16.msra.mxu0 %v1926_v30  ;;  %v2014_v25 = vld [vmem:[%s2158_s28 + $0x1cc] ss:$16 sps:$4 sm:$0xff]   ;;  %v2016_v26 = vld [vmem:[%s2158_s28 + $0x1c0] ss:$16 sps:$4 sm:$0xff]   ;;  %v2017_v27 = vld [vmem:[%s2158_s28 + $0x1c8] ss:$16 sps:$4 sm:$0xff]  }
  0x2b   : > { %1791 = vmatpush3.bf16.msra.mxu1 %v1927_v31  ;;  %v2018_v28 = vld [vmem:[%s2158_s28 + $0x1e4] ss:$16 sps:$4 sm:$0xff]   ;;  %v2020_v29 = vld [vmem:[%s2158_s28 + $0x1ec] ss:$16 sps:$4 sm:$0xff]   ;;  %v2022_v30 = vld [vmem:[%s2158_s28 + $0x1e0] ss:$16 sps:$4 sm:$0xff]  }
  0x2c   : > { %v2023_v31 = vld [vmem:[%s2158_s28 + $0x1e8] ss:$16 sps:$4 sm:$0xff]  }
  0x2d   : > { %858 = vmatmul.mubr.bf16.vlgmr.msra.gmra.mxu0 %v1928_v32 }
  0x2e   : > { %1019 = vmatmul.mubr.bf16.vlgmr.msra.gmra.mxu1 %v1931_v34  ;;  %865 = vmatprep.mubr.bf16.mxu0 %v1934_v36  ;;  %v2233_v34 = vld [vmem:[%s2294_s2] ss:$0 sm:$0xff] }
  0x2f   : > { %1026 = vmatprep.mubr.bf16.mxu1 %v1936_v37 }
  0x35   : > { %866 = vmatmul.mubr.bf16.gmra.mxu0 %v1938_v38 }
  0x36   : > { %1027 = vmatmul.mubr.bf16.gmra.mxu1 %v1939_v39  ;;  %873 = vmatprep.mubr.bf16.mxu0 %v1940_v40 }
  0x37   : > { %1034 = vmatprep.mubr.bf16.mxu1 %v1942_v41 }
  0x3d   : > { %874 = vmatmul.mubr.bf16.gmra.mxu0 %v1944_v42 }
  0x3e   : > { %1035 = vmatmul.mubr.bf16.gmra.mxu1 %v1945_v43  ;;  %881 = vmatprep.mubr.bf16.mxu0 %v1946_v44 }
  0x3f   : > { %1042 = vmatprep.mubr.bf16.mxu1 %v1948_v45 }
  0x45   : > { %882 = vmatmul.mubr.bf16.gmra.mxu0 %v1950_v46 }
  0x46   : > { %1043 = vmatmul.mubr.bf16.gmra.mxu1 %v1951_v47  ;;  %889 = vmatprep.mubr.bf16.mxu0 %v1952_v48 }
  0x47   : > { %1050 = vmatprep.mubr.bf16.mxu1 %v1954_v49 }
  0x4d   : > { %890 = vmatmul.mubr.bf16.gmra.mxu0 %v1956_v50 }
  0x4e   : > { %1051 = vmatmul.mubr.bf16.gmra.mxu1 %v1957_v51  ;;  %897 = vmatprep.mubr.bf16.mxu0 %v1958_v52 }
  0x4f   : > { %1058 = vmatprep.mubr.bf16.mxu1 %v1960_v53 }
  0x55   : > { %898 = vmatmul.mubr.bf16.gmra.mxu0 %v1962_v54 }
  0x56   : > { %1059 = vmatmul.mubr.bf16.gmra.mxu1 %v1963_v55  ;;  %905 = vmatprep.mubr.bf16.mxu0 %v1964_v56 }
  0x57   : > { %1066 = vmatprep.mubr.bf16.mxu1 %v1966_v57 }
  0x5d   : > { %906 = vmatmul.mubr.bf16.gmra.mxu0 %v1968_v58 }
  0x5e   : > { %1067 = vmatmul.mubr.bf16.gmra.mxu1 %v1969_v59  ;;  %913 = vmatprep.mubr.bf16.mxu0 %v1970_v60 }
  0x5f   : > { %1074 = vmatprep.mubr.bf16.mxu1 %v1972_v61 }
  0x65   : > { %914 = vmatmul.mubr.bf16.gmra.mxu0 %v1974_v62 }
  0x66   : > { %1075 = vmatmul.mubr.bf16.gmra.mxu1 %v1975_v63  ;;  %921 = vmatprep.mubr.bf16.mxu0 %v1976_v0 }
  0x67   : > { %1082 = vmatprep.mubr.bf16.mxu1 %v1978_v1 }
  0x6d   : > { %922 = vmatmul.mubr.bf16.gmra.mxu0 %v1980_v2 }
  0x6e   : > { %1083 = vmatmul.mubr.bf16.gmra.mxu1 %v1981_v3  ;;  %929 = vmatprep.mubr.bf16.mxu0 %v1982_v4 }
  0x6f   : > { %1090 = vmatprep.mubr.bf16.mxu1 %v1984_v5 }
  0x75   : > { %930 = vmatmul.mubr.bf16.gmra.mxu0 %v1986_v6 }
  0x76   : > { %1091 = vmatmul.mubr.bf16.gmra.mxu1 %v1987_v7  ;;  %937 = vmatprep.mubr.bf16.mxu0 %v1988_v8 }
  0x77   : > { %1098 = vmatprep.mubr.bf16.mxu1 %v1990_v9 }
  0x7d   : > { %938 = vmatmul.mubr.bf16.gmra.mxu0 %v1992_v10 }
  0x7e   : > { %1099 = vmatmul.mubr.bf16.gmra.mxu1 %v1993_v11  ;;  %945 = vmatprep.mubr.bf16.mxu0 %v1994_v12 }
  0x7f   : > { %1106 = vmatprep.mubr.bf16.mxu1 %v1996_v13 }
  0x85   : > { %946 = vmatmul.mubr.bf16.gmra.mxu0 %v1998_v14 }
  0x86   : > { %1107 = vmatmul.mubr.bf16.gmra.mxu1 %v1999_v15  ;;  %953 = vmatprep.mubr.bf16.mxu0 %v2000_v16 }
  0x87   : > { %1114 = vmatprep.mubr.bf16.mxu1 %v2002_v17 }
  0x8d   : > { %954 = vmatmul.mubr.bf16.gmra.mxu0 %v2004_v18 }
  0x8e   : > { %1115 = vmatmul.mubr.bf16.gmra.mxu1 %v2005_v19  ;;  %961 = vmatprep.mubr.bf16.mxu0 %v2006_v20 }
  0x8f   : > { %1122 = vmatprep.mubr.bf16.mxu1 %v2008_v21 }
  0x95   : > { %962 = vmatmul.mubr.bf16.gmra.mxu0 %v2010_v22 }
  0x96   : > { %1123 = vmatmul.mubr.bf16.gmra.mxu1 %v2011_v23  ;;  %969 = vmatprep.mubr.bf16.mxu0 %v2012_v24 }
  0x97   : > { %1130 = vmatprep.mubr.bf16.mxu1 %v2014_v25 }
  0x9d   : > { %970 = vmatmul.mubr.bf16.gmra.mxu0 %v2016_v26 }
  0x9e   : > { %1131 = vmatmul.mubr.bf16.gmra.mxu1 %v2017_v27  ;;  %977 = vmatprep.mubr.bf16.mxu0 %v2018_v28 }
  0x9f   : > { %1138 = vmatprep.mubr.bf16.mxu1 %v2020_v29 }
  0xa5   : > { %978 = vmatmul.mubr.bf16.gmra.mxu0 %v2022_v30 }
  0xa6   : > { %1139 = vmatmul.mubr.bf16.gmra.mxu1 %v2023_v31 }
  0xed   : > { %v1680_v32 = vpop.f32.mrf.mxu0 }
  0xee   : > { %v1792_v33 = vpop.f32.mrf.mxu1 }
  0xef   : > { %v1681_v35 = vpop.f32.mrf.mxu0 }
  0xf0   : > { %v1682_v36 = vadd.f32 %v1681_v35, %v1680_v32  ;;  %v1793_v37 = vpop.f32.mrf.mxu1 }
  0xf1   : > { %v1683_v38 = vpop.f32.mrf.mxu0  ;;  %v1794_v42 = vadd.f32 %v1793_v37, %v1792_v33 }
  0xf2   : > { %v860_v39 = vadd.f32 %v1682_v36, %v2233_v34  ;;  %v1795_v40 = vpop.f32.mrf.mxu1 }
  0xf3   : > { %v1684_v41 = vpop.f32.mrf.mxu0 }
  0xf4   : > { %v1685_v43 = vadd.f32 %v1684_v41, %v1683_v38  ;;  %v1796_v44 = vpop.f32.mrf.mxu1  ;;  %v1021_v46 = vadd.f32 %v1794_v42, %v860_v39 }
  0xf5   : > { %v1686_v45 = vpop.f32.mrf.mxu0  ;;  %v1797_v48 = vadd.f32 %v1796_v44, %v1795_v40 }
  0xf6   : > { %v863_v47 = vadd.f32 %v1685_v43, %v2233_v34  ;;  %v1798_v49 = vpop.f32.mrf.mxu1  ;;  %v1147_v55 = vmax.f32 %v1021_v46, 0.0 }
  0xf7   : > { %v1687_v50 = vpop.f32.mrf.mxu0 }
  0xf8   : > { %v1024_v51 = vadd.f32 %v1797_v48, %v863_v47  ;;  %v1688_v52 = vadd.f32 %v1687_v50, %v1686_v45  ;;  %v1799_v53 = vpop.f32.mrf.mxu1 }
  0xf9   : > { %v1689_v54 = vpop.f32.mrf.mxu0  ;;  %v1800_v61 = vadd.f32 %v1799_v53, %v1798_v49 }
  0xfa   : > { %v1148_v56 = vmax.f32 %v1024_v51, 0.0  ;;  %v868_v57 = vadd.f32 %v1688_v52, %v2233_v34  ;;  %v1801_v58 = vpop.f32.mrf.mxu1 }
  0xfb   : > { %v1690_v59 = vpop.f32.mrf.mxu0 }
  0xfc   : > { %v1572_v60 = vpack.c.bf16 %v1148_v56, %v1147_v55  ;;  %v1691_v62 = vadd.f32 %v1690_v59, %v1689_v54  ;;  %v1802_v63 = vpop.f32.mrf.mxu1  ;;  %v1029_v1 = vadd.f32 %v1800_v61, %v868_v57 }
  0xfd   : > { %v1692_v0 = vpop.f32.mrf.mxu0  ;;  %v1803_v3 = vadd.f32 %v1802_v63, %v1801_v58 }
  0xfe   : > { %1573 = vst [vmem:[%s2242_s10] sm:$0xff] %v1572_v60   ;;  %v871_v2 = vadd.f32 %v1691_v62, %v2233_v34  ;;  %v1804_v4 = vpop.f32.mrf.mxu1  ;;  %v1149_v10 = vmax.f32 %v1029_v1, 0.0 }
  0xff   : > { %v1693_v5 = vpop.f32.mrf.mxu0 }
 0x100   : > { %v1032_v6 = vadd.f32 %v1803_v3, %v871_v2  ;;  %v1694_v7 = vadd.f32 %v1693_v5, %v1692_v0  ;;  %v1805_v8 = vpop.f32.mrf.mxu1 }
 0x101   : > { %v1695_v9 = vpop.f32.mrf.mxu0  ;;  %v1806_v16 = vadd.f32 %v1805_v8, %v1804_v4 }
 0x102   : > { %v1150_v11 = vmax.f32 %v1032_v6, 0.0  ;;  %v876_v12 = vadd.f32 %v1694_v7, %v2233_v34  ;;  %v1807_v13 = vpop.f32.mrf.mxu1 }
 0x103   : > { %v1696_v14 = vpop.f32.mrf.mxu0 }
 0x104   : > { %v1577_v15 = vpack.c.bf16 %v1150_v11, %v1149_v10  ;;  %v1697_v17 = vadd.f32 %v1696_v14, %v1695_v9  ;;  %v1808_v18 = vpop.f32.mrf.mxu1  ;;  %v1037_v20 = vadd.f32 %v1806_v16, %v876_v12 }
 0x105   : > { %v1698_v19 = vpop.f32.mrf.mxu0  ;;  %v1809_v22 = vadd.f32 %v1808_v18, %v1807_v13 }
 0x106   : > { %1649 = vst [vmem:[%s2242_s10 + $0x8] sm:$0xff] %v1577_v15   ;;  %v879_v21 = vadd.f32 %v1697_v17, %v2233_v34  ;;  %v1810_v23 = vpop.f32.mrf.mxu1  ;;  %v1151_v29 = vmax.f32 %v1037_v20, 0.0 }
 0x107   : > { %v1699_v24 = vpop.f32.mrf.mxu0 }
 0x108   : > { %v1040_v25 = vadd.f32 %v1809_v22, %v879_v21  ;;  %v1700_v26 = vadd.f32 %v1699_v24, %v1698_v19  ;;  %v1811_v27 = vpop.f32.mrf.mxu1 }
 0x109   : > { %v1701_v28 = vpop.f32.mrf.mxu0  ;;  %v1812_v36 = vadd.f32 %v1811_v27, %v1810_v23 }
 0x10a   : > { %v1152_v30 = vmax.f32 %v1040_v25, 0.0  ;;  %v884_v31 = vadd.f32 %v1700_v26, %v2233_v34  ;;  %v1813_v32 = vpop.f32.mrf.mxu1 }
 0x10b   : > { %v1702_v33 = vpop.f32.mrf.mxu0 }
 0x10c   : > { %v1582_v35 = vpack.c.bf16 %v1152_v30, %v1151_v29  ;;  %v1703_v37 = vadd.f32 %v1702_v33, %v1701_v28  ;;  %v1814_v38 = vpop.f32.mrf.mxu1  ;;  %v1045_v40 = vadd.f32 %v1812_v36, %v884_v31 }
 0x10d   : > { %v1704_v39 = vpop.f32.mrf.mxu0  ;;  %v1815_v42 = vadd.f32 %v1814_v38, %v1813_v32 }
 0x10e   : > { %1650 = vst [vmem:[%s2242_s10 + $0x10] sm:$0xff] %v1582_v35   ;;  %v887_v41 = vadd.f32 %v1703_v37, %v2233_v34  ;;  %v1816_v43 = vpop.f32.mrf.mxu1  ;;  %v1153_v49 = vmax.f32 %v1045_v40, 0.0 }
 0x10f   : > { %v1705_v44 = vpop.f32.mrf.mxu0 }
 0x110   : > { %v1048_v45 = vadd.f32 %v1815_v42, %v887_v41  ;;  %v1706_v46 = vadd.f32 %v1705_v44, %v1704_v39  ;;  %v1817_v47 = vpop.f32.mrf.mxu1 }
 0x111   : > { %v1707_v48 = vpop.f32.mrf.mxu0  ;;  %v1818_v55 = vadd.f32 %v1817_v47, %v1816_v43 }
 0x112   : > { %v1154_v50 = vmax.f32 %v1048_v45, 0.0  ;;  %v892_v51 = vadd.f32 %v1706_v46, %v2233_v34  ;;  %v1819_v52 = vpop.f32.mrf.mxu1 }
 0x113   : > { %v1708_v53 = vpop.f32.mrf.mxu0 }
 0x114   : > { %v1587_v54 = vpack.c.bf16 %v1154_v50, %v1153_v49  ;;  %v1709_v56 = vadd.f32 %v1708_v53, %v1707_v48  ;;  %v1820_v57 = vpop.f32.mrf.mxu1  ;;  %v1053_v59 = vadd.f32 %v1818_v55, %v892_v51 }
 0x115   : > { %v1710_v58 = vpop.f32.mrf.mxu0  ;;  %v1821_v61 = vadd.f32 %v1820_v57, %v1819_v52 }
 0x116   : > { %1651 = vst [vmem:[%s2242_s10 + $0x18] sm:$0xff] %v1587_v54   ;;  %v895_v60 = vadd.f32 %v1709_v56, %v2233_v34  ;;  %v1822_v62 = vpop.f32.mrf.mxu1  ;;  %v1155_v4 = vmax.f32 %v1053_v59, 0.0 }
 0x117   : > { %v1711_v63 = vpop.f32.mrf.mxu0 }
 0x118   : > { %v1056_v0 = vadd.f32 %v1821_v61, %v895_v60  ;;  %v1712_v1 = vadd.f32 %v1711_v63, %v1710_v58  ;;  %v1823_v2 = vpop.f32.mrf.mxu1 }
 0x119   : > { %v1713_v3 = vpop.f32.mrf.mxu0  ;;  %v1824_v10 = vadd.f32 %v1823_v2, %v1822_v62 }
 0x11a   : > { %v1156_v5 = vmax.f32 %v1056_v0, 0.0  ;;  %v900_v6 = vadd.f32 %v1712_v1, %v2233_v34  ;;  %v1825_v7 = vpop.f32.mrf.mxu1 }
 0x11b   : > { %v1714_v8 = vpop.f32.mrf.mxu0 }
 0x11c   : > { %v1592_v9 = vpack.c.bf16 %v1156_v5, %v1155_v4  ;;  %v1715_v11 = vadd.f32 %v1714_v8, %v1713_v3  ;;  %v1826_v12 = vpop.f32.mrf.mxu1  ;;  %v1061_v14 = vadd.f32 %v1824_v10, %v900_v6 }
 0x11d   : > { %v1716_v13 = vpop.f32.mrf.mxu0  ;;  %v1827_v16 = vadd.f32 %v1826_v12, %v1825_v7 }
 0x11e   : > { %1652 = vst [vmem:[%s2242_s10 + $0x20] sm:$0xff] %v1592_v9   ;;  %v903_v15 = vadd.f32 %v1715_v11, %v2233_v34  ;;  %v1828_v17 = vpop.f32.mrf.mxu1  ;;  %v1157_v23 = vmax.f32 %v1061_v14, 0.0 }
 0x11f   : > { %v1717_v18 = vpop.f32.mrf.mxu0 }
 0x120   : > { %v1064_v19 = vadd.f32 %v1827_v16, %v903_v15  ;;  %v1718_v20 = vadd.f32 %v1717_v18, %v1716_v13  ;;  %v1829_v21 = vpop.f32.mrf.mxu1 }
 0x121   : > { %v1719_v22 = vpop.f32.mrf.mxu0  ;;  %v1830_v29 = vadd.f32 %v1829_v21, %v1828_v17 }
 0x122   : > { %v1158_v24 = vmax.f32 %v1064_v19, 0.0  ;;  %v908_v25 = vadd.f32 %v1718_v20, %v2233_v34  ;;  %v1831_v26 = vpop.f32.mrf.mxu1 }
 0x123   : > { %v1720_v27 = vpop.f32.mrf.mxu0 }
 0x124   : > { %v1597_v28 = vpack.c.bf16 %v1158_v24, %v1157_v23  ;;  %v1721_v30 = vadd.f32 %v1720_v27, %v1719_v22  ;;  %v1832_v31 = vpop.f32.mrf.mxu1  ;;  %v1069_v33 = vadd.f32 %v1830_v29, %v908_v25 }
 0x125   : > { %v1722_v32 = vpop.f32.mrf.mxu0  ;;  %v1833_v36 = vadd.f32 %v1832_v31, %v1831_v26 }
 0x126   : > { %1653 = vst [vmem:[%s2242_s10 + $0x28] sm:$0xff] %v1597_v28   ;;  %v911_v35 = vadd.f32 %v1721_v30, %v2233_v34  ;;  %v1834_v37 = vpop.f32.mrf.mxu1  ;;  %v1159_v43 = vmax.f32 %v1069_v33, 0.0 }
 0x127   : > { %v1723_v38 = vpop.f32.mrf.mxu0 }
 0x128   : > { %v1072_v39 = vadd.f32 %v1833_v36, %v911_v35  ;;  %v1724_v40 = vadd.f32 %v1723_v38, %v1722_v32  ;;  %v1835_v41 = vpop.f32.mrf.mxu1 }
 0x129   : > { %v1725_v42 = vpop.f32.mrf.mxu0  ;;  %v1836_v49 = vadd.f32 %v1835_v41, %v1834_v37 }
 0x12a   : > { %v1160_v44 = vmax.f32 %v1072_v39, 0.0  ;;  %v916_v45 = vadd.f32 %v1724_v40, %v2233_v34  ;;  %v1837_v46 = vpop.f32.mrf.mxu1 }
 0x12b   : > { %v1726_v47 = vpop.f32.mrf.mxu0 }
 0x12c   : > { %v1602_v48 = vpack.c.bf16 %v1160_v44, %v1159_v43  ;;  %v1727_v50 = vadd.f32 %v1726_v47, %v1725_v42  ;;  %v1838_v51 = vpop.f32.mrf.mxu1  ;;  %v1077_v53 = vadd.f32 %v1836_v49, %v916_v45 }
 0x12d   : > { %v1728_v52 = vpop.f32.mrf.mxu0  ;;  %v1839_v55 = vadd.f32 %v1838_v51, %v1837_v46 }
 0x12e   : > { %1654 = vst [vmem:[%s2242_s10 + $0x30] sm:$0xff] %v1602_v48   ;;  %v919_v54 = vadd.f32 %v1727_v50, %v2233_v34  ;;  %v1840_v56 = vpop.f32.mrf.mxu1  ;;  %v1161_v62 = vmax.f32 %v1077_v53, 0.0 }
 0x12f   : > { %v1729_v57 = vpop.f32.mrf.mxu0 }
 0x130   : > { %v1080_v58 = vadd.f32 %v1839_v55, %v919_v54  ;;  %v1730_v59 = vadd.f32 %v1729_v57, %v1728_v52  ;;  %v1841_v60 = vpop.f32.mrf.mxu1 }
 0x131   : > { %v1731_v61 = vpop.f32.mrf.mxu0  ;;  %v1842_v4 = vadd.f32 %v1841_v60, %v1840_v56 }
 0x132   : > { %v1162_v63 = vmax.f32 %v1080_v58, 0.0  ;;  %v924_v0 = vadd.f32 %v1730_v59, %v2233_v34  ;;  %v1843_v1 = vpop.f32.mrf.mxu1 }
 0x133   : > { %v1732_v2 = vpop.f32.mrf.mxu0 }
 0x134   : > { %v1607_v3 = vpack.c.bf16 %v1162_v63, %v1161_v62  ;;  %v1733_v5 = vadd.f32 %v1732_v2, %v1731_v61  ;;  %v1844_v6 = vpop.f32.mrf.mxu1  ;;  %v1085_v8 = vadd.f32 %v1842_v4, %v924_v0 }
 0x135   : > { %v1734_v7 = vpop.f32.mrf.mxu0  ;;  %v1845_v10 = vadd.f32 %v1844_v6, %v1843_v1 }
 0x136   : > { %1655 = vst [vmem:[%s2242_s10 + $0x38] sm:$0xff] %v1607_v3   ;;  %v927_v9 = vadd.f32 %v1733_v5, %v2233_v34  ;;  %v1846_v11 = vpop.f32.mrf.mxu1  ;;  %v1163_v17 = vmax.f32 %v1085_v8, 0.0 }
 0x137   : > { %v1735_v12 = vpop.f32.mrf.mxu0 }
 0x138   : > { %v1088_v13 = vadd.f32 %v1845_v10, %v927_v9  ;;  %v1736_v14 = vadd.f32 %v1735_v12, %v1734_v7  ;;  %v1847_v15 = vpop.f32.mrf.mxu1 }
 0x139   : > { %v1737_v16 = vpop.f32.mrf.mxu0  ;;  %v1848_v23 = vadd.f32 %v1847_v15, %v1846_v11 }
 0x13a   : > { %v1164_v18 = vmax.f32 %v1088_v13, 0.0  ;;  %v932_v19 = vadd.f32 %v1736_v14, %v2233_v34  ;;  %v1849_v20 = vpop.f32.mrf.mxu1 }
 0x13b   : > { %v1738_v21 = vpop.f32.mrf.mxu0 }
 0x13c   : > { %v1612_v22 = vpack.c.bf16 %v1164_v18, %v1163_v17  ;;  %v1739_v24 = vadd.f32 %v1738_v21, %v1737_v16  ;;  %v1850_v25 = vpop.f32.mrf.mxu1  ;;  %v1093_v27 = vadd.f32 %v1848_v23, %v932_v19 }
 0x13d   : > { %v1740_v26 = vpop.f32.mrf.mxu0  ;;  %v1851_v29 = vadd.f32 %v1850_v25, %v1849_v20 }
 0x13e   : > { %1656 = vst [vmem:[%s2242_s10 + $0x40] sm:$0xff] %v1612_v22   ;;  %v935_v28 = vadd.f32 %v1739_v24, %v2233_v34  ;;  %v1852_v30 = vpop.f32.mrf.mxu1  ;;  %v1165_v37 = vmax.f32 %v1093_v27, 0.0 }
 0x13f   : > { %v1741_v31 = vpop.f32.mrf.mxu0 }
 0x140   : > { %v1096_v32 = vadd.f32 %v1851_v29, %v935_v28  ;;  %v1742_v33 = vadd.f32 %v1741_v31, %v1740_v26  ;;  %v1853_v35 = vpop.f32.mrf.mxu1 }
 0x141   : > { %v1743_v36 = vpop.f32.mrf.mxu0  ;;  %v1854_v43 = vadd.f32 %v1853_v35, %v1852_v30 }
 0x142   : > { %v1166_v38 = vmax.f32 %v1096_v32, 0.0  ;;  %v940_v39 = vadd.f32 %v1742_v33, %v2233_v34  ;;  %v1855_v40 = vpop.f32.mrf.mxu1 }
 0x143   : > { %v1744_v41 = vpop.f32.mrf.mxu0 }
 0x144   : > { %v1617_v42 = vpack.c.bf16 %v1166_v38, %v1165_v37  ;;  %v1745_v44 = vadd.f32 %v1744_v41, %v1743_v36  ;;  %v1856_v45 = vpop.f32.mrf.mxu1  ;;  %v1101_v47 = vadd.f32 %v1854_v43, %v940_v39 }
 0x145   : > { %v1746_v46 = vpop.f32.mrf.mxu0  ;;  %v1857_v49 = vadd.f32 %v1856_v45, %v1855_v40 }
 0x146   : > { %1657 = vst [vmem:[%s2242_s10 + $0x48] sm:$0xff] %v1617_v42   ;;  %v943_v48 = vadd.f32 %v1745_v44, %v2233_v34  ;;  %v1858_v50 = vpop.f32.mrf.mxu1  ;;  %v1167_v56 = vmax.f32 %v1101_v47, 0.0 }
 0x147   : > { %v1747_v51 = vpop.f32.mrf.mxu0 }
 0x148   : > { %v1104_v52 = vadd.f32 %v1857_v49, %v943_v48  ;;  %v1748_v53 = vadd.f32 %v1747_v51, %v1746_v46  ;;  %v1859_v54 = vpop.f32.mrf.mxu1 }
 0x149   : > { %v1749_v55 = vpop.f32.mrf.mxu0  ;;  %v1860_v62 = vadd.f32 %v1859_v54, %v1858_v50 }
 0x14a   : > { %v1168_v57 = vmax.f32 %v1104_v52, 0.0  ;;  %v948_v58 = vadd.f32 %v1748_v53, %v2233_v34  ;;  %v1861_v59 = vpop.f32.mrf.mxu1 }
 0x14b   : > { %v1750_v60 = vpop.f32.mrf.mxu0 }
 0x14c   : > { %v1622_v61 = vpack.c.bf16 %v1168_v57, %v1167_v56  ;;  %v1751_v63 = vadd.f32 %v1750_v60, %v1749_v55  ;;  %v1862_v0 = vpop.f32.mrf.mxu1  ;;  %v1109_v2 = vadd.f32 %v1860_v62, %v948_v58 }
 0x14d   : > { %v1752_v1 = vpop.f32.mrf.mxu0  ;;  %v1863_v4 = vadd.f32 %v1862_v0, %v1861_v59 }
 0x14e   : > { %1658 = vst [vmem:[%s2242_s10 + $0x50] sm:$0xff] %v1622_v61   ;;  %v951_v3 = vadd.f32 %v1751_v63, %v2233_v34  ;;  %v1864_v5 = vpop.f32.mrf.mxu1  ;;  %v1169_v11 = vmax.f32 %v1109_v2, 0.0 }
 0x14f   : > { %v1753_v6 = vpop.f32.mrf.mxu0 }
 0x150   : > { %v1112_v7 = vadd.f32 %v1863_v4, %v951_v3  ;;  %v1754_v8 = vadd.f32 %v1753_v6, %v1752_v1  ;;  %v1865_v9 = vpop.f32.mrf.mxu1 }
 0x151   : > { %v1755_v10 = vpop.f32.mrf.mxu0  ;;  %v1866_v17 = vadd.f32 %v1865_v9, %v1864_v5 }
 0x152   : > { %v1170_v12 = vmax.f32 %v1112_v7, 0.0  ;;  %v956_v13 = vadd.f32 %v1754_v8, %v2233_v34  ;;  %v1867_v14 = vpop.f32.mrf.mxu1 }
 0x153   : > { %v1756_v15 = vpop.f32.mrf.mxu0 }
 0x154   : > { %v1627_v16 = vpack.c.bf16 %v1170_v12, %v1169_v11  ;;  %v1757_v18 = vadd.f32 %v1756_v15, %v1755_v10  ;;  %v1868_v19 = vpop.f32.mrf.mxu1  ;;  %v1117_v21 = vadd.f32 %v1866_v17, %v956_v13 }
 0x155   : > { %v1758_v20 = vpop.f32.mrf.mxu0  ;;  %v1869_v23 = vadd.f32 %v1868_v19, %v1867_v14 }
 0x156   : > { %1659 = vst [vmem:[%s2242_s10 + $0x58] sm:$0xff] %v1627_v16   ;;  %v959_v22 = vadd.f32 %v1757_v18, %v2233_v34  ;;  %v1870_v24 = vpop.f32.mrf.mxu1  ;;  %v1171_v30 = vmax.f32 %v1117_v21, 0.0 }
 0x157   : > { %v1759_v25 = vpop.f32.mrf.mxu0 }
 0x158   : > { %v1120_v26 = vadd.f32 %v1869_v23, %v959_v22  ;;  %v1760_v27 = vadd.f32 %v1759_v25, %v1758_v20  ;;  %v1871_v28 = vpop.f32.mrf.mxu1 }
 0x159   : > { %v1761_v29 = vpop.f32.mrf.mxu0  ;;  %v1872_v37 = vadd.f32 %v1871_v28, %v1870_v24 }
 0x15a   : > { %v1172_v31 = vmax.f32 %v1120_v26, 0.0  ;;  %v964_v32 = vadd.f32 %v1760_v27, %v2233_v34  ;;  %v1873_v33 = vpop.f32.mrf.mxu1 }
 0x15b   : > { %v1762_v35 = vpop.f32.mrf.mxu0 }
 0x15c   : > { %v1632_v36 = vpack.c.bf16 %v1172_v31, %v1171_v30  ;;  %v1763_v38 = vadd.f32 %v1762_v35, %v1761_v29  ;;  %v1874_v39 = vpop.f32.mrf.mxu1  ;;  %v1125_v41 = vadd.f32 %v1872_v37, %v964_v32 }
 0x15d   : > { %v1764_v40 = vpop.f32.mrf.mxu0  ;;  %v1875_v43 = vadd.f32 %v1874_v39, %v1873_v33 }
 0x15e   : > { %1660 = vst [vmem:[%s2242_s10 + $0x60] sm:$0xff] %v1632_v36   ;;  %v967_v42 = vadd.f32 %v1763_v38, %v2233_v34  ;;  %v1876_v44 = vpop.f32.mrf.mxu1  ;;  %v1173_v50 = vmax.f32 %v1125_v41, 0.0 }
 0x15f   : > { %v1765_v45 = vpop.f32.mrf.mxu0 }
 0x160   : > { %v1128_v46 = vadd.f32 %v1875_v43, %v967_v42  ;;  %v1766_v47 = vadd.f32 %v1765_v45, %v1764_v40  ;;  %v1877_v48 = vpop.f32.mrf.mxu1 }
 0x161   : > { %v1767_v49 = vpop.f32.mrf.mxu0  ;;  %v1878_v56 = vadd.f32 %v1877_v48, %v1876_v44 }
 0x162   : > { %v1174_v51 = vmax.f32 %v1128_v46, 0.0  ;;  %v972_v52 = vadd.f32 %v1766_v47, %v2233_v34  ;;  %v1879_v53 = vpop.f32.mrf.mxu1 }
 0x163   : > { %v1768_v54 = vpop.f32.mrf.mxu0 }
 0x164   : > { %v1637_v55 = vpack.c.bf16 %v1174_v51, %v1173_v50  ;;  %v1769_v57 = vadd.f32 %v1768_v54, %v1767_v49  ;;  %v1880_v58 = vpop.f32.mrf.mxu1  ;;  %v1133_v60 = vadd.f32 %v1878_v56, %v972_v52 }
 0x165   : > { %v1770_v59 = vpop.f32.mrf.mxu0  ;;  %v1881_v62 = vadd.f32 %v1880_v58, %v1879_v53 }
 0x166   : > { %1661 = vst [vmem:[%s2242_s10 + $0x68] sm:$0xff] %v1637_v55   ;;  %v975_v61 = vadd.f32 %v1769_v57, %v2233_v34  ;;  %v1882_v63 = vpop.f32.mrf.mxu1  ;;  %v1175_v5 = vmax.f32 %v1133_v60, 0.0 }
 0x167   : > { %v1771_v0 = vpop.f32.mrf.mxu0 }
 0x168   : > { %v1136_v1 = vadd.f32 %v1881_v62, %v975_v61  ;;  %v1772_v2 = vadd.f32 %v1771_v0, %v1770_v59  ;;  %v1883_v3 = vpop.f32.mrf.mxu1 }
 0x169   : > { %v1773_v4 = vpop.f32.mrf.mxu0  ;;  %v1884_v11 = vadd.f32 %v1883_v3, %v1882_v63 }
 0x16a   : > { %v1176_v6 = vmax.f32 %v1136_v1, 0.0  ;;  %v980_v7 = vadd.f32 %v1772_v2, %v2233_v34  ;;  %v1885_v8 = vpop.f32.mrf.mxu1 }
 0x16b   : > { %v1774_v9 = vpop.f32.mrf.mxu0 }
 0x16c   : > { %v1642_v10 = vpack.c.bf16 %v1176_v6, %v1175_v5  ;;  %v1775_v12 = vadd.f32 %v1774_v9, %v1773_v4  ;;  %v1886_v13 = vpop.f32.mrf.mxu1  ;;  %v1141_v14 = vadd.f32 %v1884_v11, %v980_v7 }
 0x16d   : > { %v1887_v16 = vadd.f32 %v1886_v13, %v1885_v8 }
 0x16e   : > { %1662 = vst [vmem:[%s2242_s10 + $0x70] sm:$0xff] %v1642_v10   ;;  %v983_v15 = vadd.f32 %v1775_v12, %v2233_v34  ;;  %v1177_v18 = vmax.f32 %v1141_v14, 0.0 }
 0x170   : > { %v1144_v17 = vadd.f32 %v1887_v16, %v983_v15 }
 0x172   : > { %v1178_v19 = vmax.f32 %v1144_v17, 0.0 }
 0x174   : > { %v1647_v20 = vpack.c.bf16 %v1178_v19, %v1177_v18 }
 0x176   : > { %1663 = vst [vmem:[%s2242_s10 + $0x78] sm:$0xff] %v1647_v20  }
 0x177 PF: > { %s13_s12 = sadd.s32 1, %s2030_s12  }
 0x178   : > { %p10_p4 = scmp.ge.s32.totalorder %s13_s12, 4  }
 0x17a   :  { %12 = sbr.rel (!%p10_p4) target bundleno = 1 (0x1), region = 62 }

// kernel: vae_forward.9
= control target key start
LH: loop header
LB: loop body
LE: loop exit
PB: predicated region body
PF: predicated region fallthrough
CT: control target
= control target key end

     0   :  { %s1662_s12 = smov 0   ;;  %s1966_s0 = inlined_call_operand.vmem [shape: bf16[128,1024], index: 0, kind: input, shape index: {}]   ;;  %s1967_s1 = inlined_call_operand.vmem [shape: bf16[1024,128], index: 1, kind: input, shape index: {}]   ;;  %s1968_s2 = inlined_call_operand.vmem [shape: f32[1,128], index: 2, kind: input, shape index: {}]   ;;  %s1969_s3 = inlined_call_operand.vmem [shape: bf16[128,128], index: 3, kind: output, shape index: {}]  }
   0x1 LB: > { %s1253_s13 = sadd.s32 4294967295, %s1640_s12   ;;  %p1257_p0 = scmp.ge.s32.totalorder %s1640_s12, 1  ;;  %s1640_s12 = sphi %s1662_s12, %s13_s12  }
   0x2   : > { %p139_p1 = scmp.lt.s32.totalorder %s1640_s12, 3 }
   0x4   : > { %p140_p2 = pnand %p1257_p0, %p139_p1 }
   0x5   : > { %s1258_s21 = sshll.u32 (!%p140_p2), %s1253_s13, 3 }
   0x6   : > { %143 = sbr.rel (%p140_p2) target bundleno = 311 (0x137), region = 32  ;;  %p165_p3 = scmp.lt.s32.totalorder (!%p140_p2), %s1258_s21, 15 }
   0xb   : > { %v1570_v0 = vld [vmem:[%s1967_s1 + $0x78] sm:$0xff]   ;;  %v1574_v4 = vld [vmem:[%s1967_s1 + $0x70] sm:$0xff]   ;;  %v1578_v8 = vld [vmem:[%s1967_s1 + $0x68] sm:$0xff]   ;;  %s1971_s21 = smov (!%p165_p3, %s1258_s21), 15 }
   0xc   : > { %v1571_v1 = vld [vmem:[%s1967_s1 + $0xf8] sm:$0xff]   ;;  %1402 = vmatprep.subr.bf16.mxu0 %v1570_v0  ;;  %v1575_v5 = vld [vmem:[%s1967_s1 + $0xf0] sm:$0xff]   ;;  %v1579_v9 = vld [vmem:[%s1967_s1 + $0xe8] sm:$0xff]   ;;  %s1370_s18 = sshll.u32 %s1971_s21, 5  ;;  %s1262_s25 = sshll.u32 %s1971_s21, 2 }
   0xd   : > { %v1572_v2 = vld [vmem:[%s1967_s1 + $0x38] sm:$0xff]   ;;  %1442 = vmatprep.subr.bf16.mxu1 %v1571_v1  ;;  %v1576_v6 = vld [vmem:[%s1967_s1 + $0x30] sm:$0xff]   ;;  %v1580_v10 = vld [vmem:[%s1967_s1 + $0x28] sm:$0xff]   ;;  %s1768_s28 = scalar_lea.vmem %s1966_s0, %s1370_s18  ;;  %s1941_s29 = scalar_lea.vmem %s1969_s3, %s1262_s25 }
   0xe   : > { %v1573_v3 = vld [vmem:[%s1967_s1 + $0xb8] sm:$0xff]   ;;  %1403 = vmatpush3.bf16.msra.mxu0 %v1572_v2  ;;  %v1577_v7 = vld [vmem:[%s1967_s1 + $0xb0] sm:$0xff]   ;;  %v1581_v11 = vld [vmem:[%s1967_s1 + $0xa8] sm:$0xff]  }
   0xf   : > { %1443 = vmatpush3.bf16.msra.mxu1 %v1573_v3  ;;  %1404 = vmatprep.subr.bf16.mxu0 %v1574_v4  ;;  %v1582_v12 = vld [vmem:[%s1967_s1 + $0x60] sm:$0xff]   ;;  %v1586_v16 = vld [vmem:[%s1967_s1 + $0x58] sm:$0xff]   ;;  %v1590_v20 = vld [vmem:[%s1967_s1 + $0x50] sm:$0xff]  }
  0x10   : > { %1444 = vmatprep.subr.bf16.mxu1 %v1575_v5  ;;  %v1583_v13 = vld [vmem:[%s1967_s1 + $0xe0] sm:$0xff]   ;;  %v1587_v17 = vld [vmem:[%s1967_s1 + $0xd8] sm:$0xff]   ;;  %v1591_v21 = vld [vmem:[%s1967_s1 + $0xd0] sm:$0xff]  }
  0x11   : > { %v1584_v14 = vld [vmem:[%s1967_s1 + $0x20] sm:$0xff]   ;;  %v1588_v18 = vld [vmem:[%s1967_s1 + $0x18] sm:$0xff]   ;;  %v1592_v22 = vld [vmem:[%s1967_s1 + $0x10] sm:$0xff]  }
  0x12   : > { %1405 = vmatpush3.bf16.msra.mxu0 %v1576_v6  ;;  %v1585_v15 = vld [vmem:[%s1967_s1 + $0xa0] sm:$0xff]   ;;  %v1589_v19 = vld [vmem:[%s1967_s1 + $0x98] sm:$0xff]   ;;  %v1593_v23 = vld [vmem:[%s1967_s1 + $0x90] sm:$0xff]  }
  0x13   : > { %1445 = vmatpush3.bf16.msra.mxu1 %v1577_v7  ;;  %1406 = vmatprep.subr.bf16.mxu0 %v1578_v8  ;;  %v1594_v24 = vld [vmem:[%s1967_s1 + $0x48] sm:$0xff]   ;;  %v1598_v28 = vld [vmem:[%s1967_s1 + $0x40] sm:$0xff]   ;;  %v1602_v40 = vld [vmem:[%s1967_s1 + $0x178] sm:$0xff]  }
  0x14   : > { %1446 = vmatprep.subr.bf16.mxu1 %v1579_v9  ;;  %v1595_v25 = vld [vmem:[%s1967_s1 + $0xc8] sm:$0xff]   ;;  %v1599_v29 = vld [vmem:[%s1967_s1 + $0xc0] sm:$0xff]   ;;  %v1603_v41 = vld [vmem:[%s1967_s1 + $0x1f8] sm:$0xff]  }
  0x15   : > { %v1596_v26 = vld [vmem:[%s1967_s1 + $0x8] sm:$0xff]   ;;  %v1600_v30 = vld [vmem:[%s1967_s1] sm:$0xff]   ;;  %v1604_v42 = vld [vmem:[%s1967_s1 + $0x138] sm:$0xff]  }
  0x16   : > { %1407 = vmatpush3.bf16.msra.mxu0 %v1580_v10  ;;  %v1597_v27 = vld [vmem:[%s1967_s1 + $0x88] sm:$0xff]   ;;  %v1601_v31 = vld [vmem:[%s1967_s1 + $0x80] sm:$0xff]   ;;  %v1605_v43 = vld [vmem:[%s1967_s1 + $0x1b8] sm:$0xff]  }
  0x17   : > { %1447 = vmatpush3.bf16.msra.mxu1 %v1581_v11  ;;  %1408 = vmatprep.subr.bf16.mxu0 %v1582_v12  ;;  %v178_v32 = vld [vmem:[%s1768_s28] sm:$0xff]  ;;  %v179_v34 = vld [vmem:[%s1768_s28 + $0x8] sm:$0xff]  ;;  %v1606_v44 = vld [vmem:[%s1967_s1 + $0x170] sm:$0xff]  }
  0x18   : > { %1448 = vmatprep.subr.bf16.mxu1 %v1583_v13  ;;  %v182_v33 = vld [vmem:[%s1768_s28 + $0x20] sm:$0xff]  ;;  %v183_v37 = vld [vmem:[%s1768_s28 + $0x28] sm:$0xff]  ;;  %v1607_v45 = vld [vmem:[%s1967_s1 + $0x1f0] sm:$0xff]  }
  0x19   : > { %v1264_v35 = vcombine.low %v178_v32, %v182_v33  ;;  %v1265_v36 = vcombine.high %v178_v32, %v182_v33  ;;  %v1266_v38 = vcombine.low %v179_v34, %v183_v37  ;;  %v1267_v39 = vcombine.high %v179_v34, %v183_v37  ;;  %v1608_v46 = vld [vmem:[%s1967_s1 + $0x130] sm:$0xff]   ;;  %v186_v48 = vld [vmem:[%s1768_s28 + $0x40] sm:$0xff]  ;;  %v187_v51 = vld [vmem:[%s1768_s28 + $0x48] sm:$0xff] }
  0x1a   : > { %1409 = vmatpush3.bf16.msra.mxu0 %v1584_v14  ;;  %v1609_v47 = vld [vmem:[%s1967_s1 + $0x1b0] sm:$0xff]   ;;  %v190_v49 = vld [vmem:[%s1768_s28 + $0x60] sm:$0xff]  ;;  %v191_v52 = vld [vmem:[%s1768_s28 + $0x68] sm:$0xff] }
  0x1b   : > { %1449 = vmatpush3.bf16.msra.mxu1 %v1585_v15  ;;  %1410 = vmatprep.subr.bf16.mxu0 %v1586_v16  ;;  %v1273_v50 = vcombine.high %v186_v48, %v190_v49  ;;  %v1272_v53 = vcombine.low %v186_v48, %v190_v49  ;;  %v1275_v54 = vcombine.high %v187_v51, %v191_v52  ;;  %v1610_v56 = vld [vmem:[%s1967_s1 + $0x168] sm:$0xff]   ;;  %v1614_v60 = vld [vmem:[%s1967_s1 + $0x160] sm:$0xff]   ;;  %v1618_v8 = vld [vmem:[%s1967_s1 + $0x158] sm:$0xff]  }
  0x1c   : > { %1450 = vmatprep.subr.bf16.mxu1 %v1587_v17  ;;  %921 = vmatprep.mubr.bf16.mxu0 %v1265_v36  ;;  %v1274_v55 = vcombine.low %v187_v51, %v191_v52  ;;  %v1611_v57 = vld [vmem:[%s1967_s1 + $0x1e8] sm:$0xff]   ;;  %v1615_v61 = vld [vmem:[%s1967_s1 + $0x1e0] sm:$0xff]   ;;  %v1619_v9 = vld [vmem:[%s1967_s1 + $0x1d8] sm:$0xff]  }
  0x1d   : > { %986 = vmatprep.mubr.bf16.mxu1 %v1267_v39  ;;  %v1612_v58 = vld [vmem:[%s1967_s1 + $0x128] sm:$0xff]   ;;  %v1616_v62 = vld [vmem:[%s1967_s1 + $0x120] sm:$0xff]   ;;  %v1620_v10 = vld [vmem:[%s1967_s1 + $0x118] sm:$0xff]  }
  0x1e   : > { %1411 = vmatpush3.bf16.msra.mxu0 %v1588_v18  ;;  %v1613_v59 = vld [vmem:[%s1967_s1 + $0x1a8] sm:$0xff]   ;;  %v1617_v63 = vld [vmem:[%s1967_s1 + $0x1a0] sm:$0xff]   ;;  %v1621_v11 = vld [vmem:[%s1967_s1 + $0x198] sm:$0xff]  }
  0x1f   : > { %1451 = vmatpush3.bf16.msra.mxu1 %v1589_v19  ;;  %1412 = vmatprep.subr.bf16.mxu0 %v1590_v20  ;;  %v194_v0 = vld [vmem:[%s1768_s28 + $0x80] sm:$0xff]  ;;  %v195_v2 = vld [vmem:[%s1768_s28 + $0x88] sm:$0xff]  ;;  %v1622_v12 = vld [vmem:[%s1967_s1 + $0x150] sm:$0xff]  }
  0x20   : > { %1452 = vmatprep.subr.bf16.mxu1 %v1591_v21  ;;  %v198_v1 = vld [vmem:[%s1768_s28 + $0xa0] sm:$0xff]  ;;  %v199_v3 = vld [vmem:[%s1768_s28 + $0xa8] sm:$0xff]  ;;  %v1623_v13 = vld [vmem:[%s1967_s1 + $0x1d0] sm:$0xff]  }
  0x21   : > { %v1281_v4 = vcombine.high %v194_v0, %v198_v1  ;;  %v1283_v5 = vcombine.high %v195_v2, %v199_v3  ;;  %v1280_v6 = vcombine.low %v194_v0, %v198_v1  ;;  %v1282_v7 = vcombine.low %v195_v2, %v199_v3  ;;  %v1624_v14 = vld [vmem:[%s1967_s1 + $0x110] sm:$0xff]   ;;  %v202_v16 = vld [vmem:[%s1768_s28 + $0xc0] sm:$0xff]  ;;  %v203_v18 = vld [vmem:[%s1768_s28 + $0xc8] sm:$0xff] }
  0x22   : > { %1413 = vmatpush3.bf16.msra.mxu0 %v1592_v22  ;;  %v1625_v15 = vld [vmem:[%s1967_s1 + $0x190] sm:$0xff]   ;;  %v206_v17 = vld [vmem:[%s1768_s28 + $0xe0] sm:$0xff]  ;;  %v207_v20 = vld [vmem:[%s1768_s28 + $0xe8] sm:$0xff] }
  0x23   : > { %1453 = vmatpush3.bf16.msra.mxu1 %v1593_v23  ;;  %1414 = vmatprep.subr.bf16.mxu0 %v1594_v24  ;;  %v1289_v19 = vcombine.high %v202_v16, %v206_v17  ;;  %v1288_v21 = vcombine.low %v202_v16, %v206_v17  ;;  %v1291_v22 = vcombine.high %v203_v18, %v207_v20  ;;  %v1626_v24 = vld [vmem:[%s1967_s1 + $0x148] sm:$0xff]   ;;  %v180_v32 = vld [vmem:[%s1768_s28 + $0x10] sm:$0xff]  ;;  %v181_v36 = vld [vmem:[%s1768_s28 + $0x18] sm:$0xff] }
  0x24   : > { %1454 = vmatprep.subr.bf16.mxu1 %v1595_v25  ;;  %v1290_v23 = vcombine.low %v203_v18, %v207_v20  ;;  %v1627_v25 = vld [vmem:[%s1967_s1 + $0x1c8] sm:$0xff]   ;;  %v184_v33 = vld [vmem:[%s1768_s28 + $0x30] sm:$0xff]  ;;  %v185_v37 = vld [vmem:[%s1768_s28 + $0x38] sm:$0xff] }
  0x25   : > { %v1268_v34 = vcombine.low %v180_v32, %v184_v33  ;;  %v1270_v39 = vcombine.low %v181_v36, %v185_v37  ;;  %v197_v48 = vld [vmem:[%s1768_s28 + $0x98] sm:$0xff] }
  0x26   : > { %1415 = vmatpush3.bf16.msra.mxu0 %v1596_v26  ;;  %v1628_v26 = vld [vmem:[%s1967_s1 + $0x108] sm:$0xff]   ;;  %v201_v49 = vld [vmem:[%s1768_s28 + $0xb8] sm:$0xff] }
  0x27   : > { %1455 = vmatpush3.bf16.msra.mxu1 %v1597_v27  ;;  %1416 = vmatprep.subr.bf16.mxu0 %v1598_v28  ;;  %v1629_v27 = vld [vmem:[%s1967_s1 + $0x188] sm:$0xff]   ;;  %v1630_v28 = vld [vmem:[%s1967_s1 + $0x140] sm:$0xff]  }
  0x28   : > { %1456 = vmatprep.subr.bf16.mxu1 %v1599_v29  ;;  %v1631_v29 = vld [vmem:[%s1967_s1 + $0x1c0] sm:$0xff]  }
  0x2a   : > { %1417 = vmatpush3.bf16.msra.mxu0 %v1600_v30  ;;  %v1632_v30 = vld [vmem:[%s1967_s1 + $0x100] sm:$0xff]  }
  0x2b   : > { %1457 = vmatpush3.bf16.msra.mxu1 %v1601_v31  ;;  %1482 = vmatprep.subr.bf16.mxu0 %v1602_v40  ;;  %v1633_v31 = vld [vmem:[%s1967_s1 + $0x180] sm:$0xff]   ;;  %v1271_v40 = vcombine.high %v181_v36, %v185_v37 }
  0x2c   : > { %1522 = vmatprep.subr.bf16.mxu1 %v1603_v41  ;;  %v192_v41 = vld [vmem:[%s1768_s28 + $0x70] sm:$0xff] }
  0x2d   : > { %922 = vmatmul.mubr.bf16.vlgmr.msra.gmra.mxu0 %v1264_v35  ;;  %v1269_v35 = vcombine.high %v180_v32, %v184_v33 }
  0x2e   : > { %987 = vmatmul.mubr.bf16.vlgmr.msra.gmra.mxu1 %v1266_v38  ;;  %1483 = vmatpush3.bf16.msra.mxu0 %v1604_v42  ;;  %v188_v38 = vld [vmem:[%s1768_s28 + $0x50] sm:$0xff]  ;;  %v189_v42 = vld [vmem:[%s1768_s28 + $0x58] sm:$0xff] }
  0x2f   : > { %1523 = vmatpush3.bf16.msra.mxu1 %v1605_v43  ;;  %1484 = vmatprep.subr.bf16.mxu0 %v1606_v44  ;;  %v193_v43 = vld [vmem:[%s1768_s28 + $0x78] sm:$0xff]  ;;  %v1277_v44 = vcombine.high %v188_v38, %v192_v41 }
  0x30   : > { %1524 = vmatprep.subr.bf16.mxu1 %v1607_v45  ;;  %929 = vmatprep.mubr.bf16.mxu0 %v1273_v50  ;;  %v1279_v45 = vcombine.high %v189_v42, %v193_v43  ;;  %v1276_v50 = vcombine.low %v188_v38, %v192_v41  ;;  %v1278_v51 = vcombine.low %v189_v42, %v193_v43 }
  0x31   : > { %994 = vmatprep.mubr.bf16.mxu1 %v1275_v54  ;;  %v204_v54 = vld [vmem:[%s1768_s28 + $0xd0] sm:$0xff] }
  0x32   : > { %1485 = vmatpush3.bf16.msra.mxu0 %v1608_v46  ;;  %v196_v46 = vld [vmem:[%s1768_s28 + $0x90] sm:$0xff] }
  0x33   : > { %1525 = vmatpush3.bf16.msra.mxu1 %v1609_v47  ;;  %1486 = vmatprep.subr.bf16.mxu0 %v1610_v56  ;;  %v200_v47 = vld [vmem:[%s1768_s28 + $0xb0] sm:$0xff]  ;;  %v205_v56 = vld [vmem:[%s1768_s28 + $0xd8] sm:$0xff] }
  0x34   : > { %1526 = vmatprep.subr.bf16.mxu1 %v1611_v57  ;;  %v1285_v52 = vcombine.high %v196_v46, %v200_v47  ;;  %v209_v57 = vld [vmem:[%s1768_s28 + $0xf8] sm:$0xff] }
  0x35   : > { %930 = vmatmul.mubr.bf16.gmra.mxu0 %v1272_v53  ;;  %v1287_v53 = vcombine.high %v197_v48, %v201_v49 }
  0x36   : > { %995 = vmatmul.mubr.bf16.gmra.mxu1 %v1274_v55  ;;  %1487 = vmatpush3.bf16.msra.mxu0 %v1612_v58  ;;  %v208_v55 = vld [vmem:[%s1768_s28 + $0xf0] sm:$0xff]  ;;  %v1284_v58 = vcombine.low %v196_v46, %v200_v47 }
  0x37   : > { %1527 = vmatpush3.bf16.msra.mxu1 %v1613_v59  ;;  %1488 = vmatprep.subr.bf16.mxu0 %v1614_v60  ;;  %v1286_v59 = vcombine.low %v197_v48, %v201_v49  ;;  %v1293_v60 = vcombine.high %v204_v54, %v208_v55 }
  0x38   : > { %1528 = vmatprep.subr.bf16.mxu1 %v1615_v61  ;;  %937 = vmatprep.mubr.bf16.mxu0 %v1281_v4  ;;  %v1295_v61 = vcombine.high %v205_v56, %v209_v57 }
  0x39   : > { %1002 = vmatprep.mubr.bf16.mxu1 %v1283_v5 }
  0x3a   : > { %1489 = vmatpush3.bf16.msra.mxu0 %v1616_v62  ;;  %v1292_v62 = vcombine.low %v204_v54, %v208_v55 }
  0x3b   : > { %1529 = vmatpush3.bf16.msra.mxu1 %v1617_v63  ;;  %1490 = vmatprep.subr.bf16.mxu0 %v1618_v8  ;;  %v1294_v63 = vcombine.low %v205_v56, %v209_v57 }
  0x3c   : > { %1530 = vmatprep.subr.bf16.mxu1 %v1619_v9 }
  0x3d   : > { %938 = vmatmul.mubr.bf16.gmra.mxu0 %v1280_v6 }
  0x3e   : > { %1003 = vmatmul.mubr.bf16.gmra.mxu1 %v1282_v7  ;;  %1491 = vmatpush3.bf16.msra.mxu0 %v1620_v10 }
  0x3f   : > { %1531 = vmatpush3.bf16.msra.mxu1 %v1621_v11  ;;  %1492 = vmatprep.subr.bf16.mxu0 %v1622_v12 }
  0x40   : > { %1532 = vmatprep.subr.bf16.mxu1 %v1623_v13  ;;  %945 = vmatprep.mubr.bf16.mxu0 %v1289_v19 }
  0x41   : > { %1010 = vmatprep.mubr.bf16.mxu1 %v1291_v22 }
  0x42   : > { %1493 = vmatpush3.bf16.msra.mxu0 %v1624_v14 }
  0x43   : > { %1533 = vmatpush3.bf16.msra.mxu1 %v1625_v15  ;;  %1494 = vmatprep.subr.bf16.mxu0 %v1626_v24 }
  0x44   : > { %1534 = vmatprep.subr.bf16.mxu1 %v1627_v25 }
  0x45   : > { %946 = vmatmul.mubr.bf16.gmra.mxu0 %v1288_v21 }
  0x46   : > { %1011 = vmatmul.mubr.bf16.gmra.mxu1 %v1290_v23  ;;  %1495 = vmatpush3.bf16.msra.mxu0 %v1628_v26 }
  0x47   : > { %1535 = vmatpush3.bf16.msra.mxu1 %v1629_v27  ;;  %1496 = vmatprep.subr.bf16.mxu0 %v1630_v28 }
  0x48   : > { %1536 = vmatprep.subr.bf16.mxu1 %v1631_v29  ;;  %1051 = vmatprep.mubr.bf16.mxu0 %v1269_v35 }
  0x49   : > { %1116 = vmatprep.mubr.bf16.mxu1 %v1271_v40 }
  0x4a   : > { %1497 = vmatpush3.bf16.msra.mxu0 %v1632_v30  ;;  %v1925_v30 = vld [vmem:[%s1968_s2] ss:$0 sm:$0xff] }
  0x4b   : > { %1537 = vmatpush3.bf16.msra.mxu1 %v1633_v31 }
  0x4d   : > { %1052 = vmatmul.mubr.bf16.vlgmr.msra.gmra.mxu0 %v1268_v34 }
  0x4e   : > { %1117 = vmatmul.mubr.bf16.vlgmr.msra.gmra.mxu1 %v1270_v39  ;;  %1059 = vmatprep.mubr.bf16.mxu0 %v1277_v44 }
  0x4f   : > { %1124 = vmatprep.mubr.bf16.mxu1 %v1279_v45 }
  0x55   : > { %1060 = vmatmul.mubr.bf16.gmra.mxu0 %v1276_v50 }
  0x56   : > { %1125 = vmatmul.mubr.bf16.gmra.mxu1 %v1278_v51  ;;  %1067 = vmatprep.mubr.bf16.mxu0 %v1285_v52 }
  0x57   : > { %1132 = vmatprep.mubr.bf16.mxu1 %v1287_v53 }
  0x5d   : > { %1068 = vmatmul.mubr.bf16.gmra.mxu0 %v1284_v58 }
  0x5e   : > { %1133 = vmatmul.mubr.bf16.gmra.mxu1 %v1286_v59  ;;  %1075 = vmatprep.mubr.bf16.mxu0 %v1293_v60 }
  0x5f   : > { %1140 = vmatprep.mubr.bf16.mxu1 %v1295_v61 }
  0x65   : > { %1076 = vmatmul.mubr.bf16.gmra.mxu0 %v1292_v62 }
  0x66   : > { %1141 = vmatmul.mubr.bf16.gmra.mxu1 %v1294_v63 }
  0xed   : > { %v1418_v0 = vpop.f32.mrf.mxu0 }
  0xee   : > { %v1458_v1 = vpop.f32.mrf.mxu1 }
  0xef   : > { %v1419_v2 = vpop.f32.mrf.mxu0 }
  0xf0   : > { %v1459_v3 = vpop.f32.mrf.mxu1  ;;  %v1420_v28 = vadd.f32 %v1419_v2, %v1418_v0 }
  0xf1   : > { %v1421_v4 = vpop.f32.mrf.mxu0  ;;  %v1460_v37 = vadd.f32 %v1459_v3, %v1458_v1 }
  0xf2   : > { %v1461_v5 = vpop.f32.mrf.mxu1  ;;  %v924_v34 = vadd.f32 %v1420_v28, %v1925_v30 }
  0xf3   : > { %v1422_v6 = vpop.f32.mrf.mxu0 }
  0xf4   : > { %v1462_v7 = vpop.f32.mrf.mxu1  ;;  %v1423_v35 = vadd.f32 %v1422_v6, %v1421_v4  ;;  %v989_v40 = vadd.f32 %v1460_v37, %v924_v34 }
  0xf5   : > { %v1424_v8 = vpop.f32.mrf.mxu0  ;;  %v1463_v46 = vadd.f32 %v1462_v7, %v1461_v5 }
  0xf6   : > { %v1464_v9 = vpop.f32.mrf.mxu1  ;;  %v927_v41 = vadd.f32 %v1423_v35, %v1925_v30 }
  0xf7   : > { %v1425_v10 = vpop.f32.mrf.mxu0 }
  0xf8   : > { %v1465_v11 = vpop.f32.mrf.mxu1  ;;  %v1426_v42 = vadd.f32 %v1425_v10, %v1424_v8  ;;  %v992_v51 = vadd.f32 %v1463_v46, %v927_v41 }
  0xf9   : > { %v1427_v12 = vpop.f32.mrf.mxu0  ;;  %v1466_v57 = vadd.f32 %v1465_v11, %v1464_v9 }
  0xfa   : > { %v1467_v13 = vpop.f32.mrf.mxu1  ;;  %v932_v52 = vadd.f32 %v1426_v42, %v1925_v30 }
  0xfb   : > { %v1428_v14 = vpop.f32.mrf.mxu0 }
  0xfc   : > { %v1468_v15 = vpop.f32.mrf.mxu1  ;;  %v1429_v49 = vadd.f32 %v1428_v14, %v1427_v12  ;;  %v997_v0 = vadd.f32 %v1466_v57, %v932_v52 }
  0xfd   : > { %v1430_v16 = vpop.f32.mrf.mxu0  ;;  %v1469_v5 = vadd.f32 %v1468_v15, %v1467_v13 }
  0xfe   : > { %v1904_v17 = vpop.f32.mrf.mxu1  ;;  %v935_v62 = vadd.f32 %v1429_v49, %v1925_v30 }
  0xff   : > { %v1431_v18 = vpop.f32.mrf.mxu0 }
 0x100   : > { %v1906_v19 = vpop.f32.mrf.mxu1  ;;  %v1432_v1 = vadd.f32 %v1431_v18, %v1430_v16  ;;  %v1000_v9 = vadd.f32 %v1469_v5, %v935_v62 }
 0x101   : > { %v1433_v20 = vpop.f32.mrf.mxu0  ;;  %v1472_v35 = vadd.f32 %v1906_v19, %v1904_v17 }
 0x102   : > { %v1908_v21 = vpop.f32.mrf.mxu1  ;;  %v940_v16 = vadd.f32 %v1432_v1, %v1925_v30 }
 0x103   : > { %v1434_v22 = vpop.f32.mrf.mxu0 }
 0x104   : > { %v1910_v23 = vpop.f32.mrf.mxu1  ;;  %v1435_v11 = vadd.f32 %v1434_v22, %v1433_v20  ;;  %v1005_v41 = vadd.f32 %v1472_v35, %v940_v16 }
 0x105   : > { %v1912_v24 = vpop.f32.mrf.mxu0 }
 0x106   : > { %v1914_v25 = vpop.f32.mrf.mxu1 }
 0x107   : > { %v1916_v26 = vpop.f32.mrf.mxu0 }
 0x108   : > { %v1918_v27 = vpop.f32.mrf.mxu1 }
 0x109   : > { %v1920_v29 = vpop.f32.mrf.mxu0 }
 0x10a   : > { %v1927_v31 = vpop.f32.mrf.mxu1 }
 0x10b   : > { %v1929_v32 = vpop.f32.mrf.mxu0 }
 0x10c   : > { %v1931_v33 = vpop.f32.mrf.mxu1 }
 0x10d   : > { %v1498_v36 = vpop.f32.mrf.mxu0 }
 0x10e   : > { %v1538_v38 = vpop.f32.mrf.mxu1 }
 0x10f   : > { %v1499_v39 = vpop.f32.mrf.mxu0 }
 0x110   : > { %v1500_v43 = vadd.f32 %v1499_v39, %v1498_v36  ;;  %v1539_v44 = vpop.f32.mrf.mxu1  ;;  %v1438_v39 = vadd.f32 %v1916_v26, %v1912_v24  ;;  %v1441_v24 = vadd.f32 %v1929_v32, %v1920_v29 }
 0x111   : > { %v1501_v45 = vpop.f32.mrf.mxu0  ;;  %v1540_v53 = vadd.f32 %v1539_v44, %v1538_v38  ;;  %v943_v38 = vadd.f32 %v1435_v11, %v1925_v30 }
 0x112   : > { %v1054_v47 = vadd.f32 %v1500_v43, %v989_v40  ;;  %v1541_v48 = vpop.f32.mrf.mxu1 }
 0x113   : > { %v1502_v50 = vpop.f32.mrf.mxu0 }
 0x114   : > { %v1503_v54 = vadd.f32 %v1502_v50, %v1501_v45  ;;  %v1542_v55 = vpop.f32.mrf.mxu1  ;;  %v1119_v58 = vadd.f32 %v1540_v53, %v1054_v47  ;;  %v1475_v45 = vadd.f32 %v1910_v23, %v1908_v21  ;;  %v948_v50 = vadd.f32 %v1438_v39, %v1925_v30 }
 0x115   : > { %v1504_v56 = vpop.f32.mrf.mxu0  ;;  %v1543_v60 = vadd.f32 %v1542_v55, %v1541_v48  ;;  %v1478_v21 = vadd.f32 %v1918_v27, %v1914_v25 }
 0x116   : > { %v1057_v59 = vadd.f32 %v1503_v54, %v992_v51  ;;  %v1544_v61 = vpop.f32.mrf.mxu1  ;;  %v1149_v7 = vmax.f32 %v1119_v58, 0.0  ;;  %v1008_v49 = vadd.f32 %v1475_v45, %v943_v38 }
 0x117   : > { %v1505_v63 = vpop.f32.mrf.mxu0 }
 0x118   : > { %v1122_v2 = vadd.f32 %v1543_v60, %v1057_v59  ;;  %v1506_v3 = vadd.f32 %v1505_v63, %v1504_v56  ;;  %v1545_v4 = vpop.f32.mrf.mxu1  ;;  %v1013_v60 = vadd.f32 %v1478_v21, %v948_v50 }
 0x119   : > { %v1507_v6 = vpop.f32.mrf.mxu0  ;;  %v1546_v28 = vadd.f32 %v1545_v4, %v1544_v61  ;;  %v951_v61 = vadd.f32 %v1441_v24, %v1925_v30 }
 0x11a   : > { %v1150_v8 = vmax.f32 %v1122_v2, 0.0  ;;  %v1062_v10 = vadd.f32 %v1506_v3, %v997_v0  ;;  %v1547_v12 = vpop.f32.mrf.mxu1  ;;  %v1481_v0 = vadd.f32 %v1931_v33, %v1927_v31 }
 0x11b   : > { %v1508_v14 = vpop.f32.mrf.mxu0 }
 0x11c   : > { %v1382_v18 = vpack.c.bf16 %v1150_v8, %v1149_v7  ;;  %v1509_v34 = vadd.f32 %v1508_v14, %v1507_v6  ;;  %v1548_v13 = vpop.f32.mrf.mxu1  ;;  %v1127_v36 = vadd.f32 %v1546_v28, %v1062_v10  ;;  %v1016_v4 = vadd.f32 %v1481_v0, %v951_v61 }
 0x11d   : > { %v1510_v15 = vpop.f32.mrf.mxu0  ;;  %v1549_v22 = vadd.f32 %v1548_v13, %v1547_v12 }
 0x11e   : > { %1383 = vst [vmem:[%s1941_s29] sm:$0xff] %v1382_v18   ;;  %v1065_v20 = vadd.f32 %v1509_v34, %v1000_v9  ;;  %v1550_v37 = vpop.f32.mrf.mxu1  ;;  %v1151_v19 = vmax.f32 %v1127_v36, 0.0 }
 0x11f   : > { %v1511_v40 = vpop.f32.mrf.mxu0 }
 0x120   : > { %v1130_v42 = vadd.f32 %v1549_v22, %v1065_v20  ;;  %v1512_v43 = vadd.f32 %v1511_v40, %v1510_v15  ;;  %v1551_v44 = vpop.f32.mrf.mxu1 }
 0x121   : > { %v1513_v17 = vpop.f32.mrf.mxu0  ;;  %v1552_v52 = vadd.f32 %v1551_v44, %v1550_v37 }
 0x122   : > { %v1152_v46 = vmax.f32 %v1130_v42, 0.0  ;;  %v1070_v47 = vadd.f32 %v1512_v43, %v1005_v41  ;;  %v1553_v48 = vpop.f32.mrf.mxu1 }
 0x123   : > { %v1514_v51 = vpop.f32.mrf.mxu0 }
 0x124   : > { %v1387_v26 = vpack.c.bf16 %v1152_v46, %v1151_v19  ;;  %v1515_v53 = vadd.f32 %v1514_v51, %v1513_v17  ;;  %v1554_v54 = vpop.f32.mrf.mxu1  ;;  %v1135_v23 = vadd.f32 %v1552_v52, %v1070_v47 }
 0x125   : > { %v1516_v55 = vpop.f32.mrf.mxu0  ;;  %v1555_v57 = vadd.f32 %v1554_v54, %v1553_v48 }
 0x126   : > { %1399 = vst [vmem:[%s1941_s29 + $0x8] sm:$0xff] %v1387_v26   ;;  %v1073_v56 = vadd.f32 %v1515_v53, %v1008_v49  ;;  %v1556_v58 = vpop.f32.mrf.mxu1  ;;  %v1153_v1 = vmax.f32 %v1135_v23, 0.0 }
 0x127   : > { %v1517_v59 = vpop.f32.mrf.mxu0 }
 0x128   : > { %v1138_v62 = vadd.f32 %v1555_v57, %v1073_v56  ;;  %v1518_v29 = vadd.f32 %v1517_v59, %v1516_v55  ;;  %v1557_v32 = vpop.f32.mrf.mxu1 }
 0x129   : > { %v1519_v63 = vpop.f32.mrf.mxu0  ;;  %v1558_v6 = vadd.f32 %v1557_v32, %v1556_v58 }
 0x12a   : > { %v1154_v2 = vmax.f32 %v1138_v62, 0.0  ;;  %v1078_v25 = vadd.f32 %v1518_v29, %v1013_v60  ;;  %v1559_v27 = vpop.f32.mrf.mxu1 }
 0x12b   : > { %v1520_v3 = vpop.f32.mrf.mxu0 }
 0x12c   : > { %v1392_v5 = vpack.c.bf16 %v1154_v2, %v1153_v1  ;;  %v1521_v7 = vadd.f32 %v1520_v3, %v1519_v63  ;;  %v1560_v8 = vpop.f32.mrf.mxu1  ;;  %v1143_v30 = vadd.f32 %v1558_v6, %v1078_v25 }
 0x12d   : > { %v1561_v12 = vadd.f32 %v1560_v8, %v1559_v27 }
 0x12e   : > { %1400 = vst [vmem:[%s1941_s29 + $0x10] sm:$0xff] %v1392_v5   ;;  %v1081_v10 = vadd.f32 %v1521_v7, %v1016_v4  ;;  %v1155_v11 = vmax.f32 %v1143_v30, 0.0 }
 0x130   : > { %v1146_v9 = vadd.f32 %v1561_v12, %v1081_v10 }
 0x132   : > { %v1156_v14 = vmax.f32 %v1146_v9, 0.0 }
 0x134   : > { %v1397_v16 = vpack.c.bf16 %v1156_v14, %v1155_v11 }
 0x136   : > { %1401 = vst [vmem:[%s1941_s29 + $0x18] sm:$0xff] %v1397_v16  }
 0x137 PF: > { %s13_s12 = sadd.s32 1, %s1640_s12  }
 0x138   : > { %p10_p4 = scmp.ge.s32.totalorder %s13_s12, 4  }
 0x13a   :  { %12 = sbr.rel (!%p10_p4) target bundleno = 1 (0x1), region = 62 }

// kernel: vae_forward.11
= control target key start
LH: loop header
LB: loop body
LE: loop exit
PB: predicated region body
PF: predicated region fallthrough
CT: control target
= control target key end

     0   :  { %s2307_s12 = smov 0   ;;  %s2927_s0 = inlined_call_operand.vmem [shape: bf16[128,1152], index: 0, kind: input, shape index: {}]   ;;  %s2928_s1 = inlined_call_operand.vmem [shape: bf16[1152,256], index: 1, kind: input, shape index: {}]   ;;  %s2929_s2 = inlined_call_operand.vmem [shape: f32[1,256], index: 2, kind: input, shape index: {}]   ;;  %s2930_s3 = inlined_call_operand.vmem [shape: bf16[128,256], index: 3, kind: output, shape index: {}]  }
   0x1 LB: > { %s1775_s13 = sadd.s32 4294967295, %s2284_s12   ;;  %p1779_p0 = scmp.ge.s32.totalorder %s2284_s12, 1  ;;  %s2284_s12 = sphi %s2307_s12, %s13_s12  }
   0x2   : > { %p139_p1 = scmp.lt.s32.totalorder %s2284_s12, 3 }
   0x4   : > { %p140_p2 = pnand %p1779_p0, %p139_p1 }
   0x6   : > { %143 = sbr.rel (%p140_p2) target bundleno = 387 (0x183), region = 32 }
   0xb   : > { %v2010_v0 = vld [vmem:[%s2928_s1 + $0x74] ss:$8 sps:$4 sm:$0xff]   ;;  %v2014_v2 = vld [vmem:[%s2928_s1 + $0x70] ss:$8 sps:$4 sm:$0xff]   ;;  %v2016_v4 = vld [vmem:[%s2928_s1 + $0x64] ss:$8 sps:$4 sm:$0xff]  }
   0xc   : > { %v2012_v1 = vld [vmem:[%s2928_s1 + $0x174] ss:$8 sps:$4 sm:$0xff]   ;;  %1280 = vmatprep.subr.bf16.mxu0 %v2010_v0  ;;  %v2015_v3 = vld [vmem:[%s2928_s1 + $0x170] ss:$8 sps:$4 sm:$0xff]   ;;  %v2018_v5 = vld [vmem:[%s2928_s1 + $0x164] ss:$8 sps:$4 sm:$0xff]  }
   0xd   : > { %1353 = vmatprep.subr.bf16.mxu1 %v2012_v1  ;;  %1281 = vmatpush1.bf16.msra.mxu0 %v2014_v2  ;;  %v2020_v6 = vld [vmem:[%s2928_s1 + $0x60] ss:$8 sps:$4 sm:$0xff]   ;;  %v2022_v8 = vld [vmem:[%s2928_s1 + $0x54] ss:$8 sps:$4 sm:$0xff]   ;;  %v2026_v10 = vld [vmem:[%s2928_s1 + $0x50] ss:$8 sps:$4 sm:$0xff]  }
   0xe   : > { %1354 = vmatpush1.bf16.msra.mxu1 %v2015_v3  ;;  %1282 = vmatprep.subr.bf16.mxu0 %v2016_v4  ;;  %v2021_v7 = vld [vmem:[%s2928_s1 + $0x160] ss:$8 sps:$4 sm:$0xff]   ;;  %v2024_v9 = vld [vmem:[%s2928_s1 + $0x154] ss:$8 sps:$4 sm:$0xff]   ;;  %v2027_v11 = vld [vmem:[%s2928_s1 + $0x150] ss:$8 sps:$4 sm:$0xff]  }
   0xf   : > { %1355 = vmatprep.subr.bf16.mxu1 %v2018_v5  ;;  %v2028_v12 = vld [vmem:[%s2928_s1 + $0x44] ss:$8 sps:$4 sm:$0xff]   ;;  %v2032_v14 = vld [vmem:[%s2928_s1 + $0x40] ss:$8 sps:$4 sm:$0xff]   ;;  %v2034_v16 = vld [vmem:[%s2928_s1 + $0x34] ss:$8 sps:$4 sm:$0xff]  }
  0x10   : > { %v2030_v13 = vld [vmem:[%s2928_s1 + $0x144] ss:$8 sps:$4 sm:$0xff]   ;;  %v2033_v15 = vld [vmem:[%s2928_s1 + $0x140] ss:$8 sps:$4 sm:$0xff]   ;;  %v2036_v17 = vld [vmem:[%s2928_s1 + $0x134] ss:$8 sps:$4 sm:$0xff]  }
  0x11   : > { %1283 = vmatpush1.bf16.msra.mxu0 %v2020_v6  ;;  %v2038_v18 = vld [vmem:[%s2928_s1 + $0x30] ss:$8 sps:$4 sm:$0xff]   ;;  %v2040_v20 = vld [vmem:[%s2928_s1 + $0x24] ss:$8 sps:$4 sm:$0xff]   ;;  %v2044_v22 = vld [vmem:[%s2928_s1 + $0x20] ss:$8 sps:$4 sm:$0xff]  }
  0x12   : > { %1356 = vmatpush1.bf16.msra.mxu1 %v2021_v7  ;;  %1284 = vmatprep.subr.bf16.mxu0 %v2022_v8  ;;  %v2039_v19 = vld [vmem:[%s2928_s1 + $0x130] ss:$8 sps:$4 sm:$0xff]   ;;  %v2042_v21 = vld [vmem:[%s2928_s1 + $0x124] ss:$8 sps:$4 sm:$0xff]   ;;  %v2045_v23 = vld [vmem:[%s2928_s1 + $0x120] ss:$8 sps:$4 sm:$0xff]  }
  0x13   : > { %1357 = vmatprep.subr.bf16.mxu1 %v2024_v9  ;;  %v2046_v24 = vld [vmem:[%s2928_s1 + $0x14] ss:$8 sps:$4 sm:$0xff]   ;;  %v2050_v26 = vld [vmem:[%s2928_s1 + $0x10] ss:$8 sps:$4 sm:$0xff]   ;;  %v2052_v28 = vld [vmem:[%s2928_s1 + $0x4] ss:$8 sps:$4 sm:$0xff]  }
  0x14   : > { %v2048_v25 = vld [vmem:[%s2928_s1 + $0x114] ss:$8 sps:$4 sm:$0xff]   ;;  %v2051_v27 = vld [vmem:[%s2928_s1 + $0x110] ss:$8 sps:$4 sm:$0xff]   ;;  %v2054_v29 = vld [vmem:[%s2928_s1 + $0x104] ss:$8 sps:$4 sm:$0xff]  }
  0x15   : > { %1285 = vmatpush1.bf16.msra.mxu0 %v2026_v10  ;;  %s1780_s24 = sshll.u32 %s1775_s13, 3  ;;  %v2056_v30 = vld [vmem:[%s2928_s1] ss:$8 sps:$4 sm:$0xff]   ;;  %v2058_v32 = vld [vmem:[%s2928_s1 + $0xf4] ss:$8 sps:$4 sm:$0xff]  }
  0x16   : > { %1358 = vmatpush1.bf16.msra.mxu1 %v2027_v11  ;;  %1286 = vmatprep.subr.bf16.mxu0 %v2028_v12  ;;  %v2057_v31 = vld [vmem:[%s2928_s1 + $0x100] ss:$8 sps:$4 sm:$0xff]   ;;  %p166_p3 = scmp.lt.s32.totalorder %s1780_s24, 15  ;;  %v2060_v33 = vld [vmem:[%s2928_s1 + $0x1f4] ss:$8 sps:$4 sm:$0xff]  }
  0x17   : > { %1359 = vmatprep.subr.bf16.mxu1 %v2030_v13  ;;  %v2062_v34 = vld [vmem:[%s2928_s1 + $0xf0] ss:$8 sps:$4 sm:$0xff]   ;;  %v2064_v36 = vld [vmem:[%s2928_s1 + $0xe4] ss:$8 sps:$4 sm:$0xff]   ;;  %v2068_v38 = vld [vmem:[%s2928_s1 + $0xe0] ss:$8 sps:$4 sm:$0xff]  }
  0x18   : > { %v2063_v35 = vld [vmem:[%s2928_s1 + $0x1f0] ss:$8 sps:$4 sm:$0xff]   ;;  %s2954_s24 = smov (!%p166_p3, %s1780_s24), 15  ;;  %v2066_v37 = vld [vmem:[%s2928_s1 + $0x1e4] ss:$8 sps:$4 sm:$0xff]  }
  0x19   : > { %1287 = vmatpush1.bf16.msra.mxu0 %v2032_v14  ;;  %v2069_v39 = vld [vmem:[%s2928_s1 + $0x1e0] ss:$8 sps:$4 sm:$0xff]   ;;  %v2070_v40 = vld [vmem:[%s2928_s1 + $0xd4] ss:$8 sps:$4 sm:$0xff]   ;;  %s2000_s21 = smul.u32 36, %s2954_s24  ;;  %s1975_s15 = sshll.u32 %s2954_s24, 3 }
  0x1a   : > { %1360 = vmatpush1.bf16.msra.mxu1 %v2033_v15  ;;  %1288 = vmatprep.subr.bf16.mxu0 %v2034_v16  ;;  %v2072_v41 = vld [vmem:[%s2928_s1 + $0x1d4] ss:$8 sps:$4 sm:$0xff]   ;;  %v2074_v42 = vld [vmem:[%s2928_s1 + $0xd0] ss:$8 sps:$4 sm:$0xff]   ;;  %v2076_v44 = vld [vmem:[%s2928_s1 + $0xc4] ss:$8 sps:$4 sm:$0xff]   ;;  %s2906_s17 = scalar_lea.vmem %s2930_s3, %s1975_s15 }
  0x1b   : > { %1361 = vmatprep.subr.bf16.mxu1 %v2036_v17  ;;  %v2075_v43 = vld [vmem:[%s2928_s1 + $0x1d0] ss:$8 sps:$4 sm:$0xff]   ;;  %s2458_s13 = scalar_lea.vmem %s2927_s0, %s2000_s21  ;;  %v2078_v45 = vld [vmem:[%s2928_s1 + $0x1c4] ss:$8 sps:$4 sm:$0xff]   ;;  %v2080_v46 = vld [vmem:[%s2928_s1 + $0xc0] ss:$8 sps:$4 sm:$0xff]  }
  0x1c   : > { %v2081_v47 = vld [vmem:[%s2928_s1 + $0x1c0] ss:$8 sps:$4 sm:$0xff]   ;;  %v2082_v48 = vld [vmem:[%s2928_s1 + $0xb4] ss:$8 sps:$4 sm:$0xff]   ;;  %v2111_v51 = vld [vmem:[%s2458_s13 + $0xc] ss:$36 sps:$4 sm:$0xff]  }
  0x1d   : > { %1289 = vmatpush1.bf16.msra.mxu0 %v2038_v18  ;;  %v2108_v49 = vld [vmem:[%s2458_s13 + $0x4] ss:$36 sps:$4 sm:$0xff]   ;;  %v2084_v50 = vld [vmem:[%s2928_s1 + $0x1b4] ss:$8 sps:$4 sm:$0xff]   ;;  %v2086_v52 = vld [vmem:[%s2928_s1 + $0xb0] ss:$8 sps:$4 sm:$0xff]   ;;  %1385 = vmatprep.mubr.bf16.mxu1 %v2111_v51 }
  0x1e   : > { %1362 = vmatpush1.bf16.msra.mxu1 %v2039_v19  ;;  %1290 = vmatprep.subr.bf16.mxu0 %v2040_v20  ;;  %v2087_v53 = vld [vmem:[%s2928_s1 + $0x1b0] ss:$8 sps:$4 sm:$0xff]   ;;  %v2088_v54 = vld [vmem:[%s2928_s1 + $0xa4] ss:$8 sps:$4 sm:$0xff]   ;;  %v2092_v56 = vld [vmem:[%s2928_s1 + $0xa0] ss:$8 sps:$4 sm:$0xff]  }
  0x1f   : > { %1363 = vmatprep.subr.bf16.mxu1 %v2042_v21  ;;  %1312 = vmatprep.mubr.bf16.mxu0 %v2108_v49  ;;  %v2090_v55 = vld [vmem:[%s2928_s1 + $0x1a4] ss:$8 sps:$4 sm:$0xff]   ;;  %v2093_v57 = vld [vmem:[%s2928_s1 + $0x1a0] ss:$8 sps:$4 sm:$0xff]   ;;  %v2094_v58 = vld [vmem:[%s2928_s1 + $0x94] ss:$8 sps:$4 sm:$0xff]  }
  0x20   : > { %v2096_v59 = vld [vmem:[%s2928_s1 + $0x194] ss:$8 sps:$4 sm:$0xff]   ;;  %v2098_v60 = vld [vmem:[%s2928_s1 + $0x90] ss:$8 sps:$4 sm:$0xff]   ;;  %v2100_v62 = vld [vmem:[%s2928_s1 + $0x84] ss:$8 sps:$4 sm:$0xff]  }
  0x21   : > { %1291 = vmatpush1.bf16.msra.mxu0 %v2044_v22  ;;  %v2099_v61 = vld [vmem:[%s2928_s1 + $0x190] ss:$8 sps:$4 sm:$0xff]   ;;  %v2102_v63 = vld [vmem:[%s2928_s1 + $0x184] ss:$8 sps:$4 sm:$0xff]   ;;  %v2104_v0 = vld [vmem:[%s2928_s1 + $0x80] ss:$8 sps:$4 sm:$0xff]  }
  0x22   : > { %1364 = vmatpush1.bf16.msra.mxu1 %v2045_v23  ;;  %1292 = vmatprep.subr.bf16.mxu0 %v2046_v24  ;;  %v2105_v1 = vld [vmem:[%s2928_s1 + $0x180] ss:$8 sps:$4 sm:$0xff]   ;;  %v2114_v2 = vld [vmem:[%s2928_s1 + $0x274] ss:$8 sps:$4 sm:$0xff]   ;;  %v2112_v6 = vld [vmem:[%s2928_s1 + $0x270] ss:$8 sps:$4 sm:$0xff]  }
  0x23   : > { %1365 = vmatprep.subr.bf16.mxu1 %v2048_v25  ;;  %v2117_v3 = vld [vmem:[%s2928_s1 + $0x374] ss:$8 sps:$4 sm:$0xff]   ;;  %v2106_v4 = vld [vmem:[%s2458_s13] ss:$36 sps:$4 sm:$0xff]   ;;  %v2109_v5 = vld [vmem:[%s2458_s13 + $0x8] ss:$36 sps:$4 sm:$0xff]  }
  0x24   : > { %v2115_v7 = vld [vmem:[%s2928_s1 + $0x370] ss:$8 sps:$4 sm:$0xff]   ;;  %v2120_v8 = vld [vmem:[%s2928_s1 + $0x264] ss:$8 sps:$4 sm:$0xff]   ;;  %v2118_v10 = vld [vmem:[%s2928_s1 + $0x260] ss:$8 sps:$4 sm:$0xff]  }
  0x25   : > { %1293 = vmatpush1.bf16.msra.mxu0 %v2050_v26  ;;  %v2123_v9 = vld [vmem:[%s2928_s1 + $0x364] ss:$8 sps:$4 sm:$0xff]   ;;  %v2121_v12 = vld [vmem:[%s2928_s1 + $0x360] ss:$8 sps:$4 sm:$0xff]   ;;  %v2126_v13 = vld [vmem:[%s2928_s1 + $0x254] ss:$8 sps:$4 sm:$0xff]  }
  0x26   : > { %1366 = vmatpush1.bf16.msra.mxu1 %v2051_v27  ;;  %1294 = vmatprep.subr.bf16.mxu0 %v2052_v28  ;;  %v2160_v11 = vld [vmem:[%s2458_s13 + $0x4c] ss:$36 sps:$4 sm:$0xff]   ;;  %v2129_v14 = vld [vmem:[%s2928_s1 + $0x354] ss:$8 sps:$4 sm:$0xff]   ;;  %v2130_v22 = vld [vmem:[%s2928_s1 + $0x240] ss:$8 sps:$4 sm:$0xff]  }
  0x27   : > { %1367 = vmatprep.subr.bf16.mxu1 %v2054_v29  ;;  %v2124_v15 = vld [vmem:[%s2928_s1 + $0x250] ss:$8 sps:$4 sm:$0xff]   ;;  %v2168_v17 = vld [vmem:[%s2458_s13 + $0x48] ss:$36 sps:$4 sm:$0xff]   ;;  %v2138_v25 = vld [vmem:[%s2928_s1 + $0x234] ss:$8 sps:$4 sm:$0xff]  }
  0x28   : > { %v2127_v16 = vld [vmem:[%s2928_s1 + $0x350] ss:$8 sps:$4 sm:$0xff]   ;;  %v2132_v20 = vld [vmem:[%s2928_s1 + $0x244] ss:$8 sps:$4 sm:$0xff]   ;;  %v2133_v24 = vld [vmem:[%s2928_s1 + $0x340] ss:$8 sps:$4 sm:$0xff]  }
  0x29   : > { %1295 = vmatpush1.bf16.msra.mxu0 %v2056_v30  ;;  %v2169_v18 = vld [vmem:[%s2458_s13 + $0x54] ss:$36 sps:$4 sm:$0xff]   ;;  %v2135_v21 = vld [vmem:[%s2928_s1 + $0x344] ss:$8 sps:$4 sm:$0xff]   ;;  %v2187_v30 = vld [vmem:[%s2458_s13 + $0x9c] ss:$36 sps:$4 sm:$0xff]  }
  0x2a   : > { %1368 = vmatpush1.bf16.msra.mxu1 %v2057_v31  ;;  %1296 = vmatprep.subr.bf16.mxu0 %v2058_v32  ;;  %v2171_v19 = vld [vmem:[%s2458_s13 + $0x50] ss:$36 sps:$4 sm:$0xff]   ;;  %v2189_v31 = vld [vmem:[%s2458_s13 + $0x98] ss:$36 sps:$4 sm:$0xff]   ;;  %v2144_v32 = vld [vmem:[%s2928_s1 + $0x224] ss:$8 sps:$4 sm:$0xff]  }
  0x2b   : > { %1369 = vmatprep.subr.bf16.mxu1 %v2060_v33  ;;  %v2178_v23 = vld [vmem:[%s2458_s13 + $0x94] ss:$36 sps:$4 sm:$0xff]   ;;  %v2147_v33 = vld [vmem:[%s2928_s1 + $0x324] ss:$8 sps:$4 sm:$0xff]  }
  0x2c   : > { %v2141_v26 = vld [vmem:[%s2928_s1 + $0x334] ss:$8 sps:$4 sm:$0xff]   ;;  %v2136_v27 = vld [vmem:[%s2928_s1 + $0x230] ss:$8 sps:$4 sm:$0xff]  }
  0x2d   : > { %1297 = vmatpush2.bf16.msra.mxu0 %v2062_v34  ;;  %v2139_v28 = vld [vmem:[%s2928_s1 + $0x330] ss:$8 sps:$4 sm:$0xff]   ;;  %v2142_v34 = vld [vmem:[%s2928_s1 + $0x220] ss:$8 sps:$4 sm:$0xff]   ;;  %v2167_v49 = vld [vmem:[%s2928_s1 + $0x3f4] ss:$8 sps:$4 sm:$0xff]  }
  0x2e   : > { %1370 = vmatpush2.bf16.msra.mxu1 %v2063_v35  ;;  %1298 = vmatprep.subr.bf16.mxu0 %v2064_v36  ;;  %v2186_v29 = vld [vmem:[%s2458_s13 + $0x90] ss:$36 sps:$4 sm:$0xff]   ;;  %v2196_v35 = vld [vmem:[%s2458_s13 + $0xdc] ss:$36 sps:$4 sm:$0xff]  }
  0x2f   : > { %1371 = vmatprep.subr.bf16.mxu1 %v2066_v37  ;;  %v2145_v36 = vld [vmem:[%s2928_s1 + $0x320] ss:$8 sps:$4 sm:$0xff]   ;;  %v2150_v37 = vld [vmem:[%s2928_s1 + $0x214] ss:$8 sps:$4 sm:$0xff]   ;;  %v2165_v51 = vld [vmem:[%s2928_s1 + $0x3f0] ss:$8 sps:$4 sm:$0xff]  }
  0x31   : > { %1299 = vmatpush2.bf16.msra.mxu0 %v2068_v38  ;;  %v2153_v38 = vld [vmem:[%s2928_s1 + $0x314] ss:$8 sps:$4 sm:$0xff]  }
  0x32   : > { %1372 = vmatpush2.bf16.msra.mxu1 %v2069_v39  ;;  %1300 = vmatprep.subr.bf16.mxu0 %v2070_v40  ;;  %v2148_v39 = vld [vmem:[%s2928_s1 + $0x210] ss:$8 sps:$4 sm:$0xff]  }
  0x33   : > { %1373 = vmatprep.subr.bf16.mxu1 %v2072_v41  ;;  %v2151_v40 = vld [vmem:[%s2928_s1 + $0x310] ss:$8 sps:$4 sm:$0xff]  }
  0x34   : > { %v2204_v41 = vld [vmem:[%s2458_s13 + $0xd8] ss:$36 sps:$4 sm:$0xff]  }
  0x35   : > { %1301 = vmatpush2.bf16.msra.mxu0 %v2074_v42  ;;  %v2205_v42 = vld [vmem:[%s2458_s13 + $0xe4] ss:$36 sps:$4 sm:$0xff]  }
  0x36   : > { %1374 = vmatpush2.bf16.msra.mxu1 %v2075_v43  ;;  %1302 = vmatprep.subr.bf16.mxu0 %v2076_v44  ;;  %v2207_v43 = vld [vmem:[%s2458_s13 + $0xe0] ss:$36 sps:$4 sm:$0xff]  }
  0x37   : > { %1375 = vmatprep.subr.bf16.mxu1 %v2078_v45  ;;  %v2156_v44 = vld [vmem:[%s2928_s1 + $0x204] ss:$8 sps:$4 sm:$0xff]  }
  0x38   : > { %v2159_v45 = vld [vmem:[%s2928_s1 + $0x304] ss:$8 sps:$4 sm:$0xff]  }
  0x39   : > { %1303 = vmatpush2.bf16.msra.mxu0 %v2080_v46  ;;  %v2154_v46 = vld [vmem:[%s2928_s1 + $0x200] ss:$8 sps:$4 sm:$0xff]  }
  0x3a   : > { %1376 = vmatpush2.bf16.msra.mxu1 %v2081_v47  ;;  %1304 = vmatprep.subr.bf16.mxu0 %v2082_v48  ;;  %v2157_v47 = vld [vmem:[%s2928_s1 + $0x300] ss:$8 sps:$4 sm:$0xff]   ;;  %v2164_v48 = vld [vmem:[%s2928_s1 + $0x2f4] ss:$8 sps:$4 sm:$0xff]  }
  0x3b   : > { %1377 = vmatprep.subr.bf16.mxu1 %v2084_v50  ;;  %v2162_v50 = vld [vmem:[%s2928_s1 + $0x2f0] ss:$8 sps:$4 sm:$0xff]  }
  0x3d   : > { %1305 = vmatpush2.bf16.msra.mxu0 %v2086_v52  ;;  %v2174_v52 = vld [vmem:[%s2928_s1 + $0x2e4] ss:$8 sps:$4 sm:$0xff]  }
  0x3e   : > { %1378 = vmatpush2.bf16.msra.mxu1 %v2087_v53  ;;  %1306 = vmatprep.subr.bf16.mxu0 %v2088_v54  ;;  %v2177_v53 = vld [vmem:[%s2928_s1 + $0x3e4] ss:$8 sps:$4 sm:$0xff]   ;;  %v2228_v54 = vld [vmem:[%s2458_s13 + $0x14] ss:$36 sps:$4 sm:$0xff]  }
  0x3f   : > { %1379 = vmatprep.subr.bf16.mxu1 %v2090_v55  ;;  %v2231_v55 = vld [vmem:[%s2458_s13 + $0x1c] ss:$36 sps:$4 sm:$0xff]  }
  0x41   : > { %1307 = vmatpush2.bf16.msra.mxu0 %v2092_v56  ;;  %v2172_v56 = vld [vmem:[%s2928_s1 + $0x2e0] ss:$8 sps:$4 sm:$0xff]  }
  0x42   : > { %1380 = vmatpush2.bf16.msra.mxu1 %v2093_v57  ;;  %1308 = vmatprep.subr.bf16.mxu0 %v2094_v58  ;;  %v2175_v57 = vld [vmem:[%s2928_s1 + $0x3e0] ss:$8 sps:$4 sm:$0xff]   ;;  %v2182_v58 = vld [vmem:[%s2928_s1 + $0x2d4] ss:$8 sps:$4 sm:$0xff]  }
  0x43   : > { %1381 = vmatprep.subr.bf16.mxu1 %v2096_v59  ;;  %v2185_v59 = vld [vmem:[%s2928_s1 + $0x3d4] ss:$8 sps:$4 sm:$0xff]  }
  0x45   : > { %1309 = vmatpush2.bf16.msra.mxu0 %v2098_v60  ;;  %v2180_v60 = vld [vmem:[%s2928_s1 + $0x2d0] ss:$8 sps:$4 sm:$0xff]  }
  0x46   : > { %1382 = vmatpush2.bf16.msra.mxu1 %v2099_v61  ;;  %1310 = vmatprep.subr.bf16.mxu0 %v2100_v62  ;;  %v2183_v61 = vld [vmem:[%s2928_s1 + $0x3d0] ss:$8 sps:$4 sm:$0xff]   ;;  %v2192_v62 = vld [vmem:[%s2928_s1 + $0x2c4] ss:$8 sps:$4 sm:$0xff]  }
  0x47   : > { %1383 = vmatprep.subr.bf16.mxu1 %v2102_v63  ;;  %v2195_v63 = vld [vmem:[%s2928_s1 + $0x3c4] ss:$8 sps:$4 sm:$0xff]  }
  0x49   : > { %1311 = vmatpush2.bf16.msra.mxu0 %v2104_v0  ;;  %v2190_v0 = vld [vmem:[%s2928_s1 + $0x2c0] ss:$8 sps:$4 sm:$0xff]  }
  0x4a   : > { %1384 = vmatpush2.bf16.msra.mxu1 %v2105_v1  ;;  %1426 = vmatprep.subr.bf16.mxu0 %v2114_v2  ;;  %v2193_v1 = vld [vmem:[%s2928_s1 + $0x3c0] ss:$8 sps:$4 sm:$0xff]   ;;  %v2200_v2 = vld [vmem:[%s2928_s1 + $0x2b4] ss:$8 sps:$4 sm:$0xff]  }
  0x4b   : > { %1499 = vmatprep.subr.bf16.mxu1 %v2117_v3  ;;  %v2203_v3 = vld [vmem:[%s2928_s1 + $0x3b4] ss:$8 sps:$4 sm:$0xff]  }
  0x4c   : > { %1313 = vmatmul.mubr.bf16.vlgmr.msra.gmra.mxu0 %v2106_v4  ;;  %v2198_v4 = vld [vmem:[%s2928_s1 + $0x2b0] ss:$8 sps:$4 sm:$0xff]  }
  0x4d   : > { %1386 = vmatmul.mubr.bf16.vlgmr.msra.gmra.mxu1 %v2109_v5  ;;  %1427 = vmatpush1.bf16.msra.mxu0 %v2112_v6  ;;  %v2201_v5 = vld [vmem:[%s2928_s1 + $0x3b0] ss:$8 sps:$4 sm:$0xff]   ;;  %v2210_v6 = vld [vmem:[%s2928_s1 + $0x2a4] ss:$8 sps:$4 sm:$0xff]  }
  0x4e   : > { %1500 = vmatpush1.bf16.msra.mxu1 %v2115_v7  ;;  %1428 = vmatprep.subr.bf16.mxu0 %v2120_v8  ;;  %v2213_v7 = vld [vmem:[%s2928_s1 + $0x3a4] ss:$8 sps:$4 sm:$0xff]   ;;  %v2208_v8 = vld [vmem:[%s2928_s1 + $0x2a0] ss:$8 sps:$4 sm:$0xff]  }
  0x4f   : > { %1501 = vmatprep.subr.bf16.mxu1 %v2123_v9  ;;  %1322 = vmatprep.mubr.bf16.mxu0 %v2160_v11  ;;  %v2211_v9 = vld [vmem:[%s2928_s1 + $0x3a0] ss:$8 sps:$4 sm:$0xff]   ;;  %v2219_v11 = vld [vmem:[%s2928_s1 + $0x394] ss:$8 sps:$4 sm:$0xff]  }
  0x50   : > { %1395 = vmatprep.mubr.bf16.mxu1 %v2169_v18  ;;  %v2234_v18 = vld [vmem:[%s2928_s1 + $0x474] ss:$8 sps:$4 sm:$0xff]  }
  0x51   : > { %1429 = vmatpush1.bf16.msra.mxu0 %v2118_v10  ;;  %v2216_v10 = vld [vmem:[%s2928_s1 + $0x294] ss:$8 sps:$4 sm:$0xff]  }
  0x52   : > { %1502 = vmatpush1.bf16.msra.mxu1 %v2121_v12  ;;  %1430 = vmatprep.subr.bf16.mxu0 %v2126_v13  ;;  %v2214_v12 = vld [vmem:[%s2928_s1 + $0x290] ss:$8 sps:$4 sm:$0xff]  }
  0x53   : > { %1503 = vmatprep.subr.bf16.mxu1 %v2129_v14  ;;  %v2217_v13 = vld [vmem:[%s2928_s1 + $0x390] ss:$8 sps:$4 sm:$0xff]   ;;  %v2222_v14 = vld [vmem:[%s2928_s1 + $0x284] ss:$8 sps:$4 sm:$0xff]  }
  0x54   : > { %1323 = vmatmul.mubr.bf16.gmra.mxu0 %v2168_v17  ;;  %v2223_v17 = vld [vmem:[%s2928_s1 + $0x380] ss:$8 sps:$4 sm:$0xff]  }
  0x55   : > { %1396 = vmatmul.mubr.bf16.gmra.mxu1 %v2171_v19  ;;  %1431 = vmatpush1.bf16.msra.mxu0 %v2124_v15  ;;  %v2225_v15 = vld [vmem:[%s2928_s1 + $0x384] ss:$8 sps:$4 sm:$0xff]   ;;  %v2226_v19 = vld [vmem:[%s2458_s13 + $0x10] ss:$36 sps:$4 sm:$0xff]  }
  0x56   : > { %1504 = vmatpush1.bf16.msra.mxu1 %v2127_v16  ;;  %1432 = vmatprep.subr.bf16.mxu0 %v2132_v20  ;;  %v2220_v16 = vld [vmem:[%s2928_s1 + $0x280] ss:$8 sps:$4 sm:$0xff]   ;;  %v2229_v20 = vld [vmem:[%s2458_s13 + $0x18] ss:$36 sps:$4 sm:$0xff]  }
  0x57   : > { %1505 = vmatprep.subr.bf16.mxu1 %v2135_v21  ;;  %1332 = vmatprep.mubr.bf16.mxu0 %v2178_v23  ;;  %v2232_v21 = vld [vmem:[%s2928_s1 + $0x470] ss:$8 sps:$4 sm:$0xff]   ;;  %v2238_v23 = vld [vmem:[%s2458_s13 + $0x5c] ss:$36 sps:$4 sm:$0xff]  }
  0x58   : > { %1405 = vmatprep.mubr.bf16.mxu1 %v2187_v30  ;;  %v2249_v30 = vld [vmem:[%s2928_s1 + $0x444] ss:$8 sps:$4 sm:$0xff]  }
  0x59   : > { %1433 = vmatpush1.bf16.msra.mxu0 %v2130_v22  ;;  %v2237_v22 = vld [vmem:[%s2928_s1 + $0x464] ss:$8 sps:$4 sm:$0xff]  }
  0x5a   : > { %1506 = vmatpush1.bf16.msra.mxu1 %v2133_v24  ;;  %1434 = vmatprep.subr.bf16.mxu0 %v2138_v25  ;;  %v2240_v24 = vld [vmem:[%s2458_s13 + $0x64] ss:$36 sps:$4 sm:$0xff]  }
  0x5b   : > { %1507 = vmatprep.subr.bf16.mxu1 %v2141_v26  ;;  %v2235_v25 = vld [vmem:[%s2928_s1 + $0x460] ss:$8 sps:$4 sm:$0xff]   ;;  %v2246_v26 = vld [vmem:[%s2928_s1 + $0x454] ss:$8 sps:$4 sm:$0xff]  }
  0x5c   : > { %1333 = vmatmul.mubr.bf16.gmra.mxu0 %v2186_v29  ;;  %v2244_v29 = vld [vmem:[%s2928_s1 + $0x450] ss:$8 sps:$4 sm:$0xff]  }
  0x5d   : > { %1406 = vmatmul.mubr.bf16.gmra.mxu1 %v2189_v31  ;;  %1435 = vmatpush1.bf16.msra.mxu0 %v2136_v27  ;;  %v2242_v27 = vld [vmem:[%s2458_s13 + $0x58] ss:$36 sps:$4 sm:$0xff]   ;;  %v2250_v31 = vld [vmem:[%s2458_s13 + $0xa4] ss:$36 sps:$4 sm:$0xff]  }
  0x5e   : > { %1508 = vmatpush1.bf16.msra.mxu1 %v2139_v28  ;;  %1436 = vmatprep.subr.bf16.mxu0 %v2144_v32  ;;  %v2243_v28 = vld [vmem:[%s2458_s13 + $0x60] ss:$36 sps:$4 sm:$0xff]   ;;  %v2252_v32 = vld [vmem:[%s2458_s13 + $0xac] ss:$36 sps:$4 sm:$0xff]  }
  0x5f   : > { %1509 = vmatprep.subr.bf16.mxu1 %v2147_v33  ;;  %1342 = vmatprep.mubr.bf16.mxu0 %v2196_v35  ;;  %v2247_v33 = vld [vmem:[%s2928_s1 + $0x440] ss:$8 sps:$4 sm:$0xff]  }
  0x60   : > { %1415 = vmatprep.mubr.bf16.mxu1 %v2205_v42  ;;  %v2254_v35 = vld [vmem:[%s2458_s13 + $0xa0] ss:$36 sps:$4 sm:$0xff]   ;;  %v2270_v42 = vld [vmem:[%s2928_s1 + $0x414] ss:$8 sps:$4 sm:$0xff]  }
  0x61   : > { %1437 = vmatpush1.bf16.msra.mxu0 %v2142_v34  ;;  %v2258_v34 = vld [vmem:[%s2928_s1 + $0x434] ss:$8 sps:$4 sm:$0xff]  }
  0x62   : > { %1510 = vmatpush1.bf16.msra.mxu1 %v2145_v36  ;;  %1438 = vmatprep.subr.bf16.mxu0 %v2150_v37  ;;  %v2255_v36 = vld [vmem:[%s2458_s13 + $0xa8] ss:$36 sps:$4 sm:$0xff]   ;;  %v2256_v37 = vld [vmem:[%s2928_s1 + $0x430] ss:$8 sps:$4 sm:$0xff]  }
  0x63   : > { %1511 = vmatprep.subr.bf16.mxu1 %v2153_v38  ;;  %v2261_v38 = vld [vmem:[%s2928_s1 + $0x424] ss:$8 sps:$4 sm:$0xff]  }
  0x64   : > { %1343 = vmatmul.mubr.bf16.gmra.mxu0 %v2204_v41  ;;  %v2259_v41 = vld [vmem:[%s2928_s1 + $0x420] ss:$8 sps:$4 sm:$0xff]  }
  0x65   : > { %1416 = vmatmul.mubr.bf16.gmra.mxu1 %v2207_v43  ;;  %1439 = vmatpush1.bf16.msra.mxu0 %v2148_v39  ;;  %v2262_v39 = vld [vmem:[%s2458_s13 + $0xec] ss:$36 sps:$4 sm:$0xff]  }
  0x66   : > { %1512 = vmatpush1.bf16.msra.mxu1 %v2151_v40  ;;  %1440 = vmatprep.subr.bf16.mxu0 %v2156_v44  ;;  %v2264_v40 = vld [vmem:[%s2458_s13 + $0xf4] ss:$36 sps:$4 sm:$0xff]   ;;  %v2266_v43 = vld [vmem:[%s2458_s13 + $0xe8] ss:$36 sps:$4 sm:$0xff]  }
  0x67   : > { %1513 = vmatprep.subr.bf16.mxu1 %v2159_v45  ;;  %1458 = vmatprep.mubr.bf16.mxu0 %v2228_v54  ;;  %v2267_v44 = vld [vmem:[%s2458_s13 + $0xf0] ss:$36 sps:$4 sm:$0xff]  }
  0x68   : > { %1531 = vmatprep.mubr.bf16.mxu1 %v2231_v55  ;;  %v2268_v45 = vld [vmem:[%s2928_s1 + $0x410] ss:$8 sps:$4 sm:$0xff]  }
  0x69   : > { %1441 = vmatpush1.bf16.msra.mxu0 %v2154_v46  ;;  %v2273_v46 = vld [vmem:[%s2928_s1 + $0x404] ss:$8 sps:$4 sm:$0xff]  }
  0x6a   : > { %1514 = vmatpush1.bf16.msra.mxu1 %v2157_v47  ;;  %1442 = vmatprep.subr.bf16.mxu0 %v2164_v48  ;;  %v2271_v47 = vld [vmem:[%s2928_s1 + $0x400] ss:$8 sps:$4 sm:$0xff]   ;;  %v2286_v48 = vmov 0  }
  0x6b   : > { %1515 = vmatprep.subr.bf16.mxu1 %v2167_v49  ;;  %v2274_v49 = vld [vmem:[%s2458_s13 + $0x20] ss:$36 sps:$4 sm:$0xff]  }
  0x6d   : > { %1443 = vmatpush2.bf16.msra.mxu0 %v2162_v50  ;;  %v2275_v50 = vld [vmem:[%s2458_s13 + $0xb0] ss:$36 sps:$4 sm:$0xff]  }
  0x6e   : > { %1516 = vmatpush2.bf16.msra.mxu1 %v2165_v51  ;;  %1444 = vmatprep.subr.bf16.mxu0 %v2174_v52  ;;  %v2276_v51 = vld [vmem:[%s2458_s13 + $0x68] ss:$36 sps:$4 sm:$0xff]   ;;  %v2277_v52 = vld [vmem:[%s2458_s13 + $0xf8] ss:$36 sps:$4 sm:$0xff]  }
  0x6f   : > { %1517 = vmatprep.subr.bf16.mxu1 %v2177_v53 }
  0x71   : > { %1445 = vmatpush2.bf16.msra.mxu0 %v2172_v56 }
  0x72   : > { %1518 = vmatpush2.bf16.msra.mxu1 %v2175_v57  ;;  %1446 = vmatprep.subr.bf16.mxu0 %v2182_v58 }
  0x73   : > { %1519 = vmatprep.subr.bf16.mxu1 %v2185_v59 }
  0x75   : > { %1447 = vmatpush2.bf16.msra.mxu0 %v2180_v60 }
  0x76   : > { %1520 = vmatpush2.bf16.msra.mxu1 %v2183_v61  ;;  %1448 = vmatprep.subr.bf16.mxu0 %v2192_v62 }
  0x77   : > { %1521 = vmatprep.subr.bf16.mxu1 %v2195_v63 }
  0x79   : > { %1449 = vmatpush2.bf16.msra.mxu0 %v2190_v0 }
  0x7a   : > { %1522 = vmatpush2.bf16.msra.mxu1 %v2193_v1  ;;  %1450 = vmatprep.subr.bf16.mxu0 %v2200_v2 }
  0x7b   : > { %1523 = vmatprep.subr.bf16.mxu1 %v2203_v3 }
  0x7d   : > { %1451 = vmatpush2.bf16.msra.mxu0 %v2198_v4 }
  0x7e   : > { %1524 = vmatpush2.bf16.msra.mxu1 %v2201_v5  ;;  %1452 = vmatprep.subr.bf16.mxu0 %v2210_v6 }
  0x7f   : > { %1525 = vmatprep.subr.bf16.mxu1 %v2213_v7 }
  0x81   : > { %1453 = vmatpush2.bf16.msra.mxu0 %v2208_v8 }
  0x82   : > { %1526 = vmatpush2.bf16.msra.mxu1 %v2211_v9  ;;  %1454 = vmatprep.subr.bf16.mxu0 %v2216_v10 }
  0x83   : > { %1527 = vmatprep.subr.bf16.mxu1 %v2219_v11 }
  0x85   : > { %1455 = vmatpush2.bf16.msra.mxu0 %v2214_v12 }
  0x86   : > { %1528 = vmatpush2.bf16.msra.mxu1 %v2217_v13  ;;  %1456 = vmatprep.subr.bf16.mxu0 %v2222_v14 }
  0x87   : > { %1529 = vmatprep.subr.bf16.mxu1 %v2225_v15 }
  0x89   : > { %1457 = vmatpush2.bf16.msra.mxu0 %v2220_v16 }
  0x8a   : > { %1530 = vmatpush2.bf16.msra.mxu1 %v2223_v17  ;;  %1572 = vmatprep.subr.bf16.mxu0 %v2234_v18 }
  0x8b   : > { %1984 = vmatprep.subr.bf16.mxu1 %v2234_v18 }
  0x8c   : > { %1459 = vmatmul.mubr.bf16.vlgmr.msra.gmra.mxu0 %v2226_v19 }
  0x8d   : > { %1532 = vmatmul.mubr.bf16.vlgmr.msra.gmra.mxu1 %v2229_v20  ;;  %1573 = vmatpush1.bf16.msra.mxu0 %v2232_v21 }
  0x8e   : > { %1992 = vmatpush1.bf16.msra.mxu1 %v2232_v21  ;;  %1574 = vmatprep.subr.bf16.mxu0 %v2237_v22 }
  0x8f   : > { %1985 = vmatprep.subr.bf16.mxu1 %v2237_v22  ;;  %1468 = vmatprep.mubr.bf16.mxu0 %v2238_v23 }
  0x90   : > { %1541 = vmatprep.mubr.bf16.mxu1 %v2240_v24 }
  0x91   : > { %1575 = vmatpush1.bf16.msra.mxu0 %v2235_v25 }
  0x92   : > { %1993 = vmatpush1.bf16.msra.mxu1 %v2235_v25  ;;  %1576 = vmatprep.subr.bf16.mxu0 %v2246_v26 }
  0x93   : > { %1986 = vmatprep.subr.bf16.mxu1 %v2246_v26 }
  0x94   : > { %1469 = vmatmul.mubr.bf16.gmra.mxu0 %v2242_v27  ;;  %v366_v27 = vlaneseq }
  0x95   : > { %1542 = vmatmul.mubr.bf16.gmra.mxu1 %v2243_v28  ;;  %1577 = vmatpush1.bf16.msra.mxu0 %v2244_v29 }
  0x96   : > { %1994 = vmatpush1.bf16.msra.mxu1 %v2244_v29  ;;  %1578 = vmatprep.subr.bf16.mxu0 %v2249_v30 }
  0x97   : > { %1987 = vmatprep.subr.bf16.mxu1 %v2249_v30  ;;  %1478 = vmatprep.mubr.bf16.mxu0 %v2250_v31 }
  0x98   : > { %1551 = vmatprep.mubr.bf16.mxu1 %v2252_v32  ;;  %v367_v32 = vshrl.u32 %v366_v27, 7 }
  0x99   : > { %1579 = vmatpush1.bf16.msra.mxu0 %v2247_v33 }
  0x9a   : > { %1995 = vmatpush1.bf16.msra.mxu1 %v2247_v33  ;;  %1580 = vmatprep.subr.bf16.mxu0 %v2258_v34 }
  0x9b   : > { %1988 = vmatprep.subr.bf16.mxu1 %v2258_v34 }
  0x9c   : > { %1479 = vmatmul.mubr.bf16.gmra.mxu0 %v2254_v35 }
  0x9d   : > { %1552 = vmatmul.mubr.bf16.gmra.mxu1 %v2255_v36  ;;  %1581 = vmatpush1.bf16.msra.mxu0 %v2256_v37 }
  0x9e   : > { %1996 = vmatpush1.bf16.msra.mxu1 %v2256_v37  ;;  %1582 = vmatprep.subr.bf16.mxu0 %v2261_v38  ;;  %v368_v37 = vsub.s32 0, %v367_v32 }
  0x9f   : > { %1989 = vmatprep.subr.bf16.mxu1 %v2261_v38  ;;  %1488 = vmatprep.mubr.bf16.mxu0 %v2262_v39  ;;  %v364_v38 = vld [vmem:[%s2929_s2] sm:$0x3]  ;;  %v372_v39 = vsub.s32 1, %v367_v32 }
  0xa0   : > { %1561 = vmatprep.mubr.bf16.mxu1 %v2264_v40 }
  0xa1   : > { %1583 = vmatpush1.bf16.msra.mxu0 %v2259_v41 }
  0xa2   : > { %1997 = vmatpush1.bf16.msra.mxu1 %v2259_v41  ;;  %1584 = vmatprep.subr.bf16.mxu0 %v2270_v42 }
  0xa3   : > { %1990 = vmatprep.subr.bf16.mxu1 %v2270_v42 }
  0xa4   : > { %1489 = vmatmul.mubr.bf16.gmra.mxu0 %v2266_v43 }
  0xa5   : > { %1562 = vmatmul.mubr.bf16.gmra.mxu1 %v2267_v44  ;;  %1585 = vmatpush1.bf16.msra.mxu0 %v2268_v45  ;;  %v369_v44 = vrot.slane %v364_v38, %v368_v37 }
  0xa6   : > { %1998 = vmatpush1.bf16.msra.mxu1 %v2268_v45  ;;  %1586 = vmatprep.subr.bf16.mxu0 %v2273_v46  ;;  %v373_v45 = vrot.slane %v364_v38, %v372_v39 }
  0xa7   : > { %1991 = vmatprep.subr.bf16.mxu1 %v2273_v46  ;;  %1604 = vmatprep.mubr.bf16.mxu0 %v2286_v48 }
  0xa8   : > { %1624 = vmatprep.mubr.bf16.mxu1 %v2286_v48 }
  0xa9   : > { %1587 = vmatpush1.bf16.msra.mxu0 %v2271_v47 }
  0xaa   : > { %1999 = vmatpush1.bf16.msra.mxu1 %v2271_v47 }
  0xac   : > { %1605 = vmatmul.mubr.bf16.vlgmr.msra.gmra.mxu0 %v2274_v49 }
  0xad   : > { %1625 = vmatmul.mubr.bf16.vlgmr.msra.gmra.mxu1 %v2275_v50  ;;  %1614 = vmatprep.mubr.bf16.mxu0 %v2286_v48 }
  0xae   : > { %1634 = vmatprep.mubr.bf16.mxu1 %v2286_v48 }
  0xb4   : > { %1615 = vmatmul.mubr.bf16.gmra.mxu0 %v2276_v51 }
  0xb5   : > { %1635 = vmatmul.mubr.bf16.gmra.mxu1 %v2277_v52 }
 0x10c   : > { %v1314_v53 = vpop.f32.mrf.mxu0 }
 0x10d   : > { %v2793_v54 = vpop.f32.mrf.mxu1  ;;  %v1315_v50 = vadd.f32 %v1314_v53, %v369_v44 }
 0x10e   : > { %v1316_v55 = vpop.f32.mrf.mxu0 }
 0x10f   : > { %v2795_v56 = vpop.f32.mrf.mxu1  ;;  %v1317_v52 = vadd.f32 %v1316_v55, %v373_v45  ;;  %v1388_v37 = vadd.f32 %v2793_v54, %v1315_v50 }
 0x110   : > { %v1318_v57 = vpop.f32.mrf.mxu0 }
 0x111   : > { %v2797_v58 = vpop.f32.mrf.mxu1  ;;  %v1319_v27 = vadd.f32 %v1318_v57, %v369_v44  ;;  %v1390_v53 = vadd.f32 %v2795_v56, %v1317_v52 }
 0x112   : > { %v1320_v59 = vpop.f32.mrf.mxu0 }
 0x113   : > { %v2799_v60 = vpop.f32.mrf.mxu1  ;;  %v1392_v55 = vadd.f32 %v2797_v58, %v1319_v27 }
 0x114   : > { %v1324_v61 = vpop.f32.mrf.mxu0 }
 0x115   : > { %v2801_v62 = vpop.f32.mrf.mxu1 }
 0x116   : > { %v1326_v63 = vpop.f32.mrf.mxu0 }
 0x117   : > { %v2803_v0 = vpop.f32.mrf.mxu1 }
 0x118   : > { %v1328_v1 = vpop.f32.mrf.mxu0 }
 0x119   : > { %v2805_v2 = vpop.f32.mrf.mxu1  ;;  %v1329_v38 = vadd.f32 %v1328_v1, %v369_v44 }
 0x11a   : > { %v1330_v3 = vpop.f32.mrf.mxu0 }
 0x11b   : > { %v2807_v4 = vpop.f32.mrf.mxu1  ;;  %v1331_v39 = vadd.f32 %v1330_v3, %v373_v45 }
 0x11c   : > { %v1334_v5 = vpop.f32.mrf.mxu0 }
 0x11d   : > { %v1407_v6 = vpop.f32.mrf.mxu1  ;;  %v1335_v51 = vadd.f32 %v1334_v5, %v369_v44 }
 0x11e   : > { %v1336_v7 = vpop.f32.mrf.mxu0 }
 0x11f   : > { %v2809_v8 = vpop.f32.mrf.mxu1  ;;  %v1337_v32 = vadd.f32 %v1336_v7, %v373_v45 }
 0x120   : > { %v1338_v9 = vpop.f32.mrf.mxu0 }
 0x121   : > { %v2811_v10 = vpop.f32.mrf.mxu1  ;;  %v1339_v57 = vadd.f32 %v1338_v9, %v369_v44  ;;  %v1404_v9 = vadd.f32 %v2807_v4, %v1331_v39 }
 0x122   : > { %v1340_v11 = vpop.f32.mrf.mxu0 }
 0x123   : > { %v2813_v12 = vpop.f32.mrf.mxu1  ;;  %v1341_v5 = vadd.f32 %v1340_v11, %v373_v45 }
 0x124   : > { %v1344_v13 = vpop.f32.mrf.mxu0 }
 0x125   : > { %v2815_v14 = vpop.f32.mrf.mxu1 }
 0x126   : > { %v2817_v15 = vpop.f32.mrf.mxu0 }
 0x127   : > { %v2819_v16 = vpop.f32.mrf.mxu1  ;;  %v1347_v56 = vadd.f32 %v2817_v15, %v373_v45 }
 0x128   : > { %v2821_v17 = vpop.f32.mrf.mxu0 }
 0x129   : > { %v2823_v18 = vpop.f32.mrf.mxu1 }
 0x12a   : > { %v2825_v19 = vpop.f32.mrf.mxu0 }
 0x12b   : > { %v2827_v20 = vpop.f32.mrf.mxu1 }
 0x14c   : > { %v1460_v21 = vpop.f32.mrf.mxu0 }
 0x14d   : > { %v2829_v22 = vpop.f32.mrf.mxu1 }
 0x14e   : > { %v1462_v23 = vpop.f32.mrf.mxu0 }
 0x14f   : > { %v2831_v24 = vpop.f32.mrf.mxu1  ;;  %v1463_v11 = vadd.f32 %v1462_v23, %v1390_v53  ;;  %v1420_v23 = vadd.f32 %v2819_v16, %v1347_v56 }
 0x150   : > { %v2833_v25 = vpop.f32.mrf.mxu0 }
 0x151   : > { %v2835_v26 = vpop.f32.mrf.mxu1 }
 0x152   : > { %2931 = vst [vmem:[#allocation2_spill] sm:$0xff] %v2835_v26  ;;  %v2837_v28 = vpop.f32.mrf.mxu0  ;;  %v1408_v26 = vadd.f32 %v1407_v6, %v1335_v51  ;;  %v1402_v6 = vadd.f32 %v2805_v2, %v1329_v38  ;;  %v1465_v2 = vadd.f32 %v2833_v25, %v1392_v55 }
 0x153   : > { %v2839_v29 = vpop.f32.mrf.mxu1 }
 0x154   : > { %2932 = vst [vmem:[#allocation3_spill] sm:$0xff] %v2839_v29  ;;  %v2841_v30 = vpop.f32.mrf.mxu0 }
 0x155   : > { %v2843_v31 = vpop.f32.mrf.mxu1 }
 0x156   : > { %2933 = vst [vmem:[#allocation4_spill] sm:$0xff] %v2843_v31  ;;  %v2845_v33 = vpop.f32.mrf.mxu0 }
 0x157   : > { %v2847_v34 = vpop.f32.mrf.mxu1 }
 0x158   : > { %2934 = vst [vmem:[#allocation5_spill] sm:$0xff] %v2847_v34  ;;  %v2849_v35 = vpop.f32.mrf.mxu0  ;;  %v1325_v34 = vadd.f32 %v1324_v61, %v369_v44  ;;  %v1345_v61 = vadd.f32 %v1344_v13, %v369_v44  ;;  %v1412_v13 = vadd.f32 %v2811_v10, %v1339_v57 }
 0x159   : > { %2935 = vst [vmem:[#allocation6_spill] sm:$0xff] %v2849_v35  ;;  %v2851_v36 = vpop.f32.mrf.mxu1 }
 0x15a   : > { %2936 = vst [vmem:[#allocation7_spill] sm:$0xff] %v2851_v36  ;;  %v2856_v40 = vpop.f32.mrf.mxu0  ;;  %v1398_v54 = vadd.f32 %v2801_v62, %v1325_v34  ;;  %v1351_v62 = vadd.f32 %v2825_v19, %v373_v45  ;;  %v1418_v15 = vadd.f32 %v2815_v14, %v1345_v61 }
 0x15b   : > { %2937 = vst [vmem:[#allocation8_spill] sm:$0xff] %v2856_v40  ;;  %v2858_v41 = vpop.f32.mrf.mxu1  ;;  %v1321_v40 = vadd.f32 %v1320_v59, %v373_v45  ;;  %v1410_v59 = vadd.f32 %v2809_v8, %v1337_v32  ;;  %v2943_v51 = vld [vmem:[#allocation3_spill] sm:$0xff] }
 0x15c   : > { %2938 = vst [vmem:[#allocation9_spill] sm:$0xff] %v2858_v41  ;;  %v1480_v42 = vpop.f32.mrf.mxu0  ;;  %v1327_v41 = vadd.f32 %v1326_v63, %v373_v45  ;;  %v1461_v63 = vadd.f32 %v1460_v21, %v1388_v37  ;;  %v1414_v21 = vadd.f32 %v2813_v12, %v1341_v5  ;;  %v1471_v12 = vadd.f32 %v2841_v30, %v1398_v54 }
 0x15d   : > { %v1553_v43 = vpop.f32.mrf.mxu1  ;;  %v1481_v7 = vadd.f32 %v1480_v42, %v1408_v26  ;;  %v1424_v25 = vadd.f32 %v2827_v20, %v1351_v62 }
 0x15e   : > { %v1482_v46 = vpop.f32.mrf.mxu0  ;;  %v1400_v1 = vadd.f32 %v2803_v0, %v1327_v41  ;;  %v1534_v34 = vadd.f32 %v2829_v22, %v1461_v63  ;;  %v1536_v41 = vadd.f32 %v2831_v24, %v1463_v11 }
 0x15f   : > { %v1555_v47 = vpop.f32.mrf.mxu1  ;;  %v1483_v8 = vadd.f32 %v1482_v46, %v1410_v59  ;;  %v1554_v4 = vadd.f32 %v1553_v43, %v1481_v7  ;;  %v2946_v53 = vld [vmem:[#allocation5_spill] sm:$0xff] }
 0x160   : > { %v1484_v48 = vpop.f32.mrf.mxu0  ;;  %v1473_v43 = vadd.f32 %v2845_v33, %v1400_v1  ;;  %v2948_v63 = vld [vmem:[#allocation6_spill] sm:$0xff] }
 0x161   : > { %v2860_v49 = vpop.f32.mrf.mxu1  ;;  %v1556_v42 = vadd.f32 %v1555_v47, %v1483_v8  ;;  %v2944_v47 = vld [vmem:[#allocation4_spill] sm:$0xff]  ;;  %v1475_v7 = vadd.f32 %v2948_v63, %v1402_v6 }
 0x162   : > { %2939 = vst [vmem:[#allocation10_spill] sm:$0xff] %v2860_v49  ;;  %v1486_v36 = vpop.f32.mrf.mxu0  ;;  %v1544_v52 = vadd.f32 %v2944_v47, %v1471_v12  ;;  %v1546_v55 = vadd.f32 %v2946_v53, %v1473_v43  ;;  %v2950_v8 = vld [vmem:[#allocation8_spill] sm:$0xff] }
 0x163   : > { %v2862_v35 = vpop.f32.mrf.mxu1  ;;  %v1487_v16 = vadd.f32 %v1486_v36, %v1414_v21 }
 0x164   : > { %2940 = vst [vmem:[#allocation11_spill] sm:$0xff] %v2862_v35  ;;  %v1490_v31 = vpop.f32.mrf.mxu0 }
 0x165   : > { %v2864_v29 = vpop.f32.mrf.mxu1  ;;  %v1491_v46 = vadd.f32 %v1490_v31, %v1418_v15 }
 0x166   : > { %2941 = vst [vmem:[#allocation12_spill] sm:$0xff] %v2864_v29  ;;  %v1492_v49 = vpop.f32.mrf.mxu0  ;;  %v1394_v29 = vadd.f32 %v2799_v60, %v1321_v40  ;;  %v1349_v60 = vadd.f32 %v2821_v17, %v369_v44  ;;  %v1485_v17 = vadd.f32 %v1484_v48, %v1412_v13  ;;  %v1477_v13 = vadd.f32 %v2950_v8, %v1404_v9 }
 0x167   : > { %v2869_v35 = vpop.f32.mrf.mxu1 }
 0x168   : > { %v1494_v3 = vpop.f32.mrf.mxu0  ;;  %v1467_v10 = vadd.f32 %v2837_v28, %v1394_v29  ;;  %v1422_v22 = vadd.f32 %v2823_v18, %v1349_v60  ;;  %v2942_v29 = vld [vmem:[#allocation2_spill] sm:$0xff]  ;;  %v1493_v18 = vadd.f32 %v1492_v49, %v1420_v23 }
 0x169   : > { %v2876_v58 = vpop.f32.mrf.mxu1  ;;  %v1538_v30 = vadd.f32 %v2942_v29, %v1465_v2  ;;  %v2945_v27 = vld [vmem:[#allocation10_spill] sm:$0xff]  ;;  %v2952_v29 = vld [vmem:[#allocation9_spill] sm:$0xff] }
 0x16a   : > { %v1496_v0 = vpop.f32.mrf.mxu0  ;;  %v1540_v24 = vadd.f32 %v2943_v51, %v1467_v10  ;;  %v1558_v32 = vadd.f32 %v2945_v27, %v1485_v17  ;;  %v1495_v21 = vadd.f32 %v1494_v3, %v1422_v22  ;;  %v1566_v2 = vadd.f32 %v2869_v35, %v1493_v18 }
 0x16b   : > { %v2884_v26 = vpop.f32.mrf.mxu1  ;;  %v2947_v57 = vld [vmem:[#allocation11_spill] sm:$0xff] }
 0x16c   : > { %v1606_v40 = vpop.f32.mrf.mxu0  ;;  %v1560_v31 = vadd.f32 %v2947_v57, %v1487_v16 }
 0x16d   : > { %v1626_v19 = vpop.f32.mrf.mxu1  ;;  %v1607_v44 = vadd.f32 %v1606_v40, %v1534_v34  ;;  %v2949_v54 = vld [vmem:[#allocation12_spill] sm:$0xff] }
 0x16e   : > { %v1627_v14 = vadd.f32 %v1626_v19, %v1554_v4  ;;  %v1608_v45 = vpop.f32.mrf.mxu0  ;;  %v1564_v1 = vadd.f32 %v2949_v54, %v1491_v46  ;;  %v1497_v4 = vadd.f32 %v1496_v0, %v1424_v25 }
 0x16f   : > { %v1628_v28 = vpop.f32.mrf.mxu1  ;;  %v1609_v48 = vadd.f32 %v1608_v45, %v1536_v41  ;;  %v1645_v38 = vmax.f32 %v1607_v44, 0.0 }
 0x170   : > { %v1629_v50 = vadd.f32 %v1628_v28, %v1556_v42  ;;  %v1610_v37 = vpop.f32.mrf.mxu0  ;;  %v1653_v33 = vmax.f32 %v1627_v14, 0.0  ;;  %v2951_v42 = vld [vmem:[#allocation7_spill] sm:$0xff]  ;;  %v1568_v14 = vadd.f32 %v2876_v58, %v1495_v21  ;;  %v1570_v46 = vadd.f32 %v2884_v26, %v1497_v4 }
 0x171   : > { %v1630_v20 = vpop.f32.mrf.mxu1  ;;  %v1646_v36 = vmax.f32 %v1609_v48, 0.0  ;;  %v1611_v5 = vadd.f32 %v1610_v37, %v1538_v30  ;;  %v1548_v44 = vadd.f32 %v2951_v42, %v1475_v7  ;;  %v1550_v30 = vadd.f32 %v2952_v29, %v1477_v13 }
 0x172   : > { %v1654_v39 = vmax.f32 %v1629_v50, 0.0  ;;  %v1631_v59 = vadd.f32 %v1630_v20, %v1558_v32  ;;  %v1612_v49 = vpop.f32.mrf.mxu0 }
 0x173   : > { %v1632_v61 = vpop.f32.mrf.mxu1  ;;  %v1976_v56 = vpack.c.bf16 %v1646_v36, %v1645_v38  ;;  %v1613_v60 = vadd.f32 %v1612_v49, %v1540_v24  ;;  %v1647_v12 = vmax.f32 %v1611_v5, 0.0 }
 0x174   : > { %v1980_v11 = vpack.c.bf16 %v1654_v39, %v1653_v33  ;;  %v1633_v62 = vadd.f32 %v1632_v61, %v1560_v31  ;;  %v1616_v15 = vpop.f32.mrf.mxu0  ;;  %v1655_v6 = vmax.f32 %v1631_v59, 0.0 }
 0x175   : > { %v1636_v34 = vpop.f32.mrf.mxu1  ;;  %1709 = vst [vmem:[%s2906_s17] sm:$0xff] %v1976_v56  ;;  %v1617_v23 = vadd.f32 %v1616_v15, %v1544_v52  ;;  %v1648_v17 = vmax.f32 %v1613_v60, 0.0 }
 0x176   : > { %1713 = vst [vmem:[%s2906_s17 + $0x20] sm:$0xff] %v1980_v11  ;;  %v1637_v10 = vadd.f32 %v1636_v34, %v1564_v1  ;;  %v1656_v40 = vmax.f32 %v1633_v62, 0.0  ;;  %v1618_v19 = vpop.f32.mrf.mxu0 }
 0x177   : > { %v1638_v41 = vpop.f32.mrf.mxu1  ;;  %v1619_v3 = vadd.f32 %v1618_v19, %v1546_v55  ;;  %v1977_v35 = vpack.c.bf16 %v1648_v17, %v1647_v12  ;;  %v1649_v43 = vmax.f32 %v1617_v23, 0.0 }
 0x178   : > { %v1639_v9 = vadd.f32 %v1638_v41, %v1566_v2  ;;  %v1981_v0 = vpack.c.bf16 %v1656_v40, %v1655_v6  ;;  %v1620_v22 = vpop.f32.mrf.mxu0  ;;  %v1657_v16 = vmax.f32 %v1637_v10, 0.0 }
 0x179   : > { %v1640_v25 = vpop.f32.mrf.mxu1  ;;  %v1650_v45 = vmax.f32 %v1619_v3, 0.0  ;;  %1710 = vst [vmem:[%s2906_s17 + $0x8] sm:$0xff] %v1977_v35  ;;  %v1621_v48 = vadd.f32 %v1620_v22, %v1548_v44 }
 0x17a   : > { %v1658_v28 = vmax.f32 %v1639_v9, 0.0  ;;  %1714 = vst [vmem:[%s2906_s17 + $0x28] sm:$0xff] %v1981_v0  ;;  %v1641_v50 = vadd.f32 %v1640_v25, %v1568_v14  ;;  %v1622_v58 = vpop.f32.mrf.mxu0 }
 0x17b   : > { %v1642_v51 = vpop.f32.mrf.mxu1  ;;  %v1978_v24 = vpack.c.bf16 %v1650_v45, %v1649_v43  ;;  %v1623_v52 = vadd.f32 %v1622_v58, %v1550_v30  ;;  %v1651_v32 = vmax.f32 %v1621_v48, 0.0 }
 0x17c   : > { %v1982_v47 = vpack.c.bf16 %v1658_v28, %v1657_v16  ;;  %v1643_v27 = vadd.f32 %v1642_v51, %v1570_v46  ;;  %v1659_v18 = vmax.f32 %v1641_v50, 0.0 }
 0x17d   : > { %1711 = vst [vmem:[%s2906_s17 + $0x10] sm:$0xff] %v1978_v24  ;;  %v1652_v37 = vmax.f32 %v1623_v52, 0.0 }
 0x17e   : > { %1715 = vst [vmem:[%s2906_s17 + $0x30] sm:$0xff] %v1982_v47  ;;  %v1660_v20 = vmax.f32 %v1643_v27, 0.0 }
 0x17f   : > { %v1979_v38 = vpack.c.bf16 %v1652_v37, %v1651_v32 }
 0x180   : > { %v1983_v26 = vpack.c.bf16 %v1660_v20, %v1659_v18 }
 0x181   : > { %1712 = vst [vmem:[%s2906_s17 + $0x18] sm:$0xff] %v1979_v38 }
 0x182   : > { %1716 = vst [vmem:[%s2906_s17 + $0x38] sm:$0xff] %v1983_v26 }
 0x183 PF: > { %s13_s12 = sadd.s32 1, %s2284_s12  }
 0x184   : > { %p10_p4 = scmp.ge.s32.totalorder %s13_s12, 4  }
 0x186   :  { %12 = sbr.rel (!%p10_p4) target bundleno = 1 (0x1), region = 62 }

// kernel: vae_forward.10
= control target key start
LH: loop header
LB: loop body
LE: loop exit
PB: predicated region body
PF: predicated region fallthrough
CT: control target
= control target key end

     0   :  { %15 = vsyncpa [#allocation4], 0  ;;  %s11382_s0 = inlined_call_operand.vmem [shape: bf16[2,8192], index: 0, kind: input, shape index: {}]   ;;  %s11383_s1 = inlined_call_operand.vmem [shape: bf16[8192,256], index: 1, kind: input, shape index: {}]   ;;  %s11384_s2 = inlined_call_operand.vmem [shape: f32[1,256], index: 2, kind: input, shape index: {}]   ;;  %s11385_s3 = inlined_call_operand.vmem [shape: f32[2,128], index: 3, kind: input, shape index: {}]   ;;  %s11386_s4 = inlined_call_operand.vmem [shape: bf16[128,8192], index: 4, kind: input, shape index: {}]   ;;  %s11387_s5 = inlined_call_operand.vmem [shape: f32[1,8192], index: 5, kind: input, shape index: {}]   ;;  %s11388_s6 = inlined_call_operand.hbm [shape: f32[2,128], index: 6, kind: output, shape index: {0}]   ;;  %s11389_s7 = inlined_call_operand.hbm [shape: f32[2,128], index: 7, kind: output, shape index: {1}]   ;;  %s11390_s8 = inlined_call_operand.hbm [shape: f32[2,128], index: 8, kind: output, shape index: {2}]   ;;  %s11391_s9 = inlined_call_operand.vmem [shape: bf16[2,8192], index: 9, kind: output, shape index: {3}]  }
   0x1   :  { %16 = vsyncpa [#allocation6], 0  ;;  %s9130_s30 = smov 0  }
   0x2 LB: > { %s9136_s10 = sadd.s32 4294967295, %s9071_s30   ;;  %p7748_p0 = scmp.ge.s32.totalorder %s9071_s30, 1  ;;  %s9071_s30 = sphi %s9130_s30, %s22_s30  }
   0x3   : > { %p288_p1 = scmp.lt.s32.totalorder %s9071_s30, 5 }
   0x5   : > { %p289_p2 = pnand %p7748_p0, %p288_p1 }
   0x6   : > { %s7749_s11 = sshll.u32 (!%p289_p2), %s9136_s10, 4  ;;  %s7750_s12 = sshll.u32 (!%p289_p2), %s9136_s10, 8 }
   0x7   : > { %292 = sbr.rel (%p289_p2) target bundleno = 1258 (0x4ea), region = 44  ;;  %p325_p3 = scmp.lt.s32.totalorder (!%p289_p2), %s7749_s11, 63 }
   0x8   : > { %p330_p4 = scmp.lt.s32.totalorder (!%p289_p2), %s7750_s12, 1023  ;;  %p7753_p5 = scmp.ne.s32.totalorder (!%p289_p2), %s9136_s10, 0 }
   0xc   : > { %s11393_s11 = smov (!%p325_p3, %s7749_s11), 63  ;;  %s11395_s12 = smov (!%p330_p4, %s7750_s12), 1023 }
   0xd   : > { %s9145_s15 = scalar_lea.vmem %s11382_s0, %s11393_s11  ;;  %s8563_s16 = sshll.u32 %s11395_s12, 3 }
   0xe   : > { %s9150_s19 = scalar_lea.vmem %s11383_s1, %s8563_s16  ;;  %340 = sbr.rel (%p7753_p5) target bundleno = 21 (0x15), region = 48 }
  0x13   : > { %v9073_v0 = vmov 0.0  }
  0x14   : > { %341 = vst [vmem:[#allocation2] sm:$0xf] %v9073_v0 }
  0x15 PF: > { %v8597_v1 = vld [vmem:[%s9150_s19 + $0x74] ss:$8 sps:$4 sm:$0xff]   ;;  %v8601_v3 = vld [vmem:[%s9150_s19 + $0x70] ss:$8 sps:$4 sm:$0xff]   ;;  %v8603_v5 = vld [vmem:[%s9150_s19 + $0x64] ss:$8 sps:$4 sm:$0xff]   ;;  %v607_v39 = vlaneseq }
  0x16   : > { %v8599_v2 = vld [vmem:[%s9150_s19 + $0x174] ss:$8 sps:$4 sm:$0xff]   ;;  %1997 = vmatprep.subr.bf16.mxu0 %v8597_v1  ;;  %v8602_v4 = vld [vmem:[%s9150_s19 + $0x170] ss:$8 sps:$4 sm:$0xff]   ;;  %v8605_v6 = vld [vmem:[%s9150_s19 + $0x164] ss:$8 sps:$4 sm:$0xff]  }
  0x17   : > { %2038 = vmatprep.subr.bf16.mxu1 %v8599_v2  ;;  %1998 = vmatpush1.bf16.msra.mxu0 %v8601_v3  ;;  %v8607_v7 = vld [vmem:[%s9150_s19 + $0x60] ss:$8 sps:$4 sm:$0xff]   ;;  %v8609_v9 = vld [vmem:[%s9150_s19 + $0x54] ss:$8 sps:$4 sm:$0xff]   ;;  %v8613_v11 = vld [vmem:[%s9150_s19 + $0x50] ss:$8 sps:$4 sm:$0xff]  }
  0x18   : > { %2039 = vmatpush1.bf16.msra.mxu1 %v8602_v4  ;;  %1999 = vmatprep.subr.bf16.mxu0 %v8603_v5  ;;  %v8608_v8 = vld [vmem:[%s9150_s19 + $0x160] ss:$8 sps:$4 sm:$0xff]   ;;  %v8611_v10 = vld [vmem:[%s9150_s19 + $0x154] ss:$8 sps:$4 sm:$0xff]   ;;  %v8614_v12 = vld [vmem:[%s9150_s19 + $0x150] ss:$8 sps:$4 sm:$0xff]  }
  0x19   : > { %2040 = vmatprep.subr.bf16.mxu1 %v8605_v6  ;;  %v8615_v13 = vld [vmem:[%s9150_s19 + $0x44] ss:$8 sps:$4 sm:$0xff]   ;;  %v8619_v15 = vld [vmem:[%s9150_s19 + $0x40] ss:$8 sps:$4 sm:$0xff]   ;;  %v8621_v17 = vld [vmem:[%s9150_s19 + $0x34] ss:$8 sps:$4 sm:$0xff]  }
  0x1a   : > { %v8617_v14 = vld [vmem:[%s9150_s19 + $0x144] ss:$8 sps:$4 sm:$0xff]   ;;  %v8620_v16 = vld [vmem:[%s9150_s19 + $0x140] ss:$8 sps:$4 sm:$0xff]   ;;  %v8623_v18 = vld [vmem:[%s9150_s19 + $0x134] ss:$8 sps:$4 sm:$0xff]  }
  0x1b   : > { %2000 = vmatpush1.bf16.msra.mxu0 %v8607_v7  ;;  %v8625_v19 = vld [vmem:[%s9150_s19 + $0x30] ss:$8 sps:$4 sm:$0xff]   ;;  %v8627_v21 = vld [vmem:[%s9150_s19 + $0x24] ss:$8 sps:$4 sm:$0xff]   ;;  %v8631_v23 = vld [vmem:[%s9150_s19 + $0x20] ss:$8 sps:$4 sm:$0xff]  }
  0x1c   : > { %2041 = vmatpush1.bf16.msra.mxu1 %v8608_v8  ;;  %2001 = vmatprep.subr.bf16.mxu0 %v8609_v9  ;;  %v8626_v20 = vld [vmem:[%s9150_s19 + $0x130] ss:$8 sps:$4 sm:$0xff]   ;;  %v8629_v22 = vld [vmem:[%s9150_s19 + $0x124] ss:$8 sps:$4 sm:$0xff]   ;;  %v8632_v24 = vld [vmem:[%s9150_s19 + $0x120] ss:$8 sps:$4 sm:$0xff]  }
  0x1d   : > { %2042 = vmatprep.subr.bf16.mxu1 %v8611_v10  ;;  %v8633_v25 = vld [vmem:[%s9150_s19 + $0x14] ss:$8 sps:$4 sm:$0xff]   ;;  %v8637_v27 = vld [vmem:[%s9150_s19 + $0x10] ss:$8 sps:$4 sm:$0xff]   ;;  %v8639_v29 = vld [vmem:[%s9150_s19 + $0x4] ss:$8 sps:$4 sm:$0xff]  }
  0x1e   : > { %v8635_v26 = vld [vmem:[%s9150_s19 + $0x114] ss:$8 sps:$4 sm:$0xff]   ;;  %v8638_v28 = vld [vmem:[%s9150_s19 + $0x110] ss:$8 sps:$4 sm:$0xff]   ;;  %v8641_v30 = vld [vmem:[%s9150_s19 + $0x104] ss:$8 sps:$4 sm:$0xff]  }
  0x1f   : > { %2002 = vmatpush1.bf16.msra.mxu0 %v8613_v11  ;;  %v8643_v31 = vld [vmem:[%s9150_s19] ss:$8 sps:$4 sm:$0xff]   ;;  %v8645_v33 = vld [vmem:[%s9150_s19 + $0xf4] ss:$8 sps:$4 sm:$0xff]   ;;  %v8649_v35 = vld [vmem:[%s9150_s19 + $0xf0] ss:$8 sps:$4 sm:$0xff]  }
  0x20   : > { %2043 = vmatpush1.bf16.msra.mxu1 %v8614_v12  ;;  %2003 = vmatprep.subr.bf16.mxu0 %v8615_v13  ;;  %v8644_v32 = vld [vmem:[%s9150_s19 + $0x100] ss:$8 sps:$4 sm:$0xff]   ;;  %v8647_v34 = vld [vmem:[%s9150_s19 + $0x1f4] ss:$8 sps:$4 sm:$0xff]   ;;  %v8650_v36 = vld [vmem:[%s9150_s19 + $0x1f0] ss:$8 sps:$4 sm:$0xff]  }
  0x21   : > { %2044 = vmatprep.subr.bf16.mxu1 %v8617_v14  ;;  %v9074_v37 = vmov 1966171168   ;;  %v8651_v40 = vld [vmem:[%s9150_s19 + $0xe4] ss:$8 sps:$4 sm:$0xff]   ;;  %v8655_v42 = vld [vmem:[%s9150_s19 + $0xe0] ss:$8 sps:$4 sm:$0xff]  }
  0x22   : > { %v605_v38 = vunpack.c.l.s4 %v9074_v37  ;;  %v8653_v41 = vld [vmem:[%s9150_s19 + $0x1e4] ss:$8 sps:$4 sm:$0xff]   ;;  %v9192_v44 = vshrl.u32 %v607_v39, 7  ;;  %v8656_v45 = vld [vmem:[%s9150_s19 + $0x1e0] ss:$8 sps:$4 sm:$0xff]   ;;  %p8010_p6 = scmp.ne.s32.totalorder %s9136_s10, 3 }
  0x23   : > { %2004 = vmatpush1.bf16.msra.mxu0 %v8619_v15  ;;  %v8657_v46 = vld [vmem:[%s9150_s19 + $0xd4] ss:$8 sps:$4 sm:$0xff]   ;;  %v8661_v48 = vld [vmem:[%s9150_s19 + $0xd0] ss:$8 sps:$4 sm:$0xff]   ;;  %v8663_v51 = vld [vmem:[%s9150_s19 + $0xc4] ss:$8 sps:$4 sm:$0xff]  }
  0x24   : > { %2045 = vmatpush1.bf16.msra.mxu1 %v8620_v16  ;;  %2005 = vmatprep.subr.bf16.mxu0 %v8621_v17  ;;  %v606_v43 = vunpack.c.0.s8 %v605_v38  ;;  %v8659_v47 = vld [vmem:[%s9150_s19 + $0x1d4] ss:$8 sps:$4 sm:$0xff]   ;;  %v8662_v49 = vld [vmem:[%s9150_s19 + $0x1d0] ss:$8 sps:$4 sm:$0xff]   ;;  %v8665_v52 = vld [vmem:[%s9150_s19 + $0x1c4] ss:$8 sps:$4 sm:$0xff]  }
  0x25   : > { %2046 = vmatprep.subr.bf16.mxu1 %v8623_v18  ;;  %v343_v53 = vld [vmem:[%s9145_s15] sm:$0xff]  ;;  %v8669_v57 = vld [vmem:[%s9150_s19 + $0xb4] ss:$8 sps:$4 sm:$0xff]   ;;  %v8673_v60 = vld [vmem:[%s9150_s19 + $0xb0] ss:$8 sps:$4 sm:$0xff]  }
  0x26   : > { %v9200_v50 = vsub.s32 %v606_v43, %v9192_v44  ;;  %v8667_v54 = vld [vmem:[%s9150_s19 + $0xc0] ss:$8 sps:$4 sm:$0xff]   ;;  %v8671_v58 = vld [vmem:[%s9150_s19 + $0x1b4] ss:$8 sps:$4 sm:$0xff]   ;;  %v8674_v62 = vld [vmem:[%s9150_s19 + $0x1b0] ss:$8 sps:$4 sm:$0xff]   ;;  %v603_v2 = vcombine.high %v343_v53, %v343_v53 }
  0x27   : > { %2006 = vmatpush1.bf16.msra.mxu0 %v8625_v19  ;;  %v8668_v56 = vld [vmem:[%s9150_s19 + $0x1c0] ss:$8 sps:$4 sm:$0xff]   ;;  %v8675_v63 = vld [vmem:[%s9150_s19 + $0xa4] ss:$8 sps:$4 sm:$0xff]   ;;  %v8681_v5 = vld [vmem:[%s9150_s19 + $0x94] ss:$8 sps:$4 sm:$0xff]  }
  0x28   : > { %2047 = vmatpush1.bf16.msra.mxu1 %v8626_v20  ;;  %2007 = vmatprep.subr.bf16.mxu0 %v8627_v21  ;;  %v610_v55 = vrot.slane %v343_v53, %v9200_v50  ;;  %v8677_v0 = vld [vmem:[%s9150_s19 + $0x1a4] ss:$8 sps:$4 sm:$0xff]   ;;  %v8679_v3 = vld [vmem:[%s9150_s19 + $0xa0] ss:$8 sps:$4 sm:$0xff]   ;;  %v8683_v6 = vld [vmem:[%s9150_s19 + $0x194] ss:$8 sps:$4 sm:$0xff]   ;;  %v9220_v7 = vrot.slane %v603_v2, %v9200_v50 }
  0x29   : > { %2048 = vmatprep.subr.bf16.mxu1 %v8629_v22  ;;  %v8680_v4 = vld [vmem:[%s9150_s19 + $0x1a0] ss:$8 sps:$4 sm:$0xff]   ;;  %v8685_v8 = vld [vmem:[%s9150_s19 + $0x90] ss:$8 sps:$4 sm:$0xff]   ;;  %v8687_v10 = vld [vmem:[%s9150_s19 + $0x84] ss:$8 sps:$4 sm:$0xff]  }
  0x2a   : > { %v618_v59 = vcombine.high %v610_v55, %v610_v55  ;;  %v8686_v9 = vld [vmem:[%s9150_s19 + $0x190] ss:$8 sps:$4 sm:$0xff]   ;;  %v8689_v11 = vld [vmem:[%s9150_s19 + $0x184] ss:$8 sps:$4 sm:$0xff]   ;;  %v619_v12 = vcombine.high %v9220_v7, %v9220_v7  ;;  %v8691_v13 = vld [vmem:[%s9150_s19 + $0x80] ss:$8 sps:$4 sm:$0xff]   ;;  %v626_v14 = vrot.slane %v610_v55, %v9200_v50 }
  0x2b   : > { %2008 = vmatpush1.bf16.msra.mxu0 %v8631_v23  ;;  %v8692_v15 = vld [vmem:[%s9150_s19 + $0x180] ss:$8 sps:$4 sm:$0xff]   ;;  %v8696_v16 = vld [vmem:[%s9150_s19 + $0x274] ss:$8 sps:$4 sm:$0xff]   ;;  %v8694_v20 = vld [vmem:[%s9150_s19 + $0x270] ss:$8 sps:$4 sm:$0xff]  }
  0x2c   : > { %2049 = vmatpush1.bf16.msra.mxu1 %v8632_v24  ;;  %2009 = vmatprep.subr.bf16.mxu0 %v8633_v25  ;;  %v640_v61 = vrot.slane %v618_v59, %v9200_v50  ;;  %v8699_v17 = vld [vmem:[%s9150_s19 + $0x374] ss:$8 sps:$4 sm:$0xff]   ;;  %v647_v18 = vrot.slane %v619_v12, %v9200_v50  ;;  %v648_v19 = vcombine.high %v626_v14, %v626_v14  ;;  %v8697_v21 = vld [vmem:[%s9150_s19 + $0x370] ss:$8 sps:$4 sm:$0xff]   ;;  %v8702_v22 = vld [vmem:[%s9150_s19 + $0x264] ss:$8 sps:$4 sm:$0xff]  }
  0x2d   : > { %2050 = vmatprep.subr.bf16.mxu1 %v8635_v26  ;;  %v8705_v23 = vld [vmem:[%s9150_s19 + $0x364] ss:$8 sps:$4 sm:$0xff]   ;;  %v8700_v25 = vld [vmem:[%s9150_s19 + $0x260] ss:$8 sps:$4 sm:$0xff]   ;;  %v8718_v37 = vld [vmem:[%s9150_s19 + $0x230] ss:$8 sps:$4 sm:$0xff]  }
  0x2e   : > { %v650_v1 = vcombine.high %v640_v61, %v640_v61  ;;  %2029 = vmatprep.mubr.bf16.mxu0 %v640_v61  ;;  %v651_v24 = vcombine.high %v647_v18, %v647_v18  ;;  %v8703_v26 = vld [vmem:[%s9150_s19 + $0x360] ss:$8 sps:$4 sm:$0xff]   ;;  %v8721_v38 = vld [vmem:[%s9150_s19 + $0x330] ss:$8 sps:$4 sm:$0xff]   ;;  %v8726_v39 = vld [vmem:[%s9150_s19 + $0x224] ss:$8 sps:$4 sm:$0xff]  }
  0x2f   : > { %2010 = vmatpush1.bf16.msra.mxu0 %v8637_v27  ;;  %v8708_v27 = vld [vmem:[%s9150_s19 + $0x254] ss:$8 sps:$4 sm:$0xff]   ;;  %v8742_v55 = vld [vmem:[%s9150_s19 + $0x2f0] ss:$8 sps:$4 sm:$0xff]   ;;  %v8748_v59 = vld [vmem:[%s9150_s19 + $0x2e0] ss:$8 sps:$4 sm:$0xff]  }
  0x30   : > { %2051 = vmatpush1.bf16.msra.mxu1 %v8638_v28  ;;  %2011 = vmatprep.subr.bf16.mxu0 %v8639_v29  ;;  %v8711_v28 = vld [vmem:[%s9150_s19 + $0x354] ss:$8 sps:$4 sm:$0xff]   ;;  %v8706_v29 = vld [vmem:[%s9150_s19 + $0x250] ss:$8 sps:$4 sm:$0xff]   ;;  %v8765_v2 = vld [vmem:[%s9150_s19 + $0x3c4] ss:$8 sps:$4 sm:$0xff]  }
  0x31   : > { %2052 = vmatprep.subr.bf16.mxu1 %v8641_v30  ;;  %2070 = vmatprep.mubr.bf16.mxu1 %v650_v1  ;;  %v8709_v30 = vld [vmem:[%s9150_s19 + $0x350] ss:$8 sps:$4 sm:$0xff]   ;;  %v8732_v43 = vld [vmem:[%s9150_s19 + $0x214] ss:$8 sps:$4 sm:$0xff]   ;;  %v8762_v1 = vld [vmem:[%s9150_s19 + $0x2c4] ss:$8 sps:$4 sm:$0xff]  }
  0x32   : > { %v8744_v53 = vld [vmem:[%s9150_s19 + $0x2f4] ss:$8 sps:$4 sm:$0xff]   ;;  %v8772_v12 = vld [vmem:[%s9150_s19 + $0x2a0] ss:$8 sps:$4 sm:$0xff]  }
  0x33   : > { %2012 = vmatpush1.bf16.msra.mxu0 %v8643_v31  ;;  %v8714_v31 = vld [vmem:[%s9150_s19 + $0x244] ss:$8 sps:$4 sm:$0xff]   ;;  %v8756_v61 = vld [vmem:[%s9150_s19 + $0x2d4] ss:$8 sps:$4 sm:$0xff]  }
  0x34   : > { %2053 = vmatpush1.bf16.msra.mxu1 %v8644_v32  ;;  %2013 = vmatprep.subr.bf16.mxu0 %v8645_v33  ;;  %v8717_v32 = vld [vmem:[%s9150_s19 + $0x344] ss:$8 sps:$4 sm:$0xff]   ;;  %v8712_v33 = vld [vmem:[%s9150_s19 + $0x240] ss:$8 sps:$4 sm:$0xff]  }
  0x35   : > { %2054 = vmatprep.subr.bf16.mxu1 %v8647_v34  ;;  %v8715_v34 = vld [vmem:[%s9150_s19 + $0x340] ss:$8 sps:$4 sm:$0xff]  }
  0x37   : > { %2014 = vmatpush2.bf16.msra.mxu0 %v8649_v35  ;;  %v8720_v35 = vld [vmem:[%s9150_s19 + $0x234] ss:$8 sps:$4 sm:$0xff]  }
  0x38   : > { %2055 = vmatpush2.bf16.msra.mxu1 %v8650_v36  ;;  %2015 = vmatprep.subr.bf16.mxu0 %v8651_v40  ;;  %v8723_v36 = vld [vmem:[%s9150_s19 + $0x334] ss:$8 sps:$4 sm:$0xff]   ;;  %v8729_v40 = vld [vmem:[%s9150_s19 + $0x324] ss:$8 sps:$4 sm:$0xff]  }
  0x39   : > { %2056 = vmatprep.subr.bf16.mxu1 %v8653_v41  ;;  %v8724_v41 = vld [vmem:[%s9150_s19 + $0x220] ss:$8 sps:$4 sm:$0xff]  }
  0x3b   : > { %2016 = vmatpush2.bf16.msra.mxu0 %v8655_v42  ;;  %v8727_v42 = vld [vmem:[%s9150_s19 + $0x320] ss:$8 sps:$4 sm:$0xff]  }
  0x3c   : > { %2057 = vmatpush2.bf16.msra.mxu1 %v8656_v45  ;;  %2017 = vmatprep.subr.bf16.mxu0 %v8657_v46  ;;  %v8735_v45 = vld [vmem:[%s9150_s19 + $0x314] ss:$8 sps:$4 sm:$0xff]   ;;  %v8730_v46 = vld [vmem:[%s9150_s19 + $0x210] ss:$8 sps:$4 sm:$0xff]  }
  0x3d   : > { %2058 = vmatprep.subr.bf16.mxu1 %v8659_v47  ;;  %v8733_v47 = vld [vmem:[%s9150_s19 + $0x310] ss:$8 sps:$4 sm:$0xff]  }
  0x3f   : > { %2018 = vmatpush2.bf16.msra.mxu0 %v8661_v48  ;;  %v8738_v48 = vld [vmem:[%s9150_s19 + $0x204] ss:$8 sps:$4 sm:$0xff]  }
  0x40   : > { %2059 = vmatpush2.bf16.msra.mxu1 %v8662_v49  ;;  %2019 = vmatprep.subr.bf16.mxu0 %v8663_v51  ;;  %v8741_v49 = vld [vmem:[%s9150_s19 + $0x304] ss:$8 sps:$4 sm:$0xff]   ;;  %v8736_v51 = vld [vmem:[%s9150_s19 + $0x200] ss:$8 sps:$4 sm:$0xff]  }
  0x41   : > { %2060 = vmatprep.subr.bf16.mxu1 %v8665_v52  ;;  %v8739_v52 = vld [vmem:[%s9150_s19 + $0x300] ss:$8 sps:$4 sm:$0xff]  }
  0x43   : > { %2020 = vmatpush2.bf16.msra.mxu0 %v8667_v54  ;;  %v8747_v54 = vld [vmem:[%s9150_s19 + $0x3f4] ss:$8 sps:$4 sm:$0xff]  }
  0x44   : > { %2061 = vmatpush2.bf16.msra.mxu1 %v8668_v56  ;;  %2021 = vmatprep.subr.bf16.mxu0 %v8669_v57  ;;  %v8745_v56 = vld [vmem:[%s9150_s19 + $0x3f0] ss:$8 sps:$4 sm:$0xff]   ;;  %v8750_v57 = vld [vmem:[%s9150_s19 + $0x2e4] ss:$8 sps:$4 sm:$0xff]  }
  0x45   : > { %2062 = vmatprep.subr.bf16.mxu1 %v8671_v58  ;;  %v8753_v58 = vld [vmem:[%s9150_s19 + $0x3e4] ss:$8 sps:$4 sm:$0xff]  }
  0x47   : > { %2022 = vmatpush2.bf16.msra.mxu0 %v8673_v60  ;;  %v8751_v60 = vld [vmem:[%s9150_s19 + $0x3e0] ss:$8 sps:$4 sm:$0xff]  }
  0x48   : > { %2063 = vmatpush2.bf16.msra.mxu1 %v8674_v62  ;;  %2023 = vmatprep.subr.bf16.mxu0 %v8675_v63  ;;  %v8759_v62 = vld [vmem:[%s9150_s19 + $0x3d4] ss:$8 sps:$4 sm:$0xff]   ;;  %v8754_v63 = vld [vmem:[%s9150_s19 + $0x2d0] ss:$8 sps:$4 sm:$0xff]  }
  0x49   : > { %2064 = vmatprep.subr.bf16.mxu1 %v8677_v0  ;;  %v8757_v0 = vld [vmem:[%s9150_s19 + $0x3d0] ss:$8 sps:$4 sm:$0xff]  }
  0x4b   : > { %2024 = vmatpush2.bf16.msra.mxu0 %v8679_v3  ;;  %v8760_v3 = vld [vmem:[%s9150_s19 + $0x2c0] ss:$8 sps:$4 sm:$0xff]  }
  0x4c   : > { %2065 = vmatpush2.bf16.msra.mxu1 %v8680_v4  ;;  %2025 = vmatprep.subr.bf16.mxu0 %v8681_v5  ;;  %v8763_v4 = vld [vmem:[%s9150_s19 + $0x3c0] ss:$8 sps:$4 sm:$0xff]   ;;  %v8768_v5 = vld [vmem:[%s9150_s19 + $0x2b4] ss:$8 sps:$4 sm:$0xff]  }
  0x4d   : > { %2066 = vmatprep.subr.bf16.mxu1 %v8683_v6  ;;  %v8771_v6 = vld [vmem:[%s9150_s19 + $0x3b4] ss:$8 sps:$4 sm:$0xff]  }
  0x4f   : > { %2026 = vmatpush2.bf16.msra.mxu0 %v8685_v8  ;;  %v8766_v8 = vld [vmem:[%s9150_s19 + $0x2b0] ss:$8 sps:$4 sm:$0xff]  }
  0x50   : > { %2067 = vmatpush2.bf16.msra.mxu1 %v8686_v9  ;;  %2027 = vmatprep.subr.bf16.mxu0 %v8687_v10  ;;  %v8769_v9 = vld [vmem:[%s9150_s19 + $0x3b0] ss:$8 sps:$4 sm:$0xff]   ;;  %v8774_v10 = vld [vmem:[%s9150_s19 + $0x2a4] ss:$8 sps:$4 sm:$0xff]  }
  0x51   : > { %2068 = vmatprep.subr.bf16.mxu1 %v8689_v11  ;;  %v8777_v11 = vld [vmem:[%s9150_s19 + $0x3a4] ss:$8 sps:$4 sm:$0xff]  }
  0x53   : > { %2028 = vmatpush2.bf16.msra.mxu0 %v8691_v13  ;;  %v8775_v13 = vld [vmem:[%s9150_s19 + $0x3a0] ss:$8 sps:$4 sm:$0xff]  }
  0x54   : > { %2069 = vmatpush2.bf16.msra.mxu1 %v8692_v15  ;;  %2079 = vmatprep.subr.bf16.mxu0 %v8696_v16  ;;  %v8783_v15 = vld [vmem:[%s9150_s19 + $0x394] ss:$8 sps:$4 sm:$0xff]   ;;  %v8778_v16 = vld [vmem:[%s9150_s19 + $0x290] ss:$8 sps:$4 sm:$0xff]  }
  0x55   : > { %2120 = vmatprep.subr.bf16.mxu1 %v8699_v17  ;;  %v8781_v17 = vld [vmem:[%s9150_s19 + $0x390] ss:$8 sps:$4 sm:$0xff]  }
  0x56   : > { %2030 = vmatmul.mubr.bf16.vlgmr.msra.gmra.mxu0 %v626_v14  ;;  %v8780_v14 = vld [vmem:[%s9150_s19 + $0x294] ss:$8 sps:$4 sm:$0xff]  }
  0x57   : > { %2071 = vmatmul.mubr.bf16.vlgmr.msra.gmra.mxu1 %v648_v19  ;;  %2080 = vmatpush1.bf16.msra.mxu0 %v8694_v20  ;;  %v8789_v19 = vld [vmem:[%s9150_s19 + $0x384] ss:$8 sps:$4 sm:$0xff]   ;;  %v8784_v20 = vld [vmem:[%s9150_s19 + $0x280] ss:$8 sps:$4 sm:$0xff]  }
  0x58   : > { %2121 = vmatpush1.bf16.msra.mxu1 %v8697_v21  ;;  %2081 = vmatprep.subr.bf16.mxu0 %v8702_v22  ;;  %v633_v21 = vrot.slane %v9220_v7, %v9200_v50  ;;  %v8787_v22 = vld [vmem:[%s9150_s19 + $0x380] ss:$8 sps:$4 sm:$0xff]   ;;  %v8798_v7 = vld [vmem:[%s9150_s19 + $0x464] ss:$8 sps:$4 sm:$0xff]  }
  0x59   : > { %2122 = vmatprep.subr.bf16.mxu1 %v8705_v23  ;;  %2111 = vmatprep.mubr.bf16.mxu0 %v647_v18  ;;  %v8786_v18 = vld [vmem:[%s9150_s19 + $0x284] ss:$8 sps:$4 sm:$0xff]   ;;  %v8792_v23 = vld [vmem:[%s9150_s19 + $0x474] ss:$8 sps:$4 sm:$0xff]  }
  0x5a   : > { %2152 = vmatprep.mubr.bf16.mxu1 %v651_v24  ;;  %v8795_v24 = vld [vmem:[%s9150_s19 + $0x574] ss:$8 sps:$4 sm:$0xff]  }
  0x5b   : > { %2082 = vmatpush1.bf16.msra.mxu0 %v8700_v25  ;;  %v649_v25 = vcombine.high %v633_v21, %v633_v21 }
  0x5c   : > { %2123 = vmatpush1.bf16.msra.mxu1 %v8703_v26  ;;  %2083 = vmatprep.subr.bf16.mxu0 %v8708_v27  ;;  %v8790_v26 = vld [vmem:[%s9150_s19 + $0x470] ss:$8 sps:$4 sm:$0xff]  }
  0x5d   : > { %2124 = vmatprep.subr.bf16.mxu1 %v8711_v28  ;;  %v8793_v27 = vld [vmem:[%s9150_s19 + $0x570] ss:$8 sps:$4 sm:$0xff]   ;;  %v9303_v28 = vld [vmem:[%s9145_s15 + $0x8] sm:$0xff] }
  0x5f   : > { %2084 = vmatpush1.bf16.msra.mxu0 %v8706_v29  ;;  %v8801_v29 = vld [vmem:[%s9150_s19 + $0x564] ss:$8 sps:$4 sm:$0xff]  }
  0x60   : > { %2125 = vmatpush1.bf16.msra.mxu1 %v8709_v30  ;;  %2085 = vmatprep.subr.bf16.mxu0 %v8714_v31  ;;  %v9309_v30 = vrot.slane %v9303_v28, %v9200_v50 }
  0x61   : > { %2126 = vmatprep.subr.bf16.mxu1 %v8717_v32  ;;  %v8796_v32 = vld [vmem:[%s9150_s19 + $0x460] ss:$8 sps:$4 sm:$0xff]  }
  0x62   : > { %v667_v31 = vcombine.high %v9309_v30, %v9309_v30 }
  0x63   : > { %2086 = vmatpush1.bf16.msra.mxu0 %v8712_v33  ;;  %v8799_v33 = vld [vmem:[%s9150_s19 + $0x560] ss:$8 sps:$4 sm:$0xff]  }
  0x64   : > { %2127 = vmatpush1.bf16.msra.mxu1 %v8715_v34  ;;  %2087 = vmatprep.subr.bf16.mxu0 %v8720_v35  ;;  %v8804_v34 = vld [vmem:[%s9150_s19 + $0x454] ss:$8 sps:$4 sm:$0xff]  }
  0x65   : > { %2128 = vmatprep.subr.bf16.mxu1 %v8723_v36  ;;  %v8807_v35 = vld [vmem:[%s9150_s19 + $0x554] ss:$8 sps:$4 sm:$0xff]   ;;  %v689_v36 = vrot.slane %v667_v31, %v9200_v50 }
  0x67   : > { %2088 = vmatpush1.bf16.msra.mxu0 %v8718_v37  ;;  %v699_v37 = vcombine.high %v689_v36, %v689_v36 }
  0x68   : > { %2129 = vmatpush1.bf16.msra.mxu1 %v8721_v38  ;;  %2089 = vmatprep.subr.bf16.mxu0 %v8726_v39  ;;  %v8802_v38 = vld [vmem:[%s9150_s19 + $0x450] ss:$8 sps:$4 sm:$0xff]  }
  0x69   : > { %2130 = vmatprep.subr.bf16.mxu1 %v8729_v40  ;;  %v8805_v39 = vld [vmem:[%s9150_s19 + $0x550] ss:$8 sps:$4 sm:$0xff]   ;;  %v8810_v40 = vld [vmem:[%s9150_s19 + $0x444] ss:$8 sps:$4 sm:$0xff]  }
  0x6b   : > { %2090 = vmatpush1.bf16.msra.mxu0 %v8724_v41  ;;  %v8813_v41 = vld [vmem:[%s9150_s19 + $0x544] ss:$8 sps:$4 sm:$0xff]  }
  0x6c   : > { %2131 = vmatpush1.bf16.msra.mxu1 %v8727_v42  ;;  %2091 = vmatprep.subr.bf16.mxu0 %v8732_v43  ;;  %v8808_v42 = vld [vmem:[%s9150_s19 + $0x440] ss:$8 sps:$4 sm:$0xff]  }
  0x6d   : > { %2132 = vmatprep.subr.bf16.mxu1 %v8735_v45  ;;  %v8811_v43 = vld [vmem:[%s9150_s19 + $0x540] ss:$8 sps:$4 sm:$0xff]   ;;  %v8816_v45 = vld [vmem:[%s9150_s19 + $0x434] ss:$8 sps:$4 sm:$0xff]  }
  0x6f   : > { %2092 = vmatpush1.bf16.msra.mxu0 %v8730_v46  ;;  %v8819_v46 = vld [vmem:[%s9150_s19 + $0x534] ss:$8 sps:$4 sm:$0xff]  }
  0x70   : > { %2133 = vmatpush1.bf16.msra.mxu1 %v8733_v47  ;;  %2093 = vmatprep.subr.bf16.mxu0 %v8738_v48  ;;  %v8814_v47 = vld [vmem:[%s9150_s19 + $0x430] ss:$8 sps:$4 sm:$0xff]  }
  0x71   : > { %2134 = vmatprep.subr.bf16.mxu1 %v8741_v49  ;;  %v8817_v48 = vld [vmem:[%s9150_s19 + $0x530] ss:$8 sps:$4 sm:$0xff]   ;;  %v8822_v49 = vld [vmem:[%s9150_s19 + $0x424] ss:$8 sps:$4 sm:$0xff]  }
  0x73   : > { %2094 = vmatpush1.bf16.msra.mxu0 %v8736_v51  ;;  %v8825_v51 = vld [vmem:[%s9150_s19 + $0x524] ss:$8 sps:$4 sm:$0xff]  }
  0x74   : > { %2135 = vmatpush1.bf16.msra.mxu1 %v8739_v52  ;;  %2095 = vmatprep.subr.bf16.mxu0 %v8744_v53  ;;  %v8820_v52 = vld [vmem:[%s9150_s19 + $0x420] ss:$8 sps:$4 sm:$0xff]  }
  0x75   : > { %2136 = vmatprep.subr.bf16.mxu1 %v8747_v54  ;;  %v8823_v53 = vld [vmem:[%s9150_s19 + $0x520] ss:$8 sps:$4 sm:$0xff]   ;;  %v8828_v54 = vld [vmem:[%s9150_s19 + $0x414] ss:$8 sps:$4 sm:$0xff]  }
  0x77   : > { %2096 = vmatpush2.bf16.msra.mxu0 %v8742_v55  ;;  %v8831_v55 = vld [vmem:[%s9150_s19 + $0x514] ss:$8 sps:$4 sm:$0xff]  }
  0x78   : > { %2137 = vmatpush2.bf16.msra.mxu1 %v8745_v56  ;;  %2097 = vmatprep.subr.bf16.mxu0 %v8750_v57  ;;  %v8826_v56 = vld [vmem:[%s9150_s19 + $0x410] ss:$8 sps:$4 sm:$0xff]  }
  0x79   : > { %2138 = vmatprep.subr.bf16.mxu1 %v8753_v58  ;;  %v8829_v57 = vld [vmem:[%s9150_s19 + $0x510] ss:$8 sps:$4 sm:$0xff]   ;;  %v8834_v58 = vld [vmem:[%s9150_s19 + $0x404] ss:$8 sps:$4 sm:$0xff]  }
  0x7b   : > { %2098 = vmatpush2.bf16.msra.mxu0 %v8748_v59  ;;  %v8837_v59 = vld [vmem:[%s9150_s19 + $0x504] ss:$8 sps:$4 sm:$0xff]  }
  0x7c   : > { %2139 = vmatpush2.bf16.msra.mxu1 %v8751_v60  ;;  %2099 = vmatprep.subr.bf16.mxu0 %v8756_v61  ;;  %v8832_v60 = vld [vmem:[%s9150_s19 + $0x400] ss:$8 sps:$4 sm:$0xff]  }
  0x7d   : > { %2140 = vmatprep.subr.bf16.mxu1 %v8759_v62  ;;  %v8835_v61 = vld [vmem:[%s9150_s19 + $0x500] ss:$8 sps:$4 sm:$0xff]   ;;  %v8840_v62 = vld [vmem:[%s9150_s19 + $0x4f4] ss:$8 sps:$4 sm:$0xff]  }
  0x7f   : > { %2100 = vmatpush2.bf16.msra.mxu0 %v8754_v63  ;;  %v8843_v63 = vld [vmem:[%s9150_s19 + $0x5f4] ss:$8 sps:$4 sm:$0xff]  }
  0x80   : > { %2141 = vmatpush2.bf16.msra.mxu1 %v8757_v0  ;;  %2101 = vmatprep.subr.bf16.mxu0 %v8762_v1  ;;  %v8838_v0 = vld [vmem:[%s9150_s19 + $0x4f0] ss:$8 sps:$4 sm:$0xff]  }
  0x81   : > { %2142 = vmatprep.subr.bf16.mxu1 %v8765_v2  ;;  %v8841_v1 = vld [vmem:[%s9150_s19 + $0x5f0] ss:$8 sps:$4 sm:$0xff]   ;;  %v8846_v2 = vld [vmem:[%s9150_s19 + $0x4e4] ss:$8 sps:$4 sm:$0xff]  }
  0x83   : > { %2102 = vmatpush2.bf16.msra.mxu0 %v8760_v3  ;;  %v8849_v3 = vld [vmem:[%s9150_s19 + $0x5e4] ss:$8 sps:$4 sm:$0xff]  }
  0x84   : > { %2143 = vmatpush2.bf16.msra.mxu1 %v8763_v4  ;;  %2103 = vmatprep.subr.bf16.mxu0 %v8768_v5  ;;  %v8844_v4 = vld [vmem:[%s9150_s19 + $0x4e0] ss:$8 sps:$4 sm:$0xff]  }
  0x85   : > { %2144 = vmatprep.subr.bf16.mxu1 %v8771_v6  ;;  %v8847_v5 = vld [vmem:[%s9150_s19 + $0x5e0] ss:$8 sps:$4 sm:$0xff]   ;;  %v8852_v6 = vld [vmem:[%s9150_s19 + $0x4d4] ss:$8 sps:$4 sm:$0xff]  }
  0x87   : > { %2104 = vmatpush2.bf16.msra.mxu0 %v8766_v8  ;;  %v8855_v8 = vld [vmem:[%s9150_s19 + $0x5d4] ss:$8 sps:$4 sm:$0xff]  }
  0x88   : > { %2145 = vmatpush2.bf16.msra.mxu1 %v8769_v9  ;;  %2105 = vmatprep.subr.bf16.mxu0 %v8774_v10  ;;  %v8850_v9 = vld [vmem:[%s9150_s19 + $0x4d0] ss:$8 sps:$4 sm:$0xff]  }
  0x89   : > { %2146 = vmatprep.subr.bf16.mxu1 %v8777_v11  ;;  %v8853_v10 = vld [vmem:[%s9150_s19 + $0x5d0] ss:$8 sps:$4 sm:$0xff]   ;;  %v8858_v11 = vld [vmem:[%s9150_s19 + $0x4c4] ss:$8 sps:$4 sm:$0xff]  }
  0x8b   : > { %2106 = vmatpush2.bf16.msra.mxu0 %v8772_v12  ;;  %v8861_v12 = vld [vmem:[%s9150_s19 + $0x5c4] ss:$8 sps:$4 sm:$0xff]  }
  0x8c   : > { %2147 = vmatpush2.bf16.msra.mxu1 %v8775_v13  ;;  %2107 = vmatprep.subr.bf16.mxu0 %v8780_v14  ;;  %v8856_v13 = vld [vmem:[%s9150_s19 + $0x4c0] ss:$8 sps:$4 sm:$0xff]  }
  0x8d   : > { %2148 = vmatprep.subr.bf16.mxu1 %v8783_v15  ;;  %v8859_v14 = vld [vmem:[%s9150_s19 + $0x5c0] ss:$8 sps:$4 sm:$0xff]   ;;  %v8864_v15 = vld [vmem:[%s9150_s19 + $0x4b4] ss:$8 sps:$4 sm:$0xff]  }
  0x8f   : > { %2108 = vmatpush2.bf16.msra.mxu0 %v8778_v16  ;;  %v8867_v16 = vld [vmem:[%s9150_s19 + $0x5b4] ss:$8 sps:$4 sm:$0xff]  }
  0x90   : > { %2149 = vmatpush2.bf16.msra.mxu1 %v8781_v17  ;;  %2109 = vmatprep.subr.bf16.mxu0 %v8786_v18  ;;  %v8862_v17 = vld [vmem:[%s9150_s19 + $0x4b0] ss:$8 sps:$4 sm:$0xff]  }
  0x91   : > { %2150 = vmatprep.subr.bf16.mxu1 %v8789_v19  ;;  %v8865_v18 = vld [vmem:[%s9150_s19 + $0x5b0] ss:$8 sps:$4 sm:$0xff]   ;;  %v8870_v19 = vld [vmem:[%s9150_s19 + $0x4a4] ss:$8 sps:$4 sm:$0xff]  }
  0x93   : > { %2110 = vmatpush2.bf16.msra.mxu0 %v8784_v20  ;;  %v8873_v20 = vld [vmem:[%s9150_s19 + $0x5a4] ss:$8 sps:$4 sm:$0xff]  }
  0x94   : > { %2151 = vmatpush2.bf16.msra.mxu1 %v8787_v22  ;;  %2161 = vmatprep.subr.bf16.mxu0 %v8792_v23  ;;  %v8868_v22 = vld [vmem:[%s9150_s19 + $0x4a0] ss:$8 sps:$4 sm:$0xff]  }
  0x95   : > { %2202 = vmatprep.subr.bf16.mxu1 %v8795_v24  ;;  %v8871_v23 = vld [vmem:[%s9150_s19 + $0x5a0] ss:$8 sps:$4 sm:$0xff]   ;;  %v8876_v24 = vld [vmem:[%s9150_s19 + $0x494] ss:$8 sps:$4 sm:$0xff]  }
  0x96   : > { %2112 = vmatmul.mubr.bf16.vlgmr.msra.gmra.mxu0 %v633_v21  ;;  %v652_v21 = vcombine.high %v9303_v28, %v9303_v28  ;;  %v8877_v28 = vld [vmem:[%s9150_s19 + $0x590] ss:$8 sps:$4 sm:$0xff]  }
  0x97   : > { %2153 = vmatmul.mubr.bf16.vlgmr.msra.gmra.mxu1 %v649_v25  ;;  %2162 = vmatpush1.bf16.msra.mxu0 %v8790_v26  ;;  %v8879_v25 = vld [vmem:[%s9150_s19 + $0x594] ss:$8 sps:$4 sm:$0xff]  }
  0x98   : > { %2203 = vmatpush1.bf16.msra.mxu1 %v8793_v27  ;;  %2163 = vmatprep.subr.bf16.mxu0 %v8798_v7  ;;  %v9369_v26 = vrot.slane %v652_v21, %v9200_v50  ;;  %v8874_v27 = vld [vmem:[%s9150_s19 + $0x490] ss:$8 sps:$4 sm:$0xff]   ;;  %v8882_v7 = vld [vmem:[%s9150_s19 + $0x484] ss:$8 sps:$4 sm:$0xff]  }
  0x99   : > { %2204 = vmatprep.subr.bf16.mxu1 %v8801_v29  ;;  %2193 = vmatprep.mubr.bf16.mxu0 %v689_v36  ;;  %v8885_v29 = vld [vmem:[%s9150_s19 + $0x584] ss:$8 sps:$4 sm:$0xff]   ;;  %v8891_v36 = vld [vmem:[%s9150_s19 + $0x774] ss:$8 sps:$4 sm:$0xff]  }
  0x9a   : > { %2234 = vmatprep.mubr.bf16.mxu1 %v699_v37  ;;  %v668_v31 = vcombine.high %v9369_v26, %v9369_v26  ;;  %v8957_v21 = vld [vmem:[%s9150_s19 + $0x7c4] ss:$8 sps:$4 sm:$0xff]  }
  0x9b   : > { %2164 = vmatpush1.bf16.msra.mxu0 %v8796_v32  ;;  %v675_v32 = vrot.slane %v9309_v30, %v9200_v50  ;;  %v8889_v30 = vld [vmem:[%s9150_s19 + $0x770] ss:$8 sps:$4 sm:$0xff]  }
  0x9c   : > { %2205 = vmatpush1.bf16.msra.mxu1 %v8799_v33  ;;  %2165 = vmatprep.subr.bf16.mxu0 %v8804_v34  ;;  %v8880_v33 = vld [vmem:[%s9150_s19 + $0x480] ss:$8 sps:$4 sm:$0xff]   ;;  %v696_v37 = vrot.slane %v668_v31, %v9200_v50 }
  0x9d   : > { %2206 = vmatprep.subr.bf16.mxu1 %v8807_v35  ;;  %v8883_v34 = vld [vmem:[%s9150_s19 + $0x580] ss:$8 sps:$4 sm:$0xff]   ;;  %v8888_v35 = vld [vmem:[%s9150_s19 + $0x674] ss:$8 sps:$4 sm:$0xff]  }
  0x9e   : > { %v8964_v31 = vld [vmem:[%s9150_s19 + $0x6a0] ss:$8 sps:$4 sm:$0xff]  }
  0x9f   : > { %2166 = vmatpush1.bf16.msra.mxu0 %v8802_v38  ;;  %v697_v38 = vcombine.high %v675_v32, %v675_v32 }
  0xa0   : > { %2207 = vmatpush1.bf16.msra.mxu1 %v8805_v39  ;;  %2167 = vmatprep.subr.bf16.mxu0 %v8810_v40  ;;  %v8886_v39 = vld [vmem:[%s9150_s19 + $0x670] ss:$8 sps:$4 sm:$0xff]   ;;  %v8894_v40 = vld [vmem:[%s9150_s19 + $0x664] ss:$8 sps:$4 sm:$0xff]  }
  0xa1   : > { %2208 = vmatprep.subr.bf16.mxu1 %v8813_v41  ;;  %v8897_v41 = vld [vmem:[%s9150_s19 + $0x764] ss:$8 sps:$4 sm:$0xff]  }
  0xa3   : > { %2168 = vmatpush1.bf16.msra.mxu0 %v8808_v42  ;;  %v700_v42 = vcombine.high %v696_v37, %v696_v37 }
  0xa4   : > { %2209 = vmatpush1.bf16.msra.mxu1 %v8811_v43  ;;  %2169 = vmatprep.subr.bf16.mxu0 %v8816_v45  ;;  %v8892_v43 = vld [vmem:[%s9150_s19 + $0x660] ss:$8 sps:$4 sm:$0xff]  }
  0xa5   : > { %2210 = vmatprep.subr.bf16.mxu1 %v8819_v46  ;;  %v8895_v45 = vld [vmem:[%s9150_s19 + $0x760] ss:$8 sps:$4 sm:$0xff]   ;;  %v8900_v46 = vld [vmem:[%s9150_s19 + $0x654] ss:$8 sps:$4 sm:$0xff]  }
  0xa7   : > { %2170 = vmatpush1.bf16.msra.mxu0 %v8814_v47  ;;  %v8903_v47 = vld [vmem:[%s9150_s19 + $0x754] ss:$8 sps:$4 sm:$0xff]  }
  0xa8   : > { %2211 = vmatpush1.bf16.msra.mxu1 %v8817_v48  ;;  %2171 = vmatprep.subr.bf16.mxu0 %v8822_v49  ;;  %v8898_v48 = vld [vmem:[%s9150_s19 + $0x650] ss:$8 sps:$4 sm:$0xff]  }
  0xa9   : > { %2212 = vmatprep.subr.bf16.mxu1 %v8825_v51  ;;  %v8901_v49 = vld [vmem:[%s9150_s19 + $0x750] ss:$8 sps:$4 sm:$0xff]   ;;  %v8906_v51 = vld [vmem:[%s9150_s19 + $0x644] ss:$8 sps:$4 sm:$0xff]  }
  0xab   : > { %2172 = vmatpush1.bf16.msra.mxu0 %v8820_v52  ;;  %v8909_v52 = vld [vmem:[%s9150_s19 + $0x744] ss:$8 sps:$4 sm:$0xff]  }
  0xac   : > { %2213 = vmatpush1.bf16.msra.mxu1 %v8823_v53  ;;  %2173 = vmatprep.subr.bf16.mxu0 %v8828_v54  ;;  %v8904_v53 = vld [vmem:[%s9150_s19 + $0x640] ss:$8 sps:$4 sm:$0xff]  }
  0xad   : > { %2214 = vmatprep.subr.bf16.mxu1 %v8831_v55  ;;  %v8907_v54 = vld [vmem:[%s9150_s19 + $0x740] ss:$8 sps:$4 sm:$0xff]   ;;  %v8912_v55 = vld [vmem:[%s9150_s19 + $0x634] ss:$8 sps:$4 sm:$0xff]  }
  0xaf   : > { %2174 = vmatpush1.bf16.msra.mxu0 %v8826_v56  ;;  %v8915_v56 = vld [vmem:[%s9150_s19 + $0x734] ss:$8 sps:$4 sm:$0xff]  }
  0xb0   : > { %2215 = vmatpush1.bf16.msra.mxu1 %v8829_v57  ;;  %2175 = vmatprep.subr.bf16.mxu0 %v8834_v58  ;;  %v8910_v57 = vld [vmem:[%s9150_s19 + $0x630] ss:$8 sps:$4 sm:$0xff]  }
  0xb1   : > { %2216 = vmatprep.subr.bf16.mxu1 %v8837_v59  ;;  %v8913_v58 = vld [vmem:[%s9150_s19 + $0x730] ss:$8 sps:$4 sm:$0xff]   ;;  %v8918_v59 = vld [vmem:[%s9150_s19 + $0x624] ss:$8 sps:$4 sm:$0xff]  }
  0xb3   : > { %2176 = vmatpush1.bf16.msra.mxu0 %v8832_v60  ;;  %v8921_v60 = vld [vmem:[%s9150_s19 + $0x724] ss:$8 sps:$4 sm:$0xff]  }
  0xb4   : > { %2217 = vmatpush1.bf16.msra.mxu1 %v8835_v61  ;;  %2177 = vmatprep.subr.bf16.mxu0 %v8840_v62  ;;  %v8916_v61 = vld [vmem:[%s9150_s19 + $0x620] ss:$8 sps:$4 sm:$0xff]  }
  0xb5   : > { %2218 = vmatprep.subr.bf16.mxu1 %v8843_v63  ;;  %v8919_v62 = vld [vmem:[%s9150_s19 + $0x720] ss:$8 sps:$4 sm:$0xff]   ;;  %v8924_v63 = vld [vmem:[%s9150_s19 + $0x614] ss:$8 sps:$4 sm:$0xff]  }
  0xb7   : > { %2178 = vmatpush2.bf16.msra.mxu0 %v8838_v0  ;;  %v8927_v0 = vld [vmem:[%s9150_s19 + $0x714] ss:$8 sps:$4 sm:$0xff]  }
  0xb8   : > { %2219 = vmatpush2.bf16.msra.mxu1 %v8841_v1  ;;  %2179 = vmatprep.subr.bf16.mxu0 %v8846_v2  ;;  %v8922_v1 = vld [vmem:[%s9150_s19 + $0x610] ss:$8 sps:$4 sm:$0xff]  }
  0xb9   : > { %2220 = vmatprep.subr.bf16.mxu1 %v8849_v3  ;;  %v8925_v2 = vld [vmem:[%s9150_s19 + $0x710] ss:$8 sps:$4 sm:$0xff]   ;;  %v8930_v3 = vld [vmem:[%s9150_s19 + $0x604] ss:$8 sps:$4 sm:$0xff]  }
  0xbb   : > { %2180 = vmatpush2.bf16.msra.mxu0 %v8844_v4  ;;  %v8933_v4 = vld [vmem:[%s9150_s19 + $0x704] ss:$8 sps:$4 sm:$0xff]  }
  0xbc   : > { %2221 = vmatpush2.bf16.msra.mxu1 %v8847_v5  ;;  %2181 = vmatprep.subr.bf16.mxu0 %v8852_v6  ;;  %v8928_v5 = vld [vmem:[%s9150_s19 + $0x600] ss:$8 sps:$4 sm:$0xff]  }
  0xbd   : > { %2222 = vmatprep.subr.bf16.mxu1 %v8855_v8  ;;  %v8931_v6 = vld [vmem:[%s9150_s19 + $0x700] ss:$8 sps:$4 sm:$0xff]   ;;  %v8936_v8 = vld [vmem:[%s9150_s19 + $0x6f4] ss:$8 sps:$4 sm:$0xff]  }
  0xbf   : > { %2182 = vmatpush2.bf16.msra.mxu0 %v8850_v9  ;;  %v8939_v9 = vld [vmem:[%s9150_s19 + $0x7f4] ss:$8 sps:$4 sm:$0xff]  }
  0xc0   : > { %2223 = vmatpush2.bf16.msra.mxu1 %v8853_v10  ;;  %2183 = vmatprep.subr.bf16.mxu0 %v8858_v11  ;;  %v8934_v10 = vld [vmem:[%s9150_s19 + $0x6f0] ss:$8 sps:$4 sm:$0xff]  }
  0xc1   : > { %2224 = vmatprep.subr.bf16.mxu1 %v8861_v12  ;;  %v8937_v11 = vld [vmem:[%s9150_s19 + $0x7f0] ss:$8 sps:$4 sm:$0xff]   ;;  %v8942_v12 = vld [vmem:[%s9150_s19 + $0x6e4] ss:$8 sps:$4 sm:$0xff]  }
  0xc3   : > { %2184 = vmatpush2.bf16.msra.mxu0 %v8856_v13  ;;  %v8945_v13 = vld [vmem:[%s9150_s19 + $0x7e4] ss:$8 sps:$4 sm:$0xff]  }
  0xc4   : > { %2225 = vmatpush2.bf16.msra.mxu1 %v8859_v14  ;;  %2185 = vmatprep.subr.bf16.mxu0 %v8864_v15  ;;  %v8940_v14 = vld [vmem:[%s9150_s19 + $0x6e0] ss:$8 sps:$4 sm:$0xff]  }
  0xc5   : > { %2226 = vmatprep.subr.bf16.mxu1 %v8867_v16  ;;  %v8943_v15 = vld [vmem:[%s9150_s19 + $0x7e0] ss:$8 sps:$4 sm:$0xff]   ;;  %v8948_v16 = vld [vmem:[%s9150_s19 + $0x6d4] ss:$8 sps:$4 sm:$0xff]  }
  0xc7   : > { %2186 = vmatpush2.bf16.msra.mxu0 %v8862_v17  ;;  %v8951_v17 = vld [vmem:[%s9150_s19 + $0x7d4] ss:$8 sps:$4 sm:$0xff]  }
  0xc8   : > { %2227 = vmatpush2.bf16.msra.mxu1 %v8865_v18  ;;  %2187 = vmatprep.subr.bf16.mxu0 %v8870_v19  ;;  %v8946_v18 = vld [vmem:[%s9150_s19 + $0x6d0] ss:$8 sps:$4 sm:$0xff]  }
  0xc9   : > { %2228 = vmatprep.subr.bf16.mxu1 %v8873_v20  ;;  %v8949_v19 = vld [vmem:[%s9150_s19 + $0x7d0] ss:$8 sps:$4 sm:$0xff]   ;;  %v8954_v20 = vld [vmem:[%s9150_s19 + $0x6c4] ss:$8 sps:$4 sm:$0xff]  }
  0xcb   : > { %2188 = vmatpush2.bf16.msra.mxu0 %v8868_v22  ;;  %v8952_v22 = vld [vmem:[%s9150_s19 + $0x6c0] ss:$8 sps:$4 sm:$0xff]  }
  0xcc   : > { %2229 = vmatpush2.bf16.msra.mxu1 %v8871_v23  ;;  %2189 = vmatprep.subr.bf16.mxu0 %v8876_v24  ;;  %v8955_v23 = vld [vmem:[%s9150_s19 + $0x7c0] ss:$8 sps:$4 sm:$0xff]   ;;  %v8960_v24 = vld [vmem:[%s9150_s19 + $0x6b4] ss:$8 sps:$4 sm:$0xff]  }
  0xcd   : > { %2230 = vmatprep.subr.bf16.mxu1 %v8879_v25  ;;  %v8963_v25 = vld [vmem:[%s9150_s19 + $0x7b4] ss:$8 sps:$4 sm:$0xff]  }
  0xcf   : > { %2190 = vmatpush2.bf16.msra.mxu0 %v8874_v27  ;;  %v8958_v27 = vld [vmem:[%s9150_s19 + $0x6b0] ss:$8 sps:$4 sm:$0xff]  }
  0xd0   : > { %2231 = vmatpush2.bf16.msra.mxu1 %v8877_v28  ;;  %2191 = vmatprep.subr.bf16.mxu0 %v8882_v7  ;;  %v8961_v28 = vld [vmem:[%s9150_s19 + $0x7b0] ss:$8 sps:$4 sm:$0xff]   ;;  %v8966_v7 = vld [vmem:[%s9150_s19 + $0x6a4] ss:$8 sps:$4 sm:$0xff]  }
  0xd1   : > { %2232 = vmatprep.subr.bf16.mxu1 %v8885_v29  ;;  %v8969_v29 = vld [vmem:[%s9150_s19 + $0x7a4] ss:$8 sps:$4 sm:$0xff]  }
  0xd3   : > { %2192 = vmatpush2.bf16.msra.mxu0 %v8880_v33  ;;  %v8972_v33 = vld [vmem:[%s9150_s19 + $0x694] ss:$8 sps:$4 sm:$0xff]  }
  0xd4   : > { %2233 = vmatpush2.bf16.msra.mxu1 %v8883_v34  ;;  %2243 = vmatprep.subr.bf16.mxu0 %v8888_v35  ;;  %v8975_v34 = vld [vmem:[%s9150_s19 + $0x794] ss:$8 sps:$4 sm:$0xff]   ;;  %v8970_v35 = vld [vmem:[%s9150_s19 + $0x690] ss:$8 sps:$4 sm:$0xff]  }
  0xd5   : > { %2284 = vmatprep.subr.bf16.mxu1 %v8891_v36  ;;  %v8973_v36 = vld [vmem:[%s9150_s19 + $0x790] ss:$8 sps:$4 sm:$0xff]  }
  0xd6   : > { %2194 = vmatmul.mubr.bf16.vlgmr.msra.gmra.mxu0 %v675_v32  ;;  %v8967_v32 = vld [vmem:[%s9150_s19 + $0x7a0] ss:$8 sps:$4 sm:$0xff]  }
  0xd7   : > { %2235 = vmatmul.mubr.bf16.vlgmr.msra.gmra.mxu1 %v697_v38  ;;  %2244 = vmatpush1.bf16.msra.mxu0 %v8886_v39  ;;  %v8981_v38 = vld [vmem:[%s9150_s19 + $0x784] ss:$8 sps:$4 sm:$0xff]   ;;  %v682_v39 = vrot.slane %v9369_v26, %v9200_v50 }
  0xd8   : > { %2285 = vmatpush1.bf16.msra.mxu1 %v8889_v30  ;;  %2245 = vmatprep.subr.bf16.mxu0 %v8894_v40  ;;  %v8976_v30 = vld [vmem:[%s9150_s19 + $0x680] ss:$8 sps:$4 sm:$0xff]  }
  0xd9   : > { %2286 = vmatprep.subr.bf16.mxu1 %v8897_v41  ;;  %2275 = vmatprep.mubr.bf16.mxu0 %v696_v37  ;;  %v8978_v37 = vld [vmem:[%s9150_s19 + $0x684] ss:$8 sps:$4 sm:$0xff]   ;;  %v8979_v40 = vld [vmem:[%s9150_s19 + $0x780] ss:$8 sps:$4 sm:$0xff]   ;;  %v698_v41 = vcombine.high %v682_v39, %v682_v39 }
  0xda   : > { %2316 = vmatprep.mubr.bf16.mxu1 %v700_v42 }
  0xdb   : > { %2246 = vmatpush1.bf16.msra.mxu0 %v8892_v43 }
  0xdc   : > { %2287 = vmatpush1.bf16.msra.mxu1 %v8895_v45  ;;  %2247 = vmatprep.subr.bf16.mxu0 %v8900_v46 }
  0xdd   : > { %2288 = vmatprep.subr.bf16.mxu1 %v8903_v47 }
  0xdf   : > { %2248 = vmatpush1.bf16.msra.mxu0 %v8898_v48 }
  0xe0   : > { %2289 = vmatpush1.bf16.msra.mxu1 %v8901_v49  ;;  %2249 = vmatprep.subr.bf16.mxu0 %v8906_v51 }
  0xe1   : > { %2290 = vmatprep.subr.bf16.mxu1 %v8909_v52 }
  0xe3   : > { %2250 = vmatpush1.bf16.msra.mxu0 %v8904_v53 }
  0xe4   : > { %2291 = vmatpush1.bf16.msra.mxu1 %v8907_v54  ;;  %2251 = vmatprep.subr.bf16.mxu0 %v8912_v55 }
  0xe5   : > { %2292 = vmatprep.subr.bf16.mxu1 %v8915_v56 }
  0xe7   : > { %2252 = vmatpush1.bf16.msra.mxu0 %v8910_v57 }
  0xe8   : > { %2293 = vmatpush1.bf16.msra.mxu1 %v8913_v58  ;;  %2253 = vmatprep.subr.bf16.mxu0 %v8918_v59 }
  0xe9   : > { %2294 = vmatprep.subr.bf16.mxu1 %v8921_v60 }
  0xeb   : > { %2254 = vmatpush1.bf16.msra.mxu0 %v8916_v61 }
  0xec   : > { %2295 = vmatpush1.bf16.msra.mxu1 %v8919_v62  ;;  %2255 = vmatprep.subr.bf16.mxu0 %v8924_v63 }
  0xed   : > { %2296 = vmatprep.subr.bf16.mxu1 %v8927_v0 }
  0xef   : > { %2256 = vmatpush1.bf16.msra.mxu0 %v8922_v1 }
  0xf0   : > { %2297 = vmatpush1.bf16.msra.mxu1 %v8925_v2  ;;  %2257 = vmatprep.subr.bf16.mxu0 %v8930_v3 }
  0xf1   : > { %2298 = vmatprep.subr.bf16.mxu1 %v8933_v4 }
  0xf3   : > { %2258 = vmatpush1.bf16.msra.mxu0 %v8928_v5 }
  0xf4   : > { %2299 = vmatpush1.bf16.msra.mxu1 %v8931_v6  ;;  %2259 = vmatprep.subr.bf16.mxu0 %v8936_v8 }
  0xf5   : > { %2300 = vmatprep.subr.bf16.mxu1 %v8939_v9 }
  0xf7   : > { %2260 = vmatpush2.bf16.msra.mxu0 %v8934_v10 }
  0xf8   : > { %2301 = vmatpush2.bf16.msra.mxu1 %v8937_v11  ;;  %2261 = vmatprep.subr.bf16.mxu0 %v8942_v12 }
  0xf9   : > { %2302 = vmatprep.subr.bf16.mxu1 %v8945_v13  ;;  %v9075_v13 = vmov 1983009808  }
  0xfb   : > { %2262 = vmatpush2.bf16.msra.mxu0 %v8940_v14  ;;  %v2329_v14 = vunpack.c.l.s4 %v9075_v13 }
  0xfc   : > { %2303 = vmatpush2.bf16.msra.mxu1 %v8943_v15  ;;  %2263 = vmatprep.subr.bf16.mxu0 %v8948_v16 }
  0xfd   : > { %2304 = vmatprep.subr.bf16.mxu1 %v8951_v17 }
  0xff   : > { %2264 = vmatpush2.bf16.msra.mxu0 %v8946_v18 }
 0x100   : > { %2305 = vmatpush2.bf16.msra.mxu1 %v8949_v19  ;;  %2265 = vmatprep.subr.bf16.mxu0 %v8954_v20  ;;  %v2330_v19 = vunpack.c.0.s8 %v2329_v14 }
 0x101   : > { %2306 = vmatprep.subr.bf16.mxu1 %v8957_v21 }
 0x103   : > { %2266 = vmatpush2.bf16.msra.mxu0 %v8952_v22 }
 0x104   : > { %2307 = vmatpush2.bf16.msra.mxu1 %v8955_v23  ;;  %2267 = vmatprep.subr.bf16.mxu0 %v8960_v24 }
 0x105   : > { %2308 = vmatprep.subr.bf16.mxu1 %v8963_v25 }
 0x107   : > { %2268 = vmatpush2.bf16.msra.mxu0 %v8958_v27 }
 0x108   : > { %2309 = vmatpush2.bf16.msra.mxu1 %v8961_v28  ;;  %2269 = vmatprep.subr.bf16.mxu0 %v8966_v7  ;;  %v9449_v28 = vsub.s32 %v2330_v19, %v9192_v44 }
 0x109   : > { %2310 = vmatprep.subr.bf16.mxu1 %v8969_v29 }
 0x10b   : > { %2270 = vmatpush2.bf16.msra.mxu0 %v8964_v31 }
 0x10c   : > { %2311 = vmatpush2.bf16.msra.mxu1 %v8967_v32  ;;  %2271 = vmatprep.subr.bf16.mxu0 %v8972_v33  ;;  %v342_v32 = vld [vmem:[#allocation2] sm:$0xf] }
 0x10d   : > { %2312 = vmatprep.subr.bf16.mxu1 %v8975_v34 }
 0x10f   : > { %2272 = vmatpush2.bf16.msra.mxu0 %v8970_v35 }
 0x110   : > { %2313 = vmatpush2.bf16.msra.mxu1 %v8973_v36  ;;  %2273 = vmatprep.subr.bf16.mxu0 %v8978_v37 }
 0x111   : > { %2314 = vmatprep.subr.bf16.mxu1 %v8981_v38 }
 0x113   : > { %2274 = vmatpush2.bf16.msra.mxu0 %v8976_v30 }
 0x114   : > { %2315 = vmatpush2.bf16.msra.mxu1 %v8979_v40 }
 0x116   : > { %v2031_v42 = vpop.f32.mrf.mxu0  ;;  %2276 = vmatmul.mubr.bf16.vlgmr.msra.gmra.mxu0 %v682_v39 }
 0x117   : > { %v2072_v43 = vpop.f32.mrf.mxu1  ;;  %2317 = vmatmul.mubr.bf16.vlgmr.msra.gmra.mxu1 %v698_v41 }
 0x118   : > { %v2073_v45 = vadd.f32 %v2072_v43, %v2031_v42  ;;  %v2033_v46 = vpop.f32.mrf.mxu0 }
 0x119   : > { %v2074_v47 = vpop.f32.mrf.mxu1 }
 0x11a   : > { %v2075_v48 = vadd.f32 %v2074_v47, %v2033_v46  ;;  %v2035_v49 = vpop.f32.mrf.mxu0 }
 0x11b   : > { %v2076_v51 = vpop.f32.mrf.mxu1 }
 0x11c   : > { %v2036_v26 = vpop.f32.mrf.mxu0 }
 0x11d   : > { %v2077_v52 = vpop.f32.mrf.mxu1 }
 0x156   : > { %v2113_v53 = vpop.f32.mrf.mxu0 }
 0x157   : > { %v2154_v54 = vpop.f32.mrf.mxu1  ;;  %v2114_v55 = vadd.f32 %v2113_v53, %v2073_v45 }
 0x158   : > { %v2115_v56 = vpop.f32.mrf.mxu0 }
 0x159   : > { %v2156_v57 = vpop.f32.mrf.mxu1  ;;  %v2155_v58 = vadd.f32 %v2154_v54, %v2114_v55  ;;  %v2116_v59 = vadd.f32 %v2115_v56, %v2075_v48 }
 0x15a   : > { %v2117_v60 = vpop.f32.mrf.mxu0 }
 0x15b   : > { %v2158_v61 = vpop.f32.mrf.mxu1  ;;  %v2157_v62 = vadd.f32 %v2156_v57, %v2116_v59 }
 0x15c   : > { %v2118_v63 = vpop.f32.mrf.mxu0 }
 0x15d   : > { %v2159_v0 = vpop.f32.mrf.mxu1 }
 0x196   : > { %v2195_v1 = vpop.f32.mrf.mxu0 }
 0x197   : > { %v2236_v2 = vpop.f32.mrf.mxu1  ;;  %v2196_v3 = vadd.f32 %v2195_v1, %v2155_v58 }
 0x198   : > { %v2197_v4 = vpop.f32.mrf.mxu0 }
 0x199   : > { %v2238_v5 = vpop.f32.mrf.mxu1  ;;  %v2237_v6 = vadd.f32 %v2236_v2, %v2196_v3  ;;  %v2198_v12 = vadd.f32 %v2197_v4, %v2157_v62 }
 0x19a   : > { %v2199_v8 = vpop.f32.mrf.mxu0 }
 0x19b   : > { %v2240_v9 = vpop.f32.mrf.mxu1  ;;  %v2239_v17 = vadd.f32 %v2238_v5, %v2198_v12 }
 0x19c   : > { %v2200_v10 = vpop.f32.mrf.mxu0 }
 0x19d   : > { %v2241_v11 = vpop.f32.mrf.mxu1 }
 0x1d6   : > { %v2277_v15 = vpop.f32.mrf.mxu0 }
 0x1d7   : > { %v2318_v16 = vpop.f32.mrf.mxu1  ;;  %v2278_v18 = vadd.f32 %v2277_v15, %v2237_v6 }
 0x1d8   : > { %v2279_v20 = vpop.f32.mrf.mxu0 }
 0x1d9   : > { %v2320_v21 = vpop.f32.mrf.mxu1  ;;  %v2280_v22 = vadd.f32 %v2279_v20, %v2239_v17  ;;  %v2319_v25 = vadd.f32 %v2318_v16, %v2278_v18 }
 0x1da   : > { %v2281_v23 = vpop.f32.mrf.mxu0 }
 0x1db   : > { %v2322_v24 = vpop.f32.mrf.mxu1  ;;  %v2321_v27 = vadd.f32 %v2320_v21, %v2280_v22 }
 0x1dc   : > { %v2282_v7 = vpop.f32.mrf.mxu0 }
 0x1dd   : > { %v2323_v29 = vpop.f32.mrf.mxu1  ;;  %v2327_v31 = vcombine.low %v2319_v25, %v2321_v27 }
 0x1df   : > { %v2334_v33 = vrot.slane %v2327_v31, %v9449_v28  ;;  %2341 = sbr.rel (%p8010_p6) target bundleno = 1217 (0x4c1), region = 52 }
 0x1e1   : > { %v2336_v34 = vadd.f32 %v2334_v33, %v342_v32 }
 0x1e3   : > { %2337 = vst [vmem:[#allocation2] sm:$0xf] %v2336_v34 }
 0x1e4   : > { %v2833_v35 = vld [vmem:[%s11386_s4 + $0xe00] sm:$0xff]  ;;  %v2834_v37 = vld [vmem:[%s11386_s4 + $0xe08] sm:$0xff]  ;;  %v9076_v42 = vmov 0   ;;  %v9504_v1 = vsub.s32 0, %v9192_v44  ;;  %v9507_v2 = vsub.s32 1, %v9192_v44 }
 0x1e5   : > { %v2865_v36 = vld [vmem:[%s11386_s4 + $0xf00] sm:$0xff]  ;;  %v2866_v39 = vld [vmem:[%s11386_s4 + $0xf08] sm:$0xff]  ;;  %5825 = vmatprep.mubr.bf16.mxu0 %v9076_v42  ;;  %5866 = vmatprep.mubr.bf16.mxu1 %v9076_v42 }
 0x1e6   : > { %v8460_v38 = vcombine.high %v2833_v35, %v2865_v36  ;;  %v8459_v30 = vcombine.low %v2833_v35, %v2865_v36  ;;  %v2769_v40 = vld [vmem:[%s11386_s4 + $0xc00] sm:$0xff]  ;;  %v8462_v43 = vcombine.high %v2834_v37, %v2866_v39  ;;  %v8461_v45 = vcombine.low %v2834_v37, %v2866_v39  ;;  %v2770_v47 = vld [vmem:[%s11386_s4 + $0xc08] sm:$0xff] }
 0x1e7   : > { %v2801_v41 = vld [vmem:[%s11386_s4 + $0xd00] sm:$0xff]  ;;  %v2802_v48 = vld [vmem:[%s11386_s4 + $0xd08] sm:$0xff] }
 0x1e8   : > { %v8396_v46 = vcombine.high %v2769_v40, %v2801_v41  ;;  %v2705_v49 = vld [vmem:[%s11386_s4 + $0xa00] sm:$0xff]  ;;  %5793 = vmatprep.subr.bf16.mxu0 %v8460_v38  ;;  %v8398_v51 = vcombine.high %v2770_v47, %v2802_v48  ;;  %v2706_v52 = vld [vmem:[%s11386_s4 + $0xa08] sm:$0xff]  ;;  %5834 = vmatprep.subr.bf16.mxu1 %v8462_v43  ;;  %v8395_v54 = vcombine.low %v2769_v40, %v2801_v41 }
 0x1e9   : > { %v2737_v26 = vld [vmem:[%s11386_s4 + $0xb00] sm:$0xff]  ;;  %v2738_v53 = vld [vmem:[%s11386_s4 + $0xb08] sm:$0xff]  ;;  %5794 = vmatpush1.bf16.msra.mxu0 %v8459_v30  ;;  %5835 = vmatpush1.bf16.msra.mxu1 %v8461_v45  ;;  %v8397_v55 = vcombine.low %v2770_v47, %v2802_v48 }
 0x1ea   : > { %5795 = vmatprep.subr.bf16.mxu0 %v8396_v46  ;;  %v8332_v56 = vcombine.high %v2705_v49, %v2737_v26  ;;  %5836 = vmatprep.subr.bf16.mxu1 %v8398_v51  ;;  %v8334_v57 = vcombine.high %v2706_v52, %v2738_v53  ;;  %v2641_v58 = vld [vmem:[%s11386_s4 + $0x800] sm:$0xff]  ;;  %v2642_v60 = vld [vmem:[%s11386_s4 + $0x808] sm:$0xff]  ;;  %v8331_v62 = vcombine.low %v2705_v49, %v2737_v26  ;;  %v2835_v26 = vld [vmem:[%s11386_s4 + $0xe10] sm:$0xff] }
 0x1eb   : > { %v2673_v59 = vld [vmem:[%s11386_s4 + $0x900] sm:$0xff]  ;;  %v2674_v61 = vld [vmem:[%s11386_s4 + $0x908] sm:$0xff]  ;;  %v8333_v63 = vcombine.low %v2706_v52, %v2738_v53  ;;  %v2867_v52 = vld [vmem:[%s11386_s4 + $0xf10] sm:$0xff] }
 0x1ec   : > { %v8268_v0 = vcombine.high %v2641_v58, %v2673_v59  ;;  %v8270_v3 = vcombine.high %v2642_v60, %v2674_v61  ;;  %v2577_v4 = vld [vmem:[%s11386_s4 + $0x600] sm:$0xff]  ;;  %v2578_v6 = vld [vmem:[%s11386_s4 + $0x608] sm:$0xff]  ;;  %v8267_v9 = vcombine.low %v2641_v58, %v2673_v59  ;;  %v8269_v10 = vcombine.low %v2642_v60, %v2674_v61  ;;  %v2836_v53 = vld [vmem:[%s11386_s4 + $0xe18] sm:$0xff] }
 0x1ed   : > { %5796 = vmatpush1.bf16.msra.mxu0 %v8395_v54  ;;  %5837 = vmatpush1.bf16.msra.mxu1 %v8397_v55  ;;  %v2609_v5 = vld [vmem:[%s11386_s4 + $0x700] sm:$0xff]  ;;  %v2610_v8 = vld [vmem:[%s11386_s4 + $0x708] sm:$0xff]  ;;  %v2868_v54 = vld [vmem:[%s11386_s4 + $0xf18] sm:$0xff] }
 0x1ee   : > { %5797 = vmatprep.subr.bf16.mxu0 %v8332_v56  ;;  %5838 = vmatprep.subr.bf16.mxu1 %v8334_v57  ;;  %v2343_v11 = vld [vmem:[%s11384_s2] sm:$0x3]  ;;  %v8204_v12 = vcombine.high %v2577_v4, %v2609_v5  ;;  %v8206_v15 = vcombine.high %v2578_v6, %v2610_v8  ;;  %v2514_v18 = vld [vmem:[%s11386_s4 + $0x408] sm:$0xff]  ;;  %v8203_v21 = vcombine.low %v2577_v4, %v2609_v5 }
 0x1ef   : > { %v2348_v13 = vrot.slane %v2343_v11, %v9504_v1  ;;  %v2352_v14 = vrot.slane %v2343_v11, %v9507_v2  ;;  %v2513_v16 = vld [vmem:[%s11386_s4 + $0x400] sm:$0xff]  ;;  %v2546_v19 = vld [vmem:[%s11386_s4 + $0x508] sm:$0xff]  ;;  %v8205_v23 = vcombine.low %v2578_v6, %v2610_v8  ;;  %v8464_v57 = vcombine.high %v2835_v26, %v2867_v52  ;;  %v2707_v11 = vld [vmem:[%s11386_s4 + $0xa10] sm:$0xff] }
 0x1f0   : > { %v2545_v17 = vld [vmem:[%s11386_s4 + $0x500] sm:$0xff]  ;;  %v8142_v27 = vcombine.high %v2514_v18, %v2546_v19  ;;  %v2450_v31 = vld [vmem:[%s11386_s4 + $0x208] sm:$0xff]  ;;  %v8141_v35 = vcombine.low %v2514_v18, %v2546_v19  ;;  %v8466_v58 = vcombine.high %v2836_v53, %v2868_v54  ;;  %v8463_v5 = vcombine.low %v2835_v26, %v2867_v52  ;;  %v2643_v19 = vld [vmem:[%s11386_s4 + $0x810] sm:$0xff] }
 0x1f1   : > { %5798 = vmatpush1.bf16.msra.mxu0 %v8331_v62  ;;  %5839 = vmatpush1.bf16.msra.mxu1 %v8333_v63  ;;  %v2353_v20 = vcombine.low %v2348_v13, %v2352_v14  ;;  %v2342_v22 = vld [vmem:[#allocation2] sm:$0xf]  ;;  %v8140_v24 = vcombine.high %v2513_v16, %v2545_v17  ;;  %v2482_v32 = vld [vmem:[%s11386_s4 + $0x308] sm:$0xff]  ;;  %v8139_v34 = vcombine.low %v2513_v16, %v2545_v17  ;;  %v2771_v62 = vld [vmem:[%s11386_s4 + $0xc10] sm:$0xff] }
 0x1f2   : > { %5799 = vmatprep.subr.bf16.mxu0 %v8268_v0  ;;  %5840 = vmatprep.subr.bf16.mxu1 %v8270_v3  ;;  %v2449_v7 = vld [vmem:[%s11386_s4 + $0x200] sm:$0xff]  ;;  %v8078_v39 = vcombine.high %v2450_v31, %v2482_v32  ;;  %v2386_v41 = vld [vmem:[%s11386_s4 + $0x8] sm:$0xff]  ;;  %v8077_v47 = vcombine.low %v2450_v31, %v2482_v32  ;;  %v2803_v63 = vld [vmem:[%s11386_s4 + $0xd10] sm:$0xff]  ;;  %v8465_v6 = vcombine.low %v2836_v53, %v2868_v54 }
 0x1f3   : > { %v2360_v25 = vrot.slane %v2353_v20, %v9449_v28  ;;  %v2481_v29 = vld [vmem:[%s11386_s4 + $0x300] sm:$0xff]  ;;  %v2418_v43 = vld [vmem:[%s11386_s4 + $0x108] sm:$0xff]  ;;  %v2772_v0 = vld [vmem:[%s11386_s4 + $0xc18] sm:$0xff] }
 0x1f4   : > { %v8076_v36 = vcombine.high %v2449_v7, %v2481_v29  ;;  %v2385_v30 = vld [vmem:[%s11386_s4] sm:$0xff]  ;;  %v8075_v46 = vcombine.low %v2449_v7, %v2481_v29  ;;  %v8014_v51 = vcombine.high %v2386_v41, %v2418_v43  ;;  %v8013_v56 = vcombine.low %v2386_v41, %v2418_v43  ;;  %v2804_v3 = vld [vmem:[%s11386_s4 + $0xd18] sm:$0xff]  ;;  %v2675_v20 = vld [vmem:[%s11386_s4 + $0x910] sm:$0xff] }
 0x1f5   : > { %5800 = vmatpush1.bf16.msra.mxu0 %v8267_v9  ;;  %5841 = vmatpush1.bf16.msra.mxu1 %v8269_v10  ;;  %v2362_v33 = vadd.f32 %v2360_v25, %v2342_v22  ;;  %v2417_v40 = vld [vmem:[%s11386_s4 + $0x100] sm:$0xff]  ;;  %v8400_v9 = vcombine.high %v2771_v62, %v2803_v63  ;;  %v8402_v10 = vcombine.high %v2772_v0, %v2804_v3  ;;  %v2708_v13 = vld [vmem:[%s11386_s4 + $0xa18] sm:$0xff]  ;;  %v2579_v7 = vld [vmem:[%s11386_s4 + $0x610] sm:$0xff] }
 0x1f6   : > { %5801 = vmatprep.subr.bf16.mxu0 %v8204_v12  ;;  %5842 = vmatprep.subr.bf16.mxu1 %v8206_v15  ;;  %v8012_v48 = vcombine.high %v2385_v30, %v2417_v40  ;;  %v8011_v55 = vcombine.low %v2385_v30, %v2417_v40  ;;  %v2363_v59 = vld [vmem:[%s11385_s3] sm:$0x3]  ;;  %v2739_v12 = vld [vmem:[%s11386_s4 + $0xb10] sm:$0xff]  ;;  %v2740_v14 = vld [vmem:[%s11386_s4 + $0xb18] sm:$0xff]  ;;  %v8399_v15 = vcombine.low %v2771_v62, %v2803_v63 }
 0x1f7   : > { %v2365_v37 = vrot.slane %v2362_v33, 2  ;;  %2372 = vst [vmem:[#allocation3] sm:$0x3] %v2362_v33  ;;  %v2379_v38 = vrot.slane %v2362_v33, %v9449_v28  ;;  %v8401_v16 = vcombine.low %v2772_v0, %v2804_v3  ;;  %v8336_v17 = vcombine.high %v2707_v11, %v2739_v12  ;;  %v2676_v22 = vld [vmem:[%s11386_s4 + $0x918] sm:$0xff]  ;;  %v2611_v29 = vld [vmem:[%s11386_s4 + $0x710] sm:$0xff]  ;;  %v2869_v62 = vld [vmem:[%s11386_s4 + $0xf20] sm:$0xff] }
 0x1f8   : > { %v8338_v18 = vcombine.high %v2708_v13, %v2740_v14  ;;  %v8272_v25 = vcombine.high %v2643_v19, %v2675_v20  ;;  %v2580_v31 = vld [vmem:[%s11386_s4 + $0x618] sm:$0xff]  ;;  %v8207_v40 = vcombine.low %v2579_v7, %v2611_v29  ;;  %v2387_v53 = vld [vmem:[%s11386_s4 + $0x10] sm:$0xff]  ;;  %v2838_v63 = vld [vmem:[%s11386_s4 + $0xe28] sm:$0xff] }
 0x1f9   : > { %5802 = vmatpush1.bf16.msra.mxu0 %v8203_v21  ;;  %5843 = vmatpush1.bf16.msra.mxu1 %v8205_v23  ;;  %v2367_v45 = vmul.f32 0.5, %v2365_v37  ;;  %v2380_v28 = vcombine.high %v2379_v38, %v2379_v38  ;;  %v2644_v21 = vld [vmem:[%s11386_s4 + $0x818] sm:$0xff]  ;;  %v8335_v23 = vcombine.low %v2707_v11, %v2739_v12  ;;  %v2515_v37 = vld [vmem:[%s11386_s4 + $0x410] sm:$0xff]  ;;  %v2870_v0 = vld [vmem:[%s11386_s4 + $0xf28] sm:$0xff] }
 0x1fa   : > { %5803 = vmatprep.subr.bf16.mxu0 %v8140_v24  ;;  %5844 = vmatprep.subr.bf16.mxu1 %v8142_v27  ;;  %v8337_v24 = vcombine.low %v2708_v13, %v2740_v14  ;;  %v8274_v27 = vcombine.high %v2644_v21, %v2676_v22  ;;  %v2612_v32 = vld [vmem:[%s11386_s4 + $0x718] sm:$0xff]  ;;  %v2547_v38 = vld [vmem:[%s11386_s4 + $0x510] sm:$0xff]  ;;  %v2774_v11 = vld [vmem:[%s11386_s4 + $0xc28] sm:$0xff]  ;;  %v8469_v14 = vcombine.low %v2838_v63, %v2870_v0 }
 0x1fb   : > { %v2368_v49 = vmul.f32 1.442695, %v2367_v45  ;;  %2382 = vst [vmem:[#allocation5] sm:$0x3] %v2380_v28  ;;  %v2548_v30 = vld [vmem:[%s11386_s4 + $0x518] sm:$0xff]  ;;  %v8209_v41 = vcombine.low %v2580_v31, %v2612_v32  ;;  %v8144_v43 = vcombine.high %v2515_v37, %v2547_v38  ;;  %v2451_v28 = vld [vmem:[%s11386_s4 + $0x210] sm:$0xff] }
 0x1fc   : > { %v2419_v54 = vld [vmem:[%s11386_s4 + $0x110] sm:$0xff]  ;;  %v2806_v12 = vld [vmem:[%s11386_s4 + $0xd28] sm:$0xff] }
 0x1fd   : > { %5804 = vmatpush1.bf16.msra.mxu0 %v8139_v34  ;;  %5845 = vmatpush1.bf16.msra.mxu1 %v8141_v35  ;;  %8983 = vpow2.f32 %v2368_v49  ;;  %v8273_v34 = vcombine.low %v2644_v21, %v2676_v22  ;;  %v8208_v35 = vcombine.high %v2579_v7, %v2611_v29  ;;  %v8143_v49 = vcombine.low %v2515_v37, %v2547_v38  ;;  %v2646_v7 = vld [vmem:[%s11386_s4 + $0x828] sm:$0xff] }
 0x1fe   : > { %5805 = vmatprep.subr.bf16.mxu0 %v8076_v36  ;;  %5846 = vmatprep.subr.bf16.mxu1 %v8078_v39  ;;  %v8210_v36 = vcombine.high %v2580_v31, %v2612_v32  ;;  %v2516_v39 = vld [vmem:[%s11386_s4 + $0x418] sm:$0xff]  ;;  %v8015_v3 = vcombine.low %v2387_v53, %v2419_v54  ;;  %v8405_v22 = vcombine.low %v2774_v11, %v2806_v12  ;;  %v2678_v29 = vld [vmem:[%s11386_s4 + $0x928] sm:$0xff] }
 0x1ff   : > { %v8146_v45 = vcombine.high %v2516_v39, %v2548_v30  ;;  %v2582_v37 = vld [vmem:[%s11386_s4 + $0x628] sm:$0xff] }
 0x200   : > { %v2614_v38 = vld [vmem:[%s11386_s4 + $0x728] sm:$0xff] }
 0x201   : > { %5806 = vmatpush1.bf16.msra.mxu0 %v8075_v46  ;;  %5847 = vmatpush1.bf16.msra.mxu1 %v8077_v47  ;;  %v2483_v46 = vld [vmem:[%s11386_s4 + $0x310] sm:$0xff]  ;;  %v2452_v47 = vld [vmem:[%s11386_s4 + $0x218] sm:$0xff] }
 0x202   : > { %5807 = vmatprep.subr.bf16.mxu0 %v8012_v48  ;;  %5848 = vmatprep.subr.bf16.mxu1 %v8014_v51  ;;  %v2484_v48 = vld [vmem:[%s11386_s4 + $0x318] sm:$0xff]  ;;  %v8145_v51 = vcombine.low %v2516_v39, %v2548_v30  ;;  %v8080_v26 = vcombine.high %v2451_v28, %v2483_v46  ;;  %v8277_v30 = vcombine.low %v2646_v7, %v2678_v29 }
 0x203   : > { %v8082_v52 = vcombine.high %v2452_v47, %v2484_v48 }
 0x205   : > { %5808 = vmatpush1.bf16.msra.mxu0 %v8011_v55  ;;  %5849 = vmatpush1.bf16.msra.mxu1 %v8013_v56  ;;  %v2388_v55 = vld [vmem:[%s11386_s4 + $0x18] sm:$0xff] }
 0x206   : > { %5875 = vmatprep.subr.bf16.mxu0 %v8464_v57  ;;  %5916 = vmatprep.subr.bf16.mxu1 %v8466_v58  ;;  %v2420_v56 = vld [vmem:[%s11386_s4 + $0x118] sm:$0xff]  ;;  %v8079_v57 = vcombine.low %v2451_v28, %v2483_v46  ;;  %v8081_v58 = vcombine.low %v2452_v47, %v2484_v48  ;;  %v2518_v28 = vld [vmem:[%s11386_s4 + $0x428] sm:$0xff]  ;;  %v8213_v48 = vcombine.low %v2582_v37, %v2614_v38 }
 0x207   : > { %v2550_v46 = vld [vmem:[%s11386_s4 + $0x528] sm:$0xff] }
 0x20a   : > { %v8984_v60 = vpop.eup %8983 }
 0x20b   : > { %v2370_v61 = vmul.f32 %v8984_v60, %v2363_v59  ;;  %v8016_v59 = vcombine.high %v2387_v53, %v2419_v54  ;;  %v8018_v60 = vcombine.high %v2388_v55, %v2420_v56  ;;  %v2454_v53 = vld [vmem:[%s11386_s4 + $0x228] sm:$0xff] }
 0x20c   : > { %v2486_v54 = vld [vmem:[%s11386_s4 + $0x328] sm:$0xff] }
 0x20d   : > { %v2371_v4 = vadd.f32 %v2370_v61, %v2362_v33  ;;  %v8271_v33 = vcombine.low %v2643_v19, %v2675_v20  ;;  %v2837_v61 = vld [vmem:[%s11386_s4 + $0xe20] sm:$0xff]  ;;  %v2710_v19 = vld [vmem:[%s11386_s4 + $0xa28] sm:$0xff] }
 0x20e   : > { %v8467_v13 = vcombine.low %v2837_v61, %v2869_v62  ;;  %v2742_v20 = vld [vmem:[%s11386_s4 + $0xb28] sm:$0xff] }
 0x20f   : > { %2383 = vst [vmem:[#allocation7] sm:$0x3] %v2371_v4  ;;  %v9591_v8 = vpack.c.bf16 %v2371_v4, %v2371_v4  ;;  %v8017_v4 = vcombine.low %v2388_v55, %v2420_v56  ;;  %v8341_v32 = vcombine.low %v2710_v19, %v2742_v20  ;;  %v8149_v56 = vcombine.low %v2518_v28, %v2550_v46 }
 0x211   : > { %5826 = vmatmul.mubr.bf16.vlgmr.msra.gmra.mxu0 %v9591_v8  ;;  %5867 = vmatmul.mubr.bf16.vlgmr.msra.gmra.mxu1 %v9591_v8 }
 0x212   : > { %5876 = vmatpush1.bf16.msra.mxu0 %v8463_v5  ;;  %5917 = vmatpush1.bf16.msra.mxu1 %v8465_v6  ;;  %v8468_v5 = vcombine.high %v2837_v61, %v2869_v62  ;;  %v8470_v6 = vcombine.high %v2838_v63, %v2870_v0  ;;  %v2390_v61 = vld [vmem:[%s11386_s4 + $0x28] sm:$0xff]  ;;  %v8085_v0 = vcombine.low %v2454_v53, %v2486_v54 }
 0x213   : > { %5877 = vmatprep.subr.bf16.mxu0 %v8400_v9  ;;  %5918 = vmatprep.subr.bf16.mxu1 %v8402_v10  ;;  %v2773_v9 = vld [vmem:[%s11386_s4 + $0xc20] sm:$0xff]  ;;  %v2422_v62 = vld [vmem:[%s11386_s4 + $0x128] sm:$0xff] }
 0x214   : > { %5907 = vmatprep.mubr.bf16.mxu0 %v9076_v42  ;;  %5948 = vmatprep.mubr.bf16.mxu1 %v9076_v42  ;;  %v2805_v10 = vld [vmem:[%s11386_s4 + $0xd20] sm:$0xff] }
 0x215   : > { %v8403_v21 = vcombine.low %v2773_v9, %v2805_v10 }
 0x216   : > { %5878 = vmatpush1.bf16.msra.mxu0 %v8399_v15  ;;  %5919 = vmatpush1.bf16.msra.mxu1 %v8401_v16  ;;  %v8404_v15 = vcombine.high %v2773_v9, %v2805_v10  ;;  %v8406_v16 = vcombine.high %v2774_v11, %v2806_v12  ;;  %v2840_v9 = vld [vmem:[%s11386_s4 + $0xe38] sm:$0xff]  ;;  %v8021_v12 = vcombine.low %v2390_v61, %v2422_v62 }
 0x217   : > { %5879 = vmatprep.subr.bf16.mxu0 %v8336_v17  ;;  %5920 = vmatprep.subr.bf16.mxu1 %v8338_v18  ;;  %v2709_v17 = vld [vmem:[%s11386_s4 + $0xa20] sm:$0xff]  ;;  %v2872_v10 = vld [vmem:[%s11386_s4 + $0xf38] sm:$0xff] }
 0x218   : > { %v2741_v18 = vld [vmem:[%s11386_s4 + $0xb20] sm:$0xff] }
 0x219   : > { %v8339_v31 = vcombine.low %v2709_v17, %v2741_v18 }
 0x21a   : > { %5880 = vmatpush1.bf16.msra.mxu0 %v8335_v23  ;;  %5921 = vmatpush1.bf16.msra.mxu1 %v8337_v24  ;;  %v8340_v23 = vcombine.high %v2709_v17, %v2741_v18  ;;  %v8342_v24 = vcombine.high %v2710_v19, %v2742_v20  ;;  %v2776_v17 = vld [vmem:[%s11386_s4 + $0xc38] sm:$0xff]  ;;  %v8473_v20 = vcombine.low %v2840_v9, %v2872_v10 }
 0x21b   : > { %5881 = vmatprep.subr.bf16.mxu0 %v8272_v25  ;;  %5922 = vmatprep.subr.bf16.mxu1 %v8274_v27  ;;  %v2645_v25 = vld [vmem:[%s11386_s4 + $0x820] sm:$0xff]  ;;  %v2808_v18 = vld [vmem:[%s11386_s4 + $0xd38] sm:$0xff] }
 0x21c   : > { %v2677_v27 = vld [vmem:[%s11386_s4 + $0x920] sm:$0xff] }
 0x21d   : > { %v8275_v39 = vcombine.low %v2645_v25, %v2677_v27 }
 0x21e   : > { %5882 = vmatpush1.bf16.msra.mxu0 %v8271_v33  ;;  %5923 = vmatpush1.bf16.msra.mxu1 %v8273_v34  ;;  %v8276_v33 = vcombine.high %v2645_v25, %v2677_v27  ;;  %v8278_v34 = vcombine.high %v2646_v7, %v2678_v29  ;;  %v2712_v25 = vld [vmem:[%s11386_s4 + $0xa38] sm:$0xff]  ;;  %v8409_v29 = vcombine.low %v2776_v17, %v2808_v18 }
 0x21f   : > { %5883 = vmatprep.subr.bf16.mxu0 %v8208_v35  ;;  %5924 = vmatprep.subr.bf16.mxu1 %v8210_v36  ;;  %v2581_v35 = vld [vmem:[%s11386_s4 + $0x620] sm:$0xff]  ;;  %v2744_v27 = vld [vmem:[%s11386_s4 + $0xb38] sm:$0xff] }
 0x220   : > { %v2613_v36 = vld [vmem:[%s11386_s4 + $0x720] sm:$0xff] }
 0x221   : > { %v8211_v47 = vcombine.low %v2581_v35, %v2613_v36 }
 0x222   : > { %5884 = vmatpush1.bf16.msra.mxu0 %v8207_v40  ;;  %5925 = vmatpush1.bf16.msra.mxu1 %v8209_v41  ;;  %v8212_v40 = vcombine.high %v2581_v35, %v2613_v36  ;;  %v8214_v41 = vcombine.high %v2582_v37, %v2614_v38  ;;  %v2648_v35 = vld [vmem:[%s11386_s4 + $0x838] sm:$0xff]  ;;  %v8345_v38 = vcombine.low %v2712_v25, %v2744_v27 }
 0x223   : > { %5885 = vmatprep.subr.bf16.mxu0 %v8144_v43  ;;  %5926 = vmatprep.subr.bf16.mxu1 %v8146_v45  ;;  %v2517_v43 = vld [vmem:[%s11386_s4 + $0x420] sm:$0xff]  ;;  %v2680_v36 = vld [vmem:[%s11386_s4 + $0x938] sm:$0xff] }
 0x224   : > { %v2549_v45 = vld [vmem:[%s11386_s4 + $0x520] sm:$0xff] }
 0x225   : > { %v8147_v55 = vcombine.low %v2517_v43, %v2549_v45 }
 0x226   : > { %5886 = vmatpush1.bf16.msra.mxu0 %v8143_v49  ;;  %5927 = vmatpush1.bf16.msra.mxu1 %v8145_v51  ;;  %v8148_v49 = vcombine.high %v2517_v43, %v2549_v45  ;;  %v8150_v51 = vcombine.high %v2518_v28, %v2550_v46  ;;  %v2584_v43 = vld [vmem:[%s11386_s4 + $0x638] sm:$0xff]  ;;  %v8281_v46 = vcombine.low %v2648_v35, %v2680_v36 }
 0x227   : > { %5887 = vmatprep.subr.bf16.mxu0 %v8080_v26  ;;  %5928 = vmatprep.subr.bf16.mxu1 %v8082_v52  ;;  %v2453_v26 = vld [vmem:[%s11386_s4 + $0x220] sm:$0xff]  ;;  %v2616_v45 = vld [vmem:[%s11386_s4 + $0x738] sm:$0xff] }
 0x228   : > { %v2485_v52 = vld [vmem:[%s11386_s4 + $0x320] sm:$0xff] }
 0x229   : > { %v8083_v63 = vcombine.low %v2453_v26, %v2485_v52 }
 0x22a   : > { %5888 = vmatpush1.bf16.msra.mxu0 %v8079_v57  ;;  %5929 = vmatpush1.bf16.msra.mxu1 %v8081_v58  ;;  %v8084_v57 = vcombine.high %v2453_v26, %v2485_v52  ;;  %v8086_v58 = vcombine.high %v2454_v53, %v2486_v54  ;;  %v2520_v26 = vld [vmem:[%s11386_s4 + $0x438] sm:$0xff]  ;;  %v8217_v54 = vcombine.low %v2584_v43, %v2616_v45 }
 0x22b   : > { %5889 = vmatprep.subr.bf16.mxu0 %v8016_v59  ;;  %5930 = vmatprep.subr.bf16.mxu1 %v8018_v60  ;;  %v2389_v59 = vld [vmem:[%s11386_s4 + $0x20] sm:$0xff]  ;;  %v2552_v52 = vld [vmem:[%s11386_s4 + $0x538] sm:$0xff] }
 0x22c   : > { %v2421_v60 = vld [vmem:[%s11386_s4 + $0x120] sm:$0xff] }
 0x22d   : > { %v8019_v11 = vcombine.low %v2389_v59, %v2421_v60 }
 0x22e   : > { %5890 = vmatpush1.bf16.msra.mxu0 %v8015_v3  ;;  %5931 = vmatpush1.bf16.msra.mxu1 %v8017_v4  ;;  %v8020_v3 = vcombine.high %v2389_v59, %v2421_v60  ;;  %v8022_v4 = vcombine.high %v2390_v61, %v2422_v62  ;;  %v2456_v59 = vld [vmem:[%s11386_s4 + $0x238] sm:$0xff]  ;;  %v8153_v62 = vcombine.low %v2520_v26, %v2552_v52 }
 0x22f   : > { %5957 = vmatprep.subr.bf16.mxu0 %v8468_v5  ;;  %5998 = vmatprep.subr.bf16.mxu1 %v8470_v6  ;;  %v2839_v5 = vld [vmem:[%s11386_s4 + $0xe30] sm:$0xff]  ;;  %v2488_v60 = vld [vmem:[%s11386_s4 + $0x338] sm:$0xff] }
 0x230   : > { %v2871_v6 = vld [vmem:[%s11386_s4 + $0xf30] sm:$0xff] }
 0x231   : > { %5908 = vmatmul.mubr.bf16.vlgmr.msra.gmra.mxu0 %v9591_v8  ;;  %5949 = vmatmul.mubr.bf16.vlgmr.msra.gmra.mxu1 %v9591_v8  ;;  %v8471_v19 = vcombine.low %v2839_v5, %v2871_v6 }
 0x232   : > { %5958 = vmatpush1.bf16.msra.mxu0 %v8467_v13  ;;  %5999 = vmatpush1.bf16.msra.mxu1 %v8469_v14  ;;  %v8472_v13 = vcombine.high %v2839_v5, %v2871_v6  ;;  %v8474_v14 = vcombine.high %v2840_v9, %v2872_v10  ;;  %v2392_v5 = vld [vmem:[%s11386_s4 + $0x38] sm:$0xff]  ;;  %v8089_v10 = vcombine.low %v2456_v59, %v2488_v60 }
 0x233   : > { %5959 = vmatprep.subr.bf16.mxu0 %v8404_v15  ;;  %6000 = vmatprep.subr.bf16.mxu1 %v8406_v16  ;;  %v2775_v15 = vld [vmem:[%s11386_s4 + $0xc30] sm:$0xff]  ;;  %v2424_v6 = vld [vmem:[%s11386_s4 + $0x138] sm:$0xff] }
 0x234   : > { %5989 = vmatprep.mubr.bf16.mxu0 %v9076_v42  ;;  %6030 = vmatprep.mubr.bf16.mxu1 %v9076_v42  ;;  %v2807_v16 = vld [vmem:[%s11386_s4 + $0xd30] sm:$0xff] }
 0x235   : > { %v8407_v7 = vcombine.low %v2775_v15, %v2807_v16 }
 0x236   : > { %5960 = vmatpush1.bf16.msra.mxu0 %v8403_v21  ;;  %6001 = vmatpush1.bf16.msra.mxu1 %v8405_v22  ;;  %v8408_v21 = vcombine.high %v2775_v15, %v2807_v16  ;;  %v8410_v22 = vcombine.high %v2776_v17, %v2808_v18  ;;  %v2842_v15 = vld [vmem:[%s11386_s4 + $0xe48] sm:$0xff]  ;;  %v8025_v18 = vcombine.low %v2392_v5, %v2424_v6 }
 0x237   : > { %5961 = vmatprep.subr.bf16.mxu0 %v8340_v23  ;;  %6002 = vmatprep.subr.bf16.mxu1 %v8342_v24  ;;  %v2711_v23 = vld [vmem:[%s11386_s4 + $0xa30] sm:$0xff]  ;;  %v2874_v16 = vld [vmem:[%s11386_s4 + $0xf48] sm:$0xff] }
 0x238   : > { %v2743_v24 = vld [vmem:[%s11386_s4 + $0xb30] sm:$0xff] }
 0x239   : > { %v8343_v37 = vcombine.low %v2711_v23, %v2743_v24 }
 0x23a   : > { %5962 = vmatpush1.bf16.msra.mxu0 %v8339_v31  ;;  %6003 = vmatpush1.bf16.msra.mxu1 %v8341_v32  ;;  %v8344_v31 = vcombine.high %v2711_v23, %v2743_v24  ;;  %v8346_v32 = vcombine.high %v2712_v25, %v2744_v27  ;;  %v2778_v23 = vld [vmem:[%s11386_s4 + $0xc48] sm:$0xff]  ;;  %v8477_v27 = vcombine.low %v2842_v15, %v2874_v16 }
 0x23b   : > { %5963 = vmatprep.subr.bf16.mxu0 %v8276_v33  ;;  %6004 = vmatprep.subr.bf16.mxu1 %v8278_v34  ;;  %v2647_v33 = vld [vmem:[%s11386_s4 + $0x830] sm:$0xff]  ;;  %v2810_v24 = vld [vmem:[%s11386_s4 + $0xd48] sm:$0xff] }
 0x23c   : > { %v2679_v34 = vld [vmem:[%s11386_s4 + $0x930] sm:$0xff] }
 0x23d   : > { %v8279_v28 = vcombine.low %v2647_v33, %v2679_v34 }
 0x23e   : > { %5964 = vmatpush1.bf16.msra.mxu0 %v8275_v39  ;;  %6005 = vmatpush1.bf16.msra.mxu1 %v8277_v30  ;;  %v8280_v39 = vcombine.high %v2647_v33, %v2679_v34  ;;  %v8282_v30 = vcombine.high %v2648_v35, %v2680_v36  ;;  %v2714_v33 = vld [vmem:[%s11386_s4 + $0xa48] sm:$0xff]  ;;  %v8413_v36 = vcombine.low %v2778_v23, %v2810_v24 }
 0x23f   : > { %5965 = vmatprep.subr.bf16.mxu0 %v8212_v40  ;;  %6006 = vmatprep.subr.bf16.mxu1 %v8214_v41  ;;  %v2583_v40 = vld [vmem:[%s11386_s4 + $0x630] sm:$0xff]  ;;  %v2746_v34 = vld [vmem:[%s11386_s4 + $0xb48] sm:$0xff] }
 0x240   : > { %v2615_v41 = vld [vmem:[%s11386_s4 + $0x730] sm:$0xff] }
 0x241   : > { %v8215_v53 = vcombine.low %v2583_v40, %v2615_v41 }
 0x242   : > { %5966 = vmatpush1.bf16.msra.mxu0 %v8211_v47  ;;  %6007 = vmatpush1.bf16.msra.mxu1 %v8213_v48  ;;  %v8216_v47 = vcombine.high %v2583_v40, %v2615_v41  ;;  %v8218_v48 = vcombine.high %v2584_v43, %v2616_v45  ;;  %v2650_v40 = vld [vmem:[%s11386_s4 + $0x848] sm:$0xff]  ;;  %v8349_v45 = vcombine.low %v2714_v33, %v2746_v34 }
 0x243   : > { %5967 = vmatprep.subr.bf16.mxu0 %v8148_v49  ;;  %6008 = vmatprep.subr.bf16.mxu1 %v8150_v51  ;;  %v2519_v49 = vld [vmem:[%s11386_s4 + $0x430] sm:$0xff]  ;;  %v2682_v41 = vld [vmem:[%s11386_s4 + $0x948] sm:$0xff] }
 0x244   : > { %v2551_v51 = vld [vmem:[%s11386_s4 + $0x530] sm:$0xff] }
 0x245   : > { %v8151_v61 = vcombine.low %v2519_v49, %v2551_v51 }
 0x246   : > { %5968 = vmatpush1.bf16.msra.mxu0 %v8147_v55  ;;  %6009 = vmatpush1.bf16.msra.mxu1 %v8149_v56  ;;  %v8152_v55 = vcombine.high %v2519_v49, %v2551_v51  ;;  %v8154_v56 = vcombine.high %v2520_v26, %v2552_v52  ;;  %v2586_v49 = vld [vmem:[%s11386_s4 + $0x648] sm:$0xff]  ;;  %v8285_v52 = vcombine.low %v2650_v40, %v2682_v41 }
 0x247   : > { %5969 = vmatprep.subr.bf16.mxu0 %v8084_v57  ;;  %6010 = vmatprep.subr.bf16.mxu1 %v8086_v58  ;;  %v2455_v57 = vld [vmem:[%s11386_s4 + $0x230] sm:$0xff]  ;;  %v2618_v51 = vld [vmem:[%s11386_s4 + $0x748] sm:$0xff] }
 0x248   : > { %v2487_v58 = vld [vmem:[%s11386_s4 + $0x330] sm:$0xff] }
 0x249   : > { %v8087_v9 = vcombine.low %v2455_v57, %v2487_v58 }
 0x24a   : > { %5970 = vmatpush1.bf16.msra.mxu0 %v8083_v63  ;;  %6011 = vmatpush1.bf16.msra.mxu1 %v8085_v0  ;;  %v8088_v63 = vcombine.high %v2455_v57, %v2487_v58  ;;  %v8090_v0 = vcombine.high %v2456_v59, %v2488_v60  ;;  %v2522_v57 = vld [vmem:[%s11386_s4 + $0x448] sm:$0xff]  ;;  %v8221_v60 = vcombine.low %v2586_v49, %v2618_v51 }
 0x24b   : > { %5971 = vmatprep.subr.bf16.mxu0 %v8020_v3  ;;  %6012 = vmatprep.subr.bf16.mxu1 %v8022_v4  ;;  %v2391_v3 = vld [vmem:[%s11386_s4 + $0x30] sm:$0xff]  ;;  %v2554_v58 = vld [vmem:[%s11386_s4 + $0x548] sm:$0xff] }
 0x24c   : > { %v2423_v4 = vld [vmem:[%s11386_s4 + $0x130] sm:$0xff] }
 0x24d   : > { %v8023_v17 = vcombine.low %v2391_v3, %v2423_v4 }
 0x24e   : > { %5972 = vmatpush1.bf16.msra.mxu0 %v8019_v11  ;;  %6013 = vmatpush1.bf16.msra.mxu1 %v8021_v12  ;;  %v8024_v11 = vcombine.high %v2391_v3, %v2423_v4  ;;  %v8026_v12 = vcombine.high %v2392_v5, %v2424_v6  ;;  %v2458_v3 = vld [vmem:[%s11386_s4 + $0x248] sm:$0xff]  ;;  %v8157_v6 = vcombine.low %v2522_v57, %v2554_v58 }
 0x24f   : > { %6039 = vmatprep.subr.bf16.mxu0 %v8472_v13  ;;  %6080 = vmatprep.subr.bf16.mxu1 %v8474_v14  ;;  %v2841_v13 = vld [vmem:[%s11386_s4 + $0xe40] sm:$0xff]  ;;  %v2490_v4 = vld [vmem:[%s11386_s4 + $0x348] sm:$0xff] }
 0x250   : > { %v2873_v14 = vld [vmem:[%s11386_s4 + $0xf40] sm:$0xff] }
 0x251   : > { %5990 = vmatmul.mubr.bf16.vlgmr.msra.gmra.mxu0 %v9591_v8  ;;  %6031 = vmatmul.mubr.bf16.vlgmr.msra.gmra.mxu1 %v9591_v8  ;;  %v8475_v25 = vcombine.low %v2841_v13, %v2873_v14 }
 0x252   : > { %6040 = vmatpush1.bf16.msra.mxu0 %v8471_v19  ;;  %6081 = vmatpush1.bf16.msra.mxu1 %v8473_v20  ;;  %v8476_v19 = vcombine.high %v2841_v13, %v2873_v14  ;;  %v8478_v20 = vcombine.high %v2842_v15, %v2874_v16  ;;  %v2394_v13 = vld [vmem:[%s11386_s4 + $0x48] sm:$0xff]  ;;  %v8093_v16 = vcombine.low %v2458_v3, %v2490_v4 }
 0x253   : > { %6041 = vmatprep.subr.bf16.mxu0 %v8408_v21  ;;  %6082 = vmatprep.subr.bf16.mxu1 %v8410_v22  ;;  %v2777_v21 = vld [vmem:[%s11386_s4 + $0xc40] sm:$0xff]  ;;  %v2426_v14 = vld [vmem:[%s11386_s4 + $0x148] sm:$0xff] }
 0x254   : > { %6071 = vmatprep.mubr.bf16.mxu0 %v9076_v42  ;;  %6112 = vmatprep.mubr.bf16.mxu1 %v9076_v42  ;;  %v2809_v22 = vld [vmem:[%s11386_s4 + $0xd40] sm:$0xff] }
 0x255   : > { %v8411_v35 = vcombine.low %v2777_v21, %v2809_v22 }
 0x256   : > { %6042 = vmatpush1.bf16.msra.mxu0 %v8407_v7  ;;  %6083 = vmatpush1.bf16.msra.mxu1 %v8409_v29  ;;  %v8412_v7 = vcombine.high %v2777_v21, %v2809_v22  ;;  %v8414_v29 = vcombine.high %v2778_v23, %v2810_v24  ;;  %v2844_v21 = vld [vmem:[%s11386_s4 + $0xe58] sm:$0xff]  ;;  %v8029_v24 = vcombine.low %v2394_v13, %v2426_v14 }
 0x257   : > { %6043 = vmatprep.subr.bf16.mxu0 %v8344_v31  ;;  %6084 = vmatprep.subr.bf16.mxu1 %v8346_v32  ;;  %v2713_v31 = vld [vmem:[%s11386_s4 + $0xa40] sm:$0xff]  ;;  %v2876_v22 = vld [vmem:[%s11386_s4 + $0xf58] sm:$0xff] }
 0x258   : > { %v2745_v32 = vld [vmem:[%s11386_s4 + $0xb40] sm:$0xff] }
 0x259   : > { %v8347_v43 = vcombine.low %v2713_v31, %v2745_v32 }
 0x25a   : > { %6044 = vmatpush1.bf16.msra.mxu0 %v8343_v37  ;;  %6085 = vmatpush1.bf16.msra.mxu1 %v8345_v38  ;;  %v8348_v37 = vcombine.high %v2713_v31, %v2745_v32  ;;  %v8350_v38 = vcombine.high %v2714_v33, %v2746_v34  ;;  %v2780_v31 = vld [vmem:[%s11386_s4 + $0xc58] sm:$0xff]  ;;  %v8481_v34 = vcombine.low %v2844_v21, %v2876_v22 }
 0x25b   : > { %6045 = vmatprep.subr.bf16.mxu0 %v8280_v39  ;;  %6086 = vmatprep.subr.bf16.mxu1 %v8282_v30  ;;  %v2649_v39 = vld [vmem:[%s11386_s4 + $0x840] sm:$0xff]  ;;  %v2812_v32 = vld [vmem:[%s11386_s4 + $0xd58] sm:$0xff] }
 0x25c   : > { %v2681_v30 = vld [vmem:[%s11386_s4 + $0x940] sm:$0xff] }
 0x25d   : > { %v8283_v26 = vcombine.low %v2649_v39, %v2681_v30 }
 0x25e   : > { %6046 = vmatpush1.bf16.msra.mxu0 %v8279_v28  ;;  %6087 = vmatpush1.bf16.msra.mxu1 %v8281_v46  ;;  %v8284_v28 = vcombine.high %v2649_v39, %v2681_v30  ;;  %v8286_v46 = vcombine.high %v2650_v40, %v2682_v41  ;;  %v2716_v39 = vld [vmem:[%s11386_s4 + $0xa58] sm:$0xff]  ;;  %v8417_v41 = vcombine.low %v2780_v31, %v2812_v32 }
 0x25f   : > { %6047 = vmatprep.subr.bf16.mxu0 %v8216_v47  ;;  %6088 = vmatprep.subr.bf16.mxu1 %v8218_v48  ;;  %v2585_v47 = vld [vmem:[%s11386_s4 + $0x640] sm:$0xff]  ;;  %v2748_v30 = vld [vmem:[%s11386_s4 + $0xb58] sm:$0xff] }
 0x260   : > { %v2617_v48 = vld [vmem:[%s11386_s4 + $0x740] sm:$0xff] }
 0x261   : > { %v8219_v59 = vcombine.low %v2585_v47, %v2617_v48 }
 0x262   : > { %6048 = vmatpush1.bf16.msra.mxu0 %v8215_v53  ;;  %6089 = vmatpush1.bf16.msra.mxu1 %v8217_v54  ;;  %v8220_v53 = vcombine.high %v2585_v47, %v2617_v48  ;;  %v8222_v54 = vcombine.high %v2586_v49, %v2618_v51  ;;  %v2652_v47 = vld [vmem:[%s11386_s4 + $0x858] sm:$0xff]  ;;  %v8353_v51 = vcombine.low %v2716_v39, %v2748_v30 }
 0x263   : > { %6049 = vmatprep.subr.bf16.mxu0 %v8152_v55  ;;  %6090 = vmatprep.subr.bf16.mxu1 %v8154_v56  ;;  %v2521_v55 = vld [vmem:[%s11386_s4 + $0x440] sm:$0xff]  ;;  %v2684_v48 = vld [vmem:[%s11386_s4 + $0x958] sm:$0xff] }
 0x264   : > { %v2553_v56 = vld [vmem:[%s11386_s4 + $0x540] sm:$0xff] }
 0x265   : > { %v8155_v5 = vcombine.low %v2521_v55, %v2553_v56 }
 0x266   : > { %6050 = vmatpush1.bf16.msra.mxu0 %v8151_v61  ;;  %6091 = vmatpush1.bf16.msra.mxu1 %v8153_v62  ;;  %v8156_v61 = vcombine.high %v2521_v55, %v2553_v56  ;;  %v8158_v62 = vcombine.high %v2522_v57, %v2554_v58  ;;  %v2588_v55 = vld [vmem:[%s11386_s4 + $0x658] sm:$0xff]  ;;  %v8289_v58 = vcombine.low %v2652_v47, %v2684_v48 }
 0x267   : > { %6051 = vmatprep.subr.bf16.mxu0 %v8088_v63  ;;  %6092 = vmatprep.subr.bf16.mxu1 %v8090_v0  ;;  %v2457_v63 = vld [vmem:[%s11386_s4 + $0x240] sm:$0xff]  ;;  %v2620_v56 = vld [vmem:[%s11386_s4 + $0x758] sm:$0xff] }
 0x268   : > { %v2489_v0 = vld [vmem:[%s11386_s4 + $0x340] sm:$0xff] }
 0x269   : > { %v8091_v15 = vcombine.low %v2457_v63, %v2489_v0 }
 0x26a   : > { %6052 = vmatpush1.bf16.msra.mxu0 %v8087_v9  ;;  %6093 = vmatpush1.bf16.msra.mxu1 %v8089_v10  ;;  %v8092_v9 = vcombine.high %v2457_v63, %v2489_v0  ;;  %v8094_v10 = vcombine.high %v2458_v3, %v2490_v4  ;;  %v2524_v63 = vld [vmem:[%s11386_s4 + $0x458] sm:$0xff]  ;;  %v8225_v4 = vcombine.low %v2588_v55, %v2620_v56 }
 0x26b   : > { %6053 = vmatprep.subr.bf16.mxu0 %v8024_v11  ;;  %6094 = vmatprep.subr.bf16.mxu1 %v8026_v12  ;;  %v2393_v11 = vld [vmem:[%s11386_s4 + $0x40] sm:$0xff]  ;;  %v2556_v0 = vld [vmem:[%s11386_s4 + $0x558] sm:$0xff] }
 0x26c   : > { %v2425_v12 = vld [vmem:[%s11386_s4 + $0x140] sm:$0xff] }
 0x26d   : > { %v8027_v23 = vcombine.low %v2393_v11, %v2425_v12 }
 0x26e   : > { %6054 = vmatpush1.bf16.msra.mxu0 %v8023_v17  ;;  %6095 = vmatpush1.bf16.msra.mxu1 %v8025_v18  ;;  %v8028_v17 = vcombine.high %v2393_v11, %v2425_v12  ;;  %v8030_v18 = vcombine.high %v2394_v13, %v2426_v14  ;;  %v2460_v11 = vld [vmem:[%s11386_s4 + $0x258] sm:$0xff]  ;;  %v8161_v14 = vcombine.low %v2524_v63, %v2556_v0 }
 0x26f   : > { %6121 = vmatprep.subr.bf16.mxu0 %v8476_v19  ;;  %6162 = vmatprep.subr.bf16.mxu1 %v8478_v20  ;;  %v2843_v19 = vld [vmem:[%s11386_s4 + $0xe50] sm:$0xff]  ;;  %v2492_v12 = vld [vmem:[%s11386_s4 + $0x358] sm:$0xff] }
 0x270   : > { %v2875_v20 = vld [vmem:[%s11386_s4 + $0xf50] sm:$0xff] }
 0x271   : > { %6072 = vmatmul.mubr.bf16.vlgmr.msra.gmra.mxu0 %v9591_v8  ;;  %6113 = vmatmul.mubr.bf16.vlgmr.msra.gmra.mxu1 %v9591_v8  ;;  %v8479_v33 = vcombine.low %v2843_v19, %v2875_v20 }
 0x272   : > { %6122 = vmatpush1.bf16.msra.mxu0 %v8475_v25  ;;  %6163 = vmatpush1.bf16.msra.mxu1 %v8477_v27  ;;  %v8480_v25 = vcombine.high %v2843_v19, %v2875_v20  ;;  %v8482_v27 = vcombine.high %v2844_v21, %v2876_v22  ;;  %v2396_v19 = vld [vmem:[%s11386_s4 + $0x58] sm:$0xff]  ;;  %v8097_v22 = vcombine.low %v2460_v11, %v2492_v12 }
 0x273   : > { %6123 = vmatprep.subr.bf16.mxu0 %v8412_v7  ;;  %6164 = vmatprep.subr.bf16.mxu1 %v8414_v29  ;;  %v2779_v7 = vld [vmem:[%s11386_s4 + $0xc50] sm:$0xff]  ;;  %v2428_v20 = vld [vmem:[%s11386_s4 + $0x158] sm:$0xff] }
 0x274   : > { %6153 = vmatprep.mubr.bf16.mxu0 %v9076_v42  ;;  %6194 = vmatprep.mubr.bf16.mxu1 %v9076_v42  ;;  %v2811_v29 = vld [vmem:[%s11386_s4 + $0xd50] sm:$0xff] }
 0x275   : > { %v8415_v40 = vcombine.low %v2779_v7, %v2811_v29 }
 0x276   : > { %6124 = vmatpush1.bf16.msra.mxu0 %v8411_v35  ;;  %6165 = vmatpush1.bf16.msra.mxu1 %v8413_v36  ;;  %v8416_v35 = vcombine.high %v2779_v7, %v2811_v29  ;;  %v8418_v36 = vcombine.high %v2780_v31, %v2812_v32  ;;  %v2846_v7 = vld [vmem:[%s11386_s4 + $0xe68] sm:$0xff]  ;;  %v8033_v32 = vcombine.low %v2396_v19, %v2428_v20 }
 0x277   : > { %6125 = vmatprep.subr.bf16.mxu0 %v8348_v37  ;;  %6166 = vmatprep.subr.bf16.mxu1 %v8350_v38  ;;  %v2715_v37 = vld [vmem:[%s11386_s4 + $0xa50] sm:$0xff]  ;;  %v2878_v29 = vld [vmem:[%s11386_s4 + $0xf68] sm:$0xff] }
 0x278   : > { %v2747_v38 = vld [vmem:[%s11386_s4 + $0xb50] sm:$0xff] }
 0x279   : > { %v8351_v49 = vcombine.low %v2715_v37, %v2747_v38 }
 0x27a   : > { %6126 = vmatpush1.bf16.msra.mxu0 %v8347_v43  ;;  %6167 = vmatpush1.bf16.msra.mxu1 %v8349_v45  ;;  %v8352_v43 = vcombine.high %v2715_v37, %v2747_v38  ;;  %v8354_v45 = vcombine.high %v2716_v39, %v2748_v30  ;;  %v2782_v37 = vld [vmem:[%s11386_s4 + $0xc68] sm:$0xff]  ;;  %v8485_v30 = vcombine.low %v2846_v7, %v2878_v29 }
 0x27b   : > { %6127 = vmatprep.subr.bf16.mxu0 %v8284_v28  ;;  %6168 = vmatprep.subr.bf16.mxu1 %v8286_v46  ;;  %v2651_v28 = vld [vmem:[%s11386_s4 + $0x850] sm:$0xff]  ;;  %v2814_v38 = vld [vmem:[%s11386_s4 + $0xd68] sm:$0xff] }
 0x27c   : > { %v2683_v46 = vld [vmem:[%s11386_s4 + $0x950] sm:$0xff] }
 0x27d   : > { %v8287_v57 = vcombine.low %v2651_v28, %v2683_v46 }
 0x27e   : > { %6128 = vmatpush1.bf16.msra.mxu0 %v8283_v26  ;;  %6169 = vmatpush1.bf16.msra.mxu1 %v8285_v52  ;;  %v8288_v26 = vcombine.high %v2651_v28, %v2683_v46  ;;  %v8290_v52 = vcombine.high %v2652_v47, %v2684_v48  ;;  %v2718_v28 = vld [vmem:[%s11386_s4 + $0xa68] sm:$0xff]  ;;  %v8421_v48 = vcombine.low %v2782_v37, %v2814_v38 }
 0x27f   : > { %6129 = vmatprep.subr.bf16.mxu0 %v8220_v53  ;;  %6170 = vmatprep.subr.bf16.mxu1 %v8222_v54  ;;  %v2587_v53 = vld [vmem:[%s11386_s4 + $0x650] sm:$0xff]  ;;  %v2750_v46 = vld [vmem:[%s11386_s4 + $0xb68] sm:$0xff] }
 0x280   : > { %v2619_v54 = vld [vmem:[%s11386_s4 + $0x750] sm:$0xff] }
 0x281   : > { %v8223_v3 = vcombine.low %v2587_v53, %v2619_v54 }
 0x282   : > { %6130 = vmatpush1.bf16.msra.mxu0 %v8219_v59  ;;  %6171 = vmatpush1.bf16.msra.mxu1 %v8221_v60  ;;  %v8224_v59 = vcombine.high %v2587_v53, %v2619_v54  ;;  %v8226_v60 = vcombine.high %v2588_v55, %v2620_v56  ;;  %v2654_v53 = vld [vmem:[%s11386_s4 + $0x868] sm:$0xff]  ;;  %v8357_v56 = vcombine.low %v2718_v28, %v2750_v46 }
 0x283   : > { %6131 = vmatprep.subr.bf16.mxu0 %v8156_v61  ;;  %6172 = vmatprep.subr.bf16.mxu1 %v8158_v62  ;;  %v2523_v61 = vld [vmem:[%s11386_s4 + $0x450] sm:$0xff]  ;;  %v2686_v54 = vld [vmem:[%s11386_s4 + $0x968] sm:$0xff] }
 0x284   : > { %v2555_v62 = vld [vmem:[%s11386_s4 + $0x550] sm:$0xff] }
 0x285   : > { %v8159_v13 = vcombine.low %v2523_v61, %v2555_v62 }
 0x286   : > { %6132 = vmatpush1.bf16.msra.mxu0 %v8155_v5  ;;  %6173 = vmatpush1.bf16.msra.mxu1 %v8157_v6  ;;  %v8160_v5 = vcombine.high %v2523_v61, %v2555_v62  ;;  %v8162_v6 = vcombine.high %v2524_v63, %v2556_v0  ;;  %v2590_v61 = vld [vmem:[%s11386_s4 + $0x668] sm:$0xff]  ;;  %v8293_v0 = vcombine.low %v2654_v53, %v2686_v54 }
 0x287   : > { %6133 = vmatprep.subr.bf16.mxu0 %v8092_v9  ;;  %6174 = vmatprep.subr.bf16.mxu1 %v8094_v10  ;;  %v2459_v9 = vld [vmem:[%s11386_s4 + $0x250] sm:$0xff]  ;;  %v2622_v62 = vld [vmem:[%s11386_s4 + $0x768] sm:$0xff] }
 0x288   : > { %v2491_v10 = vld [vmem:[%s11386_s4 + $0x350] sm:$0xff] }
 0x289   : > { %v8095_v21 = vcombine.low %v2459_v9, %v2491_v10 }
 0x28a   : > { %6134 = vmatpush1.bf16.msra.mxu0 %v8091_v15  ;;  %6175 = vmatpush1.bf16.msra.mxu1 %v8093_v16  ;;  %v8096_v15 = vcombine.high %v2459_v9, %v2491_v10  ;;  %v8098_v16 = vcombine.high %v2460_v11, %v2492_v12  ;;  %v2526_v9 = vld [vmem:[%s11386_s4 + $0x468] sm:$0xff]  ;;  %v8229_v12 = vcombine.low %v2590_v61, %v2622_v62 }
 0x28b   : > { %6135 = vmatprep.subr.bf16.mxu0 %v8028_v17  ;;  %6176 = vmatprep.subr.bf16.mxu1 %v8030_v18  ;;  %v2395_v17 = vld [vmem:[%s11386_s4 + $0x50] sm:$0xff]  ;;  %v2558_v10 = vld [vmem:[%s11386_s4 + $0x568] sm:$0xff] }
 0x28c   : > { %v2427_v18 = vld [vmem:[%s11386_s4 + $0x150] sm:$0xff] }
 0x28d   : > { %v8031_v31 = vcombine.low %v2395_v17, %v2427_v18 }
 0x28e   : > { %6136 = vmatpush1.bf16.msra.mxu0 %v8027_v23  ;;  %6177 = vmatpush1.bf16.msra.mxu1 %v8029_v24  ;;  %v8032_v23 = vcombine.high %v2395_v17, %v2427_v18  ;;  %v8034_v24 = vcombine.high %v2396_v19, %v2428_v20  ;;  %v2462_v17 = vld [vmem:[%s11386_s4 + $0x268] sm:$0xff]  ;;  %v8165_v20 = vcombine.low %v2526_v9, %v2558_v10 }
 0x28f   : > { %6203 = vmatprep.subr.bf16.mxu0 %v8480_v25  ;;  %6244 = vmatprep.subr.bf16.mxu1 %v8482_v27  ;;  %v2845_v25 = vld [vmem:[%s11386_s4 + $0xe60] sm:$0xff]  ;;  %v2494_v18 = vld [vmem:[%s11386_s4 + $0x368] sm:$0xff] }
 0x290   : > { %v2877_v27 = vld [vmem:[%s11386_s4 + $0xf60] sm:$0xff] }
 0x291   : > { %6154 = vmatmul.mubr.bf16.vlgmr.msra.gmra.mxu0 %v9591_v8  ;;  %6195 = vmatmul.mubr.bf16.vlgmr.msra.gmra.mxu1 %v9591_v8  ;;  %v8483_v39 = vcombine.low %v2845_v25, %v2877_v27 }
 0x292   : > { %6204 = vmatpush1.bf16.msra.mxu0 %v8479_v33  ;;  %6245 = vmatpush1.bf16.msra.mxu1 %v8481_v34  ;;  %v8484_v33 = vcombine.high %v2845_v25, %v2877_v27  ;;  %v8486_v34 = vcombine.high %v2846_v7, %v2878_v29  ;;  %v2398_v25 = vld [vmem:[%s11386_s4 + $0x68] sm:$0xff]  ;;  %v8101_v29 = vcombine.low %v2462_v17, %v2494_v18 }
 0x293   : > { %6205 = vmatprep.subr.bf16.mxu0 %v8416_v35  ;;  %6246 = vmatprep.subr.bf16.mxu1 %v8418_v36  ;;  %v2781_v35 = vld [vmem:[%s11386_s4 + $0xc60] sm:$0xff]  ;;  %v2430_v27 = vld [vmem:[%s11386_s4 + $0x168] sm:$0xff] }
 0x294   : > { %6235 = vmatprep.mubr.bf16.mxu0 %v9076_v42  ;;  %6276 = vmatprep.mubr.bf16.mxu1 %v9076_v42  ;;  %v2813_v36 = vld [vmem:[%s11386_s4 + $0xd60] sm:$0xff] }
 0x295   : > { %v8419_v47 = vcombine.low %v2781_v35, %v2813_v36 }
 0x296   : > { %6206 = vmatpush1.bf16.msra.mxu0 %v8415_v40  ;;  %6247 = vmatpush1.bf16.msra.mxu1 %v8417_v41  ;;  %v8420_v40 = vcombine.high %v2781_v35, %v2813_v36  ;;  %v8422_v41 = vcombine.high %v2782_v37, %v2814_v38  ;;  %v2848_v35 = vld [vmem:[%s11386_s4 + $0xe78] sm:$0xff]  ;;  %v8037_v38 = vcombine.low %v2398_v25, %v2430_v27 }
 0x297   : > { %6207 = vmatprep.subr.bf16.mxu0 %v8352_v43  ;;  %6248 = vmatprep.subr.bf16.mxu1 %v8354_v45  ;;  %v2717_v43 = vld [vmem:[%s11386_s4 + $0xa60] sm:$0xff]  ;;  %v2880_v36 = vld [vmem:[%s11386_s4 + $0xf78] sm:$0xff] }
 0x298   : > { %v2749_v45 = vld [vmem:[%s11386_s4 + $0xb60] sm:$0xff] }
 0x299   : > { %v8355_v55 = vcombine.low %v2717_v43, %v2749_v45 }
 0x29a   : > { %6208 = vmatpush1.bf16.msra.mxu0 %v8351_v49  ;;  %6249 = vmatpush1.bf16.msra.mxu1 %v8353_v51  ;;  %v8356_v49 = vcombine.high %v2717_v43, %v2749_v45  ;;  %v8358_v51 = vcombine.high %v2718_v28, %v2750_v46  ;;  %v2784_v43 = vld [vmem:[%s11386_s4 + $0xc78] sm:$0xff]  ;;  %v8489_v46 = vcombine.low %v2848_v35, %v2880_v36 }
 0x29b   : > { %6209 = vmatprep.subr.bf16.mxu0 %v8288_v26  ;;  %6250 = vmatprep.subr.bf16.mxu1 %v8290_v52  ;;  %v2653_v26 = vld [vmem:[%s11386_s4 + $0x860] sm:$0xff]  ;;  %v2816_v45 = vld [vmem:[%s11386_s4 + $0xd78] sm:$0xff] }
 0x29c   : > { %v2685_v52 = vld [vmem:[%s11386_s4 + $0x960] sm:$0xff] }
 0x29d   : > { %v8291_v63 = vcombine.low %v2653_v26, %v2685_v52 }
 0x29e   : > { %6210 = vmatpush1.bf16.msra.mxu0 %v8287_v57  ;;  %6251 = vmatpush1.bf16.msra.mxu1 %v8289_v58  ;;  %v8292_v57 = vcombine.high %v2653_v26, %v2685_v52  ;;  %v8294_v58 = vcombine.high %v2654_v53, %v2686_v54  ;;  %v2720_v26 = vld [vmem:[%s11386_s4 + $0xa78] sm:$0xff] }
 0x29f   : > { %6211 = vmatprep.subr.bf16.mxu0 %v8224_v59  ;;  %6252 = vmatprep.subr.bf16.mxu1 %v8226_v60  ;;  %v2589_v59 = vld [vmem:[%s11386_s4 + $0x660] sm:$0xff]  ;;  %v2752_v52 = vld [vmem:[%s11386_s4 + $0xb78] sm:$0xff] }
 0x2a0   : > { %v2621_v60 = vld [vmem:[%s11386_s4 + $0x760] sm:$0xff] }
 0x2a1   : > { %v8227_v11 = vcombine.low %v2589_v59, %v2621_v60 }
 0x2a2   : > { %6212 = vmatpush1.bf16.msra.mxu0 %v8223_v3  ;;  %6253 = vmatpush1.bf16.msra.mxu1 %v8225_v4  ;;  %v8228_v3 = vcombine.high %v2589_v59, %v2621_v60  ;;  %v8230_v4 = vcombine.high %v2590_v61, %v2622_v62  ;;  %v8362_v60 = vcombine.high %v2720_v26, %v2752_v52  ;;  %v2655_v61 = vld [vmem:[%s11386_s4 + $0x870] sm:$0xff] }
 0x2a3   : > { %6213 = vmatprep.subr.bf16.mxu0 %v8160_v5  ;;  %6254 = vmatprep.subr.bf16.mxu1 %v8162_v6  ;;  %v2525_v5 = vld [vmem:[%s11386_s4 + $0x460] sm:$0xff]  ;;  %v2687_v62 = vld [vmem:[%s11386_s4 + $0x970] sm:$0xff] }
 0x2a4   : > { %v2557_v6 = vld [vmem:[%s11386_s4 + $0x560] sm:$0xff] }
 0x2a5   : > { %v8163_v19 = vcombine.low %v2525_v5, %v2557_v6 }
 0x2a6   : > { %6214 = vmatpush1.bf16.msra.mxu0 %v8159_v13  ;;  %6255 = vmatpush1.bf16.msra.mxu1 %v8161_v14  ;;  %v8164_v13 = vcombine.high %v2525_v5, %v2557_v6  ;;  %v8166_v14 = vcombine.high %v2526_v9, %v2558_v10  ;;  %v8361_v6 = vcombine.low %v2720_v26, %v2752_v52  ;;  %v2849_v26 = vld [vmem:[%s11386_s4 + $0xe80] sm:$0xff] }
 0x2a7   : > { %6215 = vmatprep.subr.bf16.mxu0 %v8096_v15  ;;  %6256 = vmatprep.subr.bf16.mxu1 %v8098_v16  ;;  %v2461_v15 = vld [vmem:[%s11386_s4 + $0x260] sm:$0xff] }
 0x2a8   : > { %v2493_v16 = vld [vmem:[%s11386_s4 + $0x360] sm:$0xff] }
 0x2a9   : > { %v8099_v7 = vcombine.low %v2461_v15, %v2493_v16 }
 0x2aa   : > { %6216 = vmatpush1.bf16.msra.mxu0 %v8095_v21  ;;  %6257 = vmatpush1.bf16.msra.mxu1 %v8097_v22  ;;  %v8100_v21 = vcombine.high %v2461_v15, %v2493_v16  ;;  %v8102_v22 = vcombine.high %v2462_v17, %v2494_v18  ;;  %v2592_v15 = vld [vmem:[%s11386_s4 + $0x678] sm:$0xff]  ;;  %v8295_v17 = vcombine.low %v2655_v61, %v2687_v62 }
 0x2ab   : > { %6217 = vmatprep.subr.bf16.mxu0 %v8032_v23  ;;  %6258 = vmatprep.subr.bf16.mxu1 %v8034_v24  ;;  %v2397_v23 = vld [vmem:[%s11386_s4 + $0x60] sm:$0xff]  ;;  %v2624_v16 = vld [vmem:[%s11386_s4 + $0x778] sm:$0xff] }
 0x2ac   : > { %v2429_v24 = vld [vmem:[%s11386_s4 + $0x160] sm:$0xff] }
 0x2ad   : > { %v8035_v37 = vcombine.low %v2397_v23, %v2429_v24 }
 0x2ae   : > { %6218 = vmatpush1.bf16.msra.mxu0 %v8031_v31  ;;  %6259 = vmatpush1.bf16.msra.mxu1 %v8033_v32  ;;  %v8036_v31 = vcombine.high %v2397_v23, %v2429_v24  ;;  %v8038_v32 = vcombine.high %v2398_v25, %v2430_v27  ;;  %v2528_v23 = vld [vmem:[%s11386_s4 + $0x478] sm:$0xff]  ;;  %v8233_v27 = vcombine.low %v2592_v15, %v2624_v16 }
 0x2af   : > { %6285 = vmatprep.subr.bf16.mxu0 %v8484_v33  ;;  %6326 = vmatprep.subr.bf16.mxu1 %v8486_v34  ;;  %v2847_v33 = vld [vmem:[%s11386_s4 + $0xe70] sm:$0xff]  ;;  %v2560_v24 = vld [vmem:[%s11386_s4 + $0x578] sm:$0xff] }
 0x2b0   : > { %v2879_v34 = vld [vmem:[%s11386_s4 + $0xf70] sm:$0xff] }
 0x2b1   : > { %6236 = vmatmul.mubr.bf16.vlgmr.msra.gmra.mxu0 %v9591_v8  ;;  %6277 = vmatmul.mubr.bf16.vlgmr.msra.gmra.mxu1 %v9591_v8  ;;  %v8487_v28 = vcombine.low %v2847_v33, %v2879_v34 }
 0x2b2   : > { %6286 = vmatpush1.bf16.msra.mxu0 %v8483_v39  ;;  %6327 = vmatpush1.bf16.msra.mxu1 %v8485_v30  ;;  %v8488_v39 = vcombine.high %v2847_v33, %v2879_v34  ;;  %v8490_v30 = vcombine.high %v2848_v35, %v2880_v36  ;;  %v2464_v33 = vld [vmem:[%s11386_s4 + $0x278] sm:$0xff]  ;;  %v8169_v36 = vcombine.low %v2528_v23, %v2560_v24 }
 0x2b3   : > { %6287 = vmatprep.subr.bf16.mxu0 %v8420_v40  ;;  %6328 = vmatprep.subr.bf16.mxu1 %v8422_v41  ;;  %v2783_v40 = vld [vmem:[%s11386_s4 + $0xc70] sm:$0xff]  ;;  %v2496_v34 = vld [vmem:[%s11386_s4 + $0x378] sm:$0xff] }
 0x2b4   : > { %6317 = vmatprep.mubr.bf16.mxu0 %v9076_v42  ;;  %6358 = vmatprep.mubr.bf16.mxu1 %v9076_v42  ;;  %v2815_v41 = vld [vmem:[%s11386_s4 + $0xd70] sm:$0xff] }
 0x2b6   : > { %6288 = vmatpush1.bf16.msra.mxu0 %v8419_v47  ;;  %6329 = vmatpush1.bf16.msra.mxu1 %v8421_v48  ;;  %v8424_v47 = vcombine.high %v2783_v40, %v2815_v41  ;;  %v8426_v48 = vcombine.high %v2784_v43, %v2816_v45 }
 0x2b7   : > { %6289 = vmatprep.subr.bf16.mxu0 %v8356_v49  ;;  %6330 = vmatprep.subr.bf16.mxu1 %v8358_v51  ;;  %v2719_v49 = vld [vmem:[%s11386_s4 + $0xa70] sm:$0xff] }
 0x2b8   : > { %v2751_v51 = vld [vmem:[%s11386_s4 + $0xb70] sm:$0xff] }
 0x2b9   : > { %v8360_v59 = vcombine.high %v2719_v49, %v2751_v51  ;;  %v8359_v5 = vcombine.low %v2719_v49, %v2751_v51 }
 0x2ba   : > { %6290 = vmatpush1.bf16.msra.mxu0 %v8355_v55  ;;  %6331 = vmatpush1.bf16.msra.mxu1 %v8357_v56  ;;  %v8423_v55 = vcombine.low %v2783_v40, %v2815_v41  ;;  %v8425_v56 = vcombine.low %v2784_v43, %v2816_v45  ;;  %v2431_v40 = vld [vmem:[%s11386_s4 + $0x170] sm:$0xff]  ;;  %v2400_v41 = vld [vmem:[%s11386_s4 + $0x78] sm:$0xff]  ;;  %v10283_v45 = vld [vmem:[%s11387_s5] sm:$0xff] }
 0x2bb   : > { %6291 = vmatprep.subr.bf16.mxu0 %v8292_v57  ;;  %6332 = vmatprep.subr.bf16.mxu1 %v8294_v58  ;;  %v2432_v43 = vld [vmem:[%s11386_s4 + $0x178] sm:$0xff] }
 0x2bc   : > { %v8042_v51 = vcombine.high %v2400_v41, %v2432_v43 }
 0x2be   : > { %6292 = vmatpush1.bf16.msra.mxu0 %v8291_v63  ;;  %6333 = vmatpush1.bf16.msra.mxu1 %v8293_v0  ;;  %v2656_v63 = vld [vmem:[%s11386_s4 + $0x878] sm:$0xff] }
 0x2bf   : > { %6293 = vmatprep.subr.bf16.mxu0 %v8228_v3  ;;  %6334 = vmatprep.subr.bf16.mxu1 %v8230_v4  ;;  %v2688_v0 = vld [vmem:[%s11386_s4 + $0x978] sm:$0xff] }
 0x2c0   : > { %v8297_v18 = vcombine.low %v2656_v63, %v2688_v0 }
 0x2c2   : > { %6294 = vmatpush1.bf16.msra.mxu0 %v8227_v11  ;;  %6335 = vmatpush1.bf16.msra.mxu1 %v8229_v12  ;;  %v8296_v11 = vcombine.high %v2655_v61, %v2687_v62  ;;  %v8298_v12 = vcombine.high %v2656_v63, %v2688_v0  ;;  %v10307_v61 = vsub.s32 4, %v9192_v44  ;;  %v8041_v0 = vcombine.low %v2400_v41, %v2432_v43 }
 0x2c3   : > { %6295 = vmatprep.subr.bf16.mxu0 %v8164_v13  ;;  %6336 = vmatprep.subr.bf16.mxu1 %v8166_v14  ;;  %v2591_v13 = vld [vmem:[%s11386_s4 + $0x670] sm:$0xff] }
 0x2c4   : > { %v2623_v14 = vld [vmem:[%s11386_s4 + $0x770] sm:$0xff] }
 0x2c5   : > { %v8231_v25 = vcombine.low %v2591_v13, %v2623_v14 }
 0x2c6   : > { %6296 = vmatpush1.bf16.msra.mxu0 %v8163_v19  ;;  %6337 = vmatpush1.bf16.msra.mxu1 %v8165_v20  ;;  %v8232_v19 = vcombine.high %v2591_v13, %v2623_v14  ;;  %v8234_v20 = vcombine.high %v2592_v15, %v2624_v16  ;;  %v2786_v13 = vld [vmem:[%s11386_s4 + $0xc88] sm:$0xff]  ;;  %v2932_v15 = vrot.slane %v10283_v45, %v10307_v61 }
 0x2c7   : > { %6297 = vmatprep.subr.bf16.mxu0 %v8100_v21  ;;  %6338 = vmatprep.subr.bf16.mxu1 %v8102_v22  ;;  %v2527_v21 = vld [vmem:[%s11386_s4 + $0x470] sm:$0xff]  ;;  %v2818_v14 = vld [vmem:[%s11386_s4 + $0xd88] sm:$0xff] }
 0x2c8   : > { %v2559_v22 = vld [vmem:[%s11386_s4 + $0x570] sm:$0xff] }
 0x2c9   : > { %v8167_v35 = vcombine.low %v2527_v21, %v2559_v22 }
 0x2ca   : > { %6298 = vmatpush1.bf16.msra.mxu0 %v8099_v7  ;;  %6339 = vmatpush1.bf16.msra.mxu1 %v8101_v29  ;;  %v8168_v7 = vcombine.high %v2527_v21, %v2559_v22  ;;  %v8170_v29 = vcombine.high %v2528_v23, %v2560_v24  ;;  %v8430_v21 = vcombine.high %v2786_v13, %v2818_v14  ;;  %v2753_v24 = vld [vmem:[%s11386_s4 + $0xb80] sm:$0xff] }
 0x2cb   : > { %6299 = vmatprep.subr.bf16.mxu0 %v8036_v31  ;;  %6340 = vmatprep.subr.bf16.mxu1 %v8038_v32  ;;  %v2463_v31 = vld [vmem:[%s11386_s4 + $0x270] sm:$0xff] }
 0x2cc   : > { %v2495_v32 = vld [vmem:[%s11386_s4 + $0x370] sm:$0xff] }
 0x2ce   : > { %6300 = vmatpush1.bf16.msra.mxu0 %v8035_v37  ;;  %6341 = vmatpush1.bf16.msra.mxu1 %v8037_v38  ;;  %v8104_v37 = vcombine.high %v2463_v31, %v2495_v32  ;;  %v8106_v38 = vcombine.high %v2464_v33, %v2496_v34 }
 0x2cf   : > { %6367 = vmatprep.subr.bf16.mxu0 %v8488_v39  ;;  %6408 = vmatprep.subr.bf16.mxu1 %v8490_v30  ;;  %v2399_v39 = vld [vmem:[%s11386_s4 + $0x70] sm:$0xff]  ;;  %v10269_v30 = vsub.s32 3, %v9192_v44 }
 0x2d0   : > { %v8040_v49 = vcombine.high %v2399_v39, %v2431_v40  ;;  %v8039_v63 = vcombine.low %v2399_v39, %v2431_v40  ;;  %v2657_v40 = vld [vmem:[%s11386_s4 + $0x880] sm:$0xff] }
 0x2d1   : > { %6318 = vmatmul.mubr.bf16.vlgmr.msra.gmra.mxu0 %v9591_v8  ;;  %6359 = vmatmul.mubr.bf16.vlgmr.msra.gmra.mxu1 %v9591_v8  ;;  %v10207_v53 = vpop.f32.mrf.mxu0  ;;  %v10209_v54 = vpop.f32.mrf.mxu1  ;;  %v2928_v52 = vrot.slane %v10283_v45, %v10269_v30 }
 0x2d2   : > { %6368 = vmatpush1.bf16.msra.mxu0 %v8487_v28  ;;  %6409 = vmatpush1.bf16.msra.mxu1 %v8489_v46  ;;  %v10286_v28 = vsub.s32 2, %v9192_v44  ;;  %v8103_v46 = vcombine.low %v2463_v31, %v2495_v32 }
 0x2d3   : > { %v10211_v57 = vpop.f32.mrf.mxu0  ;;  %v10213_v58 = vpop.f32.mrf.mxu1  ;;  %6369 = vmatprep.subr.bf16.mxu0 %v8424_v47  ;;  %6410 = vmatprep.subr.bf16.mxu1 %v8426_v48  ;;  %v8105_v47 = vcombine.low %v2464_v33, %v2496_v34  ;;  %v2920_v48 = vrot.slane %v10283_v45, %v9507_v2  ;;  %v8429_v34 = vcombine.low %v2786_v13, %v2818_v14 }
 0x2d4   : > { %6399 = vmatprep.mubr.bf16.mxu0 %v9076_v42  ;;  %6440 = vmatprep.mubr.bf16.mxu1 %v9076_v42  ;;  %v2924_v62 = vrot.slane %v10283_v45, %v10286_v28 }
 0x2d5   : > { %v5831_v3 = vpop.f32.mrf.mxu0  ;;  %v5872_v4 = vpop.f32.mrf.mxu1 }
 0x2d6   : > { %6370 = vmatpush1.bf16.msra.mxu0 %v8423_v55  ;;  %6411 = vmatpush1.bf16.msra.mxu1 %v8425_v56  ;;  %v2881_v55 = vld [vmem:[%s11386_s4 + $0xf80] sm:$0xff]  ;;  %v2850_v56 = vld [vmem:[%s11386_s4 + $0xe88] sm:$0xff]  ;;  %v10312_v3 = vsub.s32 6, %v9192_v44  ;;  %v5830_v4 = vadd.f32 %v10211_v57, %v2920_v48 }
 0x2d7   : > { %v5832_v9 = vpop.f32.mrf.mxu0  ;;  %v5873_v10 = vpop.f32.mrf.mxu1  ;;  %6371 = vmatprep.subr.bf16.mxu0 %v8360_v59  ;;  %6412 = vmatprep.subr.bf16.mxu1 %v8362_v60  ;;  %v2882_v59 = vld [vmem:[%s11386_s4 + $0xf88] sm:$0xff]  ;;  %v2916_v60 = vrot.slane %v10283_v45, %v9504_v1  ;;  %v2817_v57 = vld [vmem:[%s11386_s4 + $0xd80] sm:$0xff]  ;;  %v8491_v16 = vcombine.low %v2849_v26, %v2881_v55 }
 0x2d8   : > { %v2785_v9 = vld [vmem:[%s11386_s4 + $0xc80] sm:$0xff]  ;;  %v5871_v10 = vadd.f32 %v10213_v58, %v2928_v52  ;;  %v2690_v48 = vld [vmem:[%s11386_s4 + $0x988] sm:$0xff] }
 0x2d9   : > { %v5828_v58 = vadd.f32 %v10207_v53, %v2916_v60  ;;  %v2721_v53 = vld [vmem:[%s11386_s4 + $0xa80] sm:$0xff]  ;;  %v8427_v31 = vcombine.low %v2785_v9, %v2817_v57 }
 0x2da   : > { %6372 = vmatpush1.bf16.msra.mxu0 %v8359_v5  ;;  %6413 = vmatpush1.bf16.msra.mxu1 %v8361_v6  ;;  %v8492_v5 = vcombine.high %v2849_v26, %v2881_v55  ;;  %v8494_v6 = vcombine.high %v2850_v56, %v2882_v59  ;;  %v8363_v26 = vcombine.low %v2721_v53, %v2753_v24 }
 0x2db   : > { %6373 = vmatprep.subr.bf16.mxu0 %v8296_v11  ;;  %6414 = vmatprep.subr.bf16.mxu1 %v8298_v12  ;;  %v10320_v11 = vsub.s32 5, %v9192_v44  ;;  %v10323_v12 = vsub.s32 7, %v9192_v44  ;;  %v5869_v44 = vadd.f32 %v10209_v54, %v2924_v62 }
 0x2dd   : > { %v8524_v22 = vpack.c.bf16 %v5871_v10, %v5869_v44  ;;  %v2936_v23 = vrot.slane %v10283_v45, %v10320_v11  ;;  %v2944_v54 = vrot.slane %v10283_v45, %v10323_v12  ;;  %v2594_v10 = vld [vmem:[%s11386_s4 + $0x688] sm:$0xff]  ;;  %v2529_v44 = vld [vmem:[%s11386_s4 + $0x480] sm:$0xff] }
 0x2de   : > { %6374 = vmatpush1.bf16.msra.mxu0 %v8295_v17  ;;  %6415 = vmatpush1.bf16.msra.mxu1 %v8297_v18  ;;  %v2940_v17 = vrot.slane %v10283_v45, %v10312_v3  ;;  %v8493_v18 = vcombine.low %v2850_v56, %v2882_v59 }
 0x2df   : > { %6375 = vmatprep.subr.bf16.mxu0 %v8232_v19  ;;  %6416 = vmatprep.subr.bf16.mxu1 %v8234_v20  ;;  %v8523_v19 = vpack.c.bf16 %v5830_v4, %v5828_v58  ;;  %v8428_v20 = vcombine.high %v2785_v9, %v2817_v57  ;;  %v7250_v41 = vrot.slane %v8524_v22, %v9200_v50  ;;  %v2625_v9 = vld [vmem:[%s11386_s4 + $0x780] sm:$0xff]  ;;  %v2626_v57 = vld [vmem:[%s11386_s4 + $0x788] sm:$0xff] }
 0x2e2   : > { %6376 = vmatpush1.bf16.msra.mxu0 %v8231_v25  ;;  %6417 = vmatpush1.bf16.msra.mxu1 %v8233_v27  ;;  %v2722_v25 = vld [vmem:[%s11386_s4 + $0xa88] sm:$0xff] }
 0x2e3   : > { %6377 = vmatprep.subr.bf16.mxu0 %v8168_v7  ;;  %6418 = vmatprep.subr.bf16.mxu1 %v8170_v29  ;;  %v2754_v27 = vld [vmem:[%s11386_s4 + $0xb88] sm:$0xff] }
 0x2e4   : > { %v8366_v39 = vcombine.high %v2722_v25, %v2754_v27  ;;  %v8365_v56 = vcombine.low %v2722_v25, %v2754_v27  ;;  %v2465_v25 = vld [vmem:[%s11386_s4 + $0x280] sm:$0xff] }
 0x2e5   : > { %v2497_v27 = vld [vmem:[%s11386_s4 + $0x380] sm:$0xff] }
 0x2e6   : > { %6378 = vmatpush1.bf16.msra.mxu0 %v8167_v35  ;;  %6419 = vmatpush1.bf16.msra.mxu1 %v8169_v36  ;;  %v7243_v35 = vrot.slane %v8523_v19, %v9200_v50  ;;  %v2561_v19 = vld [vmem:[%s11386_s4 + $0x580] sm:$0xff] }
 0x2e7   : > { %6379 = vmatprep.subr.bf16.mxu0 %v8104_v37  ;;  %6420 = vmatprep.subr.bf16.mxu1 %v8106_v38  ;;  %v8364_v38 = vcombine.high %v2721_v53, %v2753_v24 }
 0x2e8   : > { %v7265_v4 = vcombine.low %v7243_v35, %v7250_v41  ;;  %v2401_v35 = vld [vmem:[%s11386_s4 + $0x80] sm:$0xff] }
 0x2ea   : > { %6380 = vmatpush1.bf16.msra.mxu0 %v8103_v46  ;;  %6421 = vmatpush1.bf16.msra.mxu1 %v8105_v47  ;;  %v2689_v46 = vld [vmem:[%s11386_s4 + $0x980] sm:$0xff]  ;;  %v2658_v47 = vld [vmem:[%s11386_s4 + $0x888] sm:$0xff] }
 0x2eb   : > { %6381 = vmatprep.subr.bf16.mxu0 %v8040_v49  ;;  %6422 = vmatprep.subr.bf16.mxu1 %v8042_v51  ;;  %v8300_v62 = vcombine.high %v2657_v40, %v2689_v46  ;;  %v8299_v14 = vcombine.low %v2657_v40, %v2689_v46  ;;  %v8301_v58 = vcombine.low %v2658_v47, %v2690_v48  ;;  %v2883_v46 = vld [vmem:[%s11386_s4 + $0xf90] sm:$0xff] }
 0x2ee   : > { %6382 = vmatpush1.bf16.msra.mxu0 %v8039_v63  ;;  %6423 = vmatpush1.bf16.msra.mxu1 %v8041_v0  ;;  %v8302_v63 = vcombine.high %v2658_v47, %v2690_v48  ;;  %v2593_v0 = vld [vmem:[%s11386_s4 + $0x680] sm:$0xff]  ;;  %v2852_v47 = vld [vmem:[%s11386_s4 + $0xe98] sm:$0xff] }
 0x2ef   : > { %6449 = vmatprep.subr.bf16.mxu0 %v8492_v5  ;;  %6490 = vmatprep.subr.bf16.mxu1 %v8494_v6  ;;  %v8235_v22 = vcombine.low %v2593_v0, %v2625_v9  ;;  %v2884_v48 = vld [vmem:[%s11386_s4 + $0xf98] sm:$0xff] }
 0x2f1   : > { %v5909_v7 = vpop.f32.mrf.mxu0  ;;  %v5950_v29 = vpop.f32.mrf.mxu1  ;;  %6400 = vmatmul.mubr.bf16.vlgmr.msra.gmra.mxu0 %v9591_v8  ;;  %6441 = vmatmul.mubr.bf16.vlgmr.msra.gmra.mxu1 %v9591_v8 }
 0x2f2   : > { %v5910_v32 = vadd.f32 %v5909_v7, %v2932_v15  ;;  %v5951_v33 = vadd.f32 %v5950_v29, %v2940_v17  ;;  %6450 = vmatpush1.bf16.msra.mxu0 %v8491_v16  ;;  %6491 = vmatpush1.bf16.msra.mxu1 %v8493_v18  ;;  %v8236_v15 = vcombine.high %v2593_v0, %v2625_v9  ;;  %v2466_v7 = vld [vmem:[%s11386_s4 + $0x288] sm:$0xff]  ;;  %v2724_v9 = vld [vmem:[%s11386_s4 + $0xa98] sm:$0xff] }
 0x2f3   : > { %v5911_v36 = vpop.f32.mrf.mxu0  ;;  %v5952_v37 = vpop.f32.mrf.mxu1  ;;  %6451 = vmatprep.subr.bf16.mxu0 %v8428_v20  ;;  %6492 = vmatprep.subr.bf16.mxu1 %v8430_v21  ;;  %v8238_v16 = vcombine.high %v2594_v10, %v2626_v57  ;;  %v7273_v17 = vrot.slane %v7265_v4, %v9200_v50  ;;  %v2530_v20 = vld [vmem:[%s11386_s4 + $0x488] sm:$0xff] }
 0x2f4   : > { %v5912_v43 = vadd.f32 %v5911_v36, %v2936_v23  ;;  %v5953_v45 = vadd.f32 %v5952_v37, %v2944_v54  ;;  %6481 = vmatprep.mubr.bf16.mxu0 %v9076_v42  ;;  %6522 = vmatprep.mubr.bf16.mxu1 %v9076_v42  ;;  %v2562_v21 = vld [vmem:[%s11386_s4 + $0x588] sm:$0xff]  ;;  %v8237_v23 = vcombine.low %v2594_v10, %v2626_v57  ;;  %v2433_v36 = vld [vmem:[%s11386_s4 + $0x180] sm:$0xff]  ;;  %v2756_v10 = vld [vmem:[%s11386_s4 + $0xb98] sm:$0xff] }
 0x2f5   : > { %v5913_v49 = vpop.f32.mrf.mxu0  ;;  %v5954_v51 = vpop.f32.mrf.mxu1  ;;  %v8172_v54 = vcombine.high %v2529_v44, %v2561_v19  ;;  %v8174_v24 = vcombine.high %v2530_v20, %v2562_v21  ;;  %v2498_v29 = vld [vmem:[%s11386_s4 + $0x388] sm:$0xff]  ;;  %v8044_v41 = vcombine.high %v2401_v35, %v2433_v36 }
 0x2f6   : > { %v8525_v52 = vpack.c.bf16 %v5912_v43, %v5910_v32  ;;  %v8526_v55 = vpack.c.bf16 %v5953_v45, %v5951_v33  ;;  %6452 = vmatpush1.bf16.msra.mxu0 %v8427_v31  ;;  %6493 = vmatpush1.bf16.msra.mxu1 %v8429_v34  ;;  %v8171_v31 = vcombine.low %v2529_v44, %v2561_v19  ;;  %v2402_v37 = vld [vmem:[%s11386_s4 + $0x88] sm:$0xff]  ;;  %v2851_v45 = vld [vmem:[%s11386_s4 + $0xe90] sm:$0xff] }
 0x2f7   : > { %v5914_v59 = vpop.f32.mrf.mxu0  ;;  %v5955_v60 = vpop.f32.mrf.mxu1  ;;  %6453 = vmatprep.subr.bf16.mxu0 %v8364_v38  ;;  %6494 = vmatprep.subr.bf16.mxu1 %v8366_v39  ;;  %v8173_v32 = vcombine.low %v2530_v20, %v2562_v21  ;;  %v8108_v33 = vcombine.high %v2465_v25, %v2497_v27  ;;  %v8110_v34 = vcombine.high %v2466_v7, %v2498_v29  ;;  %v2434_v38 = vld [vmem:[%s11386_s4 + $0x188] sm:$0xff]  ;;  %v2691_v19 = vld [vmem:[%s11386_s4 + $0x990] sm:$0xff]  ;;  %v2660_v20 = vld [vmem:[%s11386_s4 + $0x898] sm:$0xff] }
 0x2f8   : > { %v7257_v5 = vrot.slane %v8525_v52, %v9200_v50  ;;  %v7264_v6 = vrot.slane %v8526_v55, %v9200_v50  ;;  %v8107_v39 = vcombine.low %v2465_v25, %v2497_v27  ;;  %v8109_v40 = vcombine.low %v2466_v7, %v2498_v29  ;;  %v2787_v55 = vld [vmem:[%s11386_s4 + $0xc90] sm:$0xff]  ;;  %v2788_v59 = vld [vmem:[%s11386_s4 + $0xc98] sm:$0xff] }
 0x2f9   : > { %v8046_v43 = vcombine.high %v2402_v37, %v2434_v38  ;;  %v8043_v49 = vcombine.low %v2401_v35, %v2433_v36  ;;  %v8045_v51 = vcombine.low %v2402_v37, %v2434_v38  ;;  %v8498_v52 = vcombine.high %v2852_v47, %v2884_v48  ;;  %v2820_v60 = vld [vmem:[%s11386_s4 + $0xd98] sm:$0xff]  ;;  %v2595_v29 = vld [vmem:[%s11386_s4 + $0x690] sm:$0xff] }
 0x2fa   : > { %v7266_v13 = vcombine.low %v7257_v5, %v7264_v6  ;;  %6454 = vmatpush1.bf16.msra.mxu0 %v8363_v26  ;;  %6495 = vmatpush1.bf16.msra.mxu1 %v8365_v56  ;;  %v8496_v26 = vcombine.high %v2851_v45, %v2883_v46  ;;  %v2819_v56 = vld [vmem:[%s11386_s4 + $0xd90] sm:$0xff]  ;;  %v8434_v4 = vcombine.high %v2788_v59, %v2820_v60  ;;  %v2692_v21 = vld [vmem:[%s11386_s4 + $0x998] sm:$0xff] }
 0x2fb   : > { %6455 = vmatprep.subr.bf16.mxu0 %v8300_v62  ;;  %6496 = vmatprep.subr.bf16.mxu1 %v8302_v63  ;;  %v8495_v62 = vcombine.low %v2851_v45, %v2883_v46  ;;  %v8497_v63 = vcombine.low %v2852_v47, %v2884_v48  ;;  %v8432_v0 = vcombine.high %v2787_v55, %v2819_v56  ;;  %v2723_v5 = vld [vmem:[%s11386_s4 + $0xa90] sm:$0xff] }
 0x2fc   : > { %v7280_v18 = vrot.slane %v7266_v13, %v9200_v50  ;;  %v2755_v6 = vld [vmem:[%s11386_s4 + $0xb90] sm:$0xff]  ;;  %v8306_v7 = vcombine.high %v2660_v20, %v2692_v21  ;;  %v8305_v35 = vcombine.low %v2660_v20, %v2692_v21  ;;  %v2854_v20 = vld [vmem:[%s11386_s4 + $0xea8] sm:$0xff] }
 0x2fd   : > { %v8368_v44 = vcombine.high %v2723_v5, %v2755_v6  ;;  %v2531_v38 = vld [vmem:[%s11386_s4 + $0x490] sm:$0xff]  ;;  %v2886_v21 = vld [vmem:[%s11386_s4 + $0xfa8] sm:$0xff] }
 0x2fe   : > { %v7281_v53 = vcombine.low %v7273_v17, %v7280_v18  ;;  %6456 = vmatpush1.bf16.msra.mxu0 %v8299_v14  ;;  %6497 = vmatpush1.bf16.msra.mxu1 %v8301_v58  ;;  %v8431_v14 = vcombine.low %v2787_v55, %v2819_v56  ;;  %v8433_v58 = vcombine.low %v2788_v59, %v2820_v60  ;;  %v2659_v18 = vld [vmem:[%s11386_s4 + $0x890] sm:$0xff]  ;;  %v10528_v56 = vld [vmem:[%s11387_s5 + $0x8] sm:$0xff] }
 0x2ff   : > { %6457 = vmatprep.subr.bf16.mxu0 %v8236_v15  ;;  %6498 = vmatprep.subr.bf16.mxu1 %v8238_v16  ;;  %v8370_v17 = vcombine.high %v2724_v9, %v2756_v10  ;;  %v8304_v27 = vcombine.high %v2659_v18, %v2691_v19  ;;  %v2467_v48 = vld [vmem:[%s11386_s4 + $0x290] sm:$0xff] }
 0x300   : > { %7633 = vst [vmem:[%s11391_s9] sm:$0xff] %v7281_v53 }
 0x302   : > { %6458 = vmatpush1.bf16.msra.mxu0 %v8235_v22  ;;  %6499 = vmatpush1.bf16.msra.mxu1 %v8237_v23  ;;  %v8367_v23 = vcombine.low %v2723_v5, %v2755_v6  ;;  %v2948_v5 = vrot.slane %v10528_v56, %v9504_v1 }
 0x303   : > { %6459 = vmatprep.subr.bf16.mxu0 %v8172_v54  ;;  %6500 = vmatprep.subr.bf16.mxu1 %v8174_v24  ;;  %v8369_v54 = vcombine.low %v2724_v9, %v2756_v10  ;;  %v2952_v10 = vrot.slane %v10528_v56, %v9507_v2 }
 0x306   : > { %6460 = vmatpush1.bf16.msra.mxu0 %v8171_v31  ;;  %6501 = vmatpush1.bf16.msra.mxu1 %v8173_v32  ;;  %v2627_v31 = vld [vmem:[%s11386_s4 + $0x790] sm:$0xff]  ;;  %v2596_v32 = vld [vmem:[%s11386_s4 + $0x698] sm:$0xff] }
 0x307   : > { %6461 = vmatprep.subr.bf16.mxu0 %v8108_v33  ;;  %6502 = vmatprep.subr.bf16.mxu1 %v8110_v34  ;;  %v2628_v33 = vld [vmem:[%s11386_s4 + $0x798] sm:$0xff]  ;;  %v8303_v34 = vcombine.low %v2659_v18, %v2691_v19  ;;  %v8240_v36 = vcombine.high %v2595_v29, %v2627_v31  ;;  %v2956_v18 = vrot.slane %v10528_v56, %v10286_v28 }
 0x308   : > { %v8242_v37 = vcombine.high %v2596_v32, %v2628_v33  ;;  %v8241_v45 = vcombine.low %v2596_v32, %v2628_v33  ;;  %v2960_v19 = vrot.slane %v10528_v56, %v10269_v30  ;;  %v2964_v32 = vrot.slane %v10528_v56, %v10307_v61 }
 0x309   : > { %v8501_v33 = vcombine.low %v2854_v20, %v2886_v21 }
 0x30a   : > { %6462 = vmatpush1.bf16.msra.mxu0 %v8107_v39  ;;  %6503 = vmatpush1.bf16.msra.mxu1 %v8109_v40  ;;  %v2563_v39 = vld [vmem:[%s11386_s4 + $0x590] sm:$0xff]  ;;  %v2532_v40 = vld [vmem:[%s11386_s4 + $0x498] sm:$0xff] }
 0x30b   : > { %6463 = vmatprep.subr.bf16.mxu0 %v8044_v41  ;;  %6504 = vmatprep.subr.bf16.mxu1 %v8046_v43  ;;  %v2564_v41 = vld [vmem:[%s11386_s4 + $0x598] sm:$0xff]  ;;  %v8239_v43 = vcombine.low %v2595_v29, %v2627_v31  ;;  %v8176_v46 = vcombine.high %v2531_v38, %v2563_v39  ;;  %v2821_v31 = vld [vmem:[%s11386_s4 + $0xda0] sm:$0xff] }
 0x30c   : > { %v8178_v47 = vcombine.high %v2532_v40, %v2564_v41  ;;  %v8177_v55 = vcombine.low %v2532_v40, %v2564_v41  ;;  %v2976_v40 = vrot.slane %v10528_v56, %v10323_v12  ;;  %v2757_v41 = vld [vmem:[%s11386_s4 + $0xba0] sm:$0xff] }
 0x30e   : > { %6464 = vmatpush1.bf16.msra.mxu0 %v8043_v49  ;;  %6505 = vmatpush1.bf16.msra.mxu1 %v8045_v51  ;;  %v2499_v49 = vld [vmem:[%s11386_s4 + $0x390] sm:$0xff]  ;;  %v2468_v51 = vld [vmem:[%s11386_s4 + $0x298] sm:$0xff] }
 0x30f   : > { %6531 = vmatprep.subr.bf16.mxu0 %v8496_v26  ;;  %6572 = vmatprep.subr.bf16.mxu1 %v8498_v52  ;;  %v2500_v26 = vld [vmem:[%s11386_s4 + $0x398] sm:$0xff]  ;;  %v8175_v52 = vcombine.low %v2531_v38, %v2563_v39  ;;  %v8112_v59 = vcombine.high %v2467_v48, %v2499_v49  ;;  %v8111_v6 = vcombine.low %v2467_v48, %v2499_v49 }
 0x310   : > { %v8114_v60 = vcombine.high %v2468_v51, %v2500_v26  ;;  %v8113_v9 = vcombine.low %v2468_v51, %v2500_v26  ;;  %v2968_v39 = vrot.slane %v10528_v56, %v10320_v11 }
 0x311   : > { %v10465_v57 = vpop.f32.mrf.mxu0  ;;  %v10467_v13 = vpop.f32.mrf.mxu1  ;;  %6482 = vmatmul.mubr.bf16.vlgmr.msra.gmra.mxu0 %v9591_v8  ;;  %6523 = vmatmul.mubr.bf16.vlgmr.msra.gmra.mxu1 %v9591_v8 }
 0x312   : > { %6532 = vmatpush1.bf16.msra.mxu0 %v8495_v62  ;;  %6573 = vmatpush1.bf16.msra.mxu1 %v8497_v63  ;;  %v2403_v62 = vld [vmem:[%s11386_s4 + $0x90] sm:$0xff] }
 0x313   : > { %v10471_v15 = vpop.f32.mrf.mxu0  ;;  %v10473_v16 = vpop.f32.mrf.mxu1  ;;  %6533 = vmatprep.subr.bf16.mxu0 %v8432_v0  ;;  %6574 = vmatprep.subr.bf16.mxu1 %v8434_v4  ;;  %v2435_v63 = vld [vmem:[%s11386_s4 + $0x190] sm:$0xff]  ;;  %v2404_v0 = vld [vmem:[%s11386_s4 + $0x98] sm:$0xff] }
 0x314   : > { %6563 = vmatprep.mubr.bf16.mxu0 %v9076_v42  ;;  %6604 = vmatprep.mubr.bf16.mxu1 %v9076_v42  ;;  %v2436_v4 = vld [vmem:[%s11386_s4 + $0x198] sm:$0xff]  ;;  %v6035_v29 = vadd.f32 %v10473_v16, %v2960_v19 }
 0x315   : > { %v5995_v53 = vpop.f32.mrf.mxu0  ;;  %v6036_v22 = vpop.f32.mrf.mxu1 }
 0x316   : > { %6534 = vmatpush1.bf16.msra.mxu0 %v8431_v14  ;;  %6575 = vmatpush1.bf16.msra.mxu1 %v8433_v58  ;;  %v8048_v14 = vcombine.high %v2403_v62, %v2435_v63  ;;  %v8050_v58 = vcombine.high %v2404_v0, %v2436_v4  ;;  %v8047_v53 = vcombine.low %v2403_v62, %v2435_v63  ;;  %v2661_v62 = vld [vmem:[%s11386_s4 + $0x8a0] sm:$0xff] }
 0x317   : > { %v5996_v24 = vpop.f32.mrf.mxu0  ;;  %v6037_v25 = vpop.f32.mrf.mxu1  ;;  %6535 = vmatprep.subr.bf16.mxu0 %v8368_v44  ;;  %6576 = vmatprep.subr.bf16.mxu1 %v8370_v17  ;;  %v2853_v44 = vld [vmem:[%s11386_s4 + $0xea0] sm:$0xff]  ;;  %v8049_v22 = vcombine.low %v2404_v0, %v2436_v4 }
 0x318   : > { %v2885_v17 = vld [vmem:[%s11386_s4 + $0xfa0] sm:$0xff]  ;;  %v5994_v24 = vadd.f32 %v10471_v15, %v2952_v10  ;;  %v8502_v25 = vcombine.high %v2854_v20, %v2886_v21  ;;  %v2822_v15 = vld [vmem:[%s11386_s4 + $0xda8] sm:$0xff] }
 0x319   : > { %v8499_v16 = vcombine.low %v2853_v44, %v2885_v17 }
 0x31a   : > { %6536 = vmatpush1.bf16.msra.mxu0 %v8367_v23  ;;  %6577 = vmatpush1.bf16.msra.mxu1 %v8369_v54  ;;  %v8500_v23 = vcombine.high %v2853_v44, %v2885_v17  ;;  %v5992_v54 = vadd.f32 %v10465_v57, %v2948_v5  ;;  %v2790_v57 = vld [vmem:[%s11386_s4 + $0xca8] sm:$0xff]  ;;  %v2693_v5 = vld [vmem:[%s11386_s4 + $0x9a0] sm:$0xff] }
 0x31b   : > { %6537 = vmatprep.subr.bf16.mxu0 %v8304_v27  ;;  %6578 = vmatprep.subr.bf16.mxu1 %v8306_v7  ;;  %v2789_v27 = vld [vmem:[%s11386_s4 + $0xca0] sm:$0xff]  ;;  %v6033_v7 = vadd.f32 %v10467_v13, %v2956_v18  ;;  %v2972_v13 = vrot.slane %v10528_v56, %v10312_v3  ;;  %v8437_v26 = vcombine.low %v2790_v57, %v2822_v15 }
 0x31c   : > { %v8435_v48 = vcombine.low %v2789_v27, %v2821_v31  ;;  %v8308_v21 = vcombine.high %v2661_v62, %v2693_v5 }
 0x31d   : > { %v8528_v38 = vpack.c.bf16 %v6035_v29, %v6033_v7  ;;  %v2630_v7 = vld [vmem:[%s11386_s4 + $0x7a8] sm:$0xff] }
 0x31e   : > { %6538 = vmatpush1.bf16.msra.mxu0 %v8303_v34  ;;  %6579 = vmatpush1.bf16.msra.mxu1 %v8305_v35  ;;  %v8527_v34 = vpack.c.bf16 %v5994_v24, %v5992_v54  ;;  %v8436_v35 = vcombine.high %v2789_v27, %v2821_v31  ;;  %v2598_v27 = vld [vmem:[%s11386_s4 + $0x6a8] sm:$0xff]  ;;  %v8307_v31 = vcombine.low %v2661_v62, %v2693_v5  ;;  %v2887_v5 = vld [vmem:[%s11386_s4 + $0xfb0] sm:$0xff] }
 0x31f   : > { %6539 = vmatprep.subr.bf16.mxu0 %v8240_v36  ;;  %6580 = vmatprep.subr.bf16.mxu1 %v8242_v37  ;;  %v8438_v36 = vcombine.high %v2790_v57, %v2822_v15  ;;  %v2725_v37 = vld [vmem:[%s11386_s4 + $0xaa0] sm:$0xff]  ;;  %v7299_v63 = vrot.slane %v8528_v38, %v9200_v50 }
 0x322   : > { %6540 = vmatpush1.bf16.msra.mxu0 %v8239_v43  ;;  %6581 = vmatpush1.bf16.msra.mxu1 %v8241_v45  ;;  %v2726_v43 = vld [vmem:[%s11386_s4 + $0xaa8] sm:$0xff] }
 0x323   : > { %6541 = vmatprep.subr.bf16.mxu0 %v8176_v46  ;;  %6582 = vmatprep.subr.bf16.mxu1 %v8178_v47  ;;  %v2758_v45 = vld [vmem:[%s11386_s4 + $0xba8] sm:$0xff] }
 0x324   : > { %v8373_v18 = vcombine.low %v2726_v43, %v2758_v45 }
 0x326   : > { %6542 = vmatpush1.bf16.msra.mxu0 %v8175_v52  ;;  %6583 = vmatpush1.bf16.msra.mxu1 %v8177_v55  ;;  %v7292_v52 = vrot.slane %v8527_v34, %v9200_v50  ;;  %v2565_v34 = vld [vmem:[%s11386_s4 + $0x5a0] sm:$0xff] }
 0x327   : > { %6543 = vmatprep.subr.bf16.mxu0 %v8112_v59  ;;  %6584 = vmatprep.subr.bf16.mxu1 %v8114_v60  ;;  %v8372_v59 = vcombine.high %v2725_v37, %v2757_v41  ;;  %v8374_v60 = vcombine.high %v2726_v43, %v2758_v45  ;;  %v2469_v43 = vld [vmem:[%s11386_s4 + $0x2a0] sm:$0xff] }
 0x328   : > { %v2501_v45 = vld [vmem:[%s11386_s4 + $0x3a0] sm:$0xff] }
 0x32a   : > { %6544 = vmatpush1.bf16.msra.mxu0 %v8111_v6  ;;  %6585 = vmatpush1.bf16.msra.mxu1 %v8113_v9  ;;  %v2662_v6 = vld [vmem:[%s11386_s4 + $0x8a8] sm:$0xff] }
 0x32b   : > { %6545 = vmatprep.subr.bf16.mxu0 %v8048_v14  ;;  %6586 = vmatprep.subr.bf16.mxu1 %v8050_v58  ;;  %v2694_v9 = vld [vmem:[%s11386_s4 + $0x9a8] sm:$0xff]  ;;  %v8371_v58 = vcombine.low %v2725_v37, %v2757_v41 }
 0x32c   : > { %v8309_v57 = vcombine.low %v2662_v6, %v2694_v9 }
 0x32e   : > { %6546 = vmatpush1.bf16.msra.mxu0 %v8047_v53  ;;  %6587 = vmatpush1.bf16.msra.mxu1 %v8049_v22  ;;  %v8310_v53 = vcombine.high %v2662_v6, %v2694_v9  ;;  %v2597_v22 = vld [vmem:[%s11386_s4 + $0x6a0] sm:$0xff]  ;;  %v2856_v6 = vld [vmem:[%s11386_s4 + $0xeb8] sm:$0xff] }
 0x32f   : > { %6613 = vmatprep.subr.bf16.mxu0 %v8500_v23  ;;  %6654 = vmatprep.subr.bf16.mxu1 %v8502_v25  ;;  %v7314_v23 = vcombine.low %v7292_v52, %v7299_v63  ;;  %v2629_v25 = vld [vmem:[%s11386_s4 + $0x7a0] sm:$0xff]  ;;  %v2888_v9 = vld [vmem:[%s11386_s4 + $0xfb8] sm:$0xff] }
 0x330   : > { %v8244_v15 = vcombine.high %v2597_v22, %v2629_v25  ;;  %v8243_v38 = vcombine.low %v2597_v22, %v2629_v25  ;;  %v2405_v52 = vld [vmem:[%s11386_s4 + $0xa0] sm:$0xff]  ;;  %v2728_v25 = vld [vmem:[%s11386_s4 + $0xab8] sm:$0xff] }
 0x331   : > { %v6073_v46 = vpop.f32.mrf.mxu0  ;;  %v6114_v47 = vpop.f32.mrf.mxu1  ;;  %6564 = vmatmul.mubr.bf16.vlgmr.msra.gmra.mxu0 %v9591_v8  ;;  %6605 = vmatmul.mubr.bf16.vlgmr.msra.gmra.mxu1 %v9591_v8 }
 0x332   : > { %v6074_v49 = vadd.f32 %v6073_v46, %v2964_v32  ;;  %v6115_v51 = vadd.f32 %v6114_v47, %v2972_v13  ;;  %6614 = vmatpush1.bf16.msra.mxu0 %v8499_v16  ;;  %6655 = vmatpush1.bf16.msra.mxu1 %v8501_v33  ;;  %v8246_v32 = vcombine.high %v2598_v27, %v2630_v7  ;;  %v2533_v13 = vld [vmem:[%s11386_s4 + $0x4a0] sm:$0xff]  ;;  %v2470_v46 = vld [vmem:[%s11386_s4 + $0x2a8] sm:$0xff] }
 0x333   : > { %v6075_v55 = vpop.f32.mrf.mxu0  ;;  %v6116_v56 = vpop.f32.mrf.mxu1  ;;  %6615 = vmatprep.subr.bf16.mxu0 %v8436_v35  ;;  %6656 = vmatprep.subr.bf16.mxu1 %v8438_v36  ;;  %v7322_v16 = vrot.slane %v7314_v23, %v9200_v50  ;;  %v2534_v35 = vld [vmem:[%s11386_s4 + $0x4a8] sm:$0xff] }
 0x334   : > { %v6076_v0 = vadd.f32 %v6075_v55, %v2968_v39  ;;  %v6117_v4 = vadd.f32 %v6116_v56, %v2976_v40  ;;  %6645 = vmatprep.mubr.bf16.mxu0 %v9076_v42  ;;  %6686 = vmatprep.mubr.bf16.mxu1 %v9076_v42  ;;  %v2566_v36 = vld [vmem:[%s11386_s4 + $0x5a8] sm:$0xff]  ;;  %v8245_v39 = vcombine.low %v2598_v27, %v2630_v7  ;;  %v2437_v55 = vld [vmem:[%s11386_s4 + $0x1a0] sm:$0xff]  ;;  %v2760_v27 = vld [vmem:[%s11386_s4 + $0xbb8] sm:$0xff] }
 0x335   : > { %v6077_v10 = vpop.f32.mrf.mxu0  ;;  %v6118_v14 = vpop.f32.mrf.mxu1  ;;  %v8180_v40 = vcombine.high %v2533_v13, %v2565_v34  ;;  %v8182_v41 = vcombine.high %v2534_v35, %v2566_v36  ;;  %v2502_v47 = vld [vmem:[%s11386_s4 + $0x3a8] sm:$0xff]  ;;  %v8052_v63 = vcombine.high %v2405_v52, %v2437_v55 }
 0x336   : > { %v8529_v44 = vpack.c.bf16 %v6076_v0, %v6074_v49  ;;  %v8530_v17 = vpack.c.bf16 %v6117_v4, %v6115_v51  ;;  %6616 = vmatpush1.bf16.msra.mxu0 %v8435_v48  ;;  %6657 = vmatpush1.bf16.msra.mxu1 %v8437_v26  ;;  %v8179_v48 = vcombine.low %v2533_v13, %v2565_v34  ;;  %v2406_v56 = vld [vmem:[%s11386_s4 + $0xa8] sm:$0xff]  ;;  %v2855_v4 = vld [vmem:[%s11386_s4 + $0xeb0] sm:$0xff] }
 0x337   : > { %v6078_v19 = vpop.f32.mrf.mxu0  ;;  %v6119_v20 = vpop.f32.mrf.mxu1  ;;  %6617 = vmatprep.subr.bf16.mxu0 %v8372_v59  ;;  %6658 = vmatprep.subr.bf16.mxu1 %v8374_v60  ;;  %v8181_v49 = vcombine.low %v2534_v35, %v2566_v36  ;;  %v8116_v51 = vcombine.high %v2469_v43, %v2501_v45  ;;  %v8118_v26 = vcombine.high %v2470_v46, %v2502_v47  ;;  %v2438_v59 = vld [vmem:[%s11386_s4 + $0x1a8] sm:$0xff]  ;;  %v2695_v34 = vld [vmem:[%s11386_s4 + $0x9b0] sm:$0xff]  ;;  %v2664_v35 = vld [vmem:[%s11386_s4 + $0x8b8] sm:$0xff] }
 0x338   : > { %v7306_v54 = vrot.slane %v8529_v44, %v9200_v50  ;;  %v7313_v24 = vrot.slane %v8530_v17, %v9200_v50  ;;  %v8115_v60 = vcombine.low %v2469_v43, %v2501_v45  ;;  %v8117_v62 = vcombine.low %v2470_v46, %v2502_v47  ;;  %v2791_v17 = vld [vmem:[%s11386_s4 + $0xcb0] sm:$0xff]  ;;  %v2792_v19 = vld [vmem:[%s11386_s4 + $0xcb8] sm:$0xff] }
 0x339   : > { %v8054_v0 = vcombine.high %v2406_v56, %v2438_v59  ;;  %v8051_v10 = vcombine.low %v2405_v52, %v2437_v55  ;;  %v8053_v14 = vcombine.low %v2406_v56, %v2438_v59  ;;  %v8506_v44 = vcombine.high %v2856_v6, %v2888_v9  ;;  %v2824_v20 = vld [vmem:[%s11386_s4 + $0xdb8] sm:$0xff]  ;;  %v2599_v47 = vld [vmem:[%s11386_s4 + $0x6b0] sm:$0xff] }
 0x33a   : > { %v7315_v29 = vcombine.low %v7306_v54, %v7313_v24  ;;  %6618 = vmatpush1.bf16.msra.mxu0 %v8371_v58  ;;  %6659 = vmatpush1.bf16.msra.mxu1 %v8373_v18  ;;  %v8504_v58 = vcombine.high %v2855_v4, %v2887_v5  ;;  %v2823_v18 = vld [vmem:[%s11386_s4 + $0xdb0] sm:$0xff]  ;;  %v8442_v23 = vcombine.high %v2792_v19, %v2824_v20  ;;  %v2696_v36 = vld [vmem:[%s11386_s4 + $0x9b8] sm:$0xff] }
 0x33b   : > { %6619 = vmatprep.subr.bf16.mxu0 %v8308_v21  ;;  %6660 = vmatprep.subr.bf16.mxu1 %v8310_v53  ;;  %v8503_v21 = vcombine.low %v2855_v4, %v2887_v5  ;;  %v8505_v53 = vcombine.low %v2856_v6, %v2888_v9  ;;  %v8440_v22 = vcombine.high %v2791_v17, %v2823_v18  ;;  %v2727_v54 = vld [vmem:[%s11386_s4 + $0xab0] sm:$0xff] }
 0x33c   : > { %v7329_v33 = vrot.slane %v7315_v29, %v9200_v50  ;;  %v2759_v24 = vld [vmem:[%s11386_s4 + $0xbb0] sm:$0xff]  ;;  %v8314_v46 = vcombine.high %v2664_v35, %v2696_v36  ;;  %v8313_v52 = vcombine.low %v2664_v35, %v2696_v36  ;;  %v2858_v35 = vld [vmem:[%s11386_s4 + $0xec8] sm:$0xff] }
 0x33d   : > { %v8376_v13 = vcombine.high %v2727_v54, %v2759_v24  ;;  %v2535_v59 = vld [vmem:[%s11386_s4 + $0x4b0] sm:$0xff]  ;;  %v2890_v36 = vld [vmem:[%s11386_s4 + $0xfc8] sm:$0xff] }
 0x33e   : > { %v7330_v37 = vcombine.low %v7322_v16, %v7329_v33  ;;  %6620 = vmatpush1.bf16.msra.mxu0 %v8307_v31  ;;  %6661 = vmatpush1.bf16.msra.mxu1 %v8309_v57  ;;  %v8439_v31 = vcombine.low %v2791_v17, %v2823_v18  ;;  %v8441_v57 = vcombine.low %v2792_v19, %v2824_v20  ;;  %v2663_v33 = vld [vmem:[%s11386_s4 + $0x8b0] sm:$0xff] }
 0x33f   : > { %6621 = vmatprep.subr.bf16.mxu0 %v8244_v15  ;;  %6662 = vmatprep.subr.bf16.mxu1 %v8246_v32  ;;  %v8378_v16 = vcombine.high %v2728_v25, %v2760_v27  ;;  %v8312_v45 = vcombine.high %v2663_v33, %v2695_v34  ;;  %v2471_v9 = vld [vmem:[%s11386_s4 + $0x2b0] sm:$0xff] }
 0x340   : > { %7634 = vst [vmem:[%s11391_s9 + $0x8] sm:$0xff] %v7330_v37  ;;  %v10770_v18 = vld [vmem:[%s11387_s5 + $0x10] sm:$0xff] }
 0x342   : > { %6622 = vmatpush1.bf16.msra.mxu0 %v8243_v38  ;;  %6663 = vmatpush1.bf16.msra.mxu1 %v8245_v39  ;;  %v8375_v39 = vcombine.low %v2727_v54, %v2759_v24  ;;  %v2980_v54 = vrot.slane %v10770_v18, %v9504_v1 }
 0x343   : > { %6623 = vmatprep.subr.bf16.mxu0 %v8180_v40  ;;  %6664 = vmatprep.subr.bf16.mxu1 %v8182_v41  ;;  %v8377_v40 = vcombine.low %v2728_v25, %v2760_v27  ;;  %v2984_v27 = vrot.slane %v10770_v18, %v9507_v2 }
 0x346   : > { %6624 = vmatpush1.bf16.msra.mxu0 %v8179_v48  ;;  %6665 = vmatpush1.bf16.msra.mxu1 %v8181_v49  ;;  %v2631_v48 = vld [vmem:[%s11386_s4 + $0x7b0] sm:$0xff]  ;;  %v2600_v49 = vld [vmem:[%s11386_s4 + $0x6b8] sm:$0xff] }
 0x347   : > { %6625 = vmatprep.subr.bf16.mxu0 %v8116_v51  ;;  %6666 = vmatprep.subr.bf16.mxu1 %v8118_v26  ;;  %v2632_v51 = vld [vmem:[%s11386_s4 + $0x7b8] sm:$0xff]  ;;  %v8311_v26 = vcombine.low %v2663_v33, %v2695_v34  ;;  %v8248_v55 = vcombine.high %v2599_v47, %v2631_v48  ;;  %v2988_v33 = vrot.slane %v10770_v18, %v10286_v28 }
 0x348   : > { %v8250_v56 = vcombine.high %v2600_v49, %v2632_v51  ;;  %v8249_v4 = vcombine.low %v2600_v49, %v2632_v51  ;;  %v2992_v34 = vrot.slane %v10770_v18, %v10269_v30  ;;  %v2996_v49 = vrot.slane %v10770_v18, %v10307_v61 }
 0x349   : > { %v8509_v51 = vcombine.low %v2858_v35, %v2890_v36 }
 0x34a   : > { %6626 = vmatpush1.bf16.msra.mxu0 %v8115_v60  ;;  %6667 = vmatpush1.bf16.msra.mxu1 %v8117_v62  ;;  %v2567_v60 = vld [vmem:[%s11386_s4 + $0x5b0] sm:$0xff]  ;;  %v2536_v62 = vld [vmem:[%s11386_s4 + $0x4b8] sm:$0xff] }
 0x34b   : > { %6627 = vmatprep.subr.bf16.mxu0 %v8052_v63  ;;  %6668 = vmatprep.subr.bf16.mxu1 %v8054_v0  ;;  %v2568_v63 = vld [vmem:[%s11386_s4 + $0x5b8] sm:$0xff]  ;;  %v8247_v0 = vcombine.low %v2599_v47, %v2631_v48  ;;  %v8184_v5 = vcombine.high %v2535_v59, %v2567_v60  ;;  %v2825_v48 = vld [vmem:[%s11386_s4 + $0xdc0] sm:$0xff] }
 0x34c   : > { %v8186_v6 = vcombine.high %v2536_v62, %v2568_v63  ;;  %v8185_v17 = vcombine.low %v2536_v62, %v2568_v63  ;;  %v3008_v62 = vrot.slane %v10770_v18, %v10323_v12  ;;  %v2761_v63 = vld [vmem:[%s11386_s4 + $0xbc0] sm:$0xff] }
 0x34e   : > { %6628 = vmatpush1.bf16.msra.mxu0 %v8051_v10  ;;  %6669 = vmatpush1.bf16.msra.mxu1 %v8053_v14  ;;  %v2503_v10 = vld [vmem:[%s11386_s4 + $0x3b0] sm:$0xff]  ;;  %v2472_v14 = vld [vmem:[%s11386_s4 + $0x2b8] sm:$0xff] }
 0x34f   : > { %6695 = vmatprep.subr.bf16.mxu0 %v8504_v58  ;;  %6736 = vmatprep.subr.bf16.mxu1 %v8506_v44  ;;  %v2504_v58 = vld [vmem:[%s11386_s4 + $0x3b8] sm:$0xff]  ;;  %v8183_v44 = vcombine.low %v2535_v59, %v2567_v60  ;;  %v8120_v19 = vcombine.high %v2471_v9, %v2503_v10  ;;  %v8119_v24 = vcombine.low %v2471_v9, %v2503_v10 }
 0x350   : > { %v8122_v20 = vcombine.high %v2472_v14, %v2504_v58  ;;  %v8121_v25 = vcombine.low %v2472_v14, %v2504_v58  ;;  %v3000_v60 = vrot.slane %v10770_v18, %v10320_v11 }
 0x351   : > { %v10707_v7 = vpop.f32.mrf.mxu0  ;;  %v10709_v29 = vpop.f32.mrf.mxu1  ;;  %6646 = vmatmul.mubr.bf16.vlgmr.msra.gmra.mxu0 %v9591_v8  ;;  %6687 = vmatmul.mubr.bf16.vlgmr.msra.gmra.mxu1 %v9591_v8 }
 0x352   : > { %6696 = vmatpush1.bf16.msra.mxu0 %v8503_v21  ;;  %6737 = vmatpush1.bf16.msra.mxu1 %v8505_v53  ;;  %v2407_v21 = vld [vmem:[%s11386_s4 + $0xb0] sm:$0xff] }
 0x353   : > { %v10713_v15 = vpop.f32.mrf.mxu0  ;;  %v10715_v32 = vpop.f32.mrf.mxu1  ;;  %6697 = vmatprep.subr.bf16.mxu0 %v8440_v22  ;;  %6738 = vmatprep.subr.bf16.mxu1 %v8442_v23  ;;  %v2439_v53 = vld [vmem:[%s11386_s4 + $0x1b0] sm:$0xff]  ;;  %v2408_v22 = vld [vmem:[%s11386_s4 + $0xb8] sm:$0xff] }
 0x354   : > { %6727 = vmatprep.mubr.bf16.mxu0 %v9076_v42  ;;  %6768 = vmatprep.mubr.bf16.mxu1 %v9076_v42  ;;  %v2440_v23 = vld [vmem:[%s11386_s4 + $0x1b8] sm:$0xff]  ;;  %v6199_v47 = vadd.f32 %v10715_v32, %v2992_v34 }
 0x355   : > { %v6159_v37 = vpop.f32.mrf.mxu0  ;;  %v6200_v38 = vpop.f32.mrf.mxu1 }
 0x356   : > { %6698 = vmatpush1.bf16.msra.mxu0 %v8439_v31  ;;  %6739 = vmatpush1.bf16.msra.mxu1 %v8441_v57  ;;  %v8056_v31 = vcombine.high %v2407_v21, %v2439_v53  ;;  %v8058_v57 = vcombine.high %v2408_v22, %v2440_v23  ;;  %v8055_v37 = vcombine.low %v2407_v21, %v2439_v53  ;;  %v2665_v21 = vld [vmem:[%s11386_s4 + $0x8c0] sm:$0xff] }
 0x357   : > { %v6160_v41 = vpop.f32.mrf.mxu0  ;;  %v6201_v43 = vpop.f32.mrf.mxu1  ;;  %6699 = vmatprep.subr.bf16.mxu0 %v8376_v13  ;;  %6740 = vmatprep.subr.bf16.mxu1 %v8378_v16  ;;  %v2857_v13 = vld [vmem:[%s11386_s4 + $0xec0] sm:$0xff]  ;;  %v8057_v38 = vcombine.low %v2408_v22, %v2440_v23 }
 0x358   : > { %v2889_v16 = vld [vmem:[%s11386_s4 + $0xfc0] sm:$0xff]  ;;  %v6158_v41 = vadd.f32 %v10713_v15, %v2984_v27  ;;  %v8510_v43 = vcombine.high %v2858_v35, %v2890_v36  ;;  %v2826_v15 = vld [vmem:[%s11386_s4 + $0xdc8] sm:$0xff] }
 0x359   : > { %v8507_v32 = vcombine.low %v2857_v13, %v2889_v16 }
 0x35a   : > { %6700 = vmatpush1.bf16.msra.mxu0 %v8375_v39  ;;  %6741 = vmatpush1.bf16.msra.mxu1 %v8377_v40  ;;  %v8508_v39 = vcombine.high %v2857_v13, %v2889_v16  ;;  %v6156_v40 = vadd.f32 %v10707_v7, %v2980_v54  ;;  %v2794_v7 = vld [vmem:[%s11386_s4 + $0xcc8] sm:$0xff]  ;;  %v2697_v54 = vld [vmem:[%s11386_s4 + $0x9c0] sm:$0xff] }
 0x35b   : > { %6701 = vmatprep.subr.bf16.mxu0 %v8312_v45  ;;  %6742 = vmatprep.subr.bf16.mxu1 %v8314_v46  ;;  %v2793_v45 = vld [vmem:[%s11386_s4 + $0xcc0] sm:$0xff]  ;;  %v6197_v46 = vadd.f32 %v10709_v29, %v2988_v33  ;;  %v3004_v29 = vrot.slane %v10770_v18, %v10312_v3  ;;  %v8445_v58 = vcombine.low %v2794_v7, %v2826_v15 }
 0x35c   : > { %v8443_v9 = vcombine.low %v2793_v45, %v2825_v48  ;;  %v8316_v36 = vcombine.high %v2665_v21, %v2697_v54 }
 0x35d   : > { %v8532_v59 = vpack.c.bf16 %v6199_v47, %v6197_v46  ;;  %v2634_v46 = vld [vmem:[%s11386_s4 + $0x7c8] sm:$0xff] }
 0x35e   : > { %6702 = vmatpush1.bf16.msra.mxu0 %v8311_v26  ;;  %6743 = vmatpush1.bf16.msra.mxu1 %v8313_v52  ;;  %v8531_v26 = vpack.c.bf16 %v6158_v41, %v6156_v40  ;;  %v8444_v52 = vcombine.high %v2793_v45, %v2825_v48  ;;  %v2602_v45 = vld [vmem:[%s11386_s4 + $0x6c8] sm:$0xff]  ;;  %v8315_v48 = vcombine.low %v2665_v21, %v2697_v54  ;;  %v2891_v54 = vld [vmem:[%s11386_s4 + $0xfd0] sm:$0xff] }
 0x35f   : > { %6703 = vmatprep.subr.bf16.mxu0 %v8248_v55  ;;  %6744 = vmatprep.subr.bf16.mxu1 %v8250_v56  ;;  %v8446_v55 = vcombine.high %v2794_v7, %v2826_v15  ;;  %v2729_v56 = vld [vmem:[%s11386_s4 + $0xac0] sm:$0xff]  ;;  %v7348_v53 = vrot.slane %v8532_v59, %v9200_v50 }
 0x362   : > { %6704 = vmatpush1.bf16.msra.mxu0 %v8247_v0  ;;  %6745 = vmatpush1.bf16.msra.mxu1 %v8249_v4  ;;  %v2730_v0 = vld [vmem:[%s11386_s4 + $0xac8] sm:$0xff] }
 0x363   : > { %6705 = vmatprep.subr.bf16.mxu0 %v8184_v5  ;;  %6746 = vmatprep.subr.bf16.mxu1 %v8186_v6  ;;  %v2762_v4 = vld [vmem:[%s11386_s4 + $0xbc8] sm:$0xff] }
 0x364   : > { %v8381_v33 = vcombine.low %v2730_v0, %v2762_v4 }
 0x366   : > { %6706 = vmatpush1.bf16.msra.mxu0 %v8183_v44  ;;  %6747 = vmatpush1.bf16.msra.mxu1 %v8185_v17  ;;  %v7341_v44 = vrot.slane %v8531_v26, %v9200_v50  ;;  %v2569_v26 = vld [vmem:[%s11386_s4 + $0x5c0] sm:$0xff] }
 0x367   : > { %6707 = vmatprep.subr.bf16.mxu0 %v8120_v19  ;;  %6748 = vmatprep.subr.bf16.mxu1 %v8122_v20  ;;  %v8380_v19 = vcombine.high %v2729_v56, %v2761_v63  ;;  %v8382_v20 = vcombine.high %v2730_v0, %v2762_v4  ;;  %v2473_v0 = vld [vmem:[%s11386_s4 + $0x2c0] sm:$0xff] }
 0x368   : > { %v2505_v4 = vld [vmem:[%s11386_s4 + $0x3c0] sm:$0xff] }
 0x36a   : > { %6708 = vmatpush1.bf16.msra.mxu0 %v8119_v24  ;;  %6749 = vmatpush1.bf16.msra.mxu1 %v8121_v25  ;;  %v2666_v24 = vld [vmem:[%s11386_s4 + $0x8c8] sm:$0xff] }
 0x36b   : > { %6709 = vmatprep.subr.bf16.mxu0 %v8056_v31  ;;  %6750 = vmatprep.subr.bf16.mxu1 %v8058_v57  ;;  %v2698_v25 = vld [vmem:[%s11386_s4 + $0x9c8] sm:$0xff]  ;;  %v8379_v57 = vcombine.low %v2729_v56, %v2761_v63 }
 0x36c   : > { %v8317_v7 = vcombine.low %v2666_v24, %v2698_v25 }
 0x36e   : > { %6710 = vmatpush1.bf16.msra.mxu0 %v8055_v37  ;;  %6751 = vmatpush1.bf16.msra.mxu1 %v8057_v38  ;;  %v8318_v37 = vcombine.high %v2666_v24, %v2698_v25  ;;  %v2601_v38 = vld [vmem:[%s11386_s4 + $0x6c0] sm:$0xff]  ;;  %v2860_v24 = vld [vmem:[%s11386_s4 + $0xed8] sm:$0xff] }
 0x36f   : > { %6777 = vmatprep.subr.bf16.mxu0 %v8508_v39  ;;  %6818 = vmatprep.subr.bf16.mxu1 %v8510_v43  ;;  %v7363_v39 = vcombine.low %v7341_v44, %v7348_v53  ;;  %v2633_v43 = vld [vmem:[%s11386_s4 + $0x7c0] sm:$0xff]  ;;  %v2892_v25 = vld [vmem:[%s11386_s4 + $0xfd8] sm:$0xff] }
 0x370   : > { %v8252_v15 = vcombine.high %v2601_v38, %v2633_v43  ;;  %v8251_v59 = vcombine.low %v2601_v38, %v2633_v43  ;;  %v2409_v44 = vld [vmem:[%s11386_s4 + $0xc0] sm:$0xff]  ;;  %v2732_v43 = vld [vmem:[%s11386_s4 + $0xad8] sm:$0xff] }
 0x371   : > { %v6237_v5 = vpop.f32.mrf.mxu0  ;;  %v6278_v6 = vpop.f32.mrf.mxu1  ;;  %6728 = vmatmul.mubr.bf16.vlgmr.msra.gmra.mxu0 %v9591_v8  ;;  %6769 = vmatmul.mubr.bf16.vlgmr.msra.gmra.mxu1 %v9591_v8 }
 0x372   : > { %v6238_v10 = vadd.f32 %v6237_v5, %v2996_v49  ;;  %v6279_v14 = vadd.f32 %v6278_v6, %v3004_v29  ;;  %6778 = vmatpush1.bf16.msra.mxu0 %v8507_v32  ;;  %6819 = vmatpush1.bf16.msra.mxu1 %v8509_v51  ;;  %v8254_v49 = vcombine.high %v2602_v45, %v2634_v46  ;;  %v2537_v29 = vld [vmem:[%s11386_s4 + $0x4c0] sm:$0xff]  ;;  %v2474_v5 = vld [vmem:[%s11386_s4 + $0x2c8] sm:$0xff] }
 0x373   : > { %v6239_v17 = vpop.f32.mrf.mxu0  ;;  %v6280_v18 = vpop.f32.mrf.mxu1  ;;  %6779 = vmatprep.subr.bf16.mxu0 %v8444_v52  ;;  %6820 = vmatprep.subr.bf16.mxu1 %v8446_v55  ;;  %v7371_v32 = vrot.slane %v7363_v39, %v9200_v50  ;;  %v2538_v52 = vld [vmem:[%s11386_s4 + $0x4c8] sm:$0xff] }
 0x374   : > { %v6240_v22 = vadd.f32 %v6239_v17, %v3000_v60  ;;  %v6281_v23 = vadd.f32 %v6280_v18, %v3008_v62  ;;  %6809 = vmatprep.mubr.bf16.mxu0 %v9076_v42  ;;  %6850 = vmatprep.mubr.bf16.mxu1 %v9076_v42  ;;  %v2570_v55 = vld [vmem:[%s11386_s4 + $0x5c8] sm:$0xff]  ;;  %v8253_v60 = vcombine.low %v2602_v45, %v2634_v46  ;;  %v2441_v17 = vld [vmem:[%s11386_s4 + $0x1c0] sm:$0xff]  ;;  %v2764_v45 = vld [vmem:[%s11386_s4 + $0xbd8] sm:$0xff] }
 0x375   : > { %v6241_v27 = vpop.f32.mrf.mxu0  ;;  %v6282_v31 = vpop.f32.mrf.mxu1  ;;  %v8188_v62 = vcombine.high %v2537_v29, %v2569_v26  ;;  %v8190_v63 = vcombine.high %v2538_v52, %v2570_v55  ;;  %v2506_v6 = vld [vmem:[%s11386_s4 + $0x3c8] sm:$0xff]  ;;  %v8060_v53 = vcombine.high %v2409_v44, %v2441_v17 }
 0x376   : > { %v8533_v13 = vpack.c.bf16 %v6240_v22, %v6238_v10  ;;  %v8534_v16 = vpack.c.bf16 %v6281_v23, %v6279_v14  ;;  %6780 = vmatpush1.bf16.msra.mxu0 %v8443_v9  ;;  %6821 = vmatpush1.bf16.msra.mxu1 %v8445_v58  ;;  %v8187_v9 = vcombine.low %v2537_v29, %v2569_v26  ;;  %v2410_v18 = vld [vmem:[%s11386_s4 + $0xc8] sm:$0xff]  ;;  %v2859_v23 = vld [vmem:[%s11386_s4 + $0xed0] sm:$0xff] }
 0x377   : > { %v6242_v34 = vpop.f32.mrf.mxu0  ;;  %v6283_v35 = vpop.f32.mrf.mxu1  ;;  %6781 = vmatprep.subr.bf16.mxu0 %v8380_v19  ;;  %6822 = vmatprep.subr.bf16.mxu1 %v8382_v20  ;;  %v8189_v10 = vcombine.low %v2538_v52, %v2570_v55  ;;  %v8124_v14 = vcombine.high %v2473_v0, %v2505_v4  ;;  %v8126_v58 = vcombine.high %v2474_v5, %v2506_v6  ;;  %v2442_v19 = vld [vmem:[%s11386_s4 + $0x1c8] sm:$0xff]  ;;  %v2699_v26 = vld [vmem:[%s11386_s4 + $0x9d0] sm:$0xff]  ;;  %v2668_v52 = vld [vmem:[%s11386_s4 + $0x8d8] sm:$0xff] }
 0x378   : > { %v7355_v40 = vrot.slane %v8533_v13, %v9200_v50  ;;  %v7362_v41 = vrot.slane %v8534_v16, %v9200_v50  ;;  %v8123_v20 = vcombine.low %v2473_v0, %v2505_v4  ;;  %v8125_v21 = vcombine.low %v2474_v5, %v2506_v6  ;;  %v2795_v16 = vld [vmem:[%s11386_s4 + $0xcd0] sm:$0xff]  ;;  %v2796_v34 = vld [vmem:[%s11386_s4 + $0xcd8] sm:$0xff] }
 0x379   : > { %v8062_v22 = vcombine.high %v2410_v18, %v2442_v19  ;;  %v8059_v27 = vcombine.low %v2409_v44, %v2441_v17  ;;  %v8061_v31 = vcombine.low %v2410_v18, %v2442_v19  ;;  %v8514_v13 = vcombine.high %v2860_v24, %v2892_v25  ;;  %v2828_v35 = vld [vmem:[%s11386_s4 + $0xdd8] sm:$0xff]  ;;  %v2603_v6 = vld [vmem:[%s11386_s4 + $0x6d0] sm:$0xff] }
 0x37a   : > { %v7364_v47 = vcombine.low %v7355_v40, %v7362_v41  ;;  %6782 = vmatpush1.bf16.msra.mxu0 %v8379_v57  ;;  %6823 = vmatpush1.bf16.msra.mxu1 %v8381_v33  ;;  %v8512_v57 = vcombine.high %v2859_v23, %v2891_v54  ;;  %v2827_v33 = vld [vmem:[%s11386_s4 + $0xdd0] sm:$0xff]  ;;  %v8450_v39 = vcombine.high %v2796_v34, %v2828_v35  ;;  %v2700_v55 = vld [vmem:[%s11386_s4 + $0x9d8] sm:$0xff] }
 0x37b   : > { %6783 = vmatprep.subr.bf16.mxu0 %v8316_v36  ;;  %6824 = vmatprep.subr.bf16.mxu1 %v8318_v37  ;;  %v8511_v36 = vcombine.low %v2859_v23, %v2891_v54  ;;  %v8513_v37 = vcombine.low %v2860_v24, %v2892_v25  ;;  %v8448_v38 = vcombine.high %v2795_v16, %v2827_v33  ;;  %v2731_v40 = vld [vmem:[%s11386_s4 + $0xad0] sm:$0xff] }
 0x37c   : > { %v7378_v51 = vrot.slane %v7364_v47, %v9200_v50  ;;  %v2763_v41 = vld [vmem:[%s11386_s4 + $0xbd0] sm:$0xff]  ;;  %v8322_v5 = vcombine.high %v2668_v52, %v2700_v55  ;;  %v8321_v44 = vcombine.low %v2668_v52, %v2700_v55  ;;  %v2862_v52 = vld [vmem:[%s11386_s4 + $0xee8] sm:$0xff] }
 0x37d   : > { %v8384_v29 = vcombine.high %v2731_v40, %v2763_v41  ;;  %v2539_v19 = vld [vmem:[%s11386_s4 + $0x4d0] sm:$0xff]  ;;  %v2894_v55 = vld [vmem:[%s11386_s4 + $0xfe8] sm:$0xff] }
 0x37e   : > { %v7379_v56 = vcombine.low %v7371_v32, %v7378_v51  ;;  %6784 = vmatpush1.bf16.msra.mxu0 %v8315_v48  ;;  %6825 = vmatpush1.bf16.msra.mxu1 %v8317_v7  ;;  %v8447_v48 = vcombine.low %v2795_v16, %v2827_v33  ;;  %v8449_v7 = vcombine.low %v2796_v34, %v2828_v35  ;;  %v2667_v51 = vld [vmem:[%s11386_s4 + $0x8d0] sm:$0xff]  ;;  %v11012_v33 = vld [vmem:[%s11387_s5 + $0x18] sm:$0xff] }
 0x37f   : > { %6785 = vmatprep.subr.bf16.mxu0 %v8252_v15  ;;  %6826 = vmatprep.subr.bf16.mxu1 %v8254_v49  ;;  %v8386_v32 = vcombine.high %v2732_v43, %v2764_v45  ;;  %v8320_v4 = vcombine.high %v2667_v51, %v2699_v26  ;;  %v2475_v25 = vld [vmem:[%s11386_s4 + $0x2d0] sm:$0xff] }
 0x380   : > { %7635 = vst [vmem:[%s11391_s9 + $0x10] sm:$0xff] %v7379_v56 }
 0x382   : > { %6786 = vmatpush1.bf16.msra.mxu0 %v8251_v59  ;;  %6827 = vmatpush1.bf16.msra.mxu1 %v8253_v60  ;;  %v8383_v60 = vcombine.low %v2731_v40, %v2763_v41  ;;  %v3012_v40 = vrot.slane %v11012_v33, %v9504_v1 }
 0x383   : > { %6787 = vmatprep.subr.bf16.mxu0 %v8188_v62  ;;  %6828 = vmatprep.subr.bf16.mxu1 %v8190_v63  ;;  %v8385_v62 = vcombine.low %v2732_v43, %v2764_v45  ;;  %v3016_v45 = vrot.slane %v11012_v33, %v9507_v2 }
 0x386   : > { %6788 = vmatpush1.bf16.msra.mxu0 %v8187_v9  ;;  %6829 = vmatpush1.bf16.msra.mxu1 %v8189_v10  ;;  %v2635_v9 = vld [vmem:[%s11386_s4 + $0x7d0] sm:$0xff]  ;;  %v2604_v10 = vld [vmem:[%s11386_s4 + $0x6d8] sm:$0xff] }
 0x387   : > { %6789 = vmatprep.subr.bf16.mxu0 %v8124_v14  ;;  %6830 = vmatprep.subr.bf16.mxu1 %v8126_v58  ;;  %v2636_v14 = vld [vmem:[%s11386_s4 + $0x7d8] sm:$0xff]  ;;  %v8319_v58 = vcombine.low %v2667_v51, %v2699_v26  ;;  %v8256_v17 = vcombine.high %v2603_v6, %v2635_v9  ;;  %v3020_v51 = vrot.slane %v11012_v33, %v10286_v28 }
 0x388   : > { %v8258_v18 = vcombine.high %v2604_v10, %v2636_v14  ;;  %v8257_v23 = vcombine.low %v2604_v10, %v2636_v14  ;;  %v3024_v26 = vrot.slane %v11012_v33, %v10269_v30  ;;  %v3028_v10 = vrot.slane %v11012_v33, %v10307_v61 }
 0x389   : > { %v8517_v14 = vcombine.low %v2862_v52, %v2894_v55 }
 0x38a   : > { %6790 = vmatpush1.bf16.msra.mxu0 %v8123_v20  ;;  %6831 = vmatpush1.bf16.msra.mxu1 %v8125_v21  ;;  %v2571_v20 = vld [vmem:[%s11386_s4 + $0x5d0] sm:$0xff]  ;;  %v2540_v21 = vld [vmem:[%s11386_s4 + $0x4d8] sm:$0xff] }
 0x38b   : > { %6791 = vmatprep.subr.bf16.mxu0 %v8060_v53  ;;  %6832 = vmatprep.subr.bf16.mxu1 %v8062_v22  ;;  %v2572_v53 = vld [vmem:[%s11386_s4 + $0x5d8] sm:$0xff]  ;;  %v8255_v22 = vcombine.low %v2603_v6, %v2635_v9  ;;  %v8192_v54 = vcombine.high %v2539_v19, %v2571_v20  ;;  %v2829_v9 = vld [vmem:[%s11386_s4 + $0xde0] sm:$0xff] }
 0x38c   : > { %v8194_v24 = vcombine.high %v2540_v21, %v2572_v53  ;;  %v8193_v16 = vcombine.low %v2540_v21, %v2572_v53  ;;  %v3040_v21 = vrot.slane %v11012_v33, %v10323_v12  ;;  %v2765_v53 = vld [vmem:[%s11386_s4 + $0xbe0] sm:$0xff] }
 0x38e   : > { %6792 = vmatpush1.bf16.msra.mxu0 %v8059_v27  ;;  %6833 = vmatpush1.bf16.msra.mxu1 %v8061_v31  ;;  %v2507_v27 = vld [vmem:[%s11386_s4 + $0x3d0] sm:$0xff]  ;;  %v2476_v31 = vld [vmem:[%s11386_s4 + $0x2d8] sm:$0xff] }
 0x38f   : > { %6859 = vmatprep.subr.bf16.mxu0 %v8512_v57  ;;  %6900 = vmatprep.subr.bf16.mxu1 %v8514_v13  ;;  %v2508_v57 = vld [vmem:[%s11386_s4 + $0x3d8] sm:$0xff]  ;;  %v8191_v13 = vcombine.low %v2539_v19, %v2571_v20  ;;  %v8128_v34 = vcombine.high %v2475_v25, %v2507_v27  ;;  %v8127_v41 = vcombine.low %v2475_v25, %v2507_v27 }
 0x390   : > { %v8130_v35 = vcombine.high %v2476_v31, %v2508_v57  ;;  %v8129_v43 = vcombine.low %v2476_v31, %v2508_v57  ;;  %v3032_v20 = vrot.slane %v11012_v33, %v10320_v11 }
 0x391   : > { %v10949_v46 = vpop.f32.mrf.mxu0  ;;  %v10951_v47 = vpop.f32.mrf.mxu1  ;;  %6810 = vmatmul.mubr.bf16.vlgmr.msra.gmra.mxu0 %v9591_v8  ;;  %6851 = vmatmul.mubr.bf16.vlgmr.msra.gmra.mxu1 %v9591_v8 }
 0x392   : > { %6860 = vmatpush1.bf16.msra.mxu0 %v8511_v36  ;;  %6901 = vmatpush1.bf16.msra.mxu1 %v8513_v37  ;;  %v2411_v36 = vld [vmem:[%s11386_s4 + $0xd0] sm:$0xff] }
 0x393   : > { %v10955_v15 = vpop.f32.mrf.mxu0  ;;  %v10957_v49 = vpop.f32.mrf.mxu1  ;;  %6861 = vmatprep.subr.bf16.mxu0 %v8448_v38  ;;  %6902 = vmatprep.subr.bf16.mxu1 %v8450_v39  ;;  %v2443_v37 = vld [vmem:[%s11386_s4 + $0x1d0] sm:$0xff]  ;;  %v2412_v38 = vld [vmem:[%s11386_s4 + $0xd8] sm:$0xff] }
 0x394   : > { %6891 = vmatprep.mubr.bf16.mxu0 %v9076_v42  ;;  %6932 = vmatprep.mubr.bf16.mxu1 %v9076_v42  ;;  %v2444_v39 = vld [vmem:[%s11386_s4 + $0x1d8] sm:$0xff]  ;;  %v6363_v6 = vadd.f32 %v10957_v49, %v3024_v26 }
 0x395   : > { %v6323_v56 = vpop.f32.mrf.mxu0  ;;  %v6364_v59 = vpop.f32.mrf.mxu1 }
 0x396   : > { %6862 = vmatpush1.bf16.msra.mxu0 %v8447_v48  ;;  %6903 = vmatpush1.bf16.msra.mxu1 %v8449_v7  ;;  %v8064_v48 = vcombine.high %v2411_v36, %v2443_v37  ;;  %v8066_v7 = vcombine.high %v2412_v38, %v2444_v39  ;;  %v8063_v56 = vcombine.low %v2411_v36, %v2443_v37  ;;  %v2669_v36 = vld [vmem:[%s11386_s4 + $0x8e0] sm:$0xff] }
 0x397   : > { %v6324_v63 = vpop.f32.mrf.mxu0  ;;  %v6365_v0 = vpop.f32.mrf.mxu1  ;;  %6863 = vmatprep.subr.bf16.mxu0 %v8384_v29  ;;  %6904 = vmatprep.subr.bf16.mxu1 %v8386_v32  ;;  %v2861_v29 = vld [vmem:[%s11386_s4 + $0xee0] sm:$0xff]  ;;  %v8065_v59 = vcombine.low %v2412_v38, %v2444_v39 }
 0x398   : > { %v2893_v32 = vld [vmem:[%s11386_s4 + $0xfe0] sm:$0xff]  ;;  %v6322_v63 = vadd.f32 %v10955_v15, %v3016_v45  ;;  %v8518_v0 = vcombine.high %v2862_v52, %v2894_v55  ;;  %v2830_v15 = vld [vmem:[%s11386_s4 + $0xde8] sm:$0xff] }
 0x399   : > { %v8515_v49 = vcombine.low %v2861_v29, %v2893_v32 }
 0x39a   : > { %6864 = vmatpush1.bf16.msra.mxu0 %v8383_v60  ;;  %6905 = vmatpush1.bf16.msra.mxu1 %v8385_v62  ;;  %v8516_v60 = vcombine.high %v2861_v29, %v2893_v32  ;;  %v6320_v62 = vadd.f32 %v10949_v46, %v3012_v40  ;;  %v2798_v46 = vld [vmem:[%s11386_s4 + $0xce8] sm:$0xff]  ;;  %v2701_v40 = vld [vmem:[%s11386_s4 + $0x9e0] sm:$0xff] }
 0x39b   : > { %6865 = vmatprep.subr.bf16.mxu0 %v8320_v4  ;;  %6906 = vmatprep.subr.bf16.mxu1 %v8322_v5  ;;  %v2797_v4 = vld [vmem:[%s11386_s4 + $0xce0] sm:$0xff]  ;;  %v6361_v5 = vadd.f32 %v10951_v47, %v3020_v51  ;;  %v3036_v47 = vrot.slane %v11012_v33, %v10312_v3  ;;  %v8453_v57 = vcombine.low %v2798_v46, %v2830_v15 }
 0x39c   : > { %v8451_v25 = vcombine.low %v2797_v4, %v2829_v9  ;;  %v8324_v55 = vcombine.high %v2669_v36, %v2701_v40 }
 0x39d   : > { %v8536_v19 = vpack.c.bf16 %v6363_v6, %v6361_v5  ;;  %v2638_v5 = vld [vmem:[%s11386_s4 + $0x7e8] sm:$0xff] }
 0x39e   : > { %6866 = vmatpush1.bf16.msra.mxu0 %v8319_v58  ;;  %6907 = vmatpush1.bf16.msra.mxu1 %v8321_v44  ;;  %v8535_v58 = vpack.c.bf16 %v6322_v63, %v6320_v62  ;;  %v8452_v44 = vcombine.high %v2797_v4, %v2829_v9  ;;  %v2606_v4 = vld [vmem:[%s11386_s4 + $0x6e8] sm:$0xff]  ;;  %v8323_v9 = vcombine.low %v2669_v36, %v2701_v40  ;;  %v2895_v40 = vld [vmem:[%s11386_s4 + $0xff0] sm:$0xff] }
 0x39f   : > { %6867 = vmatprep.subr.bf16.mxu0 %v8256_v17  ;;  %6908 = vmatprep.subr.bf16.mxu1 %v8258_v18  ;;  %v8454_v17 = vcombine.high %v2798_v46, %v2830_v15  ;;  %v2733_v18 = vld [vmem:[%s11386_s4 + $0xae0] sm:$0xff]  ;;  %v7397_v37 = vrot.slane %v8536_v19, %v9200_v50 }
 0x3a2   : > { %6868 = vmatpush1.bf16.msra.mxu0 %v8255_v22  ;;  %6909 = vmatpush1.bf16.msra.mxu1 %v8257_v23  ;;  %v2734_v22 = vld [vmem:[%s11386_s4 + $0xae8] sm:$0xff] }
 0x3a3   : > { %6869 = vmatprep.subr.bf16.mxu0 %v8192_v54  ;;  %6910 = vmatprep.subr.bf16.mxu1 %v8194_v24  ;;  %v2766_v23 = vld [vmem:[%s11386_s4 + $0xbe8] sm:$0xff] }
 0x3a4   : > { %v8389_v51 = vcombine.low %v2734_v22, %v2766_v23 }
 0x3a6   : > { %6870 = vmatpush1.bf16.msra.mxu0 %v8191_v13  ;;  %6911 = vmatpush1.bf16.msra.mxu1 %v8193_v16  ;;  %v7390_v13 = vrot.slane %v8535_v58, %v9200_v50  ;;  %v2573_v58 = vld [vmem:[%s11386_s4 + $0x5e0] sm:$0xff] }
 0x3a7   : > { %6871 = vmatprep.subr.bf16.mxu0 %v8128_v34  ;;  %6912 = vmatprep.subr.bf16.mxu1 %v8130_v35  ;;  %v8388_v34 = vcombine.high %v2733_v18, %v2765_v53  ;;  %v8390_v35 = vcombine.high %v2734_v22, %v2766_v23  ;;  %v2477_v22 = vld [vmem:[%s11386_s4 + $0x2e0] sm:$0xff] }
 0x3a8   : > { %v2509_v23 = vld [vmem:[%s11386_s4 + $0x3e0] sm:$0xff] }
 0x3aa   : > { %6872 = vmatpush1.bf16.msra.mxu0 %v8127_v41  ;;  %6913 = vmatpush1.bf16.msra.mxu1 %v8129_v43  ;;  %v2670_v41 = vld [vmem:[%s11386_s4 + $0x8e8] sm:$0xff] }
 0x3ab   : > { %6873 = vmatprep.subr.bf16.mxu0 %v8064_v48  ;;  %6914 = vmatprep.subr.bf16.mxu1 %v8066_v7  ;;  %v2702_v43 = vld [vmem:[%s11386_s4 + $0x9e8] sm:$0xff]  ;;  %v8387_v7 = vcombine.low %v2733_v18, %v2765_v53 }
 0x3ac   : > { %v8325_v46 = vcombine.low %v2670_v41, %v2702_v43 }
 0x3ae   : > { %6874 = vmatpush1.bf16.msra.mxu0 %v8063_v56  ;;  %6915 = vmatpush1.bf16.msra.mxu1 %v8065_v59  ;;  %v8326_v56 = vcombine.high %v2670_v41, %v2702_v43  ;;  %v2605_v59 = vld [vmem:[%s11386_s4 + $0x6e0] sm:$0xff]  ;;  %v2864_v41 = vld [vmem:[%s11386_s4 + $0xef8] sm:$0xff] }
 0x3af   : > { %6941 = vmatprep.subr.bf16.mxu0 %v8516_v60  ;;  %6982 = vmatprep.subr.bf16.mxu1 %v8518_v0  ;;  %v7412_v60 = vcombine.low %v7390_v13, %v7397_v37  ;;  %v2637_v0 = vld [vmem:[%s11386_s4 + $0x7e0] sm:$0xff]  ;;  %v2896_v43 = vld [vmem:[%s11386_s4 + $0xff8] sm:$0xff] }
 0x3b0   : > { %v8260_v15 = vcombine.high %v2605_v59, %v2637_v0  ;;  %v8259_v19 = vcombine.low %v2605_v59, %v2637_v0  ;;  %v2413_v13 = vld [vmem:[%s11386_s4 + $0xe0] sm:$0xff]  ;;  %v2736_v0 = vld [vmem:[%s11386_s4 + $0xaf8] sm:$0xff] }
 0x3b1   : > { %v6401_v54 = vpop.f32.mrf.mxu0  ;;  %v6442_v24 = vpop.f32.mrf.mxu1  ;;  %6892 = vmatmul.mubr.bf16.vlgmr.msra.gmra.mxu0 %v9591_v8  ;;  %6933 = vmatmul.mubr.bf16.vlgmr.msra.gmra.mxu1 %v9591_v8 }
 0x3b2   : > { %v6402_v27 = vadd.f32 %v6401_v54, %v3028_v10  ;;  %v6443_v31 = vadd.f32 %v6442_v24, %v3036_v47  ;;  %6942 = vmatpush1.bf16.msra.mxu0 %v8515_v49  ;;  %6983 = vmatpush1.bf16.msra.mxu1 %v8517_v14  ;;  %v8262_v10 = vcombine.high %v2606_v4, %v2638_v5  ;;  %v2541_v47 = vld [vmem:[%s11386_s4 + $0x4e0] sm:$0xff]  ;;  %v2478_v54 = vld [vmem:[%s11386_s4 + $0x2e8] sm:$0xff] }
 0x3b3   : > { %v6403_v16 = vpop.f32.mrf.mxu0  ;;  %v6444_v33 = vpop.f32.mrf.mxu1  ;;  %6943 = vmatprep.subr.bf16.mxu0 %v8452_v44  ;;  %6984 = vmatprep.subr.bf16.mxu1 %v8454_v17  ;;  %v7420_v49 = vrot.slane %v7412_v60, %v9200_v50  ;;  %v2542_v44 = vld [vmem:[%s11386_s4 + $0x4e8] sm:$0xff] }
 0x3b4   : > { %v6404_v38 = vadd.f32 %v6403_v16, %v3032_v20  ;;  %v6445_v39 = vadd.f32 %v6444_v33, %v3040_v21  ;;  %6973 = vmatprep.mubr.bf16.mxu0 %v9076_v42  ;;  %7014 = vmatprep.mubr.bf16.mxu1 %v9076_v42  ;;  %v2574_v17 = vld [vmem:[%s11386_s4 + $0x5e8] sm:$0xff]  ;;  %v8261_v20 = vcombine.low %v2606_v4, %v2638_v5  ;;  %v2445_v16 = vld [vmem:[%s11386_s4 + $0x1e0] sm:$0xff]  ;;  %v2768_v4 = vld [vmem:[%s11386_s4 + $0xbf8] sm:$0xff] }
 0x3b5   : > { %v6405_v45 = vpop.f32.mrf.mxu0  ;;  %v6446_v48 = vpop.f32.mrf.mxu1  ;;  %v8196_v21 = vcombine.high %v2541_v47, %v2573_v58  ;;  %v8198_v53 = vcombine.high %v2542_v44, %v2574_v17  ;;  %v2510_v24 = vld [vmem:[%s11386_s4 + $0x3e8] sm:$0xff]  ;;  %v8068_v37 = vcombine.high %v2413_v13, %v2445_v16 }
 0x3b6   : > { %v8537_v29 = vpack.c.bf16 %v6404_v38, %v6402_v27  ;;  %v8538_v32 = vpack.c.bf16 %v6445_v39, %v6443_v31  ;;  %6944 = vmatpush1.bf16.msra.mxu0 %v8451_v25  ;;  %6985 = vmatpush1.bf16.msra.mxu1 %v8453_v57  ;;  %v8195_v25 = vcombine.low %v2541_v47, %v2573_v58  ;;  %v2414_v33 = vld [vmem:[%s11386_s4 + $0xe8] sm:$0xff]  ;;  %v2863_v39 = vld [vmem:[%s11386_s4 + $0xef0] sm:$0xff] }
 0x3b7   : > { %v6406_v26 = vpop.f32.mrf.mxu0  ;;  %v6447_v52 = vpop.f32.mrf.mxu1  ;;  %6945 = vmatprep.subr.bf16.mxu0 %v8388_v34  ;;  %6986 = vmatprep.subr.bf16.mxu1 %v8390_v35  ;;  %v8197_v27 = vcombine.low %v2542_v44, %v2574_v17  ;;  %v8132_v31 = vcombine.high %v2477_v22, %v2509_v23  ;;  %v8134_v57 = vcombine.high %v2478_v54, %v2510_v24  ;;  %v2446_v34 = vld [vmem:[%s11386_s4 + $0x1e8] sm:$0xff]  ;;  %v2703_v58 = vld [vmem:[%s11386_s4 + $0x9f0] sm:$0xff]  ;;  %v2672_v44 = vld [vmem:[%s11386_s4 + $0x8f8] sm:$0xff] }
 0x3b8   : > { %v7404_v62 = vrot.slane %v8537_v29, %v9200_v50  ;;  %v7411_v63 = vrot.slane %v8538_v32, %v9200_v50  ;;  %v8131_v35 = vcombine.low %v2477_v22, %v2509_v23  ;;  %v8133_v36 = vcombine.low %v2478_v54, %v2510_v24  ;;  %v2799_v32 = vld [vmem:[%s11386_s4 + $0xcf0] sm:$0xff]  ;;  %v2800_v26 = vld [vmem:[%s11386_s4 + $0xcf8] sm:$0xff] }
 0x3b9   : > { %v8070_v38 = vcombine.high %v2414_v33, %v2446_v34  ;;  %v8067_v45 = vcombine.low %v2413_v13, %v2445_v16  ;;  %v8069_v48 = vcombine.low %v2414_v33, %v2446_v34  ;;  %v8522_v29 = vcombine.high %v2864_v41, %v2896_v43  ;;  %v2832_v52 = vld [vmem:[%s11386_s4 + $0xdf8] sm:$0xff]  ;;  %v2607_v24 = vld [vmem:[%s11386_s4 + $0x6f0] sm:$0xff] }
 0x3ba   : > { %v7413_v6 = vcombine.low %v7404_v62, %v7411_v63  ;;  %6946 = vmatpush1.bf16.msra.mxu0 %v8387_v7  ;;  %6987 = vmatpush1.bf16.msra.mxu1 %v8389_v51  ;;  %v8520_v7 = vcombine.high %v2863_v39, %v2895_v40  ;;  %v2831_v51 = vld [vmem:[%s11386_s4 + $0xdf0] sm:$0xff]  ;;  %v8458_v60 = vcombine.high %v2800_v26, %v2832_v52  ;;  %v2704_v17 = vld [vmem:[%s11386_s4 + $0x9f8] sm:$0xff] }
 0x3bb   : > { %6947 = vmatprep.subr.bf16.mxu0 %v8324_v55  ;;  %6988 = vmatprep.subr.bf16.mxu1 %v8326_v56  ;;  %v8519_v55 = vcombine.low %v2863_v39, %v2895_v40  ;;  %v8521_v56 = vcombine.low %v2864_v41, %v2896_v43  ;;  %v8456_v59 = vcombine.high %v2799_v32, %v2831_v51  ;;  %v2735_v62 = vld [vmem:[%s11386_s4 + $0xaf0] sm:$0xff] }
 0x3bc   : > { %v7427_v14 = vrot.slane %v7413_v6, %v9200_v50  ;;  %v2767_v63 = vld [vmem:[%s11386_s4 + $0xbf0] sm:$0xff]  ;;  %v8330_v54 = vcombine.high %v2672_v44, %v2704_v17 }
 0x3bd   : > { %v8392_v47 = vcombine.high %v2735_v62, %v2767_v63  ;;  %v2543_v33 = vld [vmem:[%s11386_s4 + $0x4f0] sm:$0xff] }
 0x3be   : > { %v7428_v18 = vcombine.low %v7420_v49, %v7427_v14  ;;  %6948 = vmatpush1.bf16.msra.mxu0 %v8323_v9  ;;  %6989 = vmatpush1.bf16.msra.mxu1 %v8325_v46  ;;  %v8455_v9 = vcombine.low %v2799_v32, %v2831_v51  ;;  %v8457_v46 = vcombine.low %v2800_v26, %v2832_v52  ;;  %v2671_v14 = vld [vmem:[%s11386_s4 + $0x8f0] sm:$0xff] }
 0x3bf   : > { %6949 = vmatprep.subr.bf16.mxu0 %v8260_v15  ;;  %6990 = vmatprep.subr.bf16.mxu1 %v8262_v10  ;;  %v8394_v49 = vcombine.high %v2736_v0, %v2768_v4  ;;  %v8328_v23 = vcombine.high %v2671_v14, %v2703_v58  ;;  %v2575_v34 = vld [vmem:[%s11386_s4 + $0x5f0] sm:$0xff] }
 0x3c0   : > { %7636 = vst [vmem:[%s11391_s9 + $0x18] sm:$0xff] %v7428_v18  ;;  %v8200_v39 = vcombine.high %v2543_v33, %v2575_v34  ;;  %v2479_v41 = vld [vmem:[%s11386_s4 + $0x2f0] sm:$0xff] }
 0x3c1   : > { %v2511_v43 = vld [vmem:[%s11386_s4 + $0x3f0] sm:$0xff] }
 0x3c2   : > { %6950 = vmatpush1.bf16.msra.mxu0 %v8259_v19  ;;  %6991 = vmatpush1.bf16.msra.mxu1 %v8261_v20  ;;  %v8391_v20 = vcombine.low %v2735_v62, %v2767_v63  ;;  %v8136_v32 = vcombine.high %v2479_v41, %v2511_v43  ;;  %v2415_v26 = vld [vmem:[%s11386_s4 + $0xf0] sm:$0xff] }
 0x3c3   : > { %6951 = vmatprep.subr.bf16.mxu0 %v8196_v21  ;;  %6992 = vmatprep.subr.bf16.mxu1 %v8198_v53  ;;  %v8393_v21 = vcombine.low %v2736_v0, %v2768_v4  ;;  %v2447_v52 = vld [vmem:[%s11386_s4 + $0x1f0] sm:$0xff] }
 0x3c4   : > { %v8072_v63 = vcombine.high %v2415_v26, %v2447_v52 }
 0x3c6   : > { %6952 = vmatpush1.bf16.msra.mxu0 %v8195_v25  ;;  %6993 = vmatpush1.bf16.msra.mxu1 %v8197_v27  ;;  %v2608_v25 = vld [vmem:[%s11386_s4 + $0x6f8] sm:$0xff] }
 0x3c7   : > { %6953 = vmatprep.subr.bf16.mxu0 %v8132_v31  ;;  %6994 = vmatprep.subr.bf16.mxu1 %v8134_v57  ;;  %v2640_v27 = vld [vmem:[%s11386_s4 + $0x7f8] sm:$0xff]  ;;  %v8327_v31 = vcombine.low %v2671_v14, %v2703_v58  ;;  %v8329_v57 = vcombine.low %v2672_v44, %v2704_v17 }
 0x3c8   : > { %v8266_v16 = vcombine.high %v2608_v25, %v2640_v27 }
 0x3ca   : > { %6954 = vmatpush1.bf16.msra.mxu0 %v8131_v35  ;;  %6995 = vmatpush1.bf16.msra.mxu1 %v8133_v36  ;;  %v2544_v35 = vld [vmem:[%s11386_s4 + $0x4f8] sm:$0xff] }
 0x3cb   : > { %6955 = vmatprep.subr.bf16.mxu0 %v8068_v37  ;;  %6996 = vmatprep.subr.bf16.mxu1 %v8070_v38  ;;  %v2576_v36 = vld [vmem:[%s11386_s4 + $0x5f8] sm:$0xff]  ;;  %v8265_v38 = vcombine.low %v2608_v25, %v2640_v27 }
 0x3cc   : > { %v8202_v40 = vcombine.high %v2544_v35, %v2576_v36 }
 0x3ce   : > { %6956 = vmatpush1.bf16.msra.mxu0 %v8067_v45  ;;  %6997 = vmatpush1.bf16.msra.mxu1 %v8069_v48  ;;  %v2480_v45 = vld [vmem:[%s11386_s4 + $0x2f8] sm:$0xff] }
 0x3cf   : > { %7023 = vmatprep.subr.bf16.mxu0 %v8520_v7  ;;  %7064 = vmatprep.subr.bf16.mxu1 %v8522_v29  ;;  %v2512_v48 = vld [vmem:[%s11386_s4 + $0x3f8] sm:$0xff]  ;;  %v8199_v7 = vcombine.low %v2543_v33, %v2575_v34  ;;  %v8201_v29 = vcombine.low %v2544_v35, %v2576_v36 }
 0x3d0   : > { %v8138_v51 = vcombine.high %v2480_v45, %v2512_v48  ;;  %v8137_v62 = vcombine.low %v2480_v45, %v2512_v48 }
 0x3d1   : > { %v11191_v5 = vpop.f32.mrf.mxu0  ;;  %v11193_v6 = vpop.f32.mrf.mxu1  ;;  %6974 = vmatmul.mubr.bf16.vlgmr.msra.gmra.mxu0 %v9591_v8  ;;  %7015 = vmatmul.mubr.bf16.vlgmr.msra.gmra.mxu1 %v9591_v8 }
 0x3d2   : > { %7024 = vmatpush1.bf16.msra.mxu0 %v8519_v55  ;;  %7065 = vmatpush1.bf16.msra.mxu1 %v8521_v56  ;;  %v2416_v55 = vld [vmem:[%s11386_s4 + $0xf8] sm:$0xff] }
 0x3d3   : > { %v11197_v15 = vpop.f32.mrf.mxu0  ;;  %v11199_v10 = vpop.f32.mrf.mxu1  ;;  %7025 = vmatprep.subr.bf16.mxu0 %v8456_v59  ;;  %7066 = vmatprep.subr.bf16.mxu1 %v8458_v60  ;;  %v2448_v56 = vld [vmem:[%s11386_s4 + $0x1f8] sm:$0xff]  ;;  %v2901_v59 = vld [vmem:[%s11387_s5 + $0x20] sm:$0xff]  ;;  %v8135_v60 = vcombine.low %v2479_v41, %v2511_v43 }
 0x3d4   : > { %7055 = vmatprep.mubr.bf16.mxu0 %v9076_v42  ;;  %7096 = vmatprep.mubr.bf16.mxu1 %v9076_v42  ;;  %v2639_v42 = vld [vmem:[%s11386_s4 + $0x7f0] sm:$0xff]  ;;  %v8074_v0 = vcombine.high %v2416_v55, %v2448_v56  ;;  %v3044_v4 = vrot.slane %v2901_v59, %v9504_v1  ;;  %v8073_v14 = vcombine.low %v2416_v55, %v2448_v56 }
 0x3d5   : > { %v6487_v18 = vpop.f32.mrf.mxu0  ;;  %v6528_v19 = vpop.f32.mrf.mxu1  ;;  %v8264_v13 = vcombine.high %v2607_v24, %v2639_v42  ;;  %v8263_v37 = vcombine.low %v2607_v24, %v2639_v42 }
 0x3d6   : > { %7026 = vmatpush1.bf16.msra.mxu0 %v8455_v9  ;;  %7067 = vmatpush1.bf16.msra.mxu1 %v8457_v46  ;;  %v3052_v9 = vrot.slane %v2901_v59, %v10286_v28  ;;  %v3048_v46 = vrot.slane %v2901_v59, %v9507_v2  ;;  %v6484_v58 = vadd.f32 %v11191_v5, %v3044_v4 }
 0x3d7   : > { %v6488_v53 = vpop.f32.mrf.mxu0  ;;  %v6529_v22 = vpop.f32.mrf.mxu1  ;;  %7027 = vmatprep.subr.bf16.mxu0 %v8392_v47  ;;  %7068 = vmatprep.subr.bf16.mxu1 %v8394_v49  ;;  %v3056_v47 = vrot.slane %v2901_v59, %v10269_v30  ;;  %v8071_v49 = vcombine.low %v2415_v26, %v2447_v52  ;;  %v3060_v19 = vrot.slane %v2901_v59, %v10307_v61  ;;  %v2902_v52 = vld [vmem:[%s11387_s5 + $0x28] sm:$0xff] }
 0x3d8   : > { %v6525_v44 = vadd.f32 %v11193_v6, %v3052_v9  ;;  %v6486_v17 = vadd.f32 %v11197_v15, %v3048_v46  ;;  %v3064_v22 = vrot.slane %v2901_v59, %v10320_v11  ;;  %v3076_v55 = vrot.slane %v2902_v52, %v9504_v1 }
 0x3d9   : > { %v6527_v18 = vadd.f32 %v11199_v10, %v3056_v47  ;;  %v3084_v56 = vrot.slane %v2902_v52, %v10286_v28  ;;  %v3092_v9 = vrot.slane %v2902_v52, %v10307_v61  ;;  %v3100_v46 = vrot.slane %v2902_v52, %v10312_v3 }
 0x3da   : > { %7028 = vmatpush1.bf16.msra.mxu0 %v8391_v20  ;;  %7069 = vmatpush1.bf16.msra.mxu1 %v8393_v21  ;;  %v3068_v20 = vrot.slane %v2901_v59, %v10312_v3  ;;  %v8539_v21 = vpack.c.bf16 %v6486_v17, %v6484_v58  ;;  %v3104_v58 = vrot.slane %v2902_v52, %v10323_v12 }
 0x3db   : > { %7029 = vmatprep.subr.bf16.mxu0 %v8328_v23  ;;  %7070 = vmatprep.subr.bf16.mxu1 %v8330_v54  ;;  %v8540_v53 = vpack.c.bf16 %v6527_v18, %v6525_v44  ;;  %v3072_v23 = vrot.slane %v2901_v59, %v10323_v12  ;;  %v3080_v59 = vrot.slane %v2902_v52, %v9507_v2 }
 0x3dc   : > { %v7439_v42 = vrot.slane %v8539_v21, %v9200_v50 }
 0x3dd   : > { %v7446_v25 = vrot.slane %v8540_v53, %v9200_v50 }
 0x3de   : > { %7030 = vmatpush1.bf16.msra.mxu0 %v8327_v31  ;;  %7071 = vmatpush1.bf16.msra.mxu1 %v8329_v57 }
 0x3df   : > { %7031 = vmatprep.subr.bf16.mxu0 %v8264_v13  ;;  %7072 = vmatprep.subr.bf16.mxu1 %v8266_v16  ;;  %v7461_v36 = vcombine.low %v7439_v42, %v7446_v25 }
 0x3e2   : > { %7032 = vmatpush1.bf16.msra.mxu0 %v8263_v37  ;;  %7073 = vmatpush1.bf16.msra.mxu1 %v8265_v38 }
 0x3e3   : > { %7033 = vmatprep.subr.bf16.mxu0 %v8200_v39  ;;  %7074 = vmatprep.subr.bf16.mxu1 %v8202_v40  ;;  %v7469_v39 = vrot.slane %v7461_v36, %v9200_v50 }
 0x3e6   : > { %7034 = vmatpush1.bf16.msra.mxu0 %v8199_v7  ;;  %7075 = vmatpush1.bf16.msra.mxu1 %v8201_v29 }
 0x3e7   : > { %7035 = vmatprep.subr.bf16.mxu0 %v8136_v32  ;;  %7076 = vmatprep.subr.bf16.mxu1 %v8138_v51 }
 0x3ea   : > { %7036 = vmatpush1.bf16.msra.mxu0 %v8135_v60  ;;  %7077 = vmatpush1.bf16.msra.mxu1 %v8137_v62  ;;  %v3088_v60 = vrot.slane %v2902_v52, %v10269_v30 }
 0x3eb   : > { %7037 = vmatprep.subr.bf16.mxu0 %v8072_v63  ;;  %7078 = vmatprep.subr.bf16.mxu1 %v8074_v0 }
 0x3ee   : > { %7038 = vmatpush1.bf16.msra.mxu0 %v8071_v49  ;;  %7079 = vmatpush1.bf16.msra.mxu1 %v8073_v14  ;;  %v3096_v14 = vrot.slane %v2902_v52, %v10320_v11 }
 0x3f1   : > { %v6565_v54 = vpop.f32.mrf.mxu0  ;;  %v6606_v5 = vpop.f32.mrf.mxu1  ;;  %7056 = vmatmul.mubr.bf16.vlgmr.msra.gmra.mxu0 %v9591_v8  ;;  %7097 = vmatmul.mubr.bf16.vlgmr.msra.gmra.mxu1 %v9591_v8 }
 0x3f2   : > { %v6566_v6 = vadd.f32 %v6565_v54, %v3060_v19  ;;  %v6607_v15 = vadd.f32 %v6606_v5, %v3068_v20 }
 0x3f3   : > { %v6567_v10 = vpop.f32.mrf.mxu0  ;;  %v6608_v24 = vpop.f32.mrf.mxu1 }
 0x3f4   : > { %v6568_v27 = vadd.f32 %v6567_v10, %v3064_v22  ;;  %v6609_v31 = vadd.f32 %v6608_v24, %v3072_v23 }
 0x3f5   : > { %v6569_v57 = vpop.f32.mrf.mxu0  ;;  %v6610_v13 = vpop.f32.mrf.mxu1 }
 0x3f6   : > { %v8541_v16 = vpack.c.bf16 %v6568_v27, %v6566_v6  ;;  %v8542_v33 = vpack.c.bf16 %v6609_v31, %v6607_v15 }
 0x3f7   : > { %v6570_v34 = vpop.f32.mrf.mxu0  ;;  %v6611_v35 = vpop.f32.mrf.mxu1 }
 0x3f8   : > { %v7453_v37 = vrot.slane %v8541_v16, %v9200_v50  ;;  %v7460_v8 = vrot.slane %v8542_v33, %v9200_v50 }
 0x3fa   : > { %v7462_v38 = vcombine.low %v7453_v37, %v7460_v8 }
 0x3fc   : > { %v7476_v40 = vrot.slane %v7462_v38, %v9200_v50 }
 0x3fe   : > { %v7477_v41 = vcombine.low %v7469_v39, %v7476_v40 }
 0x400   : > { %7637 = vst [vmem:[%s11391_s9 + $0x20] sm:$0xff] %v7477_v41  ;;  %v2903_v41 = vld [vmem:[%s11387_s5 + $0x30] sm:$0xff] }
 0x401   : > { %v3124_v52 = vrot.slane %v2903_v41, %v10307_v61 }
 0x411   : > { %v6647_v43 = vpop.f32.mrf.mxu0  ;;  %v6688_v45 = vpop.f32.mrf.mxu1 }
 0x412   : > { %v6648_v62 = vadd.f32 %v6647_v43, %v3076_v55  ;;  %v6689_v63 = vadd.f32 %v6688_v45, %v3084_v56  ;;  %v3108_v43 = vrot.slane %v2903_v41, %v9504_v1  ;;  %v3116_v45 = vrot.slane %v2903_v41, %v10286_v28 }
 0x413   : > { %v6649_v48 = vpop.f32.mrf.mxu0  ;;  %v6690_v7 = vpop.f32.mrf.mxu1  ;;  %v3132_v55 = vrot.slane %v2903_v41, %v10312_v3 }
 0x414   : > { %v6650_v0 = vadd.f32 %v6649_v48, %v3080_v59  ;;  %v6691_v4 = vadd.f32 %v6690_v7, %v3088_v60  ;;  %v3112_v48 = vrot.slane %v2903_v41, %v9507_v2  ;;  %v3120_v7 = vrot.slane %v2903_v41, %v10269_v30 }
 0x415   : > { %v6651_v29 = vpop.f32.mrf.mxu0  ;;  %v6692_v32 = vpop.f32.mrf.mxu1  ;;  %v3128_v60 = vrot.slane %v2903_v41, %v10320_v11 }
 0x416   : > { %v8543_v47 = vpack.c.bf16 %v6650_v0, %v6648_v62  ;;  %v8544_v49 = vpack.c.bf16 %v6691_v4, %v6689_v63  ;;  %v3136_v62 = vrot.slane %v2903_v41, %v10323_v12 }
 0x417   : > { %v6652_v51 = vpop.f32.mrf.mxu0  ;;  %v6693_v26 = vpop.f32.mrf.mxu1 }
 0x418   : > { %v7488_v53 = vrot.slane %v8543_v47, %v9200_v50  ;;  %v7495_v22 = vrot.slane %v8544_v49, %v9200_v50 }
 0x41a   : > { %v7510_v25 = vcombine.low %v7488_v53, %v7495_v22 }
 0x41c   : > { %v7518_v13 = vrot.slane %v7510_v25, %v9200_v50 }
 0x431   : > { %v6729_v44 = vpop.f32.mrf.mxu0  ;;  %v6770_v17 = vpop.f32.mrf.mxu1 }
 0x432   : > { %v6730_v18 = vadd.f32 %v6729_v44, %v3092_v9  ;;  %v6771_v19 = vadd.f32 %v6770_v17, %v3100_v46 }
 0x433   : > { %v6731_v20 = vpop.f32.mrf.mxu0  ;;  %v6772_v21 = vpop.f32.mrf.mxu1 }
 0x434   : > { %v6732_v23 = vadd.f32 %v6731_v20, %v3096_v14  ;;  %v6773_v54 = vadd.f32 %v6772_v21, %v3104_v58 }
 0x435   : > { %v6733_v5 = vpop.f32.mrf.mxu0  ;;  %v6774_v6 = vpop.f32.mrf.mxu1 }
 0x436   : > { %v8545_v15 = vpack.c.bf16 %v6732_v23, %v6730_v18  ;;  %v8546_v10 = vpack.c.bf16 %v6773_v54, %v6771_v19 }
 0x437   : > { %v6734_v24 = vpop.f32.mrf.mxu0  ;;  %v6775_v42 = vpop.f32.mrf.mxu1 }
 0x438   : > { %v7502_v27 = vrot.slane %v8545_v15, %v9200_v50  ;;  %v7509_v31 = vrot.slane %v8546_v10, %v9200_v50 }
 0x43a   : > { %v7511_v57 = vcombine.low %v7502_v27, %v7509_v31 }
 0x43c   : > { %v7525_v16 = vrot.slane %v7511_v57, %v9200_v50 }
 0x43e   : > { %v7526_v33 = vcombine.low %v7518_v13, %v7525_v16 }
 0x440   : > { %7638 = vst [vmem:[%s11391_s9 + $0x28] sm:$0xff] %v7526_v33  ;;  %v2904_v33 = vld [vmem:[%s11387_s5 + $0x38] sm:$0xff] }
 0x451   : > { %v6811_v34 = vpop.f32.mrf.mxu0  ;;  %v6852_v35 = vpop.f32.mrf.mxu1 }
 0x452   : > { %v6812_v29 = vadd.f32 %v6811_v34, %v3108_v43  ;;  %v6853_v32 = vadd.f32 %v6852_v35, %v3116_v45  ;;  %v3140_v34 = vrot.slane %v2904_v33, %v9504_v1  ;;  %v3148_v35 = vrot.slane %v2904_v33, %v10286_v28 }
 0x453   : > { %v6813_v36 = vpop.f32.mrf.mxu0  ;;  %v6854_v37 = vpop.f32.mrf.mxu1  ;;  %v3156_v45 = vrot.slane %v2904_v33, %v10307_v61  ;;  %v3168_v1 = vrot.slane %v2904_v33, %v10323_v12 }
 0x454   : > { %v6814_v51 = vadd.f32 %v6813_v36, %v3112_v48  ;;  %v6855_v26 = vadd.f32 %v6854_v37, %v3120_v7  ;;  %v3144_v36 = vrot.slane %v2904_v33, %v9507_v2  ;;  %v3152_v37 = vrot.slane %v2904_v33, %v10269_v30 }
 0x455   : > { %v6815_v8 = vpop.f32.mrf.mxu0  ;;  %v6856_v38 = vpop.f32.mrf.mxu1  ;;  %v3164_v48 = vrot.slane %v2904_v33, %v10312_v3  ;;  %v3160_v7 = vrot.slane %v2904_v33, %v10320_v11 }
 0x456   : > { %v8547_v56 = vpack.c.bf16 %v6814_v51, %v6812_v29  ;;  %v8548_v59 = vpack.c.bf16 %v6855_v26, %v6853_v32 }
 0x457   : > { %v6816_v39 = vpop.f32.mrf.mxu0  ;;  %v6857_v40 = vpop.f32.mrf.mxu1 }
 0x458   : > { %v7537_v49 = vrot.slane %v8547_v56, %v9200_v50  ;;  %v7544_v14 = vrot.slane %v8548_v59, %v9200_v50 }
 0x45a   : > { %v7559_v22 = vcombine.low %v7537_v49, %v7544_v14 }
 0x45c   : > { %v7567_v6 = vrot.slane %v7559_v22, %v9200_v50 }
 0x471   : > { %v6893_v63 = vpop.f32.mrf.mxu0  ;;  %v6934_v0 = vpop.f32.mrf.mxu1 }
 0x472   : > { %v6894_v4 = vadd.f32 %v6893_v63, %v3124_v52  ;;  %v6935_v9 = vadd.f32 %v6934_v0, %v3132_v55 }
 0x473   : > { %v6895_v46 = vpop.f32.mrf.mxu0  ;;  %v6936_v47 = vpop.f32.mrf.mxu1 }
 0x474   : > { %v6896_v58 = vadd.f32 %v6895_v46, %v3128_v60  ;;  %v6937_v44 = vadd.f32 %v6936_v47, %v3136_v62 }
 0x475   : > { %v6897_v17 = vpop.f32.mrf.mxu0  ;;  %v6938_v18 = vpop.f32.mrf.mxu1 }
 0x476   : > { %v8549_v19 = vpack.c.bf16 %v6896_v58, %v6894_v4  ;;  %v8550_v20 = vpack.c.bf16 %v6937_v44, %v6935_v9 }
 0x477   : > { %v6898_v21 = vpop.f32.mrf.mxu0  ;;  %v6939_v53 = vpop.f32.mrf.mxu1 }
 0x478   : > { %v7551_v23 = vrot.slane %v8549_v19, %v9200_v50  ;;  %v7558_v54 = vrot.slane %v8550_v20, %v9200_v50 }
 0x47a   : > { %v7560_v5 = vcombine.low %v7551_v23, %v7558_v54 }
 0x47c   : > { %v7574_v15 = vrot.slane %v7560_v5, %v9200_v50 }
 0x47e   : > { %v7575_v10 = vcombine.low %v7567_v6, %v7574_v15 }
 0x480   : > { %7639 = vst [vmem:[%s11391_s9 + $0x30] sm:$0xff] %v7575_v10 }
 0x491   : > { %v6975_v24 = vpop.f32.mrf.mxu0  ;;  %v7016_v42 = vpop.f32.mrf.mxu1 }
 0x492   : > { %v6976_v8 = vadd.f32 %v6975_v24, %v3140_v34  ;;  %v7017_v38 = vadd.f32 %v7016_v42, %v3148_v35 }
 0x493   : > { %v6977_v25 = vpop.f32.mrf.mxu0  ;;  %v7018_v27 = vpop.f32.mrf.mxu1 }
 0x494   : > { %v6978_v39 = vadd.f32 %v6977_v25, %v3144_v36  ;;  %v7019_v40 = vadd.f32 %v7018_v27, %v3152_v37 }
 0x495   : > { %v6979_v31 = vpop.f32.mrf.mxu0  ;;  %v7020_v57 = vpop.f32.mrf.mxu1 }
 0x496   : > { %v8551_v41 = vpack.c.bf16 %v6978_v39, %v6976_v8  ;;  %v8552_v43 = vpack.c.bf16 %v7019_v40, %v7017_v38 }
 0x497   : > { %v6980_v13 = vpop.f32.mrf.mxu0  ;;  %v7021_v16 = vpop.f32.mrf.mxu1 }
 0x498   : > { %v7586_v2 = vrot.slane %v8551_v41, %v9200_v50  ;;  %v7593_v30 = vrot.slane %v8552_v43, %v9200_v50 }
 0x49a   : > { %v7608_v63 = vcombine.low %v7586_v2, %v7593_v30 }
 0x49c   : > { %v7616_v9 = vrot.slane %v7608_v63, %v9200_v50 }
 0x4b1   : > { %v7057_v29 = vpop.f32.mrf.mxu0  ;;  %v7098_v28 = vpop.f32.mrf.mxu1 }
 0x4b2   : > { %v7058_v26 = vadd.f32 %v7057_v29, %v3156_v45  ;;  %v7099_v52 = vadd.f32 %v7098_v28, %v3164_v48 }
 0x4b3   : > { %v7059_v32 = vpop.f32.mrf.mxu0  ;;  %v7100_v51 = vpop.f32.mrf.mxu1 }
 0x4b4   : > { %v7060_v55 = vadd.f32 %v7059_v32, %v3160_v7  ;;  %v7101_v56 = vadd.f32 %v7100_v51, %v3168_v1 }
 0x4b5   : > { %v7061_v59 = vpop.f32.mrf.mxu0  ;;  %v7102_v61 = vpop.f32.mrf.mxu1 }
 0x4b6   : > { %v8553_v60 = vpack.c.bf16 %v7060_v55, %v7058_v26  ;;  %v8554_v3 = vpack.c.bf16 %v7101_v56, %v7099_v52 }
 0x4b7   : > { %v7062_v62 = vpop.f32.mrf.mxu0  ;;  %v7103_v11 = vpop.f32.mrf.mxu1 }
 0x4b8   : > { %v7600_v12 = vrot.slane %v8553_v60, %v9200_v50  ;;  %v7607_v0 = vrot.slane %v8554_v3, %v9200_v50 }
 0x4ba   : > { %v7609_v4 = vcombine.low %v7600_v12, %v7607_v0 }
 0x4bc   : > { %v7623_v46 = vrot.slane %v7609_v4, %v9200_v50 }
 0x4be   : > { %v7624_v47 = vcombine.low %v7616_v9, %v7623_v46 }
 0x4c0   : > { %7640 = vst [vmem:[%s11391_s9 + $0x38] sm:$0xff] %v7624_v47 }
 0x4c1 PF: > { %p8576_p7 = scmp.eq.s32.totalorder %s9136_s10, 3  ;;  %s9077_s16 = smov [#allocation5]  }
 0x4c2   : > { %s7659_s17 = sshll.u32 %s9077_s16, 4  ;;  %s9078_s18 = smov [#allocation3]   ;;  %s7660_s17 = int_to_ptr.vmem [resolvable:$true] %s7659_s17 }
 0x4c3   : > { %s7648_s19 = sshll.u32 %s9078_s18, 4  ;;  %s8985_s20 = scalar_lea.vmem %s7660_s17, 32  ;;  %s7649_s19 = int_to_ptr.vmem [resolvable:$true] %s7648_s19 }
 0x4c4   : > { %p8986_p8 = scmp.ne.s32.totalorder %s7660_s17, %s8985_s20  ;;  %p8992_p11 = scmp.lt.s32.totalorder %s7660_s17, %s7660_s17 }
 0x4c5   : > { %p8993_p12 = scmp.lt.s32.totalorder %s8985_s20, %s8985_s20 }
 0x4c6   : > { %p8987_p9 = pnand %p8986_p8, %p8576_p7 }
 0x4c7   : > { %p8994_p13 = por %p8993_p12, %p8992_p11 }
 0x4c8   : > { %p8988_p10 = pneg %p8987_p9 }
 0x4ca   : > { %p8995_p0 = pnand %p8994_p13, %p8988_p10 }
 0x4cc   : > { %8998 = shalt.err (!%p8995_p0)
}
 0x4cd   : > { %8567 = dma.vmem_to_hbm [thread:$0]  (%p8576_p7), %s7660_s17, 32, %s11389_s7, [#allocation6]  }
 0x4ce   : > { %s9009_s23 = scalar_lea.vmem %s7649_s19, 32  ;;  %p9016_p4 = scmp.lt.s32.totalorder %s7649_s19, %s7649_s19 }
 0x4cf   : > { %p9010_p1 = scmp.ne.s32.totalorder %s7649_s19, %s9009_s23  ;;  %p9017_p5 = scmp.lt.s32.totalorder %s9009_s23, %s9009_s23 }
 0x4d1   : > { %p9011_p2 = pnand %p9010_p1, %p8576_p7  ;;  %p9018_p6 = por %p9017_p5, %p9016_p4 }
 0x4d3   : > { %p9012_p3 = pneg %p9011_p2 }
 0x4d5   : > { %p9019_p8 = pnand %p9018_p6, %p9012_p3 }
 0x4d7   : > { %9022 = shalt.err (!%p9019_p8)
}
 0x4d8   : > { %8565 = dma.vmem_to_hbm [thread:$0]  (%p8576_p7), %s7649_s19, 32, %s11388_s6, [#allocation4]  }
 0x4d9   : > { %s9079_s26 = smov [#allocation7]  }
 0x4da   : > { %s7670_s27 = sshll.u32 %s9079_s26, 4  ;;  %s7671_s27 = int_to_ptr.vmem [resolvable:$true] %s7670_s27 }
 0x4db   : > { %s9033_s28 = scalar_lea.vmem %s7671_s27, 32  ;;  %p9040_p12 = scmp.lt.s32.totalorder %s7671_s27, %s7671_s27 }
 0x4dc   : > { %p9034_p9 = scmp.ne.s32.totalorder %s7671_s27, %s9033_s28  ;;  %p9041_p13 = scmp.lt.s32.totalorder %s9033_s28, %s9033_s28 }
 0x4de   : > { %p9035_p10 = pnand %p9034_p9, %p8576_p7  ;;  %p9042_p0 = por %p9041_p13, %p9040_p12 }
 0x4e0   : > { %p9036_p11 = pneg %p9035_p10 }
 0x4e2   : > { %p9043_p1 = pnand %p9042_p0, %p9036_p11 }
 0x4e4   : > { %9046 = shalt.err (!%p9043_p1)
}
 0x4e5   : > { %8569 = dma.vmem_to_hbm [thread:$0]  (%p8576_p7), %s7671_s27, 32, %s11390_s8, [#allocation6]  }
 0x4e6   : > { %9062 = dma.done.wait (%p8576_p7), [#allocation4], 32  }
 0x4e7   : > { %9064 = vsyncadd (%p8576_p7), [#allocation4], 4294967264 }
 0x4e8   : > { %9066 = dma.done.wait (%p8576_p7), [#allocation6], 64  }
 0x4e9   : > { %9068 = vsyncadd (%p8576_p7), [#allocation6], 4294967232 }
 0x4ea PF: > { %s22_s30 = sadd.s32 1, %s9071_s30  }
 0x4eb   : > { %p19_p2 = scmp.ge.s32.totalorder %s22_s30, 6  }
 0x4ed   :  { %21 = sbr.rel (!%p19_p2) target bundleno = 2 (0x2), region = 106 }
 0x4f2   :  { %7697 = vsyncpa [#allocation4], 1 }
 0x4f3   :  { %7699 = vsyncpa [#allocation4 + $0x1], 1 }
 0x4f4   :  { %7700 = vsyncpa [#allocation6], 1 }

// kernel: vae_forward.12
= control target key start
LH: loop header
LB: loop body
LE: loop exit
PB: predicated region body
PF: predicated region fallthrough
CT: control target
= control target key end

     0   :  { %s2537_s12 = smov 0   ;;  %s3047_s0 = inlined_call_operand.vmem [shape: bf16[512,576], index: 0, kind: input, shape index: {}]   ;;  %s3048_s1 = inlined_call_operand.vmem [shape: bf16[576,128], index: 1, kind: input, shape index: {}]   ;;  %s3049_s2 = inlined_call_operand.vmem [shape: f32[1,128], index: 2, kind: input, shape index: {}]   ;;  %s3050_s3 = inlined_call_operand.vmem [shape: bf16[512,128], index: 3, kind: output, shape index: {}]  }
   0x1 LB: > { %s1749_s13 = sadd.s32 4294967295, %s2515_s12   ;;  %p1753_p0 = scmp.ge.s32.totalorder %s2515_s12, 1  ;;  %s2515_s12 = sphi %s2537_s12, %s13_s12  }
   0x2   : > { %p139_p1 = scmp.lt.s32.totalorder %s2515_s12, 3 }
   0x4   : > { %p140_p2 = pnand %p1753_p0, %p139_p1 }
   0x6   : > { %143 = sbr.rel (%p140_p2) target bundleno = 406 (0x196), region = 32 }
   0xb   : > { %v2361_v0 = vld [vmem:[%s3048_s1 + $0x78] sm:$0xff]   ;;  %s1754_s16 = sshll.u32 %s1749_s13, 5  ;;  %v2363_v2 = vld [vmem:[%s3048_s1 + $0x70] sm:$0xff]   ;;  %v2365_v4 = vld [vmem:[%s3048_s1 + $0x68] sm:$0xff]   ;;  %vm969_vm0 = vcmask 523264  }
   0xc   : > { %v2362_v1 = vld [vmem:[%s3048_s1 + $0x38] sm:$0xff]   ;;  %2052 = vmatprep.subr.bf16.mxu0 %v2361_v0  ;;  %2336 = vmatprep.subr.bf16.mxu1 %v2361_v0  ;;  %p165_p3 = scmp.lt.s32.totalorder %s1754_s16, 63  ;;  %v2364_v3 = vld [vmem:[%s3048_s1 + $0x30] sm:$0xff]   ;;  %v2366_v5 = vld [vmem:[%s3048_s1 + $0x28] sm:$0xff]  }
   0xd   : > { %2053 = vmatpush3.bf16.msra.mxu0 %v2362_v1  ;;  %2344 = vmatpush3.bf16.msra.mxu1 %v2362_v1  ;;  %v2367_v6 = vld [vmem:[%s3048_s1 + $0x60] sm:$0xff]   ;;  %v2369_v8 = vld [vmem:[%s3048_s1 + $0x58] sm:$0xff]   ;;  %v2371_v10 = vld [vmem:[%s3048_s1 + $0x50] sm:$0xff]  }
   0xe   : > { %2054 = vmatprep.subr.bf16.mxu0 %v2363_v2  ;;  %2337 = vmatprep.subr.bf16.mxu1 %v2363_v2  ;;  %s3096_s16 = smov (!%p165_p3, %s1754_s16), 63  ;;  %v2368_v7 = vld [vmem:[%s3048_s1 + $0x20] sm:$0xff]   ;;  %v2370_v9 = vld [vmem:[%s3048_s1 + $0x18] sm:$0xff]   ;;  %v2372_v13 = vld [vmem:[%s3048_s1 + $0x10] sm:$0xff]  }
   0xf   : > { %s2352_s29 = smul.u32 20, %s3096_s16  ;;  %v2373_v14 = vld [vmem:[%s3048_s1 + $0x48] sm:$0xff]   ;;  %v2375_v16 = vld [vmem:[%s3048_s1 + $0x40] sm:$0xff]   ;;  %v2383_v18 = vld [vmem:[%s3048_s1 + $0xf8] sm:$0xff]   ;;  %s1757_s19 = sshll.u32 %s3096_s16, 2 }
  0x10   : > { %v2374_v15 = vld [vmem:[%s3048_s1 + $0x8] sm:$0xff]   ;;  %v2376_v17 = vld [vmem:[%s3048_s1] sm:$0xff]   ;;  %v2386_v19 = vld [vmem:[%s3048_s1 + $0x118] sm:$0xff]   ;;  %s2922_s21 = scalar_lea.vmem %s3050_s3, %s1757_s19 }
  0x11   : > { %2055 = vmatpush3.bf16.msra.mxu0 %v2364_v3  ;;  %2345 = vmatpush3.bf16.msra.mxu1 %v2364_v3  ;;  %s2578_s9 = scalar_lea.vmem %s3047_s0, %s2352_s29  ;;  %v2384_v22 = vld [vmem:[%s3048_s1 + $0xb8] sm:$0xff]   ;;  %v2385_v23 = vld [vmem:[%s3048_s1 + $0xf0] sm:$0xff]   ;;  %v2394_v28 = vld [vmem:[%s3048_s1 + $0xe8] sm:$0xff]  }
  0x12   : > { %2056 = vmatprep.subr.bf16.mxu0 %v2365_v4  ;;  %2338 = vmatprep.subr.bf16.mxu1 %v2365_v4  ;;  %v2379_v11 = vld [vmem:[%s2578_s9 + $0x4] ss:$20 sps:$4 sm:$0xff]   ;;  %v2377_v20 = vld [vmem:[%s2578_s9] ss:$20 sps:$4 sm:$0xff]   ;;  %v2392_v27 = vld [vmem:[%s2578_s9 + $0x28] ss:$20 sps:$4 sm:$0xff]  }
  0x13   : > { %v2382_v12 = vld [vmem:[%s2578_s9 + $0x1e4] ss:$20 sps:$4 sm:$0xff]   ;;  %1050 = vmatprep.mubr.bf16.mxu0 %v2379_v11  ;;  %v2380_v21 = vld [vmem:[%s2578_s9 + $0x1e0] ss:$20 sps:$4 sm:$0xff]   ;;  %v2393_v29 = vld [vmem:[%s2578_s9 + $0x208] ss:$20 sps:$4 sm:$0xff]  }
  0x14   : > { %1146 = vmatprep.mubr.bf16.mxu1 %v2382_v12  ;;  %v2388_v24 = vld [vmem:[%s2578_s9 + $0x2c] ss:$20 sps:$4 sm:$0xff]   ;;  %v2387_v26 = vld [vmem:[%s3048_s1 + $0xb0] sm:$0xff]   ;;  %v2404_v37 = vld [vmem:[%s3048_s1 + $0xd8] sm:$0xff]  }
  0x15   : > { %2057 = vmatpush3.bf16.msra.mxu0 %v2366_v5  ;;  %2346 = vmatpush3.bf16.msra.mxu1 %v2366_v5  ;;  %v2390_v25 = vld [vmem:[%s2578_s9 + $0x20c] ss:$20 sps:$4 sm:$0xff]   ;;  %v2398_v32 = vld [vmem:[%s2578_s9 + $0x54] ss:$20 sps:$4 sm:$0xff]   ;;  %v2402_v36 = vld [vmem:[%s2578_s9 + $0x50] ss:$20 sps:$4 sm:$0xff]  }
  0x16   : > { %2058 = vmatprep.subr.bf16.mxu0 %v2367_v6  ;;  %2339 = vmatprep.subr.bf16.mxu1 %v2367_v6  ;;  %v2395_v30 = vld [vmem:[%s3048_s1 + $0xa8] sm:$0xff]   ;;  %v2396_v31 = vld [vmem:[%s3048_s1 + $0xe0] sm:$0xff]   ;;  %v2417_v35 = vld [vmem:[%s3048_s1 + $0x110] sm:$0xff]  }
  0x17   : > { %v2400_v33 = vld [vmem:[%s2578_s9 + $0x234] ss:$20 sps:$4 sm:$0xff]   ;;  %v2397_v34 = vld [vmem:[%s3048_s1 + $0xa0] sm:$0xff]   ;;  %v2405_v39 = vld [vmem:[%s3048_s1 + $0x98] sm:$0xff]  }
  0x18   : > { %v2403_v38 = vld [vmem:[%s2578_s9 + $0x230] ss:$20 sps:$4 sm:$0xff]   ;;  %v2412_v44 = vld [vmem:[%s2578_s9 + $0x78] ss:$20 sps:$4 sm:$0xff]   ;;  %v2421_v53 = vld [vmem:[%s2578_s9 + $0x8] ss:$20 sps:$4 sm:$0xff]  }
  0x19   : > { %2059 = vmatpush3.bf16.msra.mxu0 %v2368_v7  ;;  %2347 = vmatpush3.bf16.msra.mxu1 %v2368_v7  ;;  %v2406_v40 = vld [vmem:[%s3048_s1 + $0xd0] sm:$0xff]   ;;  %v2413_v45 = vld [vmem:[%s2578_s9 + $0x258] ss:$20 sps:$4 sm:$0xff]   ;;  %v2416_v49 = vld [vmem:[%s3048_s1 + $0xc0] sm:$0xff]  }
  0x1a   : > { %2060 = vmatprep.subr.bf16.mxu0 %v2369_v8  ;;  %2340 = vmatprep.subr.bf16.mxu1 %v2369_v8  ;;  %v2408_v41 = vld [vmem:[%s2578_s9 + $0x7c] ss:$20 sps:$4 sm:$0xff]   ;;  %v2414_v46 = vld [vmem:[%s3048_s1 + $0xc8] sm:$0xff]   ;;  %v2419_v50 = vld [vmem:[%s2578_s9 + $0xa4] ss:$20 sps:$4 sm:$0xff]  }
  0x1b   : > { %v2410_v42 = vld [vmem:[%s2578_s9 + $0x25c] ss:$20 sps:$4 sm:$0xff]   ;;  %v2437_v47 = vld [vmem:[%s3048_s1 + $0x108] sm:$0xff]   ;;  %v2418_v52 = vld [vmem:[%s3048_s1 + $0x80] sm:$0xff]  }
  0x1c   : > { %v2407_v43 = vld [vmem:[%s3048_s1 + $0x90] sm:$0xff]   ;;  %v2415_v48 = vld [vmem:[%s3048_s1 + $0x88] sm:$0xff]   ;;  %v2456_v56 = vld [vmem:[%s3048_s1 + $0x100] sm:$0xff]  }
  0x1d   : > { %2061 = vmatpush3.bf16.msra.mxu0 %v2370_v9  ;;  %2348 = vmatpush3.bf16.msra.mxu1 %v2370_v9  ;;  %v2423_v51 = vld [vmem:[%s2578_s9 + $0xc] ss:$20 sps:$4 sm:$0xff]   ;;  %v2427_v57 = vld [vmem:[%s2578_s9 + $0x34] ss:$20 sps:$4 sm:$0xff]   ;;  %v2430_v59 = vld [vmem:[%s2578_s9 + $0x30] ss:$20 sps:$4 sm:$0xff]  }
  0x1e   : > { %2062 = vmatprep.subr.bf16.mxu0 %v2371_v10  ;;  %2341 = vmatprep.subr.bf16.mxu1 %v2371_v10  ;;  %v2424_v54 = vld [vmem:[%s2578_s9 + $0xa0] ss:$20 sps:$4 sm:$0xff]   ;;  %v2429_v58 = vld [vmem:[%s2578_s9 + $0xc8] ss:$20 sps:$4 sm:$0xff]   ;;  %v2435_v62 = vld [vmem:[%s2578_s9 + $0xf0] ss:$20 sps:$4 sm:$0xff]  }
  0x1f   : > { %v2425_v55 = vld [vmem:[%s2578_s9 + $0xcc] ss:$20 sps:$4 sm:$0xff]   ;;  %v2431_v60 = vld [vmem:[%s2578_s9 + $0xf4] ss:$20 sps:$4 sm:$0xff]   ;;  %v2433_v61 = vld [vmem:[%s2578_s9 + $0x5c] ss:$20 sps:$4 sm:$0xff]  }
  0x20   : > { %v2436_v63 = vld [vmem:[%s2578_s9 + $0x58] ss:$20 sps:$4 sm:$0xff]   ;;  %v2438_v0 = vld [vmem:[%s2578_s9 + $0x11c] ss:$20 sps:$4 sm:$0xff]   ;;  %v2443_v3 = vld [vmem:[%s2578_s9 + $0x80] ss:$20 sps:$4 sm:$0xff]  }
  0x21   : > { %2063 = vmatpush3.bf16.msra.mxu0 %v2372_v13  ;;  %2349 = vmatpush3.bf16.msra.mxu1 %v2372_v13  ;;  %v2440_v1 = vld [vmem:[%s2578_s9 + $0x84] ss:$20 sps:$4 sm:$0xff]   ;;  %v2446_v5 = vld [vmem:[%s2578_s9 + $0xac] ss:$20 sps:$4 sm:$0xff]   ;;  %v2449_v7 = vld [vmem:[%s2578_s9 + $0xa8] ss:$20 sps:$4 sm:$0xff]  }
  0x22   : > { %2064 = vmatprep.subr.bf16.mxu0 %v2373_v14  ;;  %2342 = vmatprep.subr.bf16.mxu1 %v2373_v14  ;;  %v2442_v2 = vld [vmem:[%s2578_s9 + $0x118] ss:$20 sps:$4 sm:$0xff]   ;;  %v2448_v6 = vld [vmem:[%s2578_s9 + $0x140] ss:$20 sps:$4 sm:$0xff]   ;;  %v2454_v10 = vld [vmem:[%s2578_s9 + $0x168] ss:$20 sps:$4 sm:$0xff]  }
  0x23   : > { %v2444_v4 = vld [vmem:[%s2578_s9 + $0x144] ss:$20 sps:$4 sm:$0xff]   ;;  %v2450_v8 = vld [vmem:[%s2578_s9 + $0x16c] ss:$20 sps:$4 sm:$0xff]   ;;  %v2452_v9 = vld [vmem:[%s2578_s9 + $0xd4] ss:$20 sps:$4 sm:$0xff]  }
  0x24   : > { %v2455_v11 = vld [vmem:[%s2578_s9 + $0xd0] ss:$20 sps:$4 sm:$0xff]   ;;  %v2457_v12 = vld [vmem:[%s2578_s9 + $0x194] ss:$20 sps:$4 sm:$0xff]  }
  0x25   : > { %2065 = vmatpush3.bf16.msra.mxu0 %v2374_v15  ;;  %2350 = vmatpush3.bf16.msra.mxu1 %v2374_v15  ;;  %v2459_v13 = vld [vmem:[%s2578_s9 + $0xfc] ss:$20 sps:$4 sm:$0xff]   ;;  %v2462_v15 = vld [vmem:[%s2578_s9 + $0xf8] ss:$20 sps:$4 sm:$0xff]  }
  0x26   : > { %2066 = vmatprep.subr.bf16.mxu0 %v2375_v16  ;;  %2343 = vmatprep.subr.bf16.mxu1 %v2375_v16  ;;  %v2461_v14 = vld [vmem:[%s2578_s9 + $0x190] ss:$20 sps:$4 sm:$0xff]  }
  0x27   : > { %v2463_v16 = vld [vmem:[%s2578_s9 + $0x1bc] ss:$20 sps:$4 sm:$0xff]  }
  0x29   : > { %2067 = vmatpush3.bf16.msra.mxu0 %v2376_v17  ;;  %2351 = vmatpush3.bf16.msra.mxu1 %v2376_v17  ;;  %v2465_v17 = vld [vmem:[%s2578_s9 + $0x124] ss:$20 sps:$4 sm:$0xff]  }
  0x2a   : > { %2164 = vmatprep.subr.bf16.mxu1 %v2383_v18  ;;  %2296 = vmatprep.subr.bf16.mxu0 %v2386_v19  ;;  %v2467_v18 = vld [vmem:[%s2578_s9 + $0x1b8] ss:$20 sps:$4 sm:$0xff]  }
  0x2c   : > { %1051 = vmatmul.mubr.bf16.vlgmr.msra.gmra.mxu0 %v2377_v20  ;;  %1147 = vmatmul.mubr.bf16.vlgmr.msra.gmra.mxu1 %v2380_v21  ;;  %v2469_v20 = vld [vmem:[%s2578_s9 + $0x14c] ss:$20 sps:$4 sm:$0xff]   ;;  %v2471_v21 = vld [vmem:[%s2578_s9 + $0x10] ss:$20 sps:$4 sm:$0xff]  }
  0x2d   : > { %2165 = vmatpush3.bf16.msra.mxu1 %v2384_v22  ;;  %2297 = vmatpush3.bf16.msra.mxu0 %v2386_v19  ;;  %v2468_v19 = vld [vmem:[%s2578_s9 + $0x120] ss:$20 sps:$4 sm:$0xff]   ;;  %v2472_v22 = vld [vmem:[%s2578_s9 + $0x148] ss:$20 sps:$4 sm:$0xff]  }
  0x2e   : > { %2166 = vmatprep.subr.bf16.mxu1 %v2385_v23  ;;  %1058 = vmatprep.mubr.bf16.mxu0 %v2388_v24  ;;  %v2473_v23 = vld [vmem:[%s2578_s9 + $0x38] ss:$20 sps:$4 sm:$0xff]   ;;  %v2474_v24 = vld [vmem:[%s2578_s9 + $0x174] ss:$20 sps:$4 sm:$0xff]  }
  0x2f   : > { %1154 = vmatprep.mubr.bf16.mxu1 %v2390_v25  ;;  %2298 = vmatprep.subr.bf16.mxu0 %v2417_v35  ;;  %v2476_v25 = vld [vmem:[%s2578_s9 + $0x60] ss:$20 sps:$4 sm:$0xff]  }
  0x31   : > { %2167 = vmatpush3.bf16.msra.mxu1 %v2387_v26  ;;  %2299 = vmatpush3.bf16.msra.mxu0 %v2417_v35  ;;  %v2477_v26 = vld [vmem:[%s2578_s9 + $0x170] ss:$20 sps:$4 sm:$0xff]   ;;  %v2488_v35 = vld [vmem:[%s2578_s9 + $0x128] ss:$20 sps:$4 sm:$0xff]  }
  0x32   : > { %2168 = vmatprep.subr.bf16.mxu1 %v2394_v28  ;;  %2300 = vmatprep.subr.bf16.mxu0 %v2437_v47  ;;  %v2479_v28 = vld [vmem:[%s2578_s9 + $0x19c] ss:$20 sps:$4 sm:$0xff]  }
  0x34   : > { %1059 = vmatmul.mubr.bf16.gmra.mxu0 %v2392_v27  ;;  %1155 = vmatmul.mubr.bf16.gmra.mxu1 %v2393_v29  ;;  %v2478_v27 = vld [vmem:[%s2578_s9 + $0x88] ss:$20 sps:$4 sm:$0xff]   ;;  %v2481_v29 = vld [vmem:[%s2578_s9 + $0xb0] ss:$20 sps:$4 sm:$0xff]  }
  0x35   : > { %2169 = vmatpush3.bf16.msra.mxu1 %v2395_v30  ;;  %1066 = vmatprep.mubr.bf16.mxu0 %v2398_v32  ;;  %v2482_v30 = vld [vmem:[%s2578_s9 + $0x198] ss:$20 sps:$4 sm:$0xff]  }
  0x36   : > { %2170 = vmatprep.subr.bf16.mxu1 %v2396_v31  ;;  %1162 = vmatprep.mubr.bf16.mxu1 %v2400_v33  ;;  %v2483_v31 = vld [vmem:[%s2578_s9 + $0xd8] ss:$20 sps:$4 sm:$0xff]   ;;  %v2486_v33 = vld [vmem:[%s2578_s9 + $0x100] ss:$20 sps:$4 sm:$0xff]  }
  0x37   : > { %2301 = vmatpush3.bf16.msra.mxu0 %v2437_v47  ;;  %v2484_v32 = vld [vmem:[%s2578_s9 + $0x1c4] ss:$20 sps:$4 sm:$0xff]  }
  0x38   : > { %2302 = vmatprep.subr.bf16.mxu0 %v2456_v56  ;;  %v2503_v47 = vld [vmem:[%s2578_s9 + $0x218] ss:$20 sps:$4 sm:$0xff]  }
  0x39   : > { %2171 = vmatpush3.bf16.msra.mxu1 %v2397_v34  ;;  %v2487_v34 = vld [vmem:[%s2578_s9 + $0x1c0] ss:$20 sps:$4 sm:$0xff]  }
  0x3a   : > { %2172 = vmatprep.subr.bf16.mxu1 %v2404_v37  ;;  %v2491_v37 = vld [vmem:[%s2578_s9 + $0x150] ss:$20 sps:$4 sm:$0xff]  }
  0x3b   : > { %2303 = vmatpush3.bf16.msra.mxu0 %v2456_v56 }
  0x3c   : > { %1067 = vmatmul.mubr.bf16.gmra.mxu0 %v2402_v36  ;;  %1163 = vmatmul.mubr.bf16.gmra.mxu1 %v2403_v38  ;;  %v2489_v36 = vld [vmem:[%s2578_s9 + $0x1ec] ss:$20 sps:$4 sm:$0xff]   ;;  %v2492_v38 = vld [vmem:[%s2578_s9 + $0x1e8] ss:$20 sps:$4 sm:$0xff]  }
  0x3d   : > { %2173 = vmatpush3.bf16.msra.mxu1 %v2405_v39  ;;  %1074 = vmatprep.mubr.bf16.mxu0 %v2408_v41  ;;  %v2493_v39 = vld [vmem:[%s2578_s9 + $0x178] ss:$20 sps:$4 sm:$0xff]   ;;  %v2496_v41 = vld [vmem:[%s2578_s9 + $0x1a0] ss:$20 sps:$4 sm:$0xff]  }
  0x3e   : > { %2174 = vmatprep.subr.bf16.mxu1 %v2406_v40  ;;  %1170 = vmatprep.mubr.bf16.mxu1 %v2410_v42  ;;  %v2494_v40 = vld [vmem:[%s2578_s9 + $0x214] ss:$20 sps:$4 sm:$0xff]   ;;  %v2497_v42 = vld [vmem:[%s2578_s9 + $0x210] ss:$20 sps:$4 sm:$0xff]  }
  0x41   : > { %2175 = vmatpush3.bf16.msra.mxu1 %v2407_v43  ;;  %v2498_v43 = vld [vmem:[%s2578_s9 + $0x1c8] ss:$20 sps:$4 sm:$0xff]  }
  0x42   : > { %2176 = vmatprep.subr.bf16.mxu1 %v2414_v46  ;;  %v2502_v46 = vld [vmem:[%s2578_s9 + $0x238] ss:$20 sps:$4 sm:$0xff]  }
  0x44   : > { %1075 = vmatmul.mubr.bf16.gmra.mxu0 %v2412_v44  ;;  %1171 = vmatmul.mubr.bf16.gmra.mxu1 %v2413_v45  ;;  %v2499_v44 = vld [vmem:[%s2578_s9 + $0x23c] ss:$20 sps:$4 sm:$0xff]  }
  0x45   : > { %2177 = vmatpush3.bf16.msra.mxu1 %v2415_v48  ;;  %1082 = vmatprep.mubr.bf16.mxu0 %v2419_v50  ;;  %v2501_v45 = vld [vmem:[%s2578_s9 + $0x1f0] ss:$20 sps:$4 sm:$0xff]   ;;  %v2507_v50 = vld [vmem:[%s2578_s9 + $0x260] ss:$20 sps:$4 sm:$0xff]  }
  0x46   : > { %2178 = vmatprep.subr.bf16.mxu1 %v2416_v49  ;;  %1211 = vmatprep.mubr.bf16.mxu1 %v2423_v51  ;;  %v2504_v48 = vld [vmem:[%s2578_s9 + $0x264] ss:$20 sps:$4 sm:$0xff]   ;;  %v2506_v49 = vld [vmem:[%s2578_s9 + $0x240] ss:$20 sps:$4 sm:$0xff]   ;;  %v2508_v51 = vld [vmem:[%s2578_s9 + $0x268] ss:$20 sps:$4 sm:$0xff]  }
  0x49   : > { %2179 = vmatpush3.bf16.msra.mxu1 %v2418_v52 }
  0x4c   : > { %1083 = vmatmul.mubr.bf16.gmra.mxu0 %v2424_v54  ;;  %1212 = vmatmul.mubr.bf16.vlgmr.msra.gmra.mxu1 %v2421_v53 }
  0x4d   : > { %1090 = vmatprep.mubr.bf16.mxu0 %v2425_v55  ;;  %1219 = vmatprep.mubr.bf16.mxu1 %v2427_v57 }
  0x54   : > { %1091 = vmatmul.mubr.bf16.gmra.mxu0 %v2429_v58  ;;  %1220 = vmatmul.mubr.bf16.gmra.mxu1 %v2430_v59 }
  0x55   : > { %1098 = vmatprep.mubr.bf16.mxu0 %v2431_v60  ;;  %1227 = vmatprep.mubr.bf16.mxu1 %v2433_v61 }
  0x5c   : > { %1099 = vmatmul.mubr.bf16.gmra.mxu0 %v2435_v62  ;;  %1228 = vmatmul.mubr.bf16.gmra.mxu1 %v2436_v63 }
  0x5d   : > { %1106 = vmatprep.mubr.bf16.mxu0 %v2438_v0  ;;  %1235 = vmatprep.mubr.bf16.mxu1 %v2440_v1 }
  0x64   : > { %1107 = vmatmul.mubr.bf16.gmra.mxu0 %v2442_v2  ;;  %1236 = vmatmul.mubr.bf16.gmra.mxu1 %v2443_v3 }
  0x65   : > { %1114 = vmatprep.mubr.bf16.mxu0 %v2444_v4  ;;  %1243 = vmatprep.mubr.bf16.mxu1 %v2446_v5 }
  0x6c   : > { %1115 = vmatmul.mubr.bf16.gmra.mxu0 %v2448_v6  ;;  %1244 = vmatmul.mubr.bf16.gmra.mxu1 %v2449_v7 }
  0x6d   : > { %1122 = vmatprep.mubr.bf16.mxu0 %v2450_v8  ;;  %1251 = vmatprep.mubr.bf16.mxu1 %v2452_v9 }
  0x74   : > { %1123 = vmatmul.mubr.bf16.gmra.mxu0 %v2454_v10  ;;  %1252 = vmatmul.mubr.bf16.gmra.mxu1 %v2455_v11 }
  0x75   : > { %1130 = vmatprep.mubr.bf16.mxu0 %v2457_v12  ;;  %1259 = vmatprep.mubr.bf16.mxu1 %v2459_v13 }
  0x7c   : > { %1131 = vmatmul.mubr.bf16.gmra.mxu0 %v2461_v14  ;;  %1260 = vmatmul.mubr.bf16.gmra.mxu1 %v2462_v15 }
  0x7d   : > { %1138 = vmatprep.mubr.bf16.mxu0 %v2463_v16  ;;  %1267 = vmatprep.mubr.bf16.mxu1 %v2465_v17 }
  0x84   : > { %1139 = vmatmul.mubr.bf16.gmra.mxu0 %v2467_v18  ;;  %1268 = vmatmul.mubr.bf16.gmra.mxu1 %v2468_v19 }
  0x85   : > { %1275 = vmatprep.mubr.bf16.mxu1 %v2469_v20  ;;  %2304 = vmatprep.mubr.msk.bf16.mxu0 %vm969_vm0, %v2471_v21 }
  0x8c   : > { %1276 = vmatmul.mubr.bf16.gmra.mxu1 %v2472_v22  ;;  %2305 = vmatmul.mubr.msk.bf16.vlgmr.msra.gmra.mxu0 %vm969_vm0, %v2473_v23 }
  0x8d   : > { %1283 = vmatprep.mubr.bf16.mxu1 %v2474_v24  ;;  %2308 = vmatprep.mubr.msk.bf16.mxu0 %vm969_vm0, %v2476_v25 }
  0x94   : > { %1284 = vmatmul.mubr.bf16.gmra.mxu1 %v2477_v26  ;;  %2309 = vmatmul.mubr.msk.bf16.gmra.mxu0 %vm969_vm0, %v2478_v27 }
  0x95   : > { %1291 = vmatprep.mubr.bf16.mxu1 %v2479_v28  ;;  %2312 = vmatprep.mubr.msk.bf16.mxu0 %vm969_vm0, %v2481_v29 }
  0x9c   : > { %1292 = vmatmul.mubr.bf16.gmra.mxu1 %v2482_v30  ;;  %2313 = vmatmul.mubr.msk.bf16.gmra.mxu0 %vm969_vm0, %v2483_v31 }
  0x9d   : > { %1299 = vmatprep.mubr.bf16.mxu1 %v2484_v32  ;;  %2316 = vmatprep.mubr.msk.bf16.mxu0 %vm969_vm0, %v2486_v33 }
  0xa4   : > { %1300 = vmatmul.mubr.bf16.gmra.mxu1 %v2487_v34  ;;  %2317 = vmatmul.mubr.msk.bf16.gmra.mxu0 %vm969_vm0, %v2488_v35 }
  0xa5   : > { %1307 = vmatprep.mubr.bf16.mxu1 %v2489_v36  ;;  %2320 = vmatprep.mubr.msk.bf16.mxu0 %vm969_vm0, %v2491_v37 }
  0xac   : > { %1308 = vmatmul.mubr.bf16.gmra.mxu1 %v2492_v38  ;;  %2321 = vmatmul.mubr.msk.bf16.gmra.mxu0 %vm969_vm0, %v2493_v39  ;;  %v2790_v38 = vld [vmem:[%s3049_s2] ss:$0 sm:$0xff] }
  0xad   : > { %1315 = vmatprep.mubr.bf16.mxu1 %v2494_v40  ;;  %2324 = vmatprep.mubr.msk.bf16.mxu0 %vm969_vm0, %v2496_v41 }
  0xb4   : > { %1316 = vmatmul.mubr.bf16.gmra.mxu1 %v2497_v42  ;;  %2325 = vmatmul.mubr.msk.bf16.gmra.mxu0 %vm969_vm0, %v2498_v43 }
  0xb5   : > { %1323 = vmatprep.mubr.bf16.mxu1 %v2499_v44  ;;  %2328 = vmatprep.mubr.msk.bf16.mxu0 %vm969_vm0, %v2501_v45 }
  0xbc   : > { %1324 = vmatmul.mubr.bf16.gmra.mxu1 %v2502_v46  ;;  %2329 = vmatmul.mubr.msk.bf16.gmra.mxu0 %vm969_vm0, %v2503_v47 }
  0xbd   : > { %1331 = vmatprep.mubr.bf16.mxu1 %v2504_v48  ;;  %2332 = vmatprep.mubr.msk.bf16.mxu0 %vm969_vm0, %v2506_v49 }
  0xc4   : > { %1332 = vmatmul.mubr.bf16.gmra.mxu1 %v2507_v50  ;;  %2333 = vmatmul.mubr.msk.bf16.gmra.mxu0 %vm969_vm0, %v2508_v51 }
  0xec   : > { %v2068_v52 = vpop.f32.mrf.mxu0  ;;  %v2140_v53 = vpop.f32.mrf.mxu1 }
  0xee   : > { %v2069_v54 = vpop.f32.mrf.mxu0  ;;  %v2141_v55 = vpop.f32.mrf.mxu1 }
  0xef   : > { %v2070_v56 = vadd.f32 %v2069_v54, %v2068_v52  ;;  %v2757_v57 = vadd.f32 %v2141_v55, %v2140_v53 }
  0xf0   : > { %v2071_v58 = vpop.f32.mrf.mxu0  ;;  %v2143_v59 = vpop.f32.mrf.mxu1 }
  0xf1   : > { %3051 = vst [vmem:[#allocation2_spill] sm:$0xff] %v2757_v57  ;;  %v1053_v41 = vadd.f32 %v2070_v56, %v2790_v38 }
  0xf2   : > { %v2072_v60 = vpop.f32.mrf.mxu0  ;;  %v2144_v61 = vpop.f32.mrf.mxu1 }
  0xf3   : > { %v2759_v62 = vadd.f32 %v2072_v60, %v2071_v58  ;;  %v2761_v63 = vadd.f32 %v2144_v61, %v2143_v59 }
  0xf4   : > { %v2074_v0 = vpop.f32.mrf.mxu0  ;;  %v2146_v1 = vpop.f32.mrf.mxu1 }
  0xf5   : > { %3052 = vst [vmem:[#allocation3_spill] sm:$0xff] %v2761_v63 }
  0xf6   : > { %v2075_v2 = vpop.f32.mrf.mxu0  ;;  %v2147_v3 = vpop.f32.mrf.mxu1 }
  0xf7   : > { %v2763_v4 = vadd.f32 %v2075_v2, %v2074_v0  ;;  %v2765_v5 = vadd.f32 %v2147_v3, %v2146_v1 }
  0xf8   : > { %v2077_v6 = vpop.f32.mrf.mxu0  ;;  %v2149_v7 = vpop.f32.mrf.mxu1 }
  0xf9   : > { %3053 = vst [vmem:[#allocation4_spill] sm:$0xff] %v2765_v5 }
  0xfa   : > { %v2078_v8 = vpop.f32.mrf.mxu0  ;;  %v2150_v9 = vpop.f32.mrf.mxu1 }
  0xfb   : > { %v2767_v10 = vadd.f32 %v2078_v8, %v2077_v6  ;;  %v2769_v11 = vadd.f32 %v2150_v9, %v2149_v7 }
  0xfc   : > { %v2080_v12 = vpop.f32.mrf.mxu0  ;;  %v2152_v13 = vpop.f32.mrf.mxu1 }
  0xfd   : > { %3054 = vst [vmem:[#allocation5_spill] sm:$0xff] %v2769_v11 }
  0xfe   : > { %v2081_v14 = vpop.f32.mrf.mxu0  ;;  %v2153_v15 = vpop.f32.mrf.mxu1 }
  0xff   : > { %v2771_v16 = vadd.f32 %v2081_v14, %v2080_v12  ;;  %v2773_v17 = vadd.f32 %v2153_v15, %v2152_v13 }
 0x100   : > { %v2083_v18 = vpop.f32.mrf.mxu0  ;;  %v2155_v19 = vpop.f32.mrf.mxu1 }
 0x101   : > { %3055 = vst [vmem:[#allocation6_spill] sm:$0xff] %v2773_v17 }
 0x102   : > { %v2084_v20 = vpop.f32.mrf.mxu0  ;;  %v2156_v21 = vpop.f32.mrf.mxu1 }
 0x103   : > { %v2775_v22 = vadd.f32 %v2084_v20, %v2083_v18  ;;  %v2777_v23 = vadd.f32 %v2156_v21, %v2155_v19 }
 0x104   : > { %v2086_v24 = vpop.f32.mrf.mxu0  ;;  %v2158_v25 = vpop.f32.mrf.mxu1 }
 0x105   : > { %3056 = vst [vmem:[#allocation7_spill] sm:$0xff] %v2777_v23 }
 0x106   : > { %v2087_v26 = vpop.f32.mrf.mxu0  ;;  %v2159_v27 = vpop.f32.mrf.mxu1 }
 0x107   : > { %v2779_v28 = vadd.f32 %v2087_v26, %v2086_v24  ;;  %v2781_v29 = vadd.f32 %v2159_v27, %v2158_v25 }
 0x108   : > { %v2089_v30 = vpop.f32.mrf.mxu0  ;;  %v2161_v31 = vpop.f32.mrf.mxu1 }
 0x109   : > { %3057 = vst [vmem:[#allocation8_spill] sm:$0xff] %v2781_v29 }
 0x10a   : > { %v2090_v32 = vpop.f32.mrf.mxu0  ;;  %v2162_v33 = vpop.f32.mrf.mxu1 }
 0x10b   : > { %v2783_v34 = vadd.f32 %v2090_v32, %v2089_v30  ;;  %v2785_v35 = vadd.f32 %v2162_v33, %v2161_v31 }
 0x10c   : > { %v2092_v36 = vpop.f32.mrf.mxu0  ;;  %v2180_v37 = vpop.f32.mrf.mxu1 }
 0x10d   : > { %3058 = vst [vmem:[#allocation9_spill] sm:$0xff] %v2785_v35 }
 0x10e   : > { %v2093_v39 = vpop.f32.mrf.mxu0  ;;  %v2181_v40 = vpop.f32.mrf.mxu1 }
 0x10f   : > { %v2793_v42 = vadd.f32 %v2093_v39, %v2092_v36  ;;  %v2182_v43 = vadd.f32 %v2181_v40, %v2180_v37 }
 0x110   : > { %v2095_v44 = vpop.f32.mrf.mxu0  ;;  %v2795_v45 = vpop.f32.mrf.mxu1 }
 0x111   : > { %v2797_v46 = vadd.f32 %v2182_v43, %v1053_v41 }
 0x112   : > { %v2096_v47 = vpop.f32.mrf.mxu0  ;;  %v2799_v48 = vpop.f32.mrf.mxu1 }
 0x113   : > { %v2801_v49 = vadd.f32 %v2096_v47, %v2095_v44 }
 0x114   : > { %v2098_v50 = vpop.f32.mrf.mxu0  ;;  %v2186_v51 = vpop.f32.mrf.mxu1 }
 0x116   : > { %v2099_v52 = vpop.f32.mrf.mxu0  ;;  %v2187_v53 = vpop.f32.mrf.mxu1 }
 0x117   : > { %v2803_v54 = vadd.f32 %v2099_v52, %v2098_v50  ;;  %v2188_v5 = vadd.f32 %v2187_v53, %v2186_v51 }
 0x118   : > { %v2101_v55 = vpop.f32.mrf.mxu0  ;;  %v2189_v56 = vpop.f32.mrf.mxu1 }
 0x11a   : > { %v2102_v58 = vpop.f32.mrf.mxu0  ;;  %v2190_v59 = vpop.f32.mrf.mxu1 }
 0x11b   : > { %v2805_v60 = vadd.f32 %v2102_v58, %v2101_v55 }
 0x11c   : > { %v2104_v61 = vpop.f32.mrf.mxu0  ;;  %v2807_v0 = vpop.f32.mrf.mxu1 }
 0x11e   : > { %v2105_v1 = vpop.f32.mrf.mxu0  ;;  %v2809_v2 = vpop.f32.mrf.mxu1 }
 0x11f   : > { %v2811_v3 = vadd.f32 %v2105_v1, %v2104_v61 }
 0x120   : > { %v2107_v6 = vpop.f32.mrf.mxu0  ;;  %v2813_v7 = vpop.f32.mrf.mxu1 }
 0x122   : > { %v2108_v8 = vpop.f32.mrf.mxu0  ;;  %v2815_v9 = vpop.f32.mrf.mxu1 }
 0x123   : > { %v2817_v12 = vadd.f32 %v2108_v8, %v2107_v6 }
 0x124   : > { %v2819_v13 = vpop.f32.mrf.mxu0  ;;  %v2198_v14 = vpop.f32.mrf.mxu1 }
 0x126   : > { %v2821_v15 = vpop.f32.mrf.mxu0  ;;  %v2199_v18 = vpop.f32.mrf.mxu1 }
 0x128   : > { %v2823_v19 = vpop.f32.mrf.mxu0  ;;  %v2201_v20 = vpop.f32.mrf.mxu1 }
 0x12a   : > { %v2825_v21 = vpop.f32.mrf.mxu0  ;;  %v2202_v24 = vpop.f32.mrf.mxu1 }
 0x12c   : > { %v2827_v25 = vpop.f32.mrf.mxu0  ;;  %v2829_v26 = vpop.f32.mrf.mxu1 }
 0x12e   : > { %v2831_v27 = vpop.f32.mrf.mxu0  ;;  %v2833_v30 = vpop.f32.mrf.mxu1 }
 0x12f   : > { %3059 = vst [vmem:[#allocation10_spill] sm:$0xff] %v2831_v27 }
 0x130   : > { %v2835_v31 = vpop.f32.mrf.mxu0  ;;  %v2837_v32 = vpop.f32.mrf.mxu1 }
 0x131   : > { %3060 = vst [vmem:[#allocation11_spill] sm:$0xff] %v2835_v31 }
 0x132   : > { %v2839_v33 = vpop.f32.mrf.mxu0  ;;  %v2841_v36 = vpop.f32.mrf.mxu1 }
 0x133   : > { %3061 = vst [vmem:[#allocation12_spill] sm:$0xff] %v2839_v33 }
 0x134   : > { %v2843_v37 = vpop.f32.mrf.mxu0  ;;  %v2845_v39 = vpop.f32.mrf.mxu1 }
 0x136   : > { %v2847_v40 = vpop.f32.mrf.mxu0  ;;  %v2849_v41 = vpop.f32.mrf.mxu1 }
 0x138   : > { %v2851_v43 = vpop.f32.mrf.mxu0  ;;  %v2853_v44 = vpop.f32.mrf.mxu1 }
 0x139   : > { %3062 = vst [vmem:[#allocation13_spill] sm:$0xff] %v2851_v43 }
 0x13a   : > { %v2855_v47 = vpop.f32.mrf.mxu0  ;;  %v2857_v50 = vpop.f32.mrf.mxu1 }
 0x13b   : > { %3063 = vst [vmem:[#allocation14_spill] sm:$0xff] %v2855_v47 }
 0x13c   : > { %v2859_v52 = vpop.f32.mrf.mxu0  ;;  %v2861_v55 = vpop.f32.mrf.mxu1 }
 0x13d   : > { %3064 = vst [vmem:[#allocation15_spill] sm:$0xff] %v2859_v52  ;;  %v2191_v52 = vadd.f32 %v2190_v59, %v2189_v56  ;;  %v2200_v59 = vadd.f32 %v2199_v18, %v2198_v14  ;;  %v1069_v14 = vadd.f32 %v2771_v16, %v2790_v38 }
 0x13e   : > { %v2863_v58 = vpop.f32.mrf.mxu0  ;;  %v2865_v61 = vpop.f32.mrf.mxu1 }
 0x13f   : > { %3065 = vst [vmem:[#allocation16_spill] sm:$0xff] %v2863_v58 }
 0x140   : > { %v2867_v1 = vpop.f32.mrf.mxu0  ;;  %v2869_v6 = vpop.f32.mrf.mxu1 }
 0x141   : > { %3066 = vst [vmem:[#allocation17_spill] sm:$0xff] %v2867_v1 }
 0x142   : > { %v2871_v8 = vpop.f32.mrf.mxu0  ;;  %v2873_v35 = vpop.f32.mrf.mxu1 }
 0x143   : > { %3067 = vst [vmem:[#allocation18_spill] sm:$0xff] %v2871_v8  ;;  %v1061_v8 = vadd.f32 %v2763_v4, %v2790_v38 }
 0x144   : > { %v2875_v29 = vpop.f32.mrf.mxu0  ;;  %v2877_v23 = vpop.f32.mrf.mxu1 }
 0x145   : > { %3068 = vst [vmem:[#allocation19_spill] sm:$0xff] %v2875_v29  ;;  %v1222_v31 = vadd.f32 %v2188_v5, %v1061_v8  ;;  %v1077_v5 = vadd.f32 %v2779_v28, %v2790_v38 }
 0x146   : > { %v2879_v17 = vpop.f32.mrf.mxu0  ;;  %v2881_v63 = vpop.f32.mrf.mxu1 }
 0x147   : > { %3069 = vst [vmem:[#allocation20_spill] sm:$0xff] %v2879_v17  ;;  %v1064_v17 = vadd.f32 %v2767_v10, %v2790_v38  ;;  %v1238_v16 = vadd.f32 %v2200_v59, %v1077_v5 }
 0x148   : > { %v2883_v11 = vpop.f32.mrf.mxu0  ;;  %v2885_v57 = vpop.f32.mrf.mxu1 }
 0x149   : > { %3070 = vst [vmem:[#allocation21_spill] sm:$0xff] %v2883_v11  ;;  %v2185_v11 = vadd.f32 %v2799_v48, %v2795_v45  ;;  %v1225_v4 = vadd.f32 %v2191_v52, %v1064_v17  ;;  %v2194_v45 = vadd.f32 %v2809_v2, %v2807_v0 }
 0x14a   : > { %v2887_v1 = vpop.f32.mrf.mxu0  ;;  %v2889_v58 = vpop.f32.mrf.mxu1 }
 0x14b   : > { %3071 = vst [vmem:[#allocation22_spill] sm:$0xff] %v2887_v1  ;;  %v1056_v1 = vadd.f32 %v2759_v62, %v2790_v38 }
 0x14c   : > { %v2893_v29 = vpop.f32.mrf.mxu1  ;;  %v2306_v33 = vpop.f32.mrf.mxu0 }
 0x14d   : > { %3072 = vst [vmem:[#allocation23_spill] sm:$0xff] %v2893_v29  ;;  %v1383_v47 = vadd.f32 %v2306_v33, %v1222_v31  ;;  %v1217_v27 = vadd.f32 %v2185_v11, %v1056_v1  ;;  %v2203_v31 = vadd.f32 %v2202_v24, %v2201_v20  ;;  %v2197_v11 = vadd.f32 %v2815_v9, %v2813_v7 }
 0x14e   : > { %v2899_v51 = vpop.f32.mrf.mxu1  ;;  %v1374_v53 = vpop.f32.mrf.mxu0 }
 0x14f   : > { %v1375_v29 = vadd.f32 %v1374_v53, %v2797_v46  ;;  %v1503_v17 = vmax.f32 %v1383_v47, 0.0  ;;  %v1080_v46 = vadd.f32 %v2783_v34, %v2790_v38  ;;  %v1072_v34 = vadd.f32 %v2775_v22, %v2790_v38 }
 0x150   : > { %v2903_v43 = vpop.f32.mrf.mxu1  ;;  %v2307_v56 = vpop.f32.mrf.mxu0  ;;  %v1230_v47 = vadd.f32 %v2194_v45, %v1069_v14  ;;  %v1093_v22 = vadd.f32 %v2803_v54, %v2790_v38  ;;  %v2209_v54 = vadd.f32 %v2841_v36, %v2837_v32 }
 0x151   : > { %v1386_v10 = vadd.f32 %v2307_v56, %v1225_v4  ;;  %v1501_v2 = vmax.f32 %v1375_v29, 0.0  ;;  %v1241_v1 = vadd.f32 %v2203_v31, %v1080_v46  ;;  %v2212_v29 = vadd.f32 %v2849_v41, %v2845_v39 }
 0x152   : > { %v2911_v48 = vpop.f32.mrf.mxu1  ;;  %v1377_v62 = vpop.f32.mrf.mxu0  ;;  %v1233_v59 = vadd.f32 %v2197_v11, %v1072_v34  ;;  %v1085_v41 = vadd.f32 %v2793_v42, %v2790_v38  ;;  %v1088_v46 = vadd.f32 %v2801_v49, %v2790_v38  ;;  %v2112_v42 = vadd.f32 %v2821_v15, %v2819_v13 }
 0x153   : > { %v1504_v33 = vmax.f32 %v1386_v10, 0.0  ;;  %v1378_v52 = vadd.f32 %v1377_v62, %v1217_v27  ;;  %v2206_v10 = vadd.f32 %v2833_v30, %v2829_v26  ;;  %v2215_v62 = vadd.f32 %v2857_v50, %v2853_v44 }
 0x154   : > { %v2924_v28 = vpop.f32.mrf.mxu1  ;;  %v2310_v0 = vpop.f32.mrf.mxu0  ;;  %v1254_v50 = vadd.f32 %v2212_v29, %v1093_v22  ;;  %v2224_v49 = vadd.f32 %v2881_v63, %v2877_v23  ;;  %v1249_v15 = vadd.f32 %v2209_v54, %v1088_v46  ;;  %v1101_v63 = vadd.f32 %v2811_v3, %v2790_v38 }
 0x155   : > { %v1965_v18 = vpack.c.bf16 %v1504_v33, %v1503_v17  ;;  %v1502_v20 = vmax.f32 %v1378_v52, 0.0  ;;  %v1399_v27 = vadd.f32 %v2310_v0, %v1238_v16  ;;  %v1096_v33 = vadd.f32 %v2805_v60, %v2790_v38 }
 0x156   : > { %v2928_v24 = vpop.f32.mrf.mxu1  ;;  %v1390_v7 = vpop.f32.mrf.mxu0  ;;  %v1246_v36 = vadd.f32 %v2206_v10, %v1085_v41  ;;  %v2221_v29 = vadd.f32 %v2873_v35, %v2869_v6  ;;  %v3073_v6 = vld [vmem:[#allocation10_spill] sm:$0xff] }
 0x157   : > { %2037 = vst [vmem:[%s2922_s21 + $0x8] sm:$0xff] %v1965_v18   ;;  %v1960_v9 = vpack.c.bf16 %v1502_v20, %v1501_v2  ;;  %v1391_v4 = vadd.f32 %v1390_v7, %v1230_v47  ;;  %v1507_v31 = vmax.f32 %v1399_v27, 0.0  ;;  %v1257_v2 = vadd.f32 %v2215_v62, %v1096_v33  ;;  %v3075_v41 = vld [vmem:[#allocation14_spill] sm:$0xff] }
 0x158   : > { %v2931_v8 = vpop.f32.mrf.mxu1  ;;  %v2311_v53 = vpop.f32.mrf.mxu0  ;;  %v2115_v18 = vadd.f32 %v2825_v21, %v2823_v19  ;;  %v1109_v7 = vadd.f32 %v2112_v42, %v2790_v38  ;;  %v2227_v19 = vadd.f32 %v2889_v58, %v2885_v57  ;;  %v1104_v57 = vadd.f32 %v2817_v12, %v2790_v38  ;;  %v3078_v42 = vld [vmem:[#allocation23_spill] sm:$0xff] }
 0x159   : > { %1961 = vst [vmem:[%s2922_s21] sm:$0xff] %v1960_v9   ;;  %v1402_v56 = vadd.f32 %v2311_v53, %v1241_v1  ;;  %v1505_v52 = vmax.f32 %v1391_v4, 0.0  ;;  %v2218_v9 = vadd.f32 %v2865_v61, %v2861_v55  ;;  %v2124_v58 = vadd.f32 %v2847_v40, %v2843_v37 }
 0x15a   : > { %v2940_v5 = vpop.f32.mrf.mxu1  ;;  %v1393_v45 = vpop.f32.mrf.mxu0  ;;  %v1112_v23 = vadd.f32 %v2115_v18, %v2790_v38  ;;  %v1270_v22 = vadd.f32 %v2224_v49, %v1109_v7  ;;  %v2236_v12 = vadd.f32 %v2928_v24, %v2924_v28 }
 0x15b   : > { %v1508_v17 = vmax.f32 %v1402_v56, 0.0  ;;  %v1394_v39 = vadd.f32 %v1393_v45, %v1233_v59  ;;  %v1125_v46 = vadd.f32 %v2124_v58, %v2790_v38 }
 0x15c   : > { %v2950_v26 = vpop.f32.mrf.mxu1  ;;  %v2314_v30 = vpop.f32.mrf.mxu0  ;;  %v1273_v35 = vadd.f32 %v2227_v19, %v1112_v23 }
 0x15d   : > { %v1975_v14 = vpack.c.bf16 %v1508_v17, %v1507_v31  ;;  %v1506_v44 = vmax.f32 %v1394_v39, 0.0  ;;  %v1415_v32 = vadd.f32 %v2314_v30, %v1254_v50  ;;  %v1262_v31 = vadd.f32 %v2218_v9, %v1101_v63  ;;  %v3074_v39 = vld [vmem:[#allocation13_spill] sm:$0xff]  ;;  %v3080_v9 = vld [vmem:[#allocation20_spill] sm:$0xff] }
 0x15e   : > { %v2956_v11 = vpop.f32.mrf.mxu1  ;;  %v1406_v60 = vpop.f32.mrf.mxu0  ;;  %v2118_v17 = vadd.f32 %v3073_v6, %v2827_v25  ;;  %v2127_v33 = vadd.f32 %v3075_v41, %v3074_v39  ;;  %v2230_v25 = vadd.f32 %v2899_v51, %v3078_v42  ;;  %v1286_v7 = vadd.f32 %v2236_v12, %v1125_v46 }
 0x15f   : > { %2039 = vst [vmem:[%s2922_s21 + $0x18] sm:$0xff] %v1975_v14   ;;  %v1970_v0 = vpack.c.bf16 %v1506_v44, %v1505_v52  ;;  %v1407_v34 = vadd.f32 %v1406_v60, %v1246_v36  ;;  %v1511_v21 = vmax.f32 %v1415_v32, 0.0  ;;  %v1265_v52 = vadd.f32 %v2221_v29, %v1104_v57  ;;  %v3076_v14 = vld [vmem:[#allocation11_spill] sm:$0xff]  ;;  %v3077_v44 = vld [vmem:[#allocation12_spill] sm:$0xff] }
 0x160   : > { %v2961_v20 = vpop.f32.mrf.mxu1  ;;  %v2315_v16 = vpop.f32.mrf.mxu0  ;;  %v2121_v50 = vadd.f32 %v3077_v44, %v3076_v14  ;;  %v2239_v32 = vadd.f32 %v2940_v5, %v2931_v8  ;;  %v1128_v18 = vadd.f32 %v2127_v33, %v2790_v38  ;;  %v3079_v5 = vld [vmem:[#allocation19_spill] sm:$0xff] }
 0x161   : > { %2038 = vst [vmem:[%s2922_s21 + $0x10] sm:$0xff] %v1970_v0   ;;  %v1418_v13 = vadd.f32 %v2315_v16, %v1257_v2  ;;  %v1509_v61 = vmax.f32 %v1407_v34, 0.0  ;;  %v1117_v2 = vadd.f32 %v2118_v17, %v2790_v38  ;;  %v2233_v16 = vadd.f32 %v2911_v48, %v2903_v43  ;;  %v3081_v43 = vld [vmem:[#allocation15_spill] sm:$0xff]  ;;  %v3082_v48 = vld [vmem:[#allocation16_spill] sm:$0xff] }
 0x162   : > { %v2969_v27 = vpop.f32.mrf.mxu1  ;;  %v1409_v47 = vpop.f32.mrf.mxu0  ;;  %v1120_v8 = vadd.f32 %v2121_v50, %v2790_v38  ;;  %v1289_v23 = vadd.f32 %v2239_v32, %v1128_v18  ;;  %v2130_v29 = vadd.f32 %v3082_v48, %v3081_v43  ;;  %v2242_v17 = vadd.f32 %v2956_v11, %v2950_v26  ;;  %v3087_v18 = vld [vmem:[#allocation4_spill] sm:$0xff] }
 0x163   : > { %v1512_v1 = vmax.f32 %v1418_v13, 0.0  ;;  %v1410_v53 = vadd.f32 %v1409_v47, %v1249_v15  ;;  %v2136_v47 = vadd.f32 %v3080_v9, %v3079_v5  ;;  %v1278_v63 = vadd.f32 %v2230_v25, %v1117_v2  ;;  %v3088_v9 = vld [vmem:[#allocation2_spill] sm:$0xff] }
 0x164   : > { %v2246_v4 = vpop.f32.mrf.mxu1  ;;  %v2318_v55 = vpop.f32.mrf.mxu0 }
 0x165   : > { %v1985_v56 = vpack.c.bf16 %v1512_v1, %v1511_v21  ;;  %v1510_v59 = vmax.f32 %v1410_v53, 0.0  ;;  %v1431_v62 = vadd.f32 %v2318_v55, %v1270_v22  ;;  %v3083_v55 = vld [vmem:[#allocation21_spill] sm:$0xff]  ;;  %v1141_v6 = vadd.f32 %v2136_v47, %v2790_v38 }
 0x166   : > { %v2247_v10 = vpop.f32.mrf.mxu1  ;;  %v1422_v3 = vpop.f32.mrf.mxu0  ;;  %v1149_v47 = vadd.f32 %v3088_v9, %v2790_v38 }
 0x167   : > { %2041 = vst [vmem:[%s2922_s21 + $0x28] sm:$0xff] %v1985_v56   ;;  %v1980_v45 = vpack.c.bf16 %v1510_v59, %v1509_v61  ;;  %v1423_v37 = vadd.f32 %v1422_v3, %v1262_v31  ;;  %v1515_v36 = vmax.f32 %v1431_v62, 0.0  ;;  %v3084_v61 = vld [vmem:[#allocation22_spill] sm:$0xff]  ;;  %v2248_v57 = vadd.f32 %v2247_v10, %v2246_v4  ;;  %v3085_v62 = vld [vmem:[#allocation17_spill] sm:$0xff] }
 0x168   : > { %v2249_v54 = vpop.f32.mrf.mxu1  ;;  %v2319_v30 = vpop.f32.mrf.mxu0  ;;  %v2139_v56 = vadd.f32 %v3084_v61, %v3083_v55  ;;  %v3086_v31 = vld [vmem:[#allocation18_spill] sm:$0xff]  ;;  %v1133_v4 = vadd.f32 %v2130_v29, %v2790_v38  ;;  %v3090_v29 = vld [vmem:[#allocation3_spill] sm:$0xff] }
 0x169   : > { %2040 = vst [vmem:[%s2922_s21 + $0x20] sm:$0xff] %v1980_v45   ;;  %v1434_v40 = vadd.f32 %v2319_v30, %v1273_v35  ;;  %v1513_v13 = vmax.f32 %v1423_v37, 0.0  ;;  %v1281_v45 = vadd.f32 %v2233_v16, %v1120_v8  ;;  %v2133_v35 = vadd.f32 %v3086_v31, %v3085_v62 }
 0x16a   : > { %v2250_v60 = vpop.f32.mrf.mxu1  ;;  %v1425_v0 = vpop.f32.mrf.mxu0  ;;  %v1144_v10 = vadd.f32 %v2139_v56, %v2790_v38  ;;  %v1302_v11 = vadd.f32 %v2248_v57, %v1141_v6  ;;  %v1157_v16 = vadd.f32 %v3087_v18, %v2790_v38  ;;  %v1152_v55 = vadd.f32 %v3090_v29, %v2790_v38  ;;  %v3094_v18 = vld [vmem:[#allocation9_spill] sm:$0xff] }
 0x16b   : > { %v1516_v28 = vmax.f32 %v1434_v40, 0.0  ;;  %v1426_v24 = vadd.f32 %v1425_v0, %v1265_v52  ;;  %v2251_v33 = vadd.f32 %v2250_v60, %v2249_v54  ;;  %v2245_v40 = vadd.f32 %v2969_v27, %v2961_v20 }
 0x16c   : > { %v2252_v49 = vpop.f32.mrf.mxu1  ;;  %v2322_v34 = vpop.f32.mrf.mxu0  ;;  %v1136_v54 = vadd.f32 %v2133_v35, %v2790_v38  ;;  %v1294_v0 = vadd.f32 %v2242_v17, %v1133_v4 }
 0x16d   : > { %v1995_v51 = vpack.c.bf16 %v1516_v28, %v1515_v36  ;;  %v1514_v15 = vmax.f32 %v1426_v24, 0.0  ;;  %v1447_v53 = vadd.f32 %v2322_v34, %v1286_v7  ;;  %v1305_v32 = vadd.f32 %v2251_v33, %v1144_v10 }
 0x16e   : > { %v2253_v19 = vpop.f32.mrf.mxu1  ;;  %v1438_v21 = vpop.f32.mrf.mxu0  ;;  %v1297_v2 = vadd.f32 %v2245_v40, %v1136_v54 }
 0x16f   : > { %2043 = vst [vmem:[%s2922_s21 + $0x38] sm:$0xff] %v1995_v51   ;;  %v1990_v1 = vpack.c.bf16 %v1514_v15, %v1513_v13  ;;  %v1439_v58 = vadd.f32 %v1438_v21, %v1278_v63  ;;  %v1519_v30 = vmax.f32 %v1447_v53, 0.0  ;;  %v2254_v34 = vadd.f32 %v2253_v19, %v2252_v49  ;;  %v3089_v21 = vld [vmem:[#allocation5_spill] sm:$0xff] }
 0x170   : > { %v2255_v59 = vpop.f32.mrf.mxu1  ;;  %v2323_v22 = vpop.f32.mrf.mxu0 }
 0x171   : > { %2042 = vst [vmem:[%s2922_s21 + $0x30] sm:$0xff] %v1990_v1   ;;  %v1450_v3 = vadd.f32 %v2323_v22, %v1289_v23  ;;  %v1517_v44 = vmax.f32 %v1439_v58, 0.0  ;;  %v1160_v1 = vadd.f32 %v3089_v21, %v2790_v38  ;;  %v1310_v58 = vadd.f32 %v2254_v34, %v1149_v47 }
 0x172   : > { %v2256_v39 = vpop.f32.mrf.mxu1  ;;  %v1441_v41 = vpop.f32.mrf.mxu0 }
 0x173   : > { %v1520_v12 = vmax.f32 %v1450_v3, 0.0  ;;  %v1442_v37 = vadd.f32 %v1441_v41, %v1281_v45  ;;  %v2257_v53 = vadd.f32 %v2256_v39, %v2255_v59 }
 0x174   : > { %v2258_v52 = vpop.f32.mrf.mxu1  ;;  %v2326_v14 = vpop.f32.mrf.mxu0 }
 0x175   : > { %v2005_v50 = vpack.c.bf16 %v1520_v12, %v1519_v30  ;;  %v1518_v26 = vmax.f32 %v1442_v37, 0.0  ;;  %v1463_v60 = vadd.f32 %v2326_v14, %v1302_v11  ;;  %v1313_v35 = vadd.f32 %v2257_v53, %v1152_v55  ;;  %v3091_v12 = vld [vmem:[#allocation6_spill] sm:$0xff] }
 0x176   : > { %v2259_v46 = vpop.f32.mrf.mxu1  ;;  %v1454_v42 = vpop.f32.mrf.mxu0  ;;  %v1165_v37 = vadd.f32 %v3091_v12, %v2790_v38 }
 0x177   : > { %2045 = vst [vmem:[%s2922_s21 + $0x48] sm:$0xff] %v2005_v50   ;;  %v2000_v25 = vpack.c.bf16 %v1518_v26, %v1517_v44  ;;  %v2260_v20 = vadd.f32 %v2259_v46, %v2258_v52  ;;  %v1455_v27 = vadd.f32 %v1454_v42, %v1294_v0  ;;  %v1523_v15 = vmax.f32 %v1463_v60, 0.0  ;;  %v3092_v50 = vld [vmem:[#allocation7_spill] sm:$0xff]  ;;  %v3093_v46 = vld [vmem:[#allocation8_spill] sm:$0xff] }
 0x178   : > { %v2261_v36 = vpop.f32.mrf.mxu1  ;;  %v2327_v28 = vpop.f32.mrf.mxu0  ;;  %v1168_v26 = vadd.f32 %v3092_v50, %v2790_v38  ;;  %v1173_v42 = vadd.f32 %v3093_v46, %v2790_v38 }
 0x179   : > { %2044 = vst [vmem:[%s2922_s21 + $0x40] sm:$0xff] %v2000_v25   ;;  %v1466_v24 = vadd.f32 %v2327_v28, %v1305_v32  ;;  %v1521_v43 = vmax.f32 %v1455_v27, 0.0  ;;  %v1318_v19 = vadd.f32 %v2260_v20, %v1157_v16  ;;  %v1176_v16 = vadd.f32 %v3094_v18, %v2790_v38 }
 0x17a   : > { %v2262_v13 = vpop.f32.mrf.mxu1  ;;  %v1457_v51 = vpop.f32.mrf.mxu0 }
 0x17b   : > { %v1524_v7 = vmax.f32 %v1466_v24, 0.0  ;;  %v2263_v8 = vadd.f32 %v2262_v13, %v2261_v36  ;;  %v1458_v5 = vadd.f32 %v1457_v51, %v1297_v2 }
 0x17c   : > { %v2264_v63 = vpop.f32.mrf.mxu1  ;;  %v2330_v23 = vpop.f32.mrf.mxu0 }
 0x17d   : > { %v2015_v48 = vpack.c.bf16 %v1524_v7, %v1523_v15  ;;  %v1522_v49 = vmax.f32 %v1458_v5, 0.0  ;;  %v1479_v57 = vadd.f32 %v2330_v23, %v1318_v19  ;;  %v1321_v3 = vadd.f32 %v2263_v8, %v1160_v1 }
 0x17e   : > { %v2265_v61 = vpop.f32.mrf.mxu1  ;;  %v1470_v56 = vpop.f32.mrf.mxu0 }
 0x17f   : > { %2047 = vst [vmem:[%s2922_s21 + $0x58] sm:$0xff] %v2015_v48   ;;  %v2010_v22 = vpack.c.bf16 %v1522_v49, %v1521_v43  ;;  %v1471_v59 = vadd.f32 %v1470_v56, %v1310_v58  ;;  %v1527_v39 = vmax.f32 %v1479_v57, 0.0  ;;  %v2266_v41 = vadd.f32 %v2265_v61, %v2264_v63 }
 0x180   : > { %v2267_v45 = vpop.f32.mrf.mxu1  ;;  %v2331_v62 = vpop.f32.mrf.mxu0 }
 0x181   : > { %2046 = vst [vmem:[%s2922_s21 + $0x50] sm:$0xff] %v2010_v22   ;;  %v1482_v31 = vadd.f32 %v2331_v62, %v1321_v3  ;;  %v1525_v40 = vmax.f32 %v1471_v59, 0.0  ;;  %v1326_v0 = vadd.f32 %v2266_v41, %v1165_v37 }
 0x182   : > { %v2268_v6 = vpop.f32.mrf.mxu1  ;;  %v1473_v17 = vpop.f32.mrf.mxu0 }
 0x183   : > { %v1528_v33 = vmax.f32 %v1482_v31, 0.0  ;;  %v1474_v30 = vadd.f32 %v1473_v17, %v1313_v35  ;;  %v2269_v14 = vadd.f32 %v2268_v6, %v2267_v45 }
 0x184   : > { %v2270_v4 = vpop.f32.mrf.mxu1  ;;  %v2334_v10 = vpop.f32.mrf.mxu0 }
 0x185   : > { %v2025_v52 = vpack.c.bf16 %v1528_v33, %v1527_v39  ;;  %v1526_v44 = vmax.f32 %v1474_v30, 0.0  ;;  %v1329_v27 = vadd.f32 %v2269_v14, %v1168_v26 }
 0x186   : > { %v2271_v11 = vpop.f32.mrf.mxu1  ;;  %v1486_v54 = vpop.f32.mrf.mxu0 }
 0x187   : > { %2049 = vst [vmem:[%s2922_s21 + $0x68] sm:$0xff] %v2025_v52   ;;  %v2020_v25 = vpack.c.bf16 %v1526_v44, %v1525_v40  ;;  %v2272_v60 = vadd.f32 %v2271_v11, %v2270_v4  ;;  %v1487_v20 = vadd.f32 %v1486_v54, %v1326_v0 }
 0x188   : > { %v2273_v32 = vpop.f32.mrf.mxu1  ;;  %v2335_v36 = vpop.f32.mrf.mxu0 }
 0x189   : > { %2048 = vst [vmem:[%s2922_s21 + $0x60] sm:$0xff] %v2020_v25   ;;  %v1334_v28 = vadd.f32 %v2272_v60, %v1173_v42  ;;  %v1529_v15 = vmax.f32 %v1487_v20, 0.0 }
 0x18a   : > { %v2274_v24 = vpop.f32.mrf.mxu1  ;;  %v1489_v2 = vpop.f32.mrf.mxu0 }
 0x18b   : > { %v2275_v34 = vadd.f32 %v2274_v24, %v2273_v32  ;;  %v1490_v13 = vadd.f32 %v1489_v2, %v1329_v27  ;;  %v1495_v51 = vadd.f32 %v2334_v10, %v1334_v28 }
 0x18d   : > { %v1337_v7 = vadd.f32 %v2275_v34, %v1176_v16  ;;  %v1530_v8 = vmax.f32 %v1490_v13, 0.0  ;;  %v1531_v47 = vmax.f32 %v1495_v51, 0.0 }
 0x18f   : > { %v1498_v5 = vadd.f32 %v2335_v36, %v1337_v7  ;;  %v2030_v9 = vpack.c.bf16 %v1530_v8, %v1529_v15 }
 0x191   : > { %v1532_v21 = vmax.f32 %v1498_v5, 0.0  ;;  %2050 = vst [vmem:[%s2922_s21 + $0x70] sm:$0xff] %v2030_v9  }
 0x193   : > { %v2035_v1 = vpack.c.bf16 %v1532_v21, %v1531_v47 }
 0x195   : > { %2051 = vst [vmem:[%s2922_s21 + $0x78] sm:$0xff] %v2035_v1  }
 0x196 PF: > { %s13_s12 = sadd.s32 1, %s2515_s12  }
 0x197   : > { %p10_p4 = scmp.ge.s32.totalorder %s13_s12, 4  }
 0x199   :  { %12 = sbr.rel (!%p10_p4) target bundleno = 1 (0x1), region = 62 }

// kernel: vae_forward.13
= control target key start
LH: loop header
LB: loop body
LE: loop exit
PB: predicated region body
PF: predicated region fallthrough
CT: control target
= control target key end

     0   :  { %s2401_s12 = smov 0   ;;  %s2896_s0 = inlined_call_operand.vmem [shape: bf16[2048,288], index: 0, kind: input, shape index: {}]   ;;  %s2897_s1 = inlined_call_operand.vmem [shape: bf16[288,128], index: 1, kind: input, shape index: {}]   ;;  %s2898_s2 = inlined_call_operand.vmem [shape: f32[1,128], index: 2, kind: input, shape index: {}]   ;;  %s2899_s3 = inlined_call_operand.vmem [shape: f32[2048,128], index: 3, kind: output, shape index: {}]  }
   0x1 LB: > { %s1796_s13 = sadd.s32 4294967295, %s2378_s12   ;;  %p1800_p0 = scmp.ge.s32.totalorder %s2378_s12, 1  ;;  %s2378_s12 = sphi %s2401_s12, %s13_s12  }
   0x2   : > { %p139_p1 = scmp.lt.s32.totalorder %s2378_s12, 5 }
   0x4   : > { %p140_p2 = pnand %p1800_p0, %p139_p1 }
   0x5   : > { %s1801_s16 = sshll.u32 (!%p140_p2), %s1796_s13, 6 }
   0x6   : > { %143 = sbr.rel (%p140_p2) target bundleno = 477 (0x1dd), region = 32  ;;  %p165_p3 = scmp.lt.s32.totalorder (!%p140_p2), %s1801_s16, 255 }
   0xb   : > { %v2098_v0 = vld [vmem:[%s2897_s1 + $0x38] sm:$0xff]   ;;  %v2380_v1 = vmov 0   ;;  %v2099_v2 = vld [vmem:[%s2897_s1 + $0x30] sm:$0xff]   ;;  %v2100_v3 = vld [vmem:[%s2897_s1 + $0x28] sm:$0xff]   ;;  %s2901_s16 = smov (!%p165_p3, %s1801_s16), 255  ;;  %vm937_vm0 = vcmask 261120  }
   0xc   : > { %1034 = vmatprep.subr.bf16.mxu0 %v2380_v1  ;;  %2056 = vmatprep.subr.bf16.mxu1 %v2380_v1  ;;  %v2101_v4 = vld [vmem:[%s2897_s1 + $0x20] sm:$0xff]   ;;  %s2088_s23 = smul.u32 12, %s2901_s16  ;;  %v2102_v5 = vld [vmem:[%s2897_s1 + $0x18] sm:$0xff]   ;;  %v2103_v7 = vld [vmem:[%s2897_s1 + $0x10] sm:$0xff]   ;;  %s1804_s5 = sshll.u32 %s2901_s16, 3 }
   0xd   : > { %1035 = vmatpush1.bf16.msra.mxu0 %v2098_v0  ;;  %2072 = vmatpush1.bf16.msra.mxu1 %v2098_v0  ;;  %v2104_v9 = vld [vmem:[%s2897_s1 + $0x8] sm:$0xff]   ;;  %v2105_v10 = vld [vmem:[%s2897_s1] sm:$0xff]   ;;  %v2106_v11 = vld [vmem:[%s2897_s1 + $0x78] sm:$0xff]   ;;  %s2719_s8 = scalar_lea.vmem %s2899_s3, %s1804_s5 }
   0xe   : > { %1036 = vmatprep.subr.bf16.mxu0 %v2380_v1  ;;  %2057 = vmatprep.subr.bf16.mxu1 %v2380_v1  ;;  %s2438_s28 = scalar_lea.vmem %s2896_s0, %s2088_s23  ;;  %v2107_v12 = vld [vmem:[%s2897_s1 + $0x70] sm:$0xff]   ;;  %v2108_v13 = vld [vmem:[%s2897_s1 + $0x68] sm:$0xff]   ;;  %v2109_v14 = vld [vmem:[%s2897_s1 + $0x60] sm:$0xff]  }
   0xf   : > { %v2116_v6 = vld [vmem:[%s2438_s28 + $0x4] ss:$12 sps:$4 sm:$0xff]   ;;  %v2110_v15 = vld [vmem:[%s2897_s1 + $0x58] sm:$0xff]   ;;  %v2112_v17 = vld [vmem:[%s2897_s1 + $0x48] sm:$0xff]  }
  0x10   : > { %v2119_v8 = vld [vmem:[%s2438_s28 + $0x244] ss:$12 sps:$4 sm:$0xff]   ;;  %1066 = vmatprep.mubr.bf16.mxu0 %v2116_v6  ;;  %v2120_v19 = vld [vmem:[%s2897_s1 + $0x88] sm:$0xff]   ;;  %v2127_v27 = vld [vmem:[%s2438_s28 + $0x34] ss:$12 sps:$4 sm:$0xff]  }
  0x11   : > { %1037 = vmatpush1.bf16.msra.mxu0 %v2099_v2  ;;  %2073 = vmatpush1.bf16.msra.mxu1 %v2099_v2  ;;  %v2111_v16 = vld [vmem:[%s2897_s1 + $0x50] sm:$0xff]   ;;  %v2113_v18 = vld [vmem:[%s2897_s1 + $0x40] sm:$0xff]   ;;  %v2121_v22 = vld [vmem:[%s2438_s28 + $0x1c] ss:$12 sps:$4 sm:$0xff]  }
  0x12   : > { %1038 = vmatprep.subr.bf16.mxu0 %v2380_v1  ;;  %2058 = vmatprep.subr.bf16.mxu1 %v2380_v1  ;;  %v2114_v20 = vld [vmem:[%s2438_s28] ss:$12 sps:$4 sm:$0xff]   ;;  %v2123_v23 = vld [vmem:[%s2438_s28 + $0x25c] ss:$12 sps:$4 sm:$0xff]   ;;  %v2125_v25 = vld [vmem:[%s2438_s28 + $0x18] ss:$12 sps:$4 sm:$0xff]  }
  0x13   : > { %1258 = vmatprep.mubr.bf16.mxu1 %v2119_v8  ;;  %v2117_v21 = vld [vmem:[%s2438_s28 + $0x240] ss:$12 sps:$4 sm:$0xff]   ;;  %v2126_v26 = vld [vmem:[%s2438_s28 + $0x258] ss:$12 sps:$4 sm:$0xff]   ;;  %v2131_v29 = vld [vmem:[%s2438_s28 + $0x30] ss:$12 sps:$4 sm:$0xff]  }
  0x14   : > { %v2145_v24 = vld [vmem:[%s2897_s1 + $0x80] sm:$0xff]   ;;  %v2132_v30 = vld [vmem:[%s2438_s28 + $0x270] ss:$12 sps:$4 sm:$0xff]   ;;  %v2133_v31 = vld [vmem:[%s2438_s28 + $0x4c] ss:$12 sps:$4 sm:$0xff]  }
  0x15   : > { %1039 = vmatpush1.bf16.msra.mxu0 %v2100_v3  ;;  %2074 = vmatpush1.bf16.msra.mxu1 %v2100_v3  ;;  %v2129_v28 = vld [vmem:[%s2438_s28 + $0x274] ss:$12 sps:$4 sm:$0xff]   ;;  %v2135_v32 = vld [vmem:[%s2438_s28 + $0x28c] ss:$12 sps:$4 sm:$0xff]   ;;  %v2139_v35 = vld [vmem:[%s2438_s28 + $0x64] ss:$12 sps:$4 sm:$0xff]  }
  0x16   : > { %1040 = vmatprep.subr.bf16.mxu0 %v2380_v1  ;;  %2059 = vmatprep.subr.bf16.mxu1 %v2380_v1  ;;  %v2137_v33 = vld [vmem:[%s2438_s28 + $0x48] ss:$12 sps:$4 sm:$0xff]   ;;  %v2141_v36 = vld [vmem:[%s2438_s28 + $0x2a4] ss:$12 sps:$4 sm:$0xff]   ;;  %v2143_v37 = vld [vmem:[%s2438_s28 + $0x60] ss:$12 sps:$4 sm:$0xff]  }
  0x17   : > { %v2138_v34 = vld [vmem:[%s2438_s28 + $0x288] ss:$12 sps:$4 sm:$0xff]   ;;  %v2144_v38 = vld [vmem:[%s2438_s28 + $0x2a0] ss:$12 sps:$4 sm:$0xff]   ;;  %v2150_v41 = vld [vmem:[%s2438_s28 + $0x78] ss:$12 sps:$4 sm:$0xff]  }
  0x18   : > { %v2146_v39 = vld [vmem:[%s2438_s28 + $0x7c] ss:$12 sps:$4 sm:$0xff]   ;;  %v2151_v42 = vld [vmem:[%s2438_s28 + $0x2b8] ss:$12 sps:$4 sm:$0xff]   ;;  %v2152_v43 = vld [vmem:[%s2438_s28 + $0x94] ss:$12 sps:$4 sm:$0xff]  }
  0x19   : > { %1041 = vmatpush1.bf16.msra.mxu0 %v2101_v4  ;;  %2075 = vmatpush1.bf16.msra.mxu1 %v2101_v4  ;;  %v2148_v40 = vld [vmem:[%s2438_s28 + $0x2bc] ss:$12 sps:$4 sm:$0xff]   ;;  %v2154_v44 = vld [vmem:[%s2438_s28 + $0x2d4] ss:$12 sps:$4 sm:$0xff]   ;;  %v2158_v47 = vld [vmem:[%s2438_s28 + $0xac] ss:$12 sps:$4 sm:$0xff]  }
  0x1a   : > { %1042 = vmatprep.subr.bf16.mxu0 %v2380_v1  ;;  %2060 = vmatprep.subr.bf16.mxu1 %v2380_v1  ;;  %v2156_v45 = vld [vmem:[%s2438_s28 + $0x90] ss:$12 sps:$4 sm:$0xff]   ;;  %v2160_v48 = vld [vmem:[%s2438_s28 + $0x2ec] ss:$12 sps:$4 sm:$0xff]   ;;  %v2162_v49 = vld [vmem:[%s2438_s28 + $0xa8] ss:$12 sps:$4 sm:$0xff]  }
  0x1b   : > { %v2157_v46 = vld [vmem:[%s2438_s28 + $0x2d0] ss:$12 sps:$4 sm:$0xff]   ;;  %v2163_v50 = vld [vmem:[%s2438_s28 + $0x2e8] ss:$12 sps:$4 sm:$0xff]   ;;  %v2167_v53 = vld [vmem:[%s2438_s28 + $0xc0] ss:$12 sps:$4 sm:$0xff]  }
  0x1c   : > { %v2164_v51 = vld [vmem:[%s2438_s28 + $0xc4] ss:$12 sps:$4 sm:$0xff]   ;;  %v2166_v52 = vld [vmem:[%s2438_s28 + $0x8] ss:$12 sps:$4 sm:$0xff]   ;;  %v2168_v54 = vld [vmem:[%s2438_s28 + $0x20] ss:$12 sps:$4 sm:$0xff]  }
  0x1d   : > { %1043 = vmatpush1.bf16.msra.mxu0 %v2102_v5  ;;  %2076 = vmatpush1.bf16.msra.mxu1 %v2102_v5  ;;  %v2169_v55 = vld [vmem:[%s2438_s28 + $0xdc] ss:$12 sps:$4 sm:$0xff]   ;;  %v2171_v56 = vld [vmem:[%s2438_s28 + $0x38] ss:$12 sps:$4 sm:$0xff]   ;;  %v2174_v59 = vld [vmem:[%s2438_s28 + $0xf4] ss:$12 sps:$4 sm:$0xff]  }
  0x1e   : > { %1044 = vmatprep.subr.bf16.mxu0 %v2380_v1  ;;  %2061 = vmatprep.subr.bf16.mxu1 %v2380_v1  ;;  %v2172_v57 = vld [vmem:[%s2438_s28 + $0xd8] ss:$12 sps:$4 sm:$0xff]   ;;  %v2173_v58 = vld [vmem:[%s2438_s28 + $0x50] ss:$12 sps:$4 sm:$0xff]   ;;  %v2176_v60 = vld [vmem:[%s2438_s28 + $0x68] ss:$12 sps:$4 sm:$0xff]  }
  0x1f   : > { %v2177_v61 = vld [vmem:[%s2438_s28 + $0xf0] ss:$12 sps:$4 sm:$0xff]   ;;  %v2178_v62 = vld [vmem:[%s2438_s28 + $0x80] ss:$12 sps:$4 sm:$0xff]   ;;  %v2181_v0 = vld [vmem:[%s2438_s28 + $0x98] ss:$12 sps:$4 sm:$0xff]  }
  0x20   : > { %v2179_v63 = vld [vmem:[%s2438_s28 + $0x10c] ss:$12 sps:$4 sm:$0xff]   ;;  %v2183_v2 = vld [vmem:[%s2438_s28 + $0xb0] ss:$12 sps:$4 sm:$0xff]   ;;  %v2186_v4 = vld [vmem:[%s2438_s28 + $0xc8] ss:$12 sps:$4 sm:$0xff]  }
  0x21   : > { %1045 = vmatpush1.bf16.msra.mxu0 %v2103_v7  ;;  %2077 = vmatpush1.bf16.msra.mxu1 %v2103_v7  ;;  %v2184_v3 = vld [vmem:[%s2438_s28 + $0x124] ss:$12 sps:$4 sm:$0xff]   ;;  %v2187_v5 = vld [vmem:[%s2438_s28 + $0x120] ss:$12 sps:$4 sm:$0xff]   ;;  %v2189_v7 = vld [vmem:[%s2438_s28 + $0x13c] ss:$12 sps:$4 sm:$0xff]  }
  0x22   : > { %1046 = vmatprep.subr.bf16.mxu0 %v2380_v1  ;;  %2062 = vmatprep.subr.bf16.mxu1 %v2380_v1  ;;  %v2188_v6 = vld [vmem:[%s2438_s28 + $0xe0] ss:$12 sps:$4 sm:$0xff]   ;;  %v2191_v8 = vld [vmem:[%s2438_s28 + $0xf8] ss:$12 sps:$4 sm:$0xff]  }
  0x25   : > { %1047 = vmatpush1.bf16.msra.mxu0 %v2104_v9  ;;  %2078 = vmatpush1.bf16.msra.mxu1 %v2104_v9  ;;  %v2192_v9 = vld [vmem:[%s2438_s28 + $0x138] ss:$12 sps:$4 sm:$0xff]  }
  0x26   : > { %1048 = vmatprep.subr.bf16.mxu0 %v2380_v1  ;;  %2063 = vmatprep.subr.bf16.mxu1 %v2380_v1 }
  0x29   : > { %1049 = vmatpush1.bf16.msra.mxu0 %v2105_v10  ;;  %2079 = vmatpush1.bf16.msra.mxu1 %v2105_v10  ;;  %v2193_v10 = vld [vmem:[%s2438_s28 + $0x110] ss:$12 sps:$4 sm:$0xff]  }
  0x2a   : > { %1050 = vmatprep.subr.bf16.mxu0 %v2380_v1  ;;  %2064 = vmatprep.subr.bf16.mxu1 %v2380_v1 }
  0x2d   : > { %1051 = vmatpush2.bf16.msra.mxu0 %v2106_v11  ;;  %2080 = vmatpush2.bf16.msra.mxu1 %v2106_v11  ;;  %v2194_v11 = vld [vmem:[%s2438_s28 + $0x154] ss:$12 sps:$4 sm:$0xff]  }
  0x2e   : > { %1052 = vmatprep.subr.bf16.mxu0 %v2380_v1  ;;  %2065 = vmatprep.subr.bf16.mxu1 %v2380_v1 }
  0x31   : > { %1053 = vmatpush2.bf16.msra.mxu0 %v2107_v12  ;;  %2081 = vmatpush2.bf16.msra.mxu1 %v2107_v12  ;;  %v2196_v12 = vld [vmem:[%s2438_s28 + $0x128] ss:$12 sps:$4 sm:$0xff]  }
  0x32   : > { %1054 = vmatprep.subr.bf16.mxu0 %v2380_v1  ;;  %2066 = vmatprep.subr.bf16.mxu1 %v2380_v1 }
  0x35   : > { %1055 = vmatpush2.bf16.msra.mxu0 %v2108_v13  ;;  %2082 = vmatpush2.bf16.msra.mxu1 %v2108_v13  ;;  %v2197_v13 = vld [vmem:[%s2438_s28 + $0x150] ss:$12 sps:$4 sm:$0xff]  }
  0x36   : > { %1056 = vmatprep.subr.bf16.mxu0 %v2380_v1  ;;  %2067 = vmatprep.subr.bf16.mxu1 %v2380_v1 }
  0x39   : > { %1057 = vmatpush2.bf16.msra.mxu0 %v2109_v14  ;;  %2083 = vmatpush2.bf16.msra.mxu1 %v2109_v14  ;;  %v2198_v14 = vld [vmem:[%s2438_s28 + $0x140] ss:$12 sps:$4 sm:$0xff]  }
  0x3a   : > { %1058 = vmatprep.subr.bf16.mxu0 %v2380_v1  ;;  %2068 = vmatprep.subr.bf16.mxu1 %v2380_v1 }
  0x3d   : > { %1059 = vmatpush2.bf16.msra.mxu0 %v2110_v15  ;;  %2084 = vmatpush2.bf16.msra.mxu1 %v2110_v15  ;;  %v2199_v15 = vld [vmem:[%s2438_s28 + $0x16c] ss:$12 sps:$4 sm:$0xff]  }
  0x3e   : > { %1060 = vmatprep.subr.bf16.mxu0 %v2380_v1  ;;  %2069 = vmatprep.subr.bf16.mxu1 %v2380_v1 }
  0x41   : > { %1061 = vmatpush2.bf16.msra.mxu0 %v2111_v16  ;;  %2085 = vmatpush2.bf16.msra.mxu1 %v2111_v16  ;;  %v2201_v16 = vld [vmem:[%s2438_s28 + $0x158] ss:$12 sps:$4 sm:$0xff]  }
  0x42   : > { %1062 = vmatprep.subr.bf16.mxu0 %v2380_v1  ;;  %2070 = vmatprep.subr.bf16.mxu1 %v2380_v1 }
  0x45   : > { %1063 = vmatpush2.bf16.msra.mxu0 %v2112_v17  ;;  %2086 = vmatpush2.bf16.msra.mxu1 %v2112_v17  ;;  %v2202_v17 = vld [vmem:[%s2438_s28 + $0x168] ss:$12 sps:$4 sm:$0xff]  }
  0x46   : > { %1064 = vmatprep.subr.bf16.mxu0 %v2380_v1  ;;  %2071 = vmatprep.subr.bf16.mxu1 %v2380_v1  ;;  %v2182_v1 = vld [vmem:[%s2438_s28 + $0x108] ss:$12 sps:$4 sm:$0xff]  }
  0x49   : > { %1065 = vmatpush2.bf16.msra.mxu0 %v2113_v18  ;;  %2087 = vmatpush2.bf16.msra.mxu1 %v2113_v18  ;;  %v2203_v18 = vld [vmem:[%s2438_s28 + $0x170] ss:$12 sps:$4 sm:$0xff]  }
  0x4a   : > { %1988 = vmatprep.subr.bf16.mxu1 %v2120_v19 }
  0x4c   : > { %1067 = vmatmul.mubr.bf16.vlgmr.msra.gmra.mxu0 %v2114_v20  ;;  %1259 = vmatmul.mubr.bf16.vlgmr.msra.gmra.mxu1 %v2117_v21  ;;  %v2206_v20 = vld [vmem:[%s2438_s28 + $0x188] ss:$12 sps:$4 sm:$0xff]   ;;  %v2207_v21 = vld [vmem:[%s2438_s28 + $0x180] ss:$12 sps:$4 sm:$0xff]  }
  0x4d   : > { %1989 = vmatpush3.bf16.msra.mxu1 %v2120_v19  ;;  %1074 = vmatprep.mubr.bf16.mxu0 %v2121_v22  ;;  %v2204_v19 = vld [vmem:[%s2438_s28 + $0x184] ss:$12 sps:$4 sm:$0xff]   ;;  %v2208_v22 = vld [vmem:[%s2438_s28 + $0x1a0] ss:$12 sps:$4 sm:$0xff]  }
  0x4e   : > { %1266 = vmatprep.mubr.bf16.mxu1 %v2123_v23  ;;  %1990 = vmatprep.subr.bf16.mxu1 %v2145_v24  ;;  %v2209_v23 = vld [vmem:[%s2438_s28 + $0x19c] ss:$12 sps:$4 sm:$0xff]  }
  0x51   : > { %1991 = vmatpush3.bf16.msra.mxu1 %v2145_v24  ;;  %v2211_v24 = vld [vmem:[%s2438_s28 + $0x1b8] ss:$12 sps:$4 sm:$0xff]  }
  0x54   : > { %1075 = vmatmul.mubr.bf16.gmra.mxu0 %v2125_v25  ;;  %1267 = vmatmul.mubr.bf16.gmra.mxu1 %v2126_v26  ;;  %v2212_v25 = vld [vmem:[%s2438_s28 + $0x198] ss:$12 sps:$4 sm:$0xff]   ;;  %v2213_v26 = vld [vmem:[%s2438_s28 + $0x1d0] ss:$12 sps:$4 sm:$0xff]  }
  0x55   : > { %1082 = vmatprep.mubr.bf16.mxu0 %v2127_v27  ;;  %1274 = vmatprep.mubr.bf16.mxu1 %v2129_v28  ;;  %v2214_v27 = vld [vmem:[%s2438_s28 + $0x1b4] ss:$12 sps:$4 sm:$0xff]  }
  0x56   : > { %v2216_v28 = vld [vmem:[%s2438_s28 + $0x1e8] ss:$12 sps:$4 sm:$0xff]  }
  0x5c   : > { %1083 = vmatmul.mubr.bf16.gmra.mxu0 %v2131_v29  ;;  %1275 = vmatmul.mubr.bf16.gmra.mxu1 %v2132_v30  ;;  %v2217_v29 = vld [vmem:[%s2438_s28 + $0x1b0] ss:$12 sps:$4 sm:$0xff]   ;;  %v2218_v30 = vld [vmem:[%s2438_s28 + $0x200] ss:$12 sps:$4 sm:$0xff]  }
  0x5d   : > { %1090 = vmatprep.mubr.bf16.mxu0 %v2133_v31  ;;  %1282 = vmatprep.mubr.bf16.mxu1 %v2135_v32  ;;  %v2219_v31 = vld [vmem:[%s2438_s28 + $0x1cc] ss:$12 sps:$4 sm:$0xff]  }
  0x5e   : > { %v2221_v32 = vld [vmem:[%s2438_s28 + $0x218] ss:$12 sps:$4 sm:$0xff]  }
  0x64   : > { %1091 = vmatmul.mubr.bf16.gmra.mxu0 %v2137_v33  ;;  %1283 = vmatmul.mubr.bf16.gmra.mxu1 %v2138_v34  ;;  %v2222_v33 = vld [vmem:[%s2438_s28 + $0x1c8] ss:$12 sps:$4 sm:$0xff]   ;;  %v2223_v34 = vld [vmem:[%s2438_s28 + $0x230] ss:$12 sps:$4 sm:$0xff]  }
  0x65   : > { %1098 = vmatprep.mubr.bf16.mxu0 %v2139_v35  ;;  %1290 = vmatprep.mubr.bf16.mxu1 %v2141_v36  ;;  %v2224_v35 = vld [vmem:[%s2438_s28 + $0x1e4] ss:$12 sps:$4 sm:$0xff]   ;;  %v2226_v36 = vld [vmem:[%s2438_s28 + $0x248] ss:$12 sps:$4 sm:$0xff]  }
  0x6c   : > { %1099 = vmatmul.mubr.bf16.gmra.mxu0 %v2143_v37  ;;  %1291 = vmatmul.mubr.bf16.gmra.mxu1 %v2144_v38  ;;  %v2227_v37 = vld [vmem:[%s2438_s28 + $0x1e0] ss:$12 sps:$4 sm:$0xff]  }
  0x6d   : > { %1106 = vmatprep.mubr.bf16.mxu0 %v2146_v39  ;;  %1298 = vmatprep.mubr.bf16.mxu1 %v2148_v40  ;;  %v2228_v38 = vld [vmem:[%s2438_s28 + $0x260] ss:$12 sps:$4 sm:$0xff]   ;;  %v2229_v39 = vld [vmem:[%s2438_s28 + $0x1fc] ss:$12 sps:$4 sm:$0xff]   ;;  %v2231_v40 = vld [vmem:[%s2438_s28 + $0x278] ss:$12 sps:$4 sm:$0xff]  }
  0x74   : > { %1107 = vmatmul.mubr.bf16.gmra.mxu0 %v2150_v41  ;;  %1299 = vmatmul.mubr.bf16.gmra.mxu1 %v2151_v42  ;;  %v2232_v41 = vld [vmem:[%s2438_s28 + $0x1f8] ss:$12 sps:$4 sm:$0xff]   ;;  %v2233_v42 = vld [vmem:[%s2438_s28 + $0x290] ss:$12 sps:$4 sm:$0xff]  }
  0x75   : > { %1114 = vmatprep.mubr.bf16.mxu0 %v2152_v43  ;;  %1306 = vmatprep.mubr.bf16.mxu1 %v2154_v44  ;;  %v2234_v43 = vld [vmem:[%s2438_s28 + $0x214] ss:$12 sps:$4 sm:$0xff]  }
  0x76   : > { %v2236_v44 = vld [vmem:[%s2438_s28 + $0x2a8] ss:$12 sps:$4 sm:$0xff]  }
  0x7c   : > { %1115 = vmatmul.mubr.bf16.gmra.mxu0 %v2156_v45  ;;  %1307 = vmatmul.mubr.bf16.gmra.mxu1 %v2157_v46  ;;  %v2237_v45 = vld [vmem:[%s2438_s28 + $0x210] ss:$12 sps:$4 sm:$0xff]   ;;  %v2238_v46 = vld [vmem:[%s2438_s28 + $0x2c0] ss:$12 sps:$4 sm:$0xff]  }
  0x7d   : > { %1122 = vmatprep.mubr.bf16.mxu0 %v2158_v47  ;;  %1314 = vmatprep.mubr.bf16.mxu1 %v2160_v48  ;;  %v2239_v47 = vld [vmem:[%s2438_s28 + $0x22c] ss:$12 sps:$4 sm:$0xff]  }
  0x7e   : > { %v2241_v48 = vld [vmem:[%s2438_s28 + $0x2d8] ss:$12 sps:$4 sm:$0xff]  }
  0x84   : > { %1123 = vmatmul.mubr.bf16.gmra.mxu0 %v2162_v49  ;;  %1315 = vmatmul.mubr.bf16.gmra.mxu1 %v2163_v50  ;;  %v2242_v49 = vld [vmem:[%s2438_s28 + $0x228] ss:$12 sps:$4 sm:$0xff]   ;;  %v2243_v50 = vld [vmem:[%s2438_s28 + $0x2f0] ss:$12 sps:$4 sm:$0xff]  }
  0x85   : > { %1130 = vmatprep.mubr.bf16.mxu0 %v2164_v51  ;;  %1992 = vmatprep.mubr.msk.bf16.mxu1 %vm937_vm0, %v2166_v52 }
  0x8c   : > { %1131 = vmatmul.mubr.bf16.gmra.mxu0 %v2167_v53  ;;  %1993 = vmatmul.mubr.msk.bf16.vlgmr.msra.gmra.mxu1 %vm937_vm0, %v2168_v54 }
  0x8d   : > { %1138 = vmatprep.mubr.bf16.mxu0 %v2169_v55  ;;  %1996 = vmatprep.mubr.msk.bf16.mxu1 %vm937_vm0, %v2171_v56 }
  0x94   : > { %1139 = vmatmul.mubr.bf16.gmra.mxu0 %v2172_v57  ;;  %1997 = vmatmul.mubr.msk.bf16.gmra.mxu1 %vm937_vm0, %v2173_v58 }
  0x95   : > { %1146 = vmatprep.mubr.bf16.mxu0 %v2174_v59  ;;  %2000 = vmatprep.mubr.msk.bf16.mxu1 %vm937_vm0, %v2176_v60 }
  0x9c   : > { %1147 = vmatmul.mubr.bf16.gmra.mxu0 %v2177_v61  ;;  %2001 = vmatmul.mubr.msk.bf16.gmra.mxu1 %vm937_vm0, %v2178_v62 }
  0x9d   : > { %1154 = vmatprep.mubr.bf16.mxu0 %v2179_v63  ;;  %2004 = vmatprep.mubr.msk.bf16.mxu1 %vm937_vm0, %v2181_v0 }
  0xa4   : > { %1155 = vmatmul.mubr.bf16.gmra.mxu0 %v2182_v1  ;;  %2005 = vmatmul.mubr.msk.bf16.gmra.mxu1 %vm937_vm0, %v2183_v2 }
  0xa5   : > { %1162 = vmatprep.mubr.bf16.mxu0 %v2184_v3  ;;  %2008 = vmatprep.mubr.msk.bf16.mxu1 %vm937_vm0, %v2186_v4 }
  0xac   : > { %1163 = vmatmul.mubr.bf16.gmra.mxu0 %v2187_v5  ;;  %2009 = vmatmul.mubr.msk.bf16.gmra.mxu1 %vm937_vm0, %v2188_v6 }
  0xad   : > { %1170 = vmatprep.mubr.bf16.mxu0 %v2189_v7  ;;  %2012 = vmatprep.mubr.msk.bf16.mxu1 %vm937_vm0, %v2191_v8 }
  0xb4   : > { %1171 = vmatmul.mubr.bf16.gmra.mxu0 %v2192_v9  ;;  %2013 = vmatmul.mubr.msk.bf16.gmra.mxu1 %vm937_vm0, %v2193_v10 }
  0xb5   : > { %1178 = vmatprep.mubr.bf16.mxu0 %v2194_v11  ;;  %2016 = vmatprep.mubr.msk.bf16.mxu1 %vm937_vm0, %v2196_v12 }
  0xbc   : > { %1179 = vmatmul.mubr.bf16.gmra.mxu0 %v2197_v13  ;;  %2017 = vmatmul.mubr.msk.bf16.gmra.mxu1 %vm937_vm0, %v2198_v14 }
  0xbd   : > { %1186 = vmatprep.mubr.bf16.mxu0 %v2199_v15  ;;  %2020 = vmatprep.mubr.msk.bf16.mxu1 %vm937_vm0, %v2201_v16 }
  0xc4   : > { %1187 = vmatmul.mubr.bf16.gmra.mxu0 %v2202_v17  ;;  %2021 = vmatmul.mubr.msk.bf16.gmra.mxu1 %vm937_vm0, %v2203_v18 }
  0xc5   : > { %1194 = vmatprep.mubr.bf16.mxu0 %v2204_v19  ;;  %2024 = vmatprep.mubr.msk.bf16.mxu1 %vm937_vm0, %v2206_v20 }
  0xcc   : > { %1195 = vmatmul.mubr.bf16.gmra.mxu0 %v2207_v21  ;;  %2025 = vmatmul.mubr.msk.bf16.gmra.mxu1 %vm937_vm0, %v2208_v22 }
  0xcd   : > { %1202 = vmatprep.mubr.bf16.mxu0 %v2209_v23  ;;  %2028 = vmatprep.mubr.msk.bf16.mxu1 %vm937_vm0, %v2211_v24 }
  0xd4   : > { %1203 = vmatmul.mubr.bf16.gmra.mxu0 %v2212_v25  ;;  %2029 = vmatmul.mubr.msk.bf16.gmra.mxu1 %vm937_vm0, %v2213_v26 }
  0xd5   : > { %1210 = vmatprep.mubr.bf16.mxu0 %v2214_v27  ;;  %2032 = vmatprep.mubr.msk.bf16.mxu1 %vm937_vm0, %v2216_v28 }
  0xdc   : > { %1211 = vmatmul.mubr.bf16.gmra.mxu0 %v2217_v29  ;;  %2033 = vmatmul.mubr.msk.bf16.gmra.mxu1 %vm937_vm0, %v2218_v30 }
  0xdd   : > { %1218 = vmatprep.mubr.bf16.mxu0 %v2219_v31  ;;  %2036 = vmatprep.mubr.msk.bf16.mxu1 %vm937_vm0, %v2221_v32 }
  0xe4   : > { %1219 = vmatmul.mubr.bf16.gmra.mxu0 %v2222_v33  ;;  %2037 = vmatmul.mubr.msk.bf16.gmra.mxu1 %vm937_vm0, %v2223_v34 }
  0xe5   : > { %1226 = vmatprep.mubr.bf16.mxu0 %v2224_v35  ;;  %2040 = vmatprep.mubr.msk.bf16.mxu1 %vm937_vm0, %v2226_v36 }
  0xec   : > { %1227 = vmatmul.mubr.bf16.gmra.mxu0 %v2227_v37  ;;  %2041 = vmatmul.mubr.msk.bf16.gmra.mxu1 %vm937_vm0, %v2228_v38 }
  0xed   : > { %1234 = vmatprep.mubr.bf16.mxu0 %v2229_v39  ;;  %2044 = vmatprep.mubr.msk.bf16.mxu1 %vm937_vm0, %v2231_v40 }
  0xf4   : > { %1235 = vmatmul.mubr.bf16.gmra.mxu0 %v2232_v41  ;;  %2045 = vmatmul.mubr.msk.bf16.gmra.mxu1 %vm937_vm0, %v2233_v42 }
  0xf5   : > { %1242 = vmatprep.mubr.bf16.mxu0 %v2234_v43  ;;  %2048 = vmatprep.mubr.msk.bf16.mxu1 %vm937_vm0, %v2236_v44 }
  0xfc   : > { %1243 = vmatmul.mubr.bf16.gmra.mxu0 %v2237_v45  ;;  %2049 = vmatmul.mubr.msk.bf16.gmra.mxu1 %vm937_vm0, %v2238_v46 }
  0xfd   : > { %1250 = vmatprep.mubr.bf16.mxu0 %v2239_v47  ;;  %2052 = vmatprep.mubr.msk.bf16.mxu1 %vm937_vm0, %v2241_v48 }
 0x104   : > { %1251 = vmatmul.mubr.bf16.gmra.mxu0 %v2242_v49  ;;  %2053 = vmatmul.mubr.msk.bf16.gmra.mxu1 %vm937_vm0, %v2243_v50  ;;  %v2692_v49 = vld [vmem:[%s2898_s2] ss:$0 sm:$0xff] }
 0x10c   : > { %v2631_v51 = vpop.f32.mrf.mxu0  ;;  %v2633_v52 = vpop.f32.mrf.mxu1 }
 0x10e   : > { %v1070_v53 = vpop.f32.mrf.mxu0  ;;  %v1262_v54 = vpop.f32.mrf.mxu1 }
 0x110   : > { %v2635_v55 = vpop.f32.mrf.mxu0  ;;  %v2637_v56 = vpop.f32.mrf.mxu1 }
 0x112   : > { %v1073_v57 = vpop.f32.mrf.mxu0  ;;  %v1265_v58 = vpop.f32.mrf.mxu1 }
 0x114   : > { %v1076_v59 = vpop.f32.mrf.mxu0  ;;  %v2639_v60 = vpop.f32.mrf.mxu1 }
 0x115   : > { %v1077_v54 = vadd.f32 %v2692_v49, %v1076_v59 }
 0x116   : > { %v1078_v61 = vpop.f32.mrf.mxu0  ;;  %v1270_v62 = vpop.f32.mrf.mxu1 }
 0x117   : > { %v1069_v61 = vadd.f32 %v2692_v49, %v2631_v51 }
 0x118   : > { %v1079_v63 = vpop.f32.mrf.mxu0  ;;  %v2641_v0 = vpop.f32.mrf.mxu1 }
 0x11a   : > { %v1081_v1 = vpop.f32.mrf.mxu0  ;;  %v1273_v2 = vpop.f32.mrf.mxu1 }
 0x11c   : > { %v2643_v3 = vpop.f32.mrf.mxu0  ;;  %v2645_v4 = vpop.f32.mrf.mxu1 }
 0x11e   : > { %v1086_v5 = vpop.f32.mrf.mxu0  ;;  %v1278_v6 = vpop.f32.mrf.mxu1 }
 0x11f   : > { %v1080_v5 = vadd.f32 %v2692_v49, %v1079_v63 }
 0x120   : > { %v2647_v7 = vpop.f32.mrf.mxu0  ;;  %v2649_v8 = vpop.f32.mrf.mxu1 }
 0x122   : > { %v1089_v9 = vpop.f32.mrf.mxu0  ;;  %v1281_v10 = vpop.f32.mrf.mxu1 }
 0x124   : > { %v1092_v11 = vpop.f32.mrf.mxu0  ;;  %v2651_v12 = vpop.f32.mrf.mxu1 }
 0x125   : > { %v1093_v51 = vadd.f32 %v2692_v49, %v1092_v11 }
 0x126   : > { %v1094_v13 = vpop.f32.mrf.mxu0  ;;  %v1286_v14 = vpop.f32.mrf.mxu1 }
 0x127   : > { %v1072_v13 = vadd.f32 %v2692_v49, %v2635_v55 }
 0x128   : > { %v2653_v15 = vpop.f32.mrf.mxu0  ;;  %v2655_v16 = vpop.f32.mrf.mxu1 }
 0x129   : > { %v1096_v55 = vadd.f32 %v2692_v49, %v2653_v15 }
 0x12a   : > { %v1097_v17 = vpop.f32.mrf.mxu0  ;;  %v1289_v18 = vpop.f32.mrf.mxu1 }
 0x12c   : > { %v2657_v19 = vpop.f32.mrf.mxu0  ;;  %v2659_v20 = vpop.f32.mrf.mxu1 }
 0x12e   : > { %v1102_v21 = vpop.f32.mrf.mxu0  ;;  %v1294_v22 = vpop.f32.mrf.mxu1 }
 0x12f   : > { %v1085_v22 = vadd.f32 %v2692_v49, %v2643_v3 }
 0x130   : > { %v2661_v23 = vpop.f32.mrf.mxu0  ;;  %v2663_v24 = vpop.f32.mrf.mxu1 }
 0x132   : > { %v1105_v25 = vpop.f32.mrf.mxu0  ;;  %v1297_v26 = vpop.f32.mrf.mxu1 }
 0x134   : > { %v2665_v27 = vpop.f32.mrf.mxu0  ;;  %v2667_v28 = vpop.f32.mrf.mxu1 }
 0x136   : > { %v1110_v29 = vpop.f32.mrf.mxu0  ;;  %v1302_v30 = vpop.f32.mrf.mxu1 }
 0x138   : > { %v2669_v31 = vpop.f32.mrf.mxu0  ;;  %v2671_v32 = vpop.f32.mrf.mxu1 }
 0x13a   : > { %v1113_v33 = vpop.f32.mrf.mxu0  ;;  %v1305_v34 = vpop.f32.mrf.mxu1 }
 0x13b   : > { %v1088_v34 = vadd.f32 %v2692_v49, %v2647_v7 }
 0x13c   : > { %v2673_v35 = vpop.f32.mrf.mxu0  ;;  %v2675_v36 = vpop.f32.mrf.mxu1 }
 0x13e   : > { %v1118_v37 = vpop.f32.mrf.mxu0  ;;  %v1310_v38 = vpop.f32.mrf.mxu1 }
 0x13f   : > { %v1109_v38 = vadd.f32 %v2692_v49, %v2665_v27  ;;  %v1112_v27 = vadd.f32 %v2692_v49, %v2669_v31 }
 0x140   : > { %v2677_v39 = vpop.f32.mrf.mxu0  ;;  %v2679_v40 = vpop.f32.mrf.mxu1 }
 0x142   : > { %v1121_v41 = vpop.f32.mrf.mxu0  ;;  %v1313_v42 = vpop.f32.mrf.mxu1 }
 0x144   : > { %v2681_v43 = vpop.f32.mrf.mxu0  ;;  %v2683_v44 = vpop.f32.mrf.mxu1 }
 0x145   : > { %v1125_v31 = vadd.f32 %v2692_v49, %v2681_v43 }
 0x146   : > { %v1126_v45 = vpop.f32.mrf.mxu0  ;;  %v1318_v46 = vpop.f32.mrf.mxu1 }
 0x147   : > { %v1101_v46 = vadd.f32 %v2692_v49, %v2657_v19  ;;  %v1104_v19 = vadd.f32 %v2692_v49, %v2661_v23  ;;  %v1117_v23 = vadd.f32 %v2692_v49, %v2673_v35  ;;  %v1120_v35 = vadd.f32 %v2692_v49, %v2677_v39 }
 0x148   : > { %v2685_v47 = vpop.f32.mrf.mxu0  ;;  %v2687_v48 = vpop.f32.mrf.mxu1 }
 0x149   : > { %v1128_v43 = vadd.f32 %v2692_v49, %v2685_v47 }
 0x14a   : > { %v1129_v50 = vpop.f32.mrf.mxu0  ;;  %v1321_v53 = vpop.f32.mrf.mxu1 }
 0x14c   : > { %v2695_v57 = vpop.f32.mrf.mxu0  ;;  %v1994_v58 = vpop.f32.mrf.mxu1 }
 0x14d   : > { %v1366_v62 = vadd.f32 %v1994_v58, %v1077_v54  ;;  %v1133_v39 = vadd.f32 %v2692_v49, %v2695_v57 }
 0x14e   : > { %v1134_v1 = vpop.f32.mrf.mxu0  ;;  %v1357_v2 = vpop.f32.mrf.mxu1 }
 0x14f   : > { %2244 = vtanh.f32 %v1366_v62  ;;  %v1358_v6 = vadd.f32 %v1357_v2, %v1069_v61 }
 0x150   : > { %v2700_v9 = vpop.f32.mrf.mxu0  ;;  %v1995_v10 = vpop.f32.mrf.mxu1 }
 0x151   : > { %2246 = vtanh.f32 %v1358_v6  ;;  %v1369_v59 = vadd.f32 %v1995_v10, %v1080_v5  ;;  %v1136_v57 = vadd.f32 %v2692_v49, %v2700_v9 }
 0x152   : > { %v1137_v14 = vpop.f32.mrf.mxu0  ;;  %v1360_v17 = vpop.f32.mrf.mxu1 }
 0x153   : > { %2248 = vtanh.f32 %v1369_v59  ;;  %v1361_v18 = vadd.f32 %v1360_v17, %v1072_v13 }
 0x154   : > { %v2705_v21 = vpop.f32.mrf.mxu0  ;;  %v1998_v63 = vpop.f32.mrf.mxu1 }
 0x155   : > { %2250 = vtanh.f32 %v1361_v18  ;;  %v1382_v25 = vadd.f32 %v1998_v63, %v1093_v51  ;;  %v1141_v47 = vadd.f32 %v2692_v49, %v2705_v21 }
 0x156   : > { %v1142_v26 = vpop.f32.mrf.mxu0  ;;  %v1373_v29 = vpop.f32.mrf.mxu1 }
 0x157   : > { %2252 = vtanh.f32 %v1382_v25  ;;  %v1374_v30 = vadd.f32 %v1373_v29, %v1085_v22 }
 0x158   : > { %v2712_v33 = vpop.f32.mrf.mxu0  ;;  %v1999_v11 = vpop.f32.mrf.mxu1 }
 0x159   : > { %2254 = vtanh.f32 %v1374_v30  ;;  %v1385_v37 = vadd.f32 %v1999_v11, %v1096_v55  ;;  %v1144_v21 = vadd.f32 %v2692_v49, %v2712_v33 }
 0x15a   : > { %v1145_v3 = vpop.f32.mrf.mxu0  ;;  %v1376_v15 = vpop.f32.mrf.mxu1 }
 0x15b   : > { %2256 = vtanh.f32 %v1385_v37  ;;  %v1377_v41 = vadd.f32 %v1376_v15, %v1088_v34 }
 0x15c   : > { %v2245_v42 = vpop.eup %2244  ;;  %v2723_v45 = vpop.f32.mrf.mxu0 }
 0x15d   : > { %v2002_v7 = vpop.f32.mrf.mxu1  ;;  %1678 = vst [vmem:[%s2719_s8 + $0x10] sm:$0xff] %v2245_v42  ;;  %2258 = vtanh.f32 %v1377_v41 }
 0x15e   : > { %v1398_v50 = vadd.f32 %v2002_v7, %v1109_v38  ;;  %v2247_v53 = vpop.eup %2246  ;;  %v1150_v54 = vpop.f32.mrf.mxu0 }
 0x15f   : > { %v1389_v58 = vpop.f32.mrf.mxu1  ;;  %1676 = vst [vmem:[%s2719_s8] sm:$0xff] %v2247_v53 }
 0x160   : > { %2260 = vtanh.f32 %v1398_v50  ;;  %v1390_v61 = vadd.f32 %v1389_v58, %v1101_v46  ;;  %v2249_v62 = vpop.eup %2248  ;;  %v2731_v1 = vpop.f32.mrf.mxu0 }
 0x161   : > { %v2003_v2 = vpop.f32.mrf.mxu1  ;;  %1679 = vst [vmem:[%s2719_s8 + $0x18] sm:$0xff] %v2249_v62 }
 0x162   : > { %2262 = vtanh.f32 %v1390_v61  ;;  %v1401_v5 = vadd.f32 %v2003_v2, %v1112_v27  ;;  %v2251_v6 = vpop.eup %2250  ;;  %v1153_v10 = vpop.f32.mrf.mxu0 }
 0x163   : > { %v1392_v13 = vpop.f32.mrf.mxu1  ;;  %1677 = vst [vmem:[%s2719_s8 + $0x8] sm:$0xff] %v2251_v6 }
 0x164   : > { %2264 = vtanh.f32 %v1401_v5  ;;  %v1393_v59 = vadd.f32 %v1392_v13, %v1104_v19  ;;  %v2253_v14 = vpop.eup %2252  ;;  %v1156_v17 = vpop.f32.mrf.mxu0 }
 0x165   : > { %v2006_v51 = vpop.f32.mrf.mxu1  ;;  %1682 = vst [vmem:[%s2719_s8 + $0x30] sm:$0xff] %v2253_v14  ;;  %v1157_v33 = vadd.f32 %v2692_v49, %v1156_v17 }
 0x166   : > { %2266 = vtanh.f32 %v1393_v59  ;;  %v1414_v18 = vadd.f32 %v2006_v51, %v1125_v31  ;;  %v2255_v63 = vpop.eup %2254  ;;  %v1158_v22 = vpop.f32.mrf.mxu0  ;;  %v1149_v59 = vadd.f32 %v2692_v49, %v2723_v45 }
 0x167   : > { %v1405_v25 = vpop.f32.mrf.mxu1  ;;  %1680 = vst [vmem:[%s2719_s8 + $0x20] sm:$0xff] %v2255_v63 }
 0x168   : > { %2268 = vtanh.f32 %v1414_v18  ;;  %v1406_v26 = vadd.f32 %v1405_v25, %v1117_v23  ;;  %v2257_v29 = vpop.eup %2256  ;;  %v1159_v55 = vpop.f32.mrf.mxu0 }
 0x169   : > { %v2007_v30 = vpop.f32.mrf.mxu1  ;;  %1683 = vst [vmem:[%s2719_s8 + $0x38] sm:$0xff] %v2257_v29  ;;  %v1160_v18 = vadd.f32 %v2692_v49, %v1159_v55 }
 0x16a   : > { %2270 = vtanh.f32 %v1406_v26  ;;  %v1417_v11 = vadd.f32 %v2007_v30, %v1128_v43  ;;  %v2259_v34 = vpop.eup %2258  ;;  %v1161_v37 = vpop.f32.mrf.mxu0  ;;  %v1152_v43 = vadd.f32 %v2692_v49, %v2731_v1 }
 0x16b   : > { %v1408_v3 = vpop.f32.mrf.mxu1  ;;  %1681 = vst [vmem:[%s2719_s8 + $0x28] sm:$0xff] %v2259_v34 }
 0x16c   : > { %2272 = vtanh.f32 %v1417_v11  ;;  %v1409_v15 = vadd.f32 %v1408_v3, %v1120_v35  ;;  %v1164_v41 = vpop.f32.mrf.mxu0 }
 0x16d   : > { %v2261_v38 = vpop.eup %2260  ;;  %v2010_v42 = vpop.f32.mrf.mxu1  ;;  %v1165_v3 = vadd.f32 %v2692_v49, %v1164_v41 }
 0x16e   : > { %1686 = vst [vmem:[%s2719_s8 + $0x50] sm:$0xff] %v2261_v38  ;;  %2274 = vtanh.f32 %v1409_v15  ;;  %v1430_v7 = vadd.f32 %v2010_v42, %v1141_v47  ;;  %v1166_v50 = vpop.f32.mrf.mxu0 }
 0x16f   : > { %v2263_v46 = vpop.eup %2262  ;;  %v1421_v53 = vpop.f32.mrf.mxu1 }
 0x170   : > { %1684 = vst [vmem:[%s2719_s8 + $0x40] sm:$0xff] %v2263_v46  ;;  %2276 = vtanh.f32 %v1430_v7  ;;  %v1422_v54 = vadd.f32 %v1421_v53, %v1133_v39  ;;  %v1167_v27 = vpop.f32.mrf.mxu0 }
 0x171   : > { %v2265_v58 = vpop.eup %2264  ;;  %v2011_v61 = vpop.f32.mrf.mxu1  ;;  %v1168_v53 = vadd.f32 %v2692_v49, %v1167_v27 }
 0x172   : > { %1687 = vst [vmem:[%s2719_s8 + $0x58] sm:$0xff] %v2265_v58  ;;  %2278 = vtanh.f32 %v1422_v54  ;;  %v1433_v62 = vadd.f32 %v2011_v61, %v1144_v21  ;;  %v1169_v19 = vpop.f32.mrf.mxu0 }
 0x173   : > { %v2267_v2 = vpop.eup %2266  ;;  %v1424_v5 = vpop.f32.mrf.mxu1 }
 0x174   : > { %1685 = vst [vmem:[%s2719_s8 + $0x48] sm:$0xff] %v2267_v2  ;;  %2280 = vtanh.f32 %v1433_v62  ;;  %v1425_v6 = vadd.f32 %v1424_v5, %v1136_v57  ;;  %v1172_v13 = vpop.f32.mrf.mxu0 }
 0x175   : > { %v2269_v10 = vpop.eup %2268  ;;  %v2014_v31 = vpop.f32.mrf.mxu1  ;;  %v1173_v35 = vadd.f32 %v2692_v49, %v1172_v13 }
 0x176   : > { %1690 = vst [vmem:[%s2719_s8 + $0x70] sm:$0xff] %v2269_v10  ;;  %2282 = vtanh.f32 %v1425_v6  ;;  %v1446_v9 = vadd.f32 %v2014_v31, %v1157_v33  ;;  %v1174_v51 = vpop.f32.mrf.mxu0 }
 0x177   : > { %v2271_v14 = vpop.eup %2270  ;;  %v1437_v23 = vpop.f32.mrf.mxu1 }
 0x178   : > { %1688 = vst [vmem:[%s2719_s8 + $0x60] sm:$0xff] %v2271_v14  ;;  %2284 = vtanh.f32 %v1446_v9  ;;  %v1438_v17 = vadd.f32 %v1437_v23, %v1149_v59  ;;  %v1175_v22 = vpop.f32.mrf.mxu0 }
 0x179   : > { %v2273_v63 = vpop.eup %2272  ;;  %v2015_v25 = vpop.f32.mrf.mxu1  ;;  %v1176_v42 = vadd.f32 %v2692_v49, %v1175_v22 }
 0x17a   : > { %1691 = vst [vmem:[%s2719_s8 + $0x78] sm:$0xff] %v2273_v63  ;;  %2286 = vtanh.f32 %v1438_v17  ;;  %v1449_v45 = vadd.f32 %v2015_v25, %v1160_v18  ;;  %v1177_v29 = vpop.f32.mrf.mxu0 }
 0x17b   : > { %v2275_v26 = vpop.eup %2274  ;;  %v1440_v30 = vpop.f32.mrf.mxu1 }
 0x17c   : > { %1689 = vst [vmem:[%s2719_s8 + $0x68] sm:$0xff] %v2275_v26  ;;  %2288 = vtanh.f32 %v1449_v45  ;;  %v1441_v55 = vadd.f32 %v1440_v30, %v1152_v43  ;;  %v1180_v34 = vpop.f32.mrf.mxu0 }
 0x17d   : > { %v2277_v11 = vpop.eup %2276  ;;  %v2018_v37 = vpop.f32.mrf.mxu1  ;;  %v1181_v19 = vadd.f32 %v2692_v49, %v1180_v34 }
 0x17e   : > { %1694 = vst [vmem:[%s2719_s8 + $0x90] sm:$0xff] %v2277_v11  ;;  %2290 = vtanh.f32 %v1441_v55  ;;  %v1462_v1 = vadd.f32 %v2018_v37, %v1173_v35  ;;  %v1182_v15 = vpop.f32.mrf.mxu0 }
 0x17f   : > { %v2279_v47 = vpop.eup %2278  ;;  %v1453_v38 = vpop.f32.mrf.mxu1 }
 0x180   : > { %1692 = vst [vmem:[%s2719_s8 + $0x80] sm:$0xff] %v2279_v47  ;;  %2292 = vtanh.f32 %v1462_v1  ;;  %v1454_v39 = vadd.f32 %v1453_v38, %v1165_v3  ;;  %v1183_v46 = vpop.f32.mrf.mxu0 }
 0x181   : > { %v2281_v7 = vpop.eup %2280  ;;  %v2019_v50 = vpop.f32.mrf.mxu1  ;;  %v1184_v14 = vadd.f32 %v2692_v49, %v1183_v46 }
 0x182   : > { %1695 = vst [vmem:[%s2719_s8 + $0x98] sm:$0xff] %v2281_v7  ;;  %2294 = vtanh.f32 %v1454_v39  ;;  %v1465_v41 = vadd.f32 %v2019_v50, %v1176_v42  ;;  %v1185_v54 = vpop.f32.mrf.mxu0 }
 0x183   : > { %v2283_v21 = vpop.eup %2282  ;;  %v1456_v58 = vpop.f32.mrf.mxu1 }
 0x184   : > { %1693 = vst [vmem:[%s2719_s8 + $0x88] sm:$0xff] %v2283_v21  ;;  %2296 = vtanh.f32 %v1465_v41  ;;  %v1457_v61 = vadd.f32 %v1456_v58, %v1168_v53  ;;  %v1188_v62 = vpop.f32.mrf.mxu0 }
 0x185   : > { %v2285_v57 = vpop.eup %2284  ;;  %v2022_v2 = vpop.f32.mrf.mxu1  ;;  %v1189_v27 = vadd.f32 %v2692_v49, %v1188_v62 }
 0x186   : > { %1698 = vst [vmem:[%s2719_s8 + $0xb0] sm:$0xff] %v2285_v57  ;;  %2298 = vtanh.f32 %v1457_v61  ;;  %v1190_v33 = vpop.f32.mrf.mxu0 }
 0x187   : > { %v2287_v5 = vpop.eup %2286  ;;  %v1469_v6 = vpop.f32.mrf.mxu1  ;;  %v1478_v10 = vadd.f32 %v2022_v2, %v1189_v27 }
 0x188   : > { %1696 = vst [vmem:[%s2719_s8 + $0xa0] sm:$0xff] %v2287_v5  ;;  %v1470_v13 = vadd.f32 %v1469_v6, %v1181_v19  ;;  %v1191_v59 = vpop.f32.mrf.mxu0 }
 0x189   : > { %v2289_v31 = vpop.eup %2288  ;;  %v2023_v9 = vpop.f32.mrf.mxu1  ;;  %2300 = vtanh.f32 %v1478_v10  ;;  %v1192_v51 = vadd.f32 %v2692_v49, %v1191_v59 }
 0x18a   : > { %1699 = vst [vmem:[%s2719_s8 + $0xb8] sm:$0xff] %v2289_v31  ;;  %2302 = vtanh.f32 %v1470_v13  ;;  %v1193_v18 = vpop.f32.mrf.mxu0 }
 0x18b   : > { %v2291_v23 = vpop.eup %2290  ;;  %v1472_v17 = vpop.f32.mrf.mxu1  ;;  %v1481_v63 = vadd.f32 %v2023_v9, %v1192_v51 }
 0x18c   : > { %1697 = vst [vmem:[%s2719_s8 + $0xa8] sm:$0xff] %v2291_v23  ;;  %v1473_v22 = vadd.f32 %v1472_v17, %v1184_v14  ;;  %v1196_v43 = vpop.f32.mrf.mxu0 }
 0x18d   : > { %v2293_v25 = vpop.eup %2292  ;;  %v2026_v45 = vpop.f32.mrf.mxu1  ;;  %2304 = vtanh.f32 %v1481_v63  ;;  %v1197_v26 = vadd.f32 %v2692_v49, %v1196_v43 }
 0x18e   : > { %1702 = vst [vmem:[%s2719_s8 + $0xd0] sm:$0xff] %v2293_v25  ;;  %2306 = vtanh.f32 %v1473_v22  ;;  %v1198_v30 = vpop.f32.mrf.mxu0 }
 0x18f   : > { %v2295_v29 = vpop.eup %2294  ;;  %v1485_v35 = vpop.f32.mrf.mxu1 }
 0x190   : > { %1700 = vst [vmem:[%s2719_s8 + $0xc0] sm:$0xff] %v2295_v29  ;;  %v1486_v55 = vadd.f32 %v1485_v35, %v1197_v26  ;;  %v1199_v34 = vpop.f32.mrf.mxu0 }
 0x191   : > { %v2297_v11 = vpop.eup %2296  ;;  %v2027_v37 = vpop.f32.mrf.mxu1  ;;  %v1200_v3 = vadd.f32 %v2692_v49, %v1199_v34 }
 0x192   : > { %1703 = vst [vmem:[%s2719_s8 + $0xd8] sm:$0xff] %v2297_v11  ;;  %2308 = vtanh.f32 %v1486_v55  ;;  %v1201_v47 = vpop.f32.mrf.mxu0 }
 0x193   : > { %v2299_v1 = vpop.eup %2298  ;;  %v1488_v15 = vpop.f32.mrf.mxu1 }
 0x194   : > { %1701 = vst [vmem:[%s2719_s8 + $0xc8] sm:$0xff] %v2299_v1  ;;  %v1489_v38 = vadd.f32 %v1488_v15, %v1200_v3  ;;  %v1204_v42 = vpop.f32.mrf.mxu0  ;;  %v1269_v1 = vadd.f32 %v2692_v49, %v2639_v60 }
 0x195   : > { %v2030_v39 = vpop.f32.mrf.mxu1  ;;  %v1205_v7 = vadd.f32 %v2692_v49, %v1204_v42  ;;  %v1261_v42 = vadd.f32 %v2692_v49, %v2633_v52  ;;  %v1264_v52 = vadd.f32 %v2692_v49, %v2637_v56  ;;  %v1277_v56 = vadd.f32 %v2692_v49, %v2645_v4 }
 0x196   : > { %2310 = vtanh.f32 %v1489_v38  ;;  %v2301_v46 = vpop.eup %2300  ;;  %v1206_v50 = vpop.f32.mrf.mxu0  ;;  %v1280_v4 = vadd.f32 %v2692_v49, %v2649_v8 }
 0x197   : > { %v1501_v53 = vpop.f32.mrf.mxu1  ;;  %v2303_v41 = vpop.eup %2302  ;;  %1706 = vst [vmem:[%s2719_s8 + $0xf0] sm:$0xff] %v2301_v46  ;;  %v1494_v21 = vadd.f32 %v2026_v45, %v1205_v7 }
 0x198   : > { %1704 = vst [vmem:[%s2719_s8 + $0xe0] sm:$0xff] %v2303_v41  ;;  %v1207_v54 = vpop.f32.mrf.mxu0  ;;  %v1272_v41 = vadd.f32 %v2692_v49, %v2641_v0  ;;  %v1285_v0 = vadd.f32 %v2692_v49, %v2651_v12  ;;  %v1288_v12 = vadd.f32 %v2692_v49, %v2655_v16 }
 0x199   : > { %v2031_v58 = vpop.f32.mrf.mxu1  ;;  %2312 = vtanh.f32 %v1494_v21  ;;  %v1208_v61 = vadd.f32 %v2692_v49, %v1207_v54 }
 0x19a   : > { %v2305_v57 = vpop.eup %2304  ;;  %v1209_v62 = vpop.f32.mrf.mxu0 }
 0x19b   : > { %v1504_v2 = vpop.f32.mrf.mxu1  ;;  %v2307_v19 = vpop.eup %2306  ;;  %1707 = vst [vmem:[%s2719_s8 + $0xf8] sm:$0xff] %v2305_v57  ;;  %v1497_v27 = vadd.f32 %v2027_v37, %v1208_v61 }
 0x19c   : > { %1705 = vst [vmem:[%s2719_s8 + $0xe8] sm:$0xff] %v2307_v19  ;;  %v1212_v5 = vpop.f32.mrf.mxu0 }
 0x19d   : > { %v2799_v33 = vpop.f32.mrf.mxu1  ;;  %2314 = vtanh.f32 %v1497_v27  ;;  %v1213_v6 = vadd.f32 %v2692_v49, %v1212_v5 }
 0x19e   : > { %v1214_v13 = vpop.f32.mrf.mxu0 }
 0x19f   : > { %v2309_v10 = vpop.eup %2308  ;;  %v1517_v31 = vpop.f32.mrf.mxu1  ;;  %v1502_v59 = vadd.f32 %v1501_v53, %v1213_v6 }
 0x1a0   : > { %1708 = vst [vmem:[%s2719_s8 + $0x100] sm:$0xff] %v2309_v10  ;;  %v1215_v9 = vpop.f32.mrf.mxu0 }
 0x1a1   : > { %v2803_v14 = vpop.f32.mrf.mxu1  ;;  %2316 = vtanh.f32 %v1502_v59  ;;  %v1216_v51 = vadd.f32 %v2692_v49, %v1215_v9 }
 0x1a2   : > { %v1217_v18 = vpop.f32.mrf.mxu0 }
 0x1a3   : > { %v2311_v23 = vpop.eup %2310  ;;  %v1520_v17 = vpop.f32.mrf.mxu1  ;;  %v1505_v63 = vadd.f32 %v1504_v2, %v1216_v51 }
 0x1a4   : > { %1709 = vst [vmem:[%s2719_s8 + $0x108] sm:$0xff] %v2311_v23  ;;  %v1220_v22 = vpop.f32.mrf.mxu0 }
 0x1a5   : > { %v2807_v25 = vpop.f32.mrf.mxu1  ;;  %2318 = vtanh.f32 %v1505_v63  ;;  %v1221_v43 = vadd.f32 %v2692_v49, %v1220_v22 }
 0x1a6   : > { %v2313_v45 = vpop.eup %2312  ;;  %v1222_v26 = vpop.f32.mrf.mxu0 }
 0x1a7   : > { %v2810_v29 = vpop.f32.mrf.mxu1  ;;  %1710 = vst [vmem:[%s2719_s8 + $0x110] sm:$0xff] %v2313_v45  ;;  %v1510_v30 = vadd.f32 %v2030_v39, %v1221_v43 }
 0x1a8   : > { %v1223_v35 = vpop.f32.mrf.mxu0 }
 0x1a9   : > { %v2813_v55 = vpop.f32.mrf.mxu1  ;;  %2320 = vtanh.f32 %v1510_v30  ;;  %v1224_v11 = vadd.f32 %v2692_v49, %v1223_v35  ;;  %v1301_v30 = vadd.f32 %v2692_v49, %v2667_v28 }
 0x1aa   : > { %v2315_v34 = vpop.eup %2314  ;;  %v1225_v37 = vpop.f32.mrf.mxu0 }
 0x1ab   : > { %v2816_v3 = vpop.f32.mrf.mxu1  ;;  %1711 = vst [vmem:[%s2719_s8 + $0x118] sm:$0xff] %v2315_v34  ;;  %v1513_v47 = vadd.f32 %v2031_v58, %v1224_v11  ;;  %v1293_v37 = vadd.f32 %v2692_v49, %v2659_v20 }
 0x1ac   : > { %v1228_v15 = vpop.f32.mrf.mxu0 }
 0x1ad   : > { %v2042_v38 = vpop.f32.mrf.mxu1  ;;  %2322 = vtanh.f32 %v1513_v47  ;;  %v1229_v39 = vadd.f32 %v2692_v49, %v1228_v15 }
 0x1ae   : > { %v1558_v7 = vadd.f32 %v2042_v38, %v1269_v1  ;;  %v2317_v46 = vpop.eup %2316  ;;  %v1230_v50 = vpop.f32.mrf.mxu0 }
 0x1af   : > { %v1549_v53 = vpop.f32.mrf.mxu1  ;;  %1712 = vst [vmem:[%s2719_s8 + $0x120] sm:$0xff] %v2317_v46  ;;  %v1518_v60 = vadd.f32 %v1517_v31, %v1229_v39 }
 0x1b0   : > { %2324 = vtanh.f32 %v1558_v7  ;;  %v1550_v21 = vadd.f32 %v1549_v53, %v1261_v42  ;;  %v1231_v54 = vpop.f32.mrf.mxu0  ;;  %v1304_v42 = vadd.f32 %v2692_v49, %v2671_v32  ;;  %v1296_v53 = vadd.f32 %v2692_v49, %v2663_v24 }
 0x1b1   : > { %v2043_v58 = vpop.f32.mrf.mxu1  ;;  %2326 = vtanh.f32 %v1518_v60  ;;  %v1232_v61 = vadd.f32 %v2692_v49, %v1231_v54 }
 0x1b2   : > { %v1561_v57 = vadd.f32 %v2043_v58, %v1272_v41  ;;  %v2319_v62 = vpop.eup %2318  ;;  %2328 = vtanh.f32 %v1550_v21  ;;  %v1233_v2 = vpop.f32.mrf.mxu0  ;;  %v1317_v58 = vadd.f32 %v2692_v49, %v2683_v44 }
 0x1b3   : > { %v1552_v19 = vpop.f32.mrf.mxu1  ;;  %1713 = vst [vmem:[%s2719_s8 + $0x128] sm:$0xff] %v2319_v62  ;;  %v1521_v27 = vadd.f32 %v1520_v17, %v1232_v61  ;;  %v1309_v2 = vadd.f32 %v2692_v49, %v2675_v36 }
 0x1b4   : > { %2330 = vtanh.f32 %v1561_v57  ;;  %v1553_v5 = vadd.f32 %v1552_v19, %v1264_v52  ;;  %v1236_v6 = vpop.f32.mrf.mxu0 }
 0x1b5   : > { %v2046_v10 = vpop.f32.mrf.mxu1  ;;  %2332 = vtanh.f32 %v1521_v27  ;;  %v1237_v13 = vadd.f32 %v2692_v49, %v1236_v6  ;;  %v1320_v6 = vadd.f32 %v2692_v49, %v2687_v48 }
 0x1b6   : > { %v1574_v31 = vadd.f32 %v2046_v10, %v1285_v0  ;;  %v2321_v59 = vpop.eup %2320  ;;  %2334 = vtanh.f32 %v1553_v5  ;;  %v1238_v9 = vpop.f32.mrf.mxu0 }
 0x1b7   : > { %v1565_v51 = vpop.f32.mrf.mxu1  ;;  %1714 = vst [vmem:[%s2719_s8 + $0x130] sm:$0xff] %v2321_v59  ;;  %v1526_v23 = vadd.f32 %v2799_v33, %v1237_v13  ;;  %v1312_v59 = vadd.f32 %v2692_v49, %v2679_v40 }
 0x1b8   : > { %2336 = vtanh.f32 %v1574_v31  ;;  %v1566_v18 = vadd.f32 %v1565_v51, %v1277_v56  ;;  %v1239_v17 = vpop.f32.mrf.mxu0 }
 0x1b9   : > { %v2047_v63 = vpop.f32.mrf.mxu1  ;;  %2338 = vtanh.f32 %v1526_v23  ;;  %v1240_v22 = vadd.f32 %v2692_v49, %v1239_v17 }
 0x1ba   : > { %v1577_v43 = vadd.f32 %v2047_v63, %v1288_v12  ;;  %v2323_v45 = vpop.eup %2322  ;;  %2340 = vtanh.f32 %v1566_v18  ;;  %v1241_v26 = vpop.f32.mrf.mxu0 }
 0x1bb   : > { %v1568_v16 = vpop.f32.mrf.mxu1  ;;  %1715 = vst [vmem:[%s2719_s8 + $0x138] sm:$0xff] %v2323_v45  ;;  %v1529_v33 = vadd.f32 %v2803_v14, %v1240_v22 }
 0x1bc   : > { %2342 = vtanh.f32 %v1577_v43  ;;  %v1569_v35 = vadd.f32 %v1568_v16, %v1280_v4  ;;  %v1244_v8 = vpop.f32.mrf.mxu0 }
 0x1bd   : > { %v2325_v11 = vpop.eup %2324  ;;  %v2050_v34 = vpop.f32.mrf.mxu1  ;;  %2344 = vtanh.f32 %v1529_v33  ;;  %v1245_v1 = vadd.f32 %v2692_v49, %v1244_v8 }
 0x1be   : > { %1726 = vst [vmem:[%s2719_s8 + $0x190] sm:$0xff] %v2325_v11  ;;  %v1590_v47 = vadd.f32 %v2050_v34, %v1301_v30  ;;  %v2327_v28 = vpop.eup %2326  ;;  %2346 = vtanh.f32 %v1569_v35  ;;  %v1246_v15 = vpop.f32.mrf.mxu0 }
 0x1bf   : > { %v1581_v14 = vpop.f32.mrf.mxu1  ;;  %v2329_v38 = vpop.eup %2328  ;;  %1716 = vst [vmem:[%s2719_s8 + $0x140] sm:$0xff] %v2327_v28  ;;  %v1534_v39 = vadd.f32 %v2810_v29, %v1245_v1 }
 0x1c0   : > { %2348 = vtanh.f32 %v1590_v47  ;;  %v1582_v20 = vadd.f32 %v1581_v14, %v1293_v37  ;;  %1724 = vst [vmem:[%s2719_s8 + $0x180] sm:$0xff] %v2329_v38  ;;  %v1247_v46 = vpop.f32.mrf.mxu0 }
 0x1c1   : > { %v2331_v7 = vpop.eup %2330  ;;  %v2051_v50 = vpop.f32.mrf.mxu1  ;;  %2350 = vtanh.f32 %v1534_v39  ;;  %v1248_v41 = vadd.f32 %v2692_v49, %v1247_v46 }
 0x1c2   : > { %1727 = vst [vmem:[%s2719_s8 + $0x198] sm:$0xff] %v2331_v7  ;;  %v1593_v60 = vadd.f32 %v2051_v50, %v1304_v42  ;;  %v2333_v32 = vpop.eup %2332  ;;  %2352 = vtanh.f32 %v1582_v20  ;;  %v1249_v29 = vpop.f32.mrf.mxu0 }
 0x1c3   : > { %v1584_v21 = vpop.f32.mrf.mxu1  ;;  %v2335_v54 = vpop.eup %2334  ;;  %1717 = vst [vmem:[%s2719_s8 + $0x148] sm:$0xff] %v2333_v32  ;;  %v1537_v52 = vadd.f32 %v2816_v3, %v1248_v41 }
 0x1c4   : > { %2354 = vtanh.f32 %v1593_v60  ;;  %v1585_v24 = vadd.f32 %v1584_v21, %v1296_v53  ;;  %1725 = vst [vmem:[%s2719_s8 + $0x188] sm:$0xff] %v2335_v54  ;;  %v1252_v57 = vpop.f32.mrf.mxu0 }
 0x1c5   : > { %v2337_v61 = vpop.eup %2336  ;;  %v2054_v62 = vpop.f32.mrf.mxu1  ;;  %2356 = vtanh.f32 %v1537_v52  ;;  %v1253_v19 = vadd.f32 %v2692_v49, %v1252_v57 }
 0x1c6   : > { %1730 = vst [vmem:[%s2719_s8 + $0x1b0] sm:$0xff] %v2337_v61  ;;  %v1606_v0 = vadd.f32 %v2054_v62, %v1317_v58  ;;  %v2339_v44 = vpop.eup %2338  ;;  %2358 = vtanh.f32 %v1585_v24  ;;  %v1254_v3 = vpop.f32.mrf.mxu0 }
 0x1c7   : > { %v1597_v27 = vpop.f32.mrf.mxu1  ;;  %v2341_v5 = vpop.eup %2340  ;;  %1718 = vst [vmem:[%s2719_s8 + $0x150] sm:$0xff] %v2339_v44  ;;  %v1542_v10 = vadd.f32 %v2807_v25, %v1253_v19 }
 0x1c8   : > { %2360 = vtanh.f32 %v1606_v0  ;;  %v1598_v36 = vadd.f32 %v1597_v27, %v1309_v2  ;;  %1728 = vst [vmem:[%s2719_s8 + $0x1a0] sm:$0xff] %v2341_v5  ;;  %v1255_v13 = vpop.f32.mrf.mxu0 }
 0x1c9   : > { %v2343_v56 = vpop.eup %2342  ;;  %v2055_v31 = vpop.f32.mrf.mxu1  ;;  %2362 = vtanh.f32 %v1542_v10  ;;  %v1256_v9 = vadd.f32 %v2692_v49, %v1255_v13 }
 0x1ca   : > { %1731 = vst [vmem:[%s2719_s8 + $0x1b8] sm:$0xff] %v2343_v56  ;;  %v1609_v48 = vadd.f32 %v2055_v31, %v1320_v6  ;;  %v2345_v51 = vpop.eup %2344  ;;  %2364 = vtanh.f32 %v1598_v36  ;;  %v1257_v25 = vpop.f32.mrf.mxu0 }
 0x1cb   : > { %v1600_v12 = vpop.f32.mrf.mxu1  ;;  %v2347_v23 = vpop.eup %2346  ;;  %1719 = vst [vmem:[%s2719_s8 + $0x158] sm:$0xff] %v2345_v51  ;;  %v1545_v18 = vadd.f32 %v2813_v55, %v1256_v9 }
 0x1cc   : > { %2366 = vtanh.f32 %v1609_v48  ;;  %v1601_v40 = vadd.f32 %v1600_v12, %v1312_v59  ;;  %1729 = vst [vmem:[%s2719_s8 + $0x1a8] sm:$0xff] %v2347_v23 }
 0x1cd   : > { %v2349_v17 = vpop.eup %2348  ;;  %2368 = vtanh.f32 %v1545_v18 }
 0x1ce   : > { %1734 = vst [vmem:[%s2719_s8 + $0x1d0] sm:$0xff] %v2349_v17  ;;  %v2351_v49 = vpop.eup %2350  ;;  %2370 = vtanh.f32 %v1601_v40 }
 0x1cf   : > { %v2353_v63 = vpop.eup %2352  ;;  %1720 = vst [vmem:[%s2719_s8 + $0x160] sm:$0xff] %v2351_v49 }
 0x1d0   : > { %1732 = vst [vmem:[%s2719_s8 + $0x1c0] sm:$0xff] %v2353_v63 }
 0x1d1   : > { %v2355_v4 = vpop.eup %2354 }
 0x1d2   : > { %1735 = vst [vmem:[%s2719_s8 + $0x1d8] sm:$0xff] %v2355_v4  ;;  %v2357_v55 = vpop.eup %2356 }
 0x1d3   : > { %v2359_v22 = vpop.eup %2358  ;;  %1721 = vst [vmem:[%s2719_s8 + $0x168] sm:$0xff] %v2357_v55 }
 0x1d4   : > { %1733 = vst [vmem:[%s2719_s8 + $0x1c8] sm:$0xff] %v2359_v22 }
 0x1d5   : > { %v2361_v43 = vpop.eup %2360 }
 0x1d6   : > { %1738 = vst [vmem:[%s2719_s8 + $0x1f0] sm:$0xff] %v2361_v43  ;;  %v2363_v45 = vpop.eup %2362 }
 0x1d7   : > { %v2365_v26 = vpop.eup %2364  ;;  %1722 = vst [vmem:[%s2719_s8 + $0x170] sm:$0xff] %v2363_v45 }
 0x1d8   : > { %1736 = vst [vmem:[%s2719_s8 + $0x1e0] sm:$0xff] %v2365_v26 }
 0x1d9   : > { %v2367_v16 = vpop.eup %2366 }
 0x1da   : > { %1739 = vst [vmem:[%s2719_s8 + $0x1f8] sm:$0xff] %v2367_v16  ;;  %v2369_v30 = vpop.eup %2368 }
 0x1db   : > { %v2371_v33 = vpop.eup %2370  ;;  %1723 = vst [vmem:[%s2719_s8 + $0x178] sm:$0xff] %v2369_v30 }
 0x1dc   : > { %1737 = vst [vmem:[%s2719_s8 + $0x1e8] sm:$0xff] %v2371_v33 }
 0x1dd PF: > { %s13_s12 = sadd.s32 1, %s2378_s12  }
 0x1de   : > { %p10_p4 = scmp.ge.s32.totalorder %s13_s12, 6  }
 0x1e0   :  { %12 = sbr.rel (!%p10_p4) target bundleno = 1 (0x1), region = 62 }

</bundles_post_ra>
